<compile_context>
chip_gen: v7x
topology: tpu7x:2x2x1
jax: 0.10.0
libtpu: 0.0.40
codegen_flags: <defaults>
</compile_context>

<pallas_src>
import functools

import jax
import jax.numpy as jnp
from jax.experimental import pallas as pl
from jax.experimental.pallas import tpu as pltpu

EPS = 1e-5
CONV_DIMS = [(3, 64), (64, 64), (64, 128), (128, 256), (256, 512), (512, 1024)]
FEAT = 1024 + 512 + 256 + 128  # 1920
# lane sections of the concat [x_1024, x_512, x_256, x_128] (all 128-aligned)
SEC_1024 = (0, 1024)
SEC_512 = (1024, 1536)
SEC_256 = (1536, 1792)
SEC_128 = (1792, 1920)


# ------------------------------- fused kernel -------------------------------
def latent_kernel(num_scales, cparams_ref, x_ref,
                  w1_ref, b1_ref, w2_ref, b2_ref, w3_ref, b3_ref,
                  w4_ref, b4_ref, w5_ref, b5_ref, w6_ref, b6_ref,
                  out_ref, pool_ref):
    s = pl.program_id(0)        # scale index
    nt = pl.program_id(1)       # tile along the point dimension
    n_tiles = pl.num_programs(1)

    # Reset the per-scale running-max accumulator on the first point tile.
    # (Post-ReLU values are >= 0, so 0 is a valid identity for the max.)
    @pl.when(nt == 0)
    def _():
        pool_ref[...] = jnp.zeros_like(pool_ref)

    B, TN, _ = x_ref.shape
    x = x_ref[...].reshape(B * TN, 3)            # (M, 3) f32, M = B*TN

    # ---- conv1 (1x3 kernel, Cin=3) on the VPU: 3 scaled-column adds --------
    w1 = w1_ref[...]                             # (3, 64) f32
    h = (x[:, 0:1] * w1[0:1, :]
         + x[:, 1:2] * w1[1:2, :]
         + x[:, 2:3] * w1[2:3, :]
         + b1_ref[...])
    h = jnp.maximum(h, 0.0)                      # (M, 64) f32

    def lin(h, w_ref, b_ref):
        # bf16 operands into the MXU, f32 accumulation; bias + ReLU in f32.
        y = jnp.dot(h.astype(jnp.bfloat16), w_ref[...],
                    preferred_element_type=jnp.float32) + b_ref[...]
        return jnp.maximum(y, 0.0)

    def pool_into(h, lo, hi):
        # per-batch max over this tile's points, folded into the running max
        p = jnp.max(h.reshape(B, TN, h.shape[-1]), axis=1)        # (B, C)
        pool_ref[:, lo:hi] = jnp.maximum(pool_ref[:, lo:hi], p)

    # Pool each stage eagerly; only one activation slab is live at a time.
    h = lin(h, w2_ref, b2_ref)                   # (M,   64)
    h = lin(h, w3_ref, b3_ref)                   # (M,  128)
    pool_into(h, *SEC_128)
    h = lin(h, w4_ref, b4_ref)                   # (M,  256)
    pool_into(h, *SEC_256)
    h = lin(h, w5_ref, b5_ref)                   # (M,  512)
    pool_into(h, *SEC_512)
    h = lin(h, w6_ref, b6_ref)                   # (M, 1024)
    pool_into(h, *SEC_1024)

    # --- epilogue: Conv1d(3,1,1)+BN1d+ReLU as a weighted sum over scales ----
    last_tile = nt == n_tiles - 1

    @pl.when(jnp.logical_and(last_tile, s == 0))
    def _():
        out_ref[...] = jnp.zeros_like(out_ref)

    @pl.when(last_tile)
    def _():
        scale = cparams_ref[0]
        for i in range(1, num_scales):           # static, tiny
            scale = jnp.where(s == i, cparams_ref[i], scale)
        out_ref[...] += pool_ref[...] * scale

    @pl.when(jnp.logical_and(last_tile, s == num_scales - 1))
    def _():
        out_ref[...] = jnp.maximum(out_ref[...] + cparams_ref[num_scales], 0.0)


# ------------------------------- host wrapper --------------------------------
def latentfeature_forward(xs, conv_params_per_scale, w1d, b1d, bn1d, *,
                          n_tile=128):
    """xs: list of (B, N_s, 3) f32; conv_params_per_scale[s]: list of 6
    (w_eff (Cin,Cout), b_eff (1,Cout)) folded conv+BN params; w1d (3,), b1d (),
    bn1d = (gamma, beta, mean, var) scalars of BatchNorm1d(1)."""
    num_scales = len(xs)
    B = xs[0].shape[0]

    # point-dim padding (replicate last point: max-pool invariant) and tiling
    n_max = max(int(x.shape[1]) for x in xs)
    tn = min(n_tile, -(-n_max // 8) * 8)          # tile size, multiple of 8
    n_pad = -(-n_max // tn) * tn
    n_tiles = n_pad // tn

    def pad_pts(x):
        b, n, _ = x.shape
        if n == n_pad:
            return x
        rep = jnp.broadcast_to(x[:, -1:, :], (b, n_pad - n, 3))
        return jnp.concatenate([x, rep], axis=1)

    x_all = jnp.stack([pad_pts(x) for x in xs], axis=0).astype(jnp.float32)

    # stack folded conv+BN params across scales; bf16 weights for MXU layers
    flat_params, layer_specs = [], []
    for li, (cin, cout) in enumerate(CONV_DIMS):
        w = jnp.stack([conv_params_per_scale[s][li][0] for s in range(num_scales)])
        b = jnp.stack([conv_params_per_scale[s][li][1] for s in range(num_scales)])
        w = w.astype(jnp.float32 if li == 0 else jnp.bfloat16)
        flat_params += [w, b.astype(jnp.float32)]
        layer_specs += [
            pl.BlockSpec((None, cin, cout), lambda s, t: (s, 0, 0)),
            pl.BlockSpec((None, 1, cout), lambda s, t: (s, 0, 0)),
        ]

    # fold the final Conv1d(3,1,1)+BN1d(1) (eval mode) into 3 scalars + bias
    gamma, beta, mean, var = bn1d
    scl = gamma / jnp.sqrt(var + EPS)
    w_eff = (w1d * scl).astype(jnp.float32)                    # (num_scales,)
    b_eff = ((b1d - mean) * scl + beta).astype(jnp.float32)    # scalar
    cparams = jnp.concatenate([w_eff.reshape(num_scales), b_eff.reshape(1)])

    kernel = pl.pallas_call(
        functools.partial(latent_kernel, num_scales),
        out_shape=jax.ShapeDtypeStruct((B, FEAT), jnp.float32),
        grid=(num_scales, n_tiles),
        in_specs=[pl.BlockSpec(memory_space=pltpu.MemorySpace.SMEM),
                  pl.BlockSpec((None, B, tn, 3), lambda s, t: (s, 0, t, 0))]
                 + layer_specs,
        out_specs=pl.BlockSpec((B, FEAT), lambda s, t: (0, 0)),
        scratch_shapes=[pltpu.VMEM((B, FEAT), jnp.float32)],
        compiler_params=pltpu.CompilerParams(
            dimension_semantics=("arbitrary", "arbitrary")),
    )
    return kernel(cparams, x_all, *flat_params)


# ------------------------------ parameter glue -------------------------------
def fold_bn(w, b, gamma, beta, mean, var, eps=EPS):
    scale = gamma / jnp.sqrt(var + eps)
    return w * scale[None, :], ((b - mean) * scale + beta)[None, :]


def init_convlayer_params(key):
    params = []
    for (cin, cout) in CONV_DIMS:
        key, kw, kb, kg, kbe, km, kv = jax.random.split(key, 7)
        w = jax.random.normal(kw, (cin, cout), jnp.float32) / jnp.sqrt(float(cin))
        b = 0.01 * jax.random.normal(kb, (cout,), jnp.float32)
        gamma = 1.0 + 0.1 * jax.random.normal(kg, (cout,), jnp.float32)
        beta = 0.05 * jax.random.normal(kbe, (cout,), jnp.float32)
        mean = 0.05 * jax.random.normal(km, (cout,), jnp.float32)
        var = 1.0 + 0.1 * jnp.abs(jax.random.normal(kv, (cout,), jnp.float32))
        params.append(fold_bn(w, b, gamma, beta, mean, var))
    return params


# ----------------------------- pure-JAX reference ----------------------------
def latentfeature_reference(xs, conv_params_per_scale, w1d, b1d, bn1d):
    feats = []
    for x, params in zip(xs, conv_params_per_scale):
        B, N, _ = x.shape
        h = x.reshape(B * N, 3)
        outs = []
        for (w, b) in params:
            h = jnp.maximum(h @ w + b, 0.0)
            outs.append(h)
        pool = lambda a: jnp.max(a.reshape(B, N, -1), axis=1)
        feats.append(jnp.concatenate(
            [pool(outs[5]), pool(outs[4]), pool(outs[3]), pool(outs[2])], axis=1))
    gamma, beta, mean, var = bn1d
    scl = gamma / jnp.sqrt(var + EPS)
    w_eff = w1d * scl
    b_eff = (b1d - mean) * scl + beta
    y = sum(w_eff[i] * feats[i] for i in range(len(feats))) + b_eff
    return jnp.maximum(y, 0.0)


# ---------------------------------- driver -----------------------------------
if __name__ == "__main__":
    key = jax.random.PRNGKey(0)
    B = 2
    point_scales_list = [128, 64, 32]      # num_scales = 3, each_scales_size = 1

    key, kx0, kx1, kx2 = jax.random.split(key, 4)
    xs = [jax.random.normal(k, (B, n, 3), jnp.float32)
          for k, n in zip((kx0, kx1, kx2), point_scales_list)]

    key, k1, k2, k3 = jax.random.split(key, 4)
    conv_params = [init_convlayer_params(k) for k in (k1, k2, k3)]

    key, kw, kb, kg, kbe, km, kv = jax.random.split(key, 7)
    w1d = jax.random.normal(kw, (3,), jnp.float32) / jnp.sqrt(3.0)
    b1d = 0.01 * jax.random.normal(kb, (), jnp.float32)
    bn1d = (1.0 + 0.1 * jax.random.normal(kg, (), jnp.float32),
            0.05 * jax.random.normal(kbe, (), jnp.float32),
            0.05 * jax.random.normal(km, (), jnp.float32),
            1.0 + 0.1 * jnp.abs(jax.random.normal(kv, (), jnp.float32)))

    out = latentfeature_forward(xs, conv_params, w1d, b1d, bn1d)
    out = jax.block_until_ready(out)
    assert out.shape == (B, FEAT) and out.dtype == jnp.float32

    ref = latentfeature_reference(xs, conv_params, w1d, b1d, bn1d)
    # loose tolerance: kernel feeds bf16 operands to the MXU (f32 accumulation)
    assert bool(jnp.allclose(out, ref, rtol=1e-1, atol=1e-1)), \
        float(jnp.max(jnp.abs(out - ref)))
    print("KERNEL_OK")
</pallas_src>

<mosaic_0001>
module attributes {stable_mosaic.version = 11 : i64} {
  func.func @latent_kernel(%arg0: i32, %arg1: i32, %arg2: memref<4xf32, #tpu.memory_space<smem>>, %arg3: memref<1x2x128x3xf32, #tpu.memory_space<vmem>>, %arg4: memref<1x3x64xf32, #tpu.memory_space<vmem>>, %arg5: memref<1x1x64xf32, #tpu.memory_space<vmem>>, %arg6: memref<1x64x64xbf16, #tpu.memory_space<vmem>>, %arg7: memref<1x1x64xf32, #tpu.memory_space<vmem>>, %arg8: memref<1x64x128xbf16, #tpu.memory_space<vmem>>, %arg9: memref<1x1x128xf32, #tpu.memory_space<vmem>>, %arg10: memref<1x128x256xbf16, #tpu.memory_space<vmem>>, %arg11: memref<1x1x256xf32, #tpu.memory_space<vmem>>, %arg12: memref<1x256x512xbf16, #tpu.memory_space<vmem>>, %arg13: memref<1x1x512xf32, #tpu.memory_space<vmem>>, %arg14: memref<1x512x1024xbf16, #tpu.memory_space<vmem>>, %arg15: memref<1x1x1024xf32, #tpu.memory_space<vmem>>, %arg16: memref<2x1920xf32, #tpu.memory_space<vmem>>, %arg17: memref<2x1920xf32, #tpu.memory_space<vmem>>) attributes {dimension_semantics = [#tpu.dimension_semantics<arbitrary>, #tpu.dimension_semantics<arbitrary>], iteration_bounds = array<i64: 3, 1>, scalar_prefetch = 0 : i64, scratch_operands = 1 : i64, tpu.core_type = #tpu.core_type<tc>, window_params = [{transform_indices = @transform_0, window_bounds = array<i64: 4>}, {transform_indices = @transform_1, window_bounds = array<i64: 1, 2, 128, 3>}, {transform_indices = @transform_2, window_bounds = array<i64: 1, 3, 64>}, {transform_indices = @transform_3, window_bounds = array<i64: 1, 1, 64>}, {transform_indices = @transform_4, window_bounds = array<i64: 1, 64, 64>}, {transform_indices = @transform_5, window_bounds = array<i64: 1, 1, 64>}, {transform_indices = @transform_6, window_bounds = array<i64: 1, 64, 128>}, {transform_indices = @transform_7, window_bounds = array<i64: 1, 1, 128>}, {transform_indices = @transform_8, window_bounds = array<i64: 1, 128, 256>}, {transform_indices = @transform_9, window_bounds = array<i64: 1, 1, 256>}, {transform_indices = @transform_10, window_bounds = array<i64: 1, 256, 512>}, {transform_indices = @transform_11, window_bounds = array<i64: 1, 1, 512>}, {transform_indices = @transform_12, window_bounds = array<i64: 1, 512, 1024>}, {transform_indices = @transform_13, window_bounds = array<i64: 1, 1, 1024>}, {pipeline_mode = #tpu.pipeline_mode<synchronous>, transform_indices = @transform_14, window_bounds = array<i64: 2, 1920>}]} {
    %c0_i32 = arith.constant 0 : i32
    %0 = arith.cmpi eq, %arg1, %c0_i32 : i32
    %1 = arith.extui %0 : i1 to i32
    %c0_i32_0 = arith.constant 0 : i32
    %2 = arith.cmpi ne, %1, %c0_i32_0 : i32
    scf.if %2 {
      %cst_72 = arith.constant 0.000000e+00 : f32
      %112 = vector.broadcast %cst_72 : f32 to vector<2x1920xf32>
      %c0_73 = arith.constant 0 : index
      %c0_74 = arith.constant 0 : index
      %113 = vector.load %arg17[%c0_73, %c0_74] : memref<2x1920xf32, #tpu.memory_space<vmem>>, vector<2x1920xf32>
      tpu.vector_store %arg17[%c0_73, %c0_74], %112 {strides = array<i32>} : memref<2x1920xf32, #tpu.memory_space<vmem>>, vector<2x1920xf32>,
    } else {
    }
    %c0 = arith.constant 0 : index
    %c0_1 = arith.constant 0 : index
    %c0_2 = arith.constant 0 : index
    %c0_3 = arith.constant 0 : index
    %3 = vector.load %arg3[%c0, %c0_1, %c0_2, %c0_3] : memref<1x2x128x3xf32, #tpu.memory_space<vmem>>, vector<1x2x128x3xf32>
    %4 = vector.shape_cast %3 : vector<1x2x128x3xf32> to vector<2x128x3xf32>
    %5 = vector.shape_cast %4 : vector<2x128x3xf32> to vector<256x3xf32>
    %c0_4 = arith.constant 0 : index
    %c0_5 = arith.constant 0 : index
    %c0_6 = arith.constant 0 : index
    %6 = vector.load %arg4[%c0_4, %c0_5, %c0_6] : memref<1x3x64xf32, #tpu.memory_space<vmem>>, vector<1x3x64xf32>
    %7 = vector.shape_cast %6 : vector<1x3x64xf32> to vector<3x64xf32>
    %8 = vector.extract_strided_slice %5 {offsets = [0, 0], sizes = [256, 1], strides = [1, 1]} : vector<256x3xf32> to vector<256x1xf32>
    %9 = vector.extract_strided_slice %7 {offsets = [0, 0], sizes = [1, 64], strides = [1, 1]} : vector<3x64xf32> to vector<1x64xf32>
    %10 = vector.broadcast %8 : vector<256x1xf32> to vector<256x64xf32>
    %11 = vector.broadcast %9 : vector<1x64xf32> to vector<256x64xf32>
    %12 = arith.mulf %10, %11 : vector<256x64xf32>
    %13 = vector.extract_strided_slice %5 {offsets = [0, 1], sizes = [256, 1], strides = [1, 1]} : vector<256x3xf32> to vector<256x1xf32>
    %14 = vector.extract_strided_slice %7 {offsets = [1, 0], sizes = [1, 64], strides = [1, 1]} : vector<3x64xf32> to vector<1x64xf32>
    %15 = vector.broadcast %13 : vector<256x1xf32> to vector<256x64xf32>
    %16 = vector.broadcast %14 : vector<1x64xf32> to vector<256x64xf32>
    %17 = arith.mulf %15, %16 : vector<256x64xf32>
    %18 = arith.addf %12, %17 : vector<256x64xf32>
    %19 = vector.extract_strided_slice %5 {offsets = [0, 2], sizes = [256, 1], strides = [1, 1]} : vector<256x3xf32> to vector<256x1xf32>
    %20 = vector.extract_strided_slice %7 {offsets = [2, 0], sizes = [1, 64], strides = [1, 1]} : vector<3x64xf32> to vector<1x64xf32>
    %21 = vector.broadcast %19 : vector<256x1xf32> to vector<256x64xf32>
    %22 = vector.broadcast %20 : vector<1x64xf32> to vector<256x64xf32>
    %23 = arith.mulf %21, %22 : vector<256x64xf32>
    %24 = arith.addf %18, %23 : vector<256x64xf32>
    %c0_7 = arith.constant 0 : index
    %c0_8 = arith.constant 0 : index
    %c0_9 = arith.constant 0 : index
    %25 = vector.load %arg5[%c0_7, %c0_8, %c0_9] : memref<1x1x64xf32, #tpu.memory_space<vmem>>, vector<1x1x64xf32>
    %26 = vector.shape_cast %25 : vector<1x1x64xf32> to vector<1x64xf32>
    %27 = vector.broadcast %26 : vector<1x64xf32> to vector<256x64xf32>
    %28 = arith.addf %24, %27 : vector<256x64xf32>
    %cst = arith.constant 0.000000e+00 : f32
    %29 = vector.broadcast %cst : f32 to vector<256x64xf32>
    %30 = arith.maximumf %28, %29 : vector<256x64xf32>
    %31 = arith.truncf %30 : vector<256x64xf32> to vector<256x64xbf16>
    %c0_10 = arith.constant 0 : index
    %c0_11 = arith.constant 0 : index
    %c0_12 = arith.constant 0 : index
    %32 = vector.load %arg6[%c0_10, %c0_11, %c0_12] : memref<1x64x64xbf16, #tpu.memory_space<vmem>>, vector<1x64x64xbf16>
    %33 = vector.shape_cast %32 : vector<1x64x64xbf16> to vector<64x64xbf16>
    %cst_13 = arith.constant dense<0.000000e+00> : vector<256x64xf32>
    %34 = tpu.matmul %31, %33, %cst_13 {dimension_numbers = #tpu.dot_dimension_numbers<[1], [0], [0], [1], [0, 0, 1, 1], [], []>} : vector<256x64xbf16>, vector<64x64xbf16>, vector<256x64xf32> -> vector<256x64xf32>
    %c0_14 = arith.constant 0 : index
    %c0_15 = arith.constant 0 : index
    %c0_16 = arith.constant 0 : index
    %35 = vector.load %arg7[%c0_14, %c0_15, %c0_16] : memref<1x1x64xf32, #tpu.memory_space<vmem>>, vector<1x1x64xf32>
    %36 = vector.shape_cast %35 : vector<1x1x64xf32> to vector<1x64xf32>
    %37 = vector.broadcast %36 : vector<1x64xf32> to vector<256x64xf32>
    %38 = arith.addf %34, %37 : vector<256x64xf32>
    %cst_17 = arith.constant 0.000000e+00 : f32
    %39 = vector.broadcast %cst_17 : f32 to vector<256x64xf32>
    %40 = arith.maximumf %38, %39 : vector<256x64xf32>
    %41 = arith.truncf %40 : vector<256x64xf32> to vector<256x64xbf16>
    %c0_18 = arith.constant 0 : index
    %c0_19 = arith.constant 0 : index
    %c0_20 = arith.constant 0 : index
    %42 = vector.load %arg8[%c0_18, %c0_19, %c0_20] : memref<1x64x128xbf16, #tpu.memory_space<vmem>>, vector<1x64x128xbf16>
    %43 = vector.shape_cast %42 : vector<1x64x128xbf16> to vector<64x128xbf16>
    %cst_21 = arith.constant dense<0.000000e+00> : vector<256x128xf32>
    %44 = tpu.matmul %41, %43, %cst_21 {dimension_numbers = #tpu.dot_dimension_numbers<[1], [0], [0], [1], [0, 0, 1, 1], [], []>} : vector<256x64xbf16>, vector<64x128xbf16>, vector<256x128xf32> -> vector<256x128xf32>
    %c0_22 = arith.constant 0 : index
    %c0_23 = arith.constant 0 : index
    %c0_24 = arith.constant 0 : index
    %45 = vector.load %arg9[%c0_22, %c0_23, %c0_24] : memref<1x1x128xf32, #tpu.memory_space<vmem>>, vector<1x1x128xf32>
    %46 = vector.shape_cast %45 : vector<1x1x128xf32> to vector<1x128xf32>
    %47 = vector.broadcast %46 : vector<1x128xf32> to vector<256x128xf32>
    %48 = arith.addf %44, %47 : vector<256x128xf32>
    %cst_25 = arith.constant 0.000000e+00 : f32
    %49 = vector.broadcast %cst_25 : f32 to vector<256x128xf32>
    %50 = arith.maximumf %48, %49 : vector<256x128xf32>
    %51 = vector.shape_cast %50 : vector<256x128xf32> to vector<2x128x128xf32>
    %cst_26 = arith.constant dense<0xFF800000> : vector<2x128xf32>
    %52 = vector.multi_reduction <maximumf>, %51, %cst_26 [1] : vector<2x128x128xf32> to vector<2x128xf32>
    %c0_27 = arith.constant 0 : index
    %c1792 = arith.constant 1792 : index
    %53 = vector.load %arg17[%c0_27, %c1792] : memref<2x1920xf32, #tpu.memory_space<vmem>>, vector<2x128xf32>
    %54 = arith.maximumf %53, %52 : vector<2x128xf32>
    %c0_28 = arith.constant 0 : index
    %c1792_29 = arith.constant 1792 : index
    %55 = vector.load %arg17[%c0_28, %c1792_29] : memref<2x1920xf32, #tpu.memory_space<vmem>>, vector<2x128xf32>
    tpu.vector_store %arg17[%c0_28, %c1792_29], %54 {strides = array<i32>} : memref<2x1920xf32, #tpu.memory_space<vmem>>, vector<2x128xf32>,
    %56 = arith.truncf %50 : vector<256x128xf32> to vector<256x128xbf16>
    %c0_30 = arith.constant 0 : index
    %c0_31 = arith.constant 0 : index
    %c0_32 = arith.constant 0 : index
    %57 = vector.load %arg10[%c0_30, %c0_31, %c0_32] : memref<1x128x256xbf16, #tpu.memory_space<vmem>>, vector<1x128x256xbf16>
    %58 = vector.shape_cast %57 : vector<1x128x256xbf16> to vector<128x256xbf16>
    %cst_33 = arith.constant dense<0.000000e+00> : vector<256x256xf32>
    %59 = tpu.matmul %56, %58, %cst_33 {dimension_numbers = #tpu.dot_dimension_numbers<[1], [0], [0], [1], [0, 0, 1, 1], [], []>} : vector<256x128xbf16>, vector<128x256xbf16>, vector<256x256xf32> -> vector<256x256xf32>
    %c0_34 = arith.constant 0 : index
    %c0_35 = arith.constant 0 : index
    %c0_36 = arith.constant 0 : index
    %60 = vector.load %arg11[%c0_34, %c0_35, %c0_36] : memref<1x1x256xf32, #tpu.memory_space<vmem>>, vector<1x1x256xf32>
    %61 = vector.shape_cast %60 : vector<1x1x256xf32> to vector<1x256xf32>
    %62 = vector.broadcast %61 : vector<1x256xf32> to vector<256x256xf32>
    %63 = arith.addf %59, %62 : vector<256x256xf32>
    %cst_37 = arith.constant 0.000000e+00 : f32
    %64 = vector.broadcast %cst_37 : f32 to vector<256x256xf32>
    %65 = arith.maximumf %63, %64 : vector<256x256xf32>
    %66 = vector.shape_cast %65 : vector<256x256xf32> to vector<2x128x256xf32>
    %cst_38 = arith.constant dense<0xFF800000> : vector<2x256xf32>
    %67 = vector.multi_reduction <maximumf>, %66, %cst_38 [1] : vector<2x128x256xf32> to vector<2x256xf32>
    %c0_39 = arith.constant 0 : index
    %c1536 = arith.constant 1536 : index
    %68 = vector.load %arg17[%c0_39, %c1536] : memref<2x1920xf32, #tpu.memory_space<vmem>>, vector<2x256xf32>
    %69 = arith.maximumf %68, %67 : vector<2x256xf32>
    %c0_40 = arith.constant 0 : index
    %c1536_41 = arith.constant 1536 : index
    %70 = vector.load %arg17[%c0_40, %c1536_41] : memref<2x1920xf32, #tpu.memory_space<vmem>>, vector<2x256xf32>
    tpu.vector_store %arg17[%c0_40, %c1536_41], %69 {strides = array<i32>} : memref<2x1920xf32, #tpu.memory_space<vmem>>, vector<2x256xf32>,
    %71 = arith.truncf %65 : vector<256x256xf32> to vector<256x256xbf16>
    %c0_42 = arith.constant 0 : index
    %c0_43 = arith.constant 0 : index
    %c0_44 = arith.constant 0 : index
    %72 = vector.load %arg12[%c0_42, %c0_43, %c0_44] : memref<1x256x512xbf16, #tpu.memory_space<vmem>>, vector<1x256x512xbf16>
    %73 = vector.shape_cast %72 : vector<1x256x512xbf16> to vector<256x512xbf16>
    %cst_45 = arith.constant dense<0.000000e+00> : vector<256x512xf32>
    %74 = tpu.matmul %71, %73, %cst_45 {dimension_numbers = #tpu.dot_dimension_numbers<[1], [0], [0], [1], [0, 0, 1, 1], [], []>} : vector<256x256xbf16>, vector<256x512xbf16>, vector<256x512xf32> -> vector<256x512xf32>
    %c0_46 = arith.constant 0 : index
    %c0_47 = arith.constant 0 : index
    %c0_48 = arith.constant 0 : index
    %75 = vector.load %arg13[%c0_46, %c0_47, %c0_48] : memref<1x1x512xf32, #tpu.memory_space<vmem>>, vector<1x1x512xf32>
    %76 = vector.shape_cast %75 : vector<1x1x512xf32> to vector<1x512xf32>
    %77 = vector.broadcast %76 : vector<1x512xf32> to vector<256x512xf32>
    %78 = arith.addf %74, %77 : vector<256x512xf32>
    %cst_49 = arith.constant 0.000000e+00 : f32
    %79 = vector.broadcast %cst_49 : f32 to vector<256x512xf32>
    %80 = arith.maximumf %78, %79 : vector<256x512xf32>
    %81 = vector.shape_cast %80 : vector<256x512xf32> to vector<2x128x512xf32>
    %cst_50 = arith.constant dense<0xFF800000> : vector<2x512xf32>
    %82 = vector.multi_reduction <maximumf>, %81, %cst_50 [1] : vector<2x128x512xf32> to vector<2x512xf32>
    %c0_51 = arith.constant 0 : index
    %c1024 = arith.constant 1024 : index
    %83 = vector.load %arg17[%c0_51, %c1024] : memref<2x1920xf32, #tpu.memory_space<vmem>>, vector<2x512xf32>
    %84 = arith.maximumf %83, %82 : vector<2x512xf32>
    %c0_52 = arith.constant 0 : index
    %c1024_53 = arith.constant 1024 : index
    %85 = vector.load %arg17[%c0_52, %c1024_53] : memref<2x1920xf32, #tpu.memory_space<vmem>>, vector<2x512xf32>
    tpu.vector_store %arg17[%c0_52, %c1024_53], %84 {strides = array<i32>} : memref<2x1920xf32, #tpu.memory_space<vmem>>, vector<2x512xf32>,
    %86 = arith.truncf %80 : vector<256x512xf32> to vector<256x512xbf16>
    %c0_54 = arith.constant 0 : index
    %c0_55 = arith.constant 0 : index
    %c0_56 = arith.constant 0 : index
    %87 = vector.load %arg14[%c0_54, %c0_55, %c0_56] : memref<1x512x1024xbf16, #tpu.memory_space<vmem>>, vector<1x512x1024xbf16>
    %88 = vector.shape_cast %87 : vector<1x512x1024xbf16> to vector<512x1024xbf16>
    %cst_57 = arith.constant dense<0.000000e+00> : vector<256x1024xf32>
    %89 = tpu.matmul %86, %88, %cst_57 {dimension_numbers = #tpu.dot_dimension_numbers<[1], [0], [0], [1], [0, 0, 1, 1], [], []>} : vector<256x512xbf16>, vector<512x1024xbf16>, vector<256x1024xf32> -> vector<256x1024xf32>
    %c0_58 = arith.constant 0 : index
    %c0_59 = arith.constant 0 : index
    %c0_60 = arith.constant 0 : index
    %90 = vector.load %arg15[%c0_58, %c0_59, %c0_60] : memref<1x1x1024xf32, #tpu.memory_space<vmem>>, vector<1x1x1024xf32>
    %91 = vector.shape_cast %90 : vector<1x1x1024xf32> to vector<1x1024xf32>
    %92 = vector.broadcast %91 : vector<1x1024xf32> to vector<256x1024xf32>
    %93 = arith.addf %89, %92 : vector<256x1024xf32>
    %cst_61 = arith.constant 0.000000e+00 : f32
    %94 = vector.broadcast %cst_61 : f32 to vector<256x1024xf32>
    %95 = arith.maximumf %93, %94 : vector<256x1024xf32>
    %96 = vector.shape_cast %95 : vector<256x1024xf32> to vector<2x128x1024xf32>
    %cst_62 = arith.constant dense<0xFF800000> : vector<2x1024xf32>
    %97 = vector.multi_reduction <maximumf>, %96, %cst_62 [1] : vector<2x128x1024xf32> to vector<2x1024xf32>
    %c0_63 = arith.constant 0 : index
    %c0_64 = arith.constant 0 : index
    %98 = vector.load %arg17[%c0_63, %c0_64] : memref<2x1920xf32, #tpu.memory_space<vmem>>, vector<2x1024xf32>
    %99 = arith.maximumf %98, %97 : vector<2x1024xf32>
    %c0_65 = arith.constant 0 : index
    %c0_66 = arith.constant 0 : index
    %100 = vector.load %arg17[%c0_65, %c0_66] : memref<2x1920xf32, #tpu.memory_space<vmem>>, vector<2x1024xf32>
    tpu.vector_store %arg17[%c0_65, %c0_66], %99 {strides = array<i32>} : memref<2x1920xf32, #tpu.memory_space<vmem>>, vector<2x1024xf32>,
    %c0_i32_67 = arith.constant 0 : i32
    %101 = arith.cmpi eq, %arg1, %c0_i32_67 : i32
    %c0_i32_68 = arith.constant 0 : i32
    %102 = arith.cmpi eq, %arg0, %c0_i32_68 : i32
    %103 = arith.andi %101, %102 : i1
    %104 = arith.extui %103 : i1 to i32
    %c0_i32_69 = arith.constant 0 : i32
    %105 = arith.cmpi ne, %104, %c0_i32_69 : i32
    scf.if %105 {
      %cst_72 = arith.constant 0.000000e+00 : f32
      %112 = vector.broadcast %cst_72 : f32 to vector<2x1920xf32>
      %c0_73 = arith.constant 0 : index
      %c0_74 = arith.constant 0 : index
      %113 = vector.load %arg16[%c0_73, %c0_74] : memref<2x1920xf32, #tpu.memory_space<vmem>>, vector<2x1920xf32>
      tpu.vector_store %arg16[%c0_73, %c0_74], %112 {strides = array<i32>} : memref<2x1920xf32, #tpu.memory_space<vmem>>, vector<2x1920xf32>,
    } else {
    }
    %106 = arith.extui %101 : i1 to i32
    %c0_i32_70 = arith.constant 0 : i32
    %107 = arith.cmpi ne, %106, %c0_i32_70 : i32
    scf.if %107 {
      %c0_72 = arith.constant 0 : index
      %112 = memref.load %arg2[%c0_72] : memref<4xf32, #tpu.memory_space<smem>>
      %c1_i32 = arith.constant 1 : i32
      %113 = arith.cmpi eq, %arg0, %c1_i32 : i32
      %c1 = arith.constant 1 : index
      %114 = memref.load %arg2[%c1] : memref<4xf32, #tpu.memory_space<smem>>
      %115 = arith.select %113, %114, %112 : f32
      %c2_i32_73 = arith.constant 2 : i32
      %116 = arith.cmpi eq, %arg0, %c2_i32_73 : i32
      %c2 = arith.constant 2 : index
      %117 = memref.load %arg2[%c2] : memref<4xf32, #tpu.memory_space<smem>>
      %118 = arith.select %116, %117, %115 : f32
      %c0_74 = arith.constant 0 : index
      %c0_75 = arith.constant 0 : index
      %119 = vector.load %arg16[%c0_74, %c0_75] : memref<2x1920xf32, #tpu.memory_space<vmem>>, vector<2x1920xf32>
      %c0_76 = arith.constant 0 : index
      %c0_77 = arith.constant 0 : index
      %120 = vector.load %arg17[%c0_76, %c0_77] : memref<2x1920xf32, #tpu.memory_space<vmem>>, vector<2x1920xf32>
      %121 = vector.broadcast %118 : f32 to vector<2x1920xf32>
      %122 = arith.mulf %120, %121 : vector<2x1920xf32>
      %123 = arith.addf %119, %122 : vector<2x1920xf32>
      %c0_78 = arith.constant 0 : index
      %c0_79 = arith.constant 0 : index
      %124 = vector.load %arg16[%c0_78, %c0_79] : memref<2x1920xf32, #tpu.memory_space<vmem>>, vector<2x1920xf32>
      tpu.vector_store %arg16[%c0_78, %c0_79], %123 {strides = array<i32>} : memref<2x1920xf32, #tpu.memory_space<vmem>>, vector<2x1920xf32>,
    } else {
    }
    %c2_i32 = arith.constant 2 : i32
    %108 = arith.cmpi eq, %arg0, %c2_i32 : i32
    %109 = arith.andi %101, %108 : i1
    %110 = arith.extui %109 : i1 to i32
    %c0_i32_71 = arith.constant 0 : i32
    %111 = arith.cmpi ne, %110, %c0_i32_71 : i32
    scf.if %111 {
      %c0_72 = arith.constant 0 : index
      %c0_73 = arith.constant 0 : index
      %112 = vector.load %arg16[%c0_72, %c0_73] : memref<2x1920xf32, #tpu.memory_space<vmem>>, vector<2x1920xf32>
      %c3 = arith.constant 3 : index
      %113 = memref.load %arg2[%c3] : memref<4xf32, #tpu.memory_space<smem>>
      %114 = vector.broadcast %113 : f32 to vector<2x1920xf32>
      %115 = arith.addf %112, %114 : vector<2x1920xf32>
      %cst_74 = arith.constant 0.000000e+00 : f32
      %116 = vector.broadcast %cst_74 : f32 to vector<2x1920xf32>
      %117 = arith.maximumf %115, %116 : vector<2x1920xf32>
      %c0_75 = arith.constant 0 : index
      %c0_76 = arith.constant 0 : index
      %118 = vector.load %arg16[%c0_75, %c0_76] : memref<2x1920xf32, #tpu.memory_space<vmem>>, vector<2x1920xf32>
      tpu.vector_store %arg16[%c0_75, %c0_76], %117 {strides = array<i32>} : memref<2x1920xf32, #tpu.memory_space<vmem>>, vector<2x1920xf32>,
    } else {
    }
    return
  }
  func.func @transform_0(%arg0: i32, %arg1: i32) -> i32 {
    %c0_i32 = arith.constant 0 : i32
    %c0_i32_0 = arith.constant 0 : i32
    return %c0_i32 : i32
  }
  func.func @transform_1(%arg0: i32, %arg1: i32) -> (i32, i32, i32, i32) {
    %c0_i32 = arith.constant 0 : i32
    %c0_i32_0 = arith.constant 0 : i32
    %c0_i32_1 = arith.constant 0 : i32
    return %arg0, %c0_i32, %arg1, %c0_i32_0 : i32, i32, i32, i32
  }
  func.func @transform_2(%arg0: i32, %arg1: i32) -> (i32, i32, i32) {
    %c0_i32 = arith.constant 0 : i32
    %c0_i32_0 = arith.constant 0 : i32
    %c0_i32_1 = arith.constant 0 : i32
    return %arg0, %c0_i32, %c0_i32_0 : i32, i32, i32
  }
  func.func @transform_3(%arg0: i32, %arg1: i32) -> (i32, i32, i32) {
    %c0_i32 = arith.constant 0 : i32
    %c0_i32_0 = arith.constant 0 : i32
    %c0_i32_1 = arith.constant 0 : i32
    return %arg0, %c0_i32, %c0_i32_0 : i32, i32, i32
  }
  func.func @transform_4(%arg0: i32, %arg1: i32) -> (i32, i32, i32) {
    %c0_i32 = arith.constant 0 : i32
    %c0_i32_0 = arith.constant 0 : i32
    %c0_i32_1 = arith.constant 0 : i32
    return %arg0, %c0_i32, %c0_i32_0 : i32, i32, i32
  }
  func.func @transform_5(%arg0: i32, %arg1: i32) -> (i32, i32, i32) {
    %c0_i32 = arith.constant 0 : i32
    %c0_i32_0 = arith.constant 0 : i32
    %c0_i32_1 = arith.constant 0 : i32
    return %arg0, %c0_i32, %c0_i32_0 : i32, i32, i32
  }
  func.func @transform_6(%arg0: i32, %arg1: i32) -> (i32, i32, i32) {
    %c0_i32 = arith.constant 0 : i32
    %c0_i32_0 = arith.constant 0 : i32
    %c0_i32_1 = arith.constant 0 : i32
    return %arg0, %c0_i32, %c0_i32_0 : i32, i32, i32
  }
  func.func @transform_7(%arg0: i32, %arg1: i32) -> (i32, i32, i32) {
    %c0_i32 = arith.constant 0 : i32
    %c0_i32_0 = arith.constant 0 : i32
    %c0_i32_1 = arith.constant 0 : i32
    return %arg0, %c0_i32, %c0_i32_0 : i32, i32, i32
  }
  func.func @transform_8(%arg0: i32, %arg1: i32) -> (i32, i32, i32) {
    %c0_i32 = arith.constant 0 : i32
    %c0_i32_0 = arith.constant 0 : i32
    %c0_i32_1 = arith.constant 0 : i32
    return %arg0, %c0_i32, %c0_i32_0 : i32, i32, i32
  }
  func.func @transform_9(%arg0: i32, %arg1: i32) -> (i32, i32, i32) {
    %c0_i32 = arith.constant 0 : i32
    %c0_i32_0 = arith.constant 0 : i32
    %c0_i32_1 = arith.constant 0 : i32
    return %arg0, %c0_i32, %c0_i32_0 : i32, i32, i32
  }
  func.func @transform_10(%arg0: i32, %arg1: i32) -> (i32, i32, i32) {
    %c0_i32 = arith.constant 0 : i32
    %c0_i32_0 = arith.constant 0 : i32
    %c0_i32_1 = arith.constant 0 : i32
    return %arg0, %c0_i32, %c0_i32_0 : i32, i32, i32
  }
  func.func @transform_11(%arg0: i32, %arg1: i32) -> (i32, i32, i32) {
    %c0_i32 = arith.constant 0 : i32
    %c0_i32_0 = arith.constant 0 : i32
    %c0_i32_1 = arith.constant 0 : i32
    return %arg0, %c0_i32, %c0_i32_0 : i32, i32, i32
  }
  func.func @transform_12(%arg0: i32, %arg1: i32) -> (i32, i32, i32) {
    %c0_i32 = arith.constant 0 : i32
    %c0_i32_0 = arith.constant 0 : i32
    %c0_i32_1 = arith.constant 0 : i32
    return %arg0, %c0_i32, %c0_i32_0 : i32, i32, i32
  }
  func.func @transform_13(%arg0: i32, %arg1: i32) -> (i32, i32, i32) {
    %c0_i32 = arith.constant 0 : i32
    %c0_i32_0 = arith.constant 0 : i32
    %c0_i32_1 = arith.constant 0 : i32
    return %arg0, %c0_i32, %c0_i32_0 : i32, i32, i32
  }
  func.func @transform_14(%arg0: i32, %arg1: i32) -> (i32, i32) {
    %c0_i32 = arith.constant 0 : i32
    %c0_i32_0 = arith.constant 0 : i32
    %c0_i32_1 = arith.constant 0 : i32
    return %c0_i32, %c0_i32_0 : i32, i32
  }
}

</mosaic_0001>

<bundles_post_ra>
// kernel: tpu_custom_call.1
= control target key start
LH: loop header
LB: loop body
LE: loop exit
PB: predicated region body
PF: predicated region fallthrough
CT: control target
= control target key end

     0   :  { %s12888_s0 = inlined_call_operand.hbm [shape: f32[4], index: 0, kind: input, shape index: {}]   ;;  %s12889_s1 = inlined_call_operand.vmem [shape: f32[3,2,128,3], index: 1, kind: input, shape index: {}]   ;;  %s12890_s2 = inlined_call_operand.hbm [shape: f32[3,3,64], index: 2, kind: input, shape index: {}]   ;;  %s12891_s3 = inlined_call_operand.hbm [shape: f32[3,1,64], index: 3, kind: input, shape index: {}]   ;;  %s12892_s4 = inlined_call_operand.hbm [shape: bf16[3,64,64], index: 4, kind: input, shape index: {}]   ;;  %s12893_s5 = inlined_call_operand.hbm [shape: f32[3,1,64], index: 5, kind: input, shape index: {}]   ;;  %s12894_s6 = inlined_call_operand.hbm [shape: bf16[3,64,128], index: 6, kind: input, shape index: {}]   ;;  %s12895_s7 = inlined_call_operand.hbm [shape: f32[3,1,128], index: 7, kind: input, shape index: {}]   ;;  %s12896_s8 = inlined_call_operand.hbm [shape: bf16[3,128,256], index: 8, kind: input, shape index: {}]   ;;  %s12897_s9 = inlined_call_operand.hbm [shape: f32[3,1,256], index: 9, kind: input, shape index: {}]   ;;  %s12898_s10 = inlined_call_operand.hbm [shape: bf16[3,256,512], index: 10, kind: input, shape index: {}]   ;;  %s12899_s11 = inlined_call_operand.hbm [shape: f32[3,1,512], index: 11, kind: input, shape index: {}]   ;;  %s12900_s12 = inlined_call_operand.hbm [shape: bf16[3,512,1024], index: 12, kind: input, shape index: {}]   ;;  %s12901_s13 = inlined_call_operand.hbm [shape: f32[3,1,1024], index: 13, kind: input, shape index: {}]   ;;  %s12902_s14 = inlined_call_operand.hbm [shape: f32[2,1920], index: 14, kind: output, shape index: {}]  }
   0x1   :  { %12999 = sst [smem:[#allocation82_spill]] %s12888_s0 }
   0x2   :  { %13000 = sst [smem:[#allocation83_spill]] %s12889_s1 }
   0x3   :  { %13001 = sst [smem:[#allocation84_spill]] %s12890_s2 }
   0x4   :  { %13002 = sst [smem:[#allocation85_spill]] %s12891_s3 }
   0x5   :  { %13003 = sst [smem:[#allocation86_spill]] %s12892_s4 }
   0x6   :  { %13004 = sst [smem:[#allocation87_spill]] %s12893_s5 }
   0x7   :  { %13005 = sst [smem:[#allocation88_spill]] %s12895_s7 }
   0x8   :  { %13006 = sst [smem:[#allocation89_spill]] %s12901_s13 }
   0x9   :  { %13007 = sst [smem:[#allocation90_spill]] %s12902_s14 }
   0xa   :  { %19 = vsyncpa [#allocation6], 0 }
   0xb   :  { %20 = vsyncpa [#allocation4], 0 }
   0xc   :  { %22 = vsyncpa [#allocation4 + $0x1], 0 }
   0xd   :  { %23 = vsyncpa [#allocation9], 0 }
   0xe   :  { %25 = vsyncpa [#allocation9 + $0x1], 0 }
   0xf   :  { %26 = vsyncpa [#allocation12], 0 }
  0x10   :  { %28 = vsyncpa [#allocation12 + $0x1], 0 }
  0x11   :  { %29 = vsyncpa [#allocation15], 0 }
  0x12   :  { %31 = vsyncpa [#allocation15 + $0x1], 0 }
  0x13   :  { %32 = vsyncpa [#allocation18], 0 }
  0x14   :  { %34 = vsyncpa [#allocation18 + $0x1], 0 }
  0x15   :  { %35 = vsyncpa [#allocation21], 0 }
  0x16   :  { %37 = vsyncpa [#allocation21 + $0x1], 0 }
  0x17   :  { %38 = vsyncpa [#allocation24], 0 }
  0x18   :  { %40 = vsyncpa [#allocation24 + $0x1], 0 }
  0x19   :  { %41 = vsyncpa [#allocation5], 0  ;;  %s10239_s29 = smov 0   ;;  %s10241_s30 = smov 0  }
  0x1a   :  { %s10243_s15 = smov 0   ;;  %s10245_s16 = smov 0  }
  0x1b   :  { %s10247_s17 = smov 0   ;;  %s10249_s18 = smov 0  }
  0x1c LB: > { %13008 = sst [smem:[#allocation35_spill]] %s10122_s15  ;;  %s59_s19 = sadd.s32 1, %s10130_s17  ;;  %s10134_s18 = sphi %s10249_s18, %s47_s18   ;;  %s10130_s17 = sphi %s10247_s17, %s13156_s17   ;;  %s10126_s16 = sphi %s10245_s16, %s13155_s16   ;;  %s10122_s15 = sphi %s10243_s15, %s13151_s15   ;;  %s10118_s30 = sphi %s10241_s30, %s13154_s30   ;;  %s10114_s29 = sphi %s10239_s29, %s13153_s29  }
  0x1d   : > { %13009 = sst [smem:[#allocation36_spill]] %s10126_s16  ;;  %s115_s20 = sadd.s32 1, %s10122_s15 }
  0x1e   : > { %p61_p0 = scmp.ge.s32.totalorder %s59_s19, 3  ;;  %p122_p1 = scmp.ne.s32.totalorder %s10122_s15, %s10118_s30 }
  0x1f   : > { %p123_p2 = scmp.eq.s32.totalorder %s10134_s18, 0  ;;  %p9409_p4 = scmp.lt.s32.totalorder %s10134_s18, 3 }
  0x20   : > { %s13158_s19 = smov (%p61_p0, %s59_s19), 0  ;;  %s10280_s22 = sand.u32 1, %s10122_s15  }
  0x21   : > { %13010 = sst [smem:[#allocation37_spill]] %s13158_s19  ;;  %p124_p3 = por %p123_p2, %p122_p1 }
  0x22   : > { %s112_s21 = ssub.s32 %s10130_s17, %s13158_s19  ;;  %s10287_s24 = sand.u32 1, %s10134_s18  }
  0x23   : > { %p113_p5 = scmp.eq.s32.totalorder %s112_s21, 0  ;;  %p10282_p6 = pnand %p9409_p4, %p124_p3 }
  0x24   : > { %s10293_s26 = sshll.u32 %s10130_s17, 4  ;;  %s502_s27 = scalar_lea.vmem [#allocation8], %s10280_s22 }
  0x25   : > { %s13011_s23 = scalar_select %p10282_p6, 1, 0 }
  0x26   : > { %s10290_s25 = scalar_select %p113_p5, %s10122_s15, %s115_s20  }
  0x27   : > { %s509_s28 = sshll.u32 %s502_s27, 4  ;;  %s13013_s3 = sld [smem:[#allocation85_spill]]  ;;  %s10302_s28 = int_to_ptr.vmem [resolvable:$true] %s509_s28 }
  0x28   : > { %13012 = sst [smem:[#allocation38_spill]] %s10290_s25  ;;  %p10309_p8 = pneg %p10282_p6 }
  0x2d   : > { %s10300_s1 = scalar_lea.hbm %s13013_s3, %s10293_s26  ;;  %s9658_s27 = scalar_lea.hbm %s13013_s3, 48 }
  0x2e   : > { %s9653_s16 = scalar_lea.hbm %s10300_s1, 16  ;;  %p9659_p11 = scmp.lt.u32.totalorder %s10300_s1, %s13013_s3 }
  0x2f   : > { %p9654_p7 = scmp.ne.s32.totalorder %s10300_s1, %s9653_s16  ;;  %p9660_p12 = scmp.lt.u32.totalorder %s9658_s27, %s9653_s16 }
  0x30   : > { %p9662_p0 = scmp.lt.u32.totalorder %s9653_s16, %s10300_s1 }
  0x31   : > { %p9656_p9 = pnand %p10309_p8, %p9654_p7  ;;  %p9661_p13 = por %p9660_p12, %p9659_p11 }
  0x33   : > { %p9657_p10 = pneg %p9656_p9  ;;  %p9663_p1 = por %p9662_p0, %p9661_p13 }
  0x35   : > { %p9664_p2 = pnand %p9663_p1, %p9657_p10 }
  0x37   : > { %9667 = shalt.err (!%p9664_p2)
}
  0x38   : > { %s9668_s21 = scalar_lea.vmem %s10302_s28, 16  ;;  %s10136_s14 = smov [#allocation8]  }
  0x39   : > { %p9669_p3 = scmp.ne.s32.totalorder %s10302_s28, %s9668_s21  ;;  %s9673_s19 = sshll.u32 %s10136_s14, 4  ;;  %s9674_s19 = int_to_ptr.vmem [resolvable:$false] %s9673_s19 }
  0x3a   : > { %s9675_s15 = scalar_lea.vmem %s9674_s19, 32  ;;  %p9676_p7 = scmp.lt.s32.totalorder %s10302_s28, %s9674_s19 }
  0x3b   : > { %p9671_p4 = pnand %p9669_p3, %p10309_p8  ;;  %p9677_p9 = scmp.lt.s32.totalorder %s9675_s15, %s9668_s21 }
  0x3d   : > { %p9672_p5 = pneg %p9671_p4  ;;  %p9678_p11 = por %p9677_p9, %p9676_p7 }
  0x3f   : > { %p9679_p12 = pnand %p9678_p11, %p9672_p5 }
  0x41   : > { %9682 = shalt.err (!%p9679_p12)
}
  0x42   : > { %s13015_s16 = scalar_lea.sflag [#allocation9], %s10287_s24  ;;  %s13016_s5 = sld [smem:[#allocation87_spill]] }
  0x43   : > { %9377 = dma.hbm_to_vmem [thread:$0]  (!%p10282_p6), %s10300_s1, 16, %s10302_s28, %s13015_s16  }
  0x44   : > { %s540_s21 = scalar_lea.vmem [#allocation11], %s10280_s22 }
  0x45   : > { %s547_s19 = sshll.u32 %s540_s21, 4  ;;  %s548_s19 = int_to_ptr.vmem [resolvable:$true] %s547_s19 }
  0x48   : > { %s10338_s14 = scalar_lea.hbm %s13016_s5, %s10293_s26  ;;  %s9688_s28 = scalar_lea.hbm %s13016_s5, 48 }
  0x49   : > { %s9683_s3 = scalar_lea.hbm %s10338_s14, 16  ;;  %p9689_p1 = scmp.lt.u32.totalorder %s10338_s14, %s13016_s5 }
  0x4a   : > { %p9684_p10 = scmp.ne.s32.totalorder %s10338_s14, %s9683_s3  ;;  %p9690_p2 = scmp.lt.u32.totalorder %s9688_s28, %s9683_s3 }
  0x4b   : > { %p9692_p4 = scmp.lt.u32.totalorder %s9683_s3, %s10338_s14 }
  0x4c   : > { %p9686_p13 = pnand %p9684_p10, %p10309_p8  ;;  %p9691_p3 = por %p9690_p2, %p9689_p1 }
  0x4e   : > { %p9687_p0 = pneg %p9686_p13  ;;  %p9693_p5 = por %p9692_p4, %p9691_p3 }
  0x50   : > { %p9694_p7 = pnand %p9693_p5, %p9687_p0 }
  0x52   : > { %9697 = shalt.err (!%p9694_p7)
}
  0x53   : > { %s9698_s27 = scalar_lea.vmem %s548_s19, 16  ;;  %s10137_s21 = smov [#allocation11]  }
  0x54   : > { %p9699_p9 = scmp.ne.s32.totalorder %s548_s19, %s9698_s27  ;;  %s9703_s15 = sshll.u32 %s10137_s21, 4  ;;  %s9704_s15 = int_to_ptr.vmem [resolvable:$false] %s9703_s15 }
  0x55   : > { %s9705_s13 = scalar_lea.vmem %s9704_s15, 32  ;;  %p9706_p10 = scmp.lt.s32.totalorder %s548_s19, %s9704_s15 }
  0x56   : > { %p9701_p11 = pnand %p9699_p9, %p10309_p8  ;;  %p9707_p13 = scmp.lt.s32.totalorder %s9705_s13, %s9698_s27 }
  0x58   : > { %p9702_p12 = pneg %p9701_p11  ;;  %p9708_p6 = por %p9707_p13, %p9706_p10 }
  0x5a   : > { %p9709_p1 = pnand %p9708_p6, %p9702_p12 }
  0x5c   : > { %9712 = shalt.err (!%p9709_p1)
}
  0x5d   : > { %p13017_p2 = scmp.ne.s32.totalorder %s13011_s23, 0  ;;  %s13018_s3 = scalar_lea.sflag [#allocation12], %s10287_s24 }
  0x5e   : > { %s13019_s7 = sld [smem:[#allocation88_spill]]  ;;  %s578_s15 = scalar_lea.vmem [#allocation14], %s10280_s22 }
  0x5f   : > { %9383 = dma.hbm_to_vmem [thread:$0]  (!%p13017_p2), %s10338_s14, 16, %s548_s19, %s13018_s3  }
  0x60   : > { %s585_s25 = sshll.u32 %s578_s15, 4  ;;  %s8260_s27 = sshll.u32 %s10280_s22, 1  ;;  %s10368_s25 = int_to_ptr.vmem [resolvable:$true] %s585_s25 }
  0x61   : > { %s12912_s21 = scalar_lea.sflag [#allocation15], %s10287_s24 }
  0x64   : > { %s10365_s16 = scalar_lea.hbm %s13019_s7, %s10293_s26  ;;  %s9718_s26 = scalar_lea.hbm %s13019_s7, 48 }
  0x65   : > { %s9713_s13 = scalar_lea.hbm %s10365_s16, 16  ;;  %p9719_p4 = scmp.lt.u32.totalorder %s10365_s16, %s13019_s7 }
  0x66   : > { %p9714_p6 = scmp.ne.s32.totalorder %s10365_s16, %s9713_s13  ;;  %p9720_p5 = scmp.lt.u32.totalorder %s9718_s26, %s9713_s13 }
  0x67   : > { %p9722_p9 = scmp.lt.u32.totalorder %s9713_s13, %s10365_s16 }
  0x68   : > { %p9716_p0 = pnand %p9714_p6, %p10309_p8  ;;  %p9721_p7 = por %p9720_p5, %p9719_p4 }
  0x6a   : > { %p9717_p3 = pneg %p9716_p0  ;;  %p9723_p11 = por %p9722_p9, %p9721_p7 }
  0x6c   : > { %p9724_p12 = pnand %p9723_p11, %p9717_p3 }
  0x6e   : > { %9727 = shalt.err (!%p9724_p12)
}
  0x6f   : > { %s9728_s28 = scalar_lea.vmem %s10368_s25, 16  ;;  %s10138_s15 = smov [#allocation14]  }
  0x70   : > { %p9729_p10 = scmp.ne.s32.totalorder %s10368_s25, %s9728_s28  ;;  %s9733_s14 = sshll.u32 %s10138_s15, 4  ;;  %s9734_s14 = int_to_ptr.vmem [resolvable:$false] %s9733_s14 }
  0x71   : > { %s9735_s19 = scalar_lea.vmem %s9734_s14, 32  ;;  %p9736_p6 = scmp.lt.s32.totalorder %s10368_s25, %s9734_s14 }
  0x72   : > { %p9731_p13 = pnand %p9729_p10, %p10309_p8  ;;  %p9737_p0 = scmp.lt.s32.totalorder %s9735_s19, %s9728_s28 }
  0x74   : > { %p9732_p1 = pneg %p9731_p13  ;;  %p9738_p4 = por %p9737_p0, %p9736_p6 }
  0x76   : > { %p9739_p5 = pnand %p9738_p4, %p9732_p1 }
  0x78   : > { %9742 = shalt.err (!%p9739_p5)
}
  0x79   : > { %9389 = dma.hbm_to_vmem [thread:$0]  (!%p13017_p2), %s10365_s16, 16, %s10368_s25, %s12912_s21  }
  0x7a   : > { %s8679_s13 = sshll.u32 %s10130_s17, 5  ;;  %s617_s28 = scalar_lea.vmem [#allocation17], %s8260_s27 }
  0x7b   : > { %s10399_s1 = scalar_lea.hbm %s12897_s9, %s8679_s13  ;;  %s625_s15 = sshll.u32 %s617_s28, 4  ;;  %s10403_s15 = int_to_ptr.vmem [resolvable:$true] %s625_s15 }
  0x7c   : > { %s12913_s14 = sshll.u32 %s10280_s22, 2  ;;  %s12911_s19 = scalar_lea.sflag [#allocation18], %s10287_s24 }
  0x7d   : > { %s9743_s5 = scalar_lea.hbm %s10399_s1, 32  ;;  %s9748_s13 = scalar_lea.hbm %s12897_s9, 96 }
  0x7e   : > { %p9744_p3 = scmp.ne.s32.totalorder %s10399_s1, %s9743_s5  ;;  %p9749_p11 = scmp.lt.u32.totalorder %s10399_s1, %s12897_s9 }
  0x7f   : > { %p9750_p12 = scmp.lt.u32.totalorder %s9748_s13, %s9743_s5  ;;  %p9752_p13 = scmp.lt.u32.totalorder %s9743_s5, %s10399_s1 }
  0x80   : > { %p9746_p7 = pnand %p9744_p3, %p10309_p8 }
  0x81   : > { %p9751_p10 = por %p9750_p12, %p9749_p11 }
  0x82   : > { %p9747_p9 = pneg %p9746_p7 }
  0x83   : > { %p9753_p1 = por %p9752_p13, %p9751_p10 }
  0x85   : > { %p9754_p6 = pnand %p9753_p1, %p9747_p9 }
  0x87   : > { %9757 = shalt.err (!%p9754_p6)
}
  0x88   : > { %s9758_s27 = scalar_lea.vmem %s10403_s15, 32  ;;  %s10139_s28 = smov [#allocation17]  }
  0x89   : > { %p9759_p0 = scmp.ne.s32.totalorder %s10403_s15, %s9758_s27  ;;  %s9763_s16 = sshll.u32 %s10139_s28, 4  ;;  %s9764_s16 = int_to_ptr.vmem [resolvable:$false] %s9763_s16 }
  0x8a   : > { %s9765_s25 = scalar_lea.vmem %s9764_s16, 64  ;;  %p9766_p3 = scmp.lt.s32.totalorder %s10403_s15, %s9764_s16 }
  0x8b   : > { %p9761_p4 = pnand %p9759_p0, %p10309_p8  ;;  %p9767_p7 = scmp.lt.s32.totalorder %s9765_s25, %s9758_s27 }
  0x8d   : > { %p9762_p5 = pneg %p9761_p4  ;;  %p9768_p11 = por %p9767_p7, %p9766_p3 }
  0x8f   : > { %p9769_p12 = pnand %p9768_p11, %p9762_p5 }
  0x91   : > { %9772 = shalt.err (!%p9769_p12)
}
  0x92   : > { %9395 = dma.hbm_to_vmem [thread:$0]  (!%p13017_p2), %s10399_s1, 32, %s10403_s15, %s12911_s19  }
  0x93   : > { %s8247_s5 = sshll.u32 %s10130_s17, 6  ;;  %s657_s27 = scalar_lea.vmem [#allocation20], %s12913_s14 }
  0x94   : > { %s10436_s3 = scalar_lea.hbm %s12899_s11, %s8247_s5  ;;  %s665_s28 = sshll.u32 %s657_s27, 4  ;;  %s666_s28 = int_to_ptr.vmem [resolvable:$true] %s665_s28 }
  0x95   : > { %s12915_s16 = scalar_lea.sflag [#allocation21], %s10287_s24  ;;  %s9773_s25 = scalar_lea.hbm %s10436_s3, 64 }
  0x96   : > { %p9774_p9 = scmp.ne.s32.totalorder %s10436_s3, %s9773_s25  ;;  %s9778_s13 = scalar_lea.hbm %s12899_s11, 192 }
  0x97   : > { %p9779_p1 = scmp.lt.u32.totalorder %s10436_s3, %s12899_s11  ;;  %p9780_p6 = scmp.lt.u32.totalorder %s9778_s13, %s9773_s25 }
  0x98   : > { %p9776_p10 = pnand %p9774_p9, %p10309_p8  ;;  %p9782_p4 = scmp.lt.u32.totalorder %s9773_s25, %s10436_s3 }
  0x99   : > { %p9781_p0 = por %p9780_p6, %p9779_p1 }
  0x9a   : > { %p9777_p13 = pneg %p9776_p10 }
  0x9b   : > { %p9783_p5 = por %p9782_p4, %p9781_p0 }
  0x9d   : > { %p9784_p3 = pnand %p9783_p5, %p9777_p13 }
  0x9f   : > { %9787 = shalt.err (!%p9784_p3)
}
  0xa0   : > { %s9788_s27 = scalar_lea.vmem %s666_s28, 64  ;;  %s10140_s21 = smov [#allocation20]  }
  0xa1   : > { %p9789_p7 = scmp.ne.s32.totalorder %s666_s28, %s9788_s27  ;;  %s9793_s14 = sshll.u32 %s10140_s21, 4  ;;  %s9794_s14 = int_to_ptr.vmem [resolvable:$false] %s9793_s14 }
  0xa2   : > { %s9795_s1 = scalar_lea.vmem %s9794_s14, 128  ;;  %p9796_p9 = scmp.lt.s32.totalorder %s666_s28, %s9794_s14 }
  0xa3   : > { %p9791_p11 = pnand %p9789_p7, %p10309_p8  ;;  %p9797_p10 = scmp.lt.s32.totalorder %s9795_s1, %s9788_s27 }
  0xa5   : > { %p9792_p12 = pneg %p9791_p11  ;;  %p9798_p2 = por %p9797_p10, %p9796_p9 }
  0xa7   : > { %p9799_p1 = pnand %p9798_p2, %p9792_p12 }
  0xa9   : > { %9802 = shalt.err (!%p9799_p1)
}
  0xaa   : > { %p13020_p6 = scmp.ne.s32.totalorder %s13011_s23, 0  ;;  %s10461_s21 = sadd.s32 4294967295, %s10134_s18  }
  0xab   : > { %p128_p2 = scmp.ne.s32.totalorder %s10118_s30, %s10114_s29  ;;  %p12916_p13 = scmp.eq.s32.totalorder %s10461_s21, 0 }
  0xac   : > { %9401 = dma.hbm_to_vmem [thread:$0]  (!%p13020_p6), %s10436_s3, 64, %s666_s28, %s12915_s16  }
  0xad   : > { %p8243_p0 = scmp.ge.s32.totalorder %s10134_s18, 1  ;;  %p446_p4 = scmp.lt.s32.totalorder %s10134_s18, 4 }
  0xae   : > { %p10470_p5 = por %p12916_p13, %p128_p2  ;;  %s13023_s2 = sld [smem:[#allocation84_spill]] }
  0xaf   : > { %p10474_p3 = pnand %p8243_p0, %p446_p4  ;;  %s13024_s29 = sshll.u32 %s10280_s22, 2 }
  0xb0   : > { %s13021_s14 = scalar_select %p10470_p5, 1, 0 }
  0xb1   : > { %s13022_s19 = scalar_select %p10474_p3, 1, 0 }
  0xb2   : > { %p9367_p7 = pneg %p10474_p3  ;;  %s485_s15 = scalar_lea.vmem [#allocation7], %s13024_s29 }
  0xb3   : > { %s492_s13 = sshll.u32 %s485_s15, 4  ;;  %s482_s1 = scalar_lea.sflag [#allocation4], %s10280_s22  ;;  %s10489_s13 = int_to_ptr.vmem [resolvable:$true] %s492_s13 }
  0xb4   : > { %s10483_s25 = scalar_lea.hbm %s13023_s2, %s8247_s5  ;;  %p10494_p11 = pnand %p9367_p7, %p12916_p13 }
  0xb5   : > { %s9803_s5 = scalar_lea.hbm %s10483_s25, 64  ;;  %s9808_s16 = scalar_lea.hbm %s13023_s2, 192 }
  0xb6   : > { %s13025_s27 = scalar_select %p10494_p11, 1, 0 }
  0xb7   : > { %p9804_p12 = scmp.ne.s32.totalorder %s10483_s25, %s9803_s5  ;;  %p9809_p1 = scmp.lt.u32.totalorder %s10483_s25, %s13023_s2 }
  0xb8   : > { %p9810_p2 = scmp.lt.u32.totalorder %s9808_s16, %s9803_s5  ;;  %p9812_p4 = scmp.lt.u32.totalorder %s9803_s5, %s10483_s25 }
  0xb9   : > { %p9806_p9 = pnand %p9804_p12, %p10309_p8 }
  0xba   : > { %p9811_p0 = por %p9810_p2, %p9809_p1 }
  0xbb   : > { %p9807_p10 = pneg %p9806_p9 }
  0xbc   : > { %p9813_p7 = por %p9812_p4, %p9811_p0 }
  0xbe   : > { %p9814_p13 = pnand %p9813_p7, %p9807_p10 }
  0xc0   : > { %9817 = shalt.err (!%p9814_p13)
}
  0xc1   : > { %s9818_s26 = scalar_lea.vmem %s10489_s13, 64  ;;  %s10141_s3 = smov [#allocation7]  }
  0xc2   : > { %p9819_p12 = scmp.ne.s32.totalorder %s10489_s13, %s9818_s26  ;;  %s9823_s28 = sshll.u32 %s10141_s3, 4  ;;  %s9824_s28 = int_to_ptr.vmem [resolvable:$false] %s9823_s28 }
  0xc3   : > { %s9825_s29 = scalar_lea.vmem %s9824_s28, 128  ;;  %p9826_p3 = scmp.lt.s32.totalorder %s10489_s13, %s9824_s28 }
  0xc4   : > { %p9821_p9 = pnand %p9819_p12, %p10309_p8  ;;  %p9827_p11 = scmp.lt.s32.totalorder %s9825_s29, %s9818_s26 }
  0xc6   : > { %p9822_p5 = pneg %p9821_p9  ;;  %p9828_p1 = por %p9827_p11, %p9826_p3 }
  0xc8   : > { %p9829_p2 = pnand %p9828_p1, %p9822_p5 }
  0xca   : > { %9832 = shalt.err (!%p9829_p2)
}
  0xcb   : > { %9374 = dma.hbm_to_vmem [thread:$0]  (!%p13020_p6), %s10483_s25, 64, %s10489_s13, %s482_s1  }
  0xcc   : > { %s8676_s16 = sshll.u32 %s10130_s17, 9  ;;  %s13026_s0 = sld [smem:[#allocation82_spill]] }
  0xcd   : > { %p13027_p10 = scmp.ne.s32.totalorder %s13025_s27, 0 }
  0xcf   : > { %p9835_p3 = pneg %p13027_p10 }
  0xd2   : > { %s9833_s2 = scalar_lea.hbm %s13026_s0, 16 }
  0xd3   : > { %p9834_p13 = scmp.ne.s32.totalorder %s13026_s0, %s9833_s2  ;;  %p9840_p0 = scmp.lt.u32.totalorder %s9833_s2, %s13026_s0 }
  0xd5   : > { %p9836_p5 = pnand %p9835_p3, %p9834_p13 }
  0xd7   : > { %p9837_p11 = pneg %p9836_p5 }
  0xd9   : > { %p9842_p4 = pnand %p9840_p0, %p9837_p11 }
  0xdb   : > { %9845 = shalt.err (!%p9842_p4)
}
  0xdc   : > { %s10142_s25 = smov [#allocation3]   ;;  %s13028_s4 = sld [smem:[#allocation86_spill]] }
  0xdd   : > { %9370 = dma.hbm_to_smem (!%p13027_p10), %s13026_s0, 16, %s10142_s25, [#allocation6]  }
  0xde   : > { %s13029_s15 = sshll.u32 %s10280_s22, 5 }
  0xdf   : > { %s520_s2 = scalar_lea.vmem [#allocation10], %s13029_s15 }
  0xe0   : > { %s527_s27 = sshll.u32 %s520_s2, 4  ;;  %s10546_s27 = int_to_ptr.vmem [resolvable:$true] %s527_s27 }
  0xe2   : > { %s10542_s5 = scalar_lea.hbm %s13028_s4, %s8676_s16  ;;  %s9851_s25 = scalar_lea.hbm %s13028_s4, 1536 }
  0xe3   : > { %s9846_s3 = scalar_lea.hbm %s10542_s5, 512  ;;  %p9852_p1 = scmp.lt.u32.totalorder %s10542_s5, %s13028_s4 }
  0xe4   : > { %p9847_p7 = scmp.ne.s32.totalorder %s10542_s5, %s9846_s3  ;;  %p9853_p2 = scmp.lt.u32.totalorder %s9851_s25, %s9846_s3 }
  0xe5   : > { %p9855_p10 = scmp.lt.u32.totalorder %s9846_s3, %s10542_s5 }
  0xe6   : > { %p9849_p12 = pnand %p9847_p7, %p10309_p8  ;;  %p9854_p13 = por %p9853_p2, %p9852_p1 }
  0xe8   : > { %p9850_p9 = pneg %p9849_p12  ;;  %p9856_p3 = por %p9855_p10, %p9854_p13 }
  0xea   : > { %p9857_p5 = pnand %p9856_p3, %p9850_p9 }
  0xec   : > { %9860 = shalt.err (!%p9857_p5)
}
  0xed   : > { %s9861_s7 = scalar_lea.vmem %s10546_s27, 512  ;;  %s10143_s29 = smov [#allocation10]  }
  0xee   : > { %p9862_p11 = scmp.ne.s32.totalorder %s10546_s27, %s9861_s7  ;;  %s9866_s15 = sshll.u32 %s10143_s29, 4  ;;  %s9867_s15 = int_to_ptr.vmem [resolvable:$false] %s9866_s15 }
  0xef   : > { %s9868_s2 = scalar_lea.vmem %s9867_s15, 1024  ;;  %p9869_p7 = scmp.lt.s32.totalorder %s10546_s27, %s9867_s15 }
  0xf0   : > { %p9864_p0 = pnand %p9862_p11, %p10309_p8  ;;  %p9870_p12 = scmp.lt.s32.totalorder %s9868_s2, %s9861_s7 }
  0xf2   : > { %p9865_p4 = pneg %p9864_p0  ;;  %p9871_p1 = por %p9870_p12, %p9869_p7 }
  0xf4   : > { %p9872_p2 = pnand %p9871_p1, %p9865_p4 }
  0xf6   : > { %9875 = shalt.err (!%p9872_p2)
}
  0xf7   : > { %s10144_s3 = smov 64   ;;  %s10145_s26 = smov 4  }
  0xf8   : > { %s13030_s28 = scalar_lea.sflag [#allocation9], %s10287_s24  ;;  %s10579_s1 = scalar_lea.hbm %s12894_s6, %s8676_s16 }
  0xf9   : > { %9380 = dma.hbm_to_vmem [thread:$0]  (!%p13020_p6), %s10542_s5, 512, %s10546_s27, %s13030_s28, %s10144_s3, %s10144_s3, %s10145_s26  }
  0xfa   : > { %s13031_s7 = sshll.u32 %s10280_s22, 5  ;;  %s8257_s2 = sshll.u32 %s10280_s22, 7 }
  0xfb   : > { %s558_s29 = scalar_lea.vmem [#allocation13], %s13031_s7  ;;  %s9876_s0 = scalar_lea.hbm %s10579_s1, 512 }
  0xfc   : > { %s565_s15 = sshll.u32 %s558_s29, 4  ;;  %p9877_p9 = scmp.ne.s32.totalorder %s10579_s1, %s9876_s0  ;;  %s10583_s15 = int_to_ptr.vmem [resolvable:$true] %s565_s15 }
  0xfd   : > { %s9881_s16 = scalar_lea.hbm %s12894_s6, 1536  ;;  %p9882_p3 = scmp.lt.u32.totalorder %s10579_s1, %s12894_s6 }
  0xfe   : > { %p9879_p13 = pnand %p9877_p9, %p10309_p8  ;;  %p9883_p5 = scmp.lt.u32.totalorder %s9881_s16, %s9876_s0 }
  0xff   : > { %p9885_p0 = scmp.lt.u32.totalorder %s9876_s0, %s10579_s1 }
 0x100   : > { %p9880_p10 = pneg %p9879_p13  ;;  %p9884_p11 = por %p9883_p5, %p9882_p3 }
 0x102   : > { %p9886_p4 = por %p9885_p0, %p9884_p11 }
 0x104   : > { %p9887_p7 = pnand %p9886_p4, %p9880_p10 }
 0x106   : > { %9890 = shalt.err (!%p9887_p7)
}
 0x107   : > { %s9891_s13 = scalar_lea.vmem %s10583_s15, 512  ;;  %s10146_s7 = smov [#allocation13]  }
 0x108   : > { %p9892_p12 = scmp.ne.s32.totalorder %s10583_s15, %s9891_s13  ;;  %s9896_s29 = sshll.u32 %s10146_s7, 4  ;;  %s9897_s29 = int_to_ptr.vmem [resolvable:$false] %s9896_s29 }
 0x109   : > { %s9898_s5 = scalar_lea.vmem %s9897_s29, 1024  ;;  %p9899_p9 = scmp.lt.s32.totalorder %s10583_s15, %s9897_s29 }
 0x10a   : > { %p9894_p1 = pnand %p9892_p12, %p10309_p8  ;;  %p9900_p13 = scmp.lt.s32.totalorder %s9898_s5, %s9891_s13 }
 0x10c   : > { %p9895_p2 = pneg %p9894_p1  ;;  %p9901_p3 = por %p9900_p13, %p9899_p9 }
 0x10e   : > { %p9902_p5 = pnand %p9901_p3, %p9895_p2 }
 0x110   : > { %9905 = shalt.err (!%p9902_p5)
}
 0x111   : > { %s13032_s0 = scalar_lea.sflag [#allocation12], %s10287_s24  ;;  %s8678_s27 = sshll.u32 %s10130_s17, 11 }
 0x112   : > { %9386 = dma.hbm_to_vmem [thread:$0]  (!%p13020_p6), %s10579_s1, 512, %s10583_s15, %s13032_s0, %s10144_s3, %s10144_s3, %s10145_s26  }
 0x113   : > { %s10616_s25 = scalar_lea.hbm %s12896_s8, %s8678_s27  ;;  %s596_s13 = scalar_lea.vmem [#allocation16], %s8257_s2 }
 0x114   : > { %s603_s7 = sshll.u32 %s596_s13, 4  ;;  %s8263_s29 = sshll.u32 %s10280_s22, 9  ;;  %s10620_s7 = int_to_ptr.vmem [resolvable:$true] %s603_s7 }
 0x115   : > { %s9906_s5 = scalar_lea.hbm %s10616_s25, 2048  ;;  %s9911_s1 = scalar_lea.hbm %s12896_s8, 6144 }
 0x116   : > { %p9907_p10 = scmp.ne.s32.totalorder %s10616_s25, %s9906_s5  ;;  %p9912_p4 = scmp.lt.u32.totalorder %s10616_s25, %s12896_s8 }
 0x117   : > { %p9913_p7 = scmp.lt.u32.totalorder %s9911_s1, %s9906_s5  ;;  %p9915_p1 = scmp.lt.u32.totalorder %s9906_s5, %s10616_s25 }
 0x118   : > { %p9909_p11 = pnand %p9907_p10, %p10309_p8 }
 0x119   : > { %p9914_p12 = por %p9913_p7, %p9912_p4 }
 0x11a   : > { %p9910_p0 = pneg %p9909_p11 }
 0x11b   : > { %p9916_p2 = por %p9915_p1, %p9914_p12 }
 0x11d   : > { %p9917_p9 = pnand %p9916_p2, %p9910_p0 }
 0x11f   : > { %9920 = shalt.err (!%p9917_p9)
}
 0x120   : > { %s9921_s2 = scalar_lea.vmem %s10620_s7, 2048  ;;  %s10147_s27 = smov [#allocation16]  }
 0x121   : > { %p9922_p13 = scmp.ne.s32.totalorder %s10620_s7, %s9921_s2  ;;  %s9926_s16 = sshll.u32 %s10147_s27, 4  ;;  %s9927_s16 = int_to_ptr.vmem [resolvable:$false] %s9926_s16 }
 0x122   : > { %s9928_s28 = scalar_lea.vmem %s9927_s16, 4096  ;;  %p9929_p10 = scmp.lt.s32.totalorder %s10620_s7, %s9927_s16 }
 0x123   : > { %p9924_p3 = pnand %p9922_p13, %p10309_p8  ;;  %p9930_p11 = scmp.lt.s32.totalorder %s9928_s28, %s9921_s2 }
 0x125   : > { %p9925_p5 = pneg %p9924_p3  ;;  %p9931_p4 = por %p9930_p11, %p9929_p10 }
 0x127   : > { %p9932_p7 = pnand %p9931_p4, %p9925_p5 }
 0x129   : > { %9935 = shalt.err (!%p9932_p7)
}
 0x12a   : > { %s10148_s13 = smov 128   ;;  %s10149_s5 = smov 8  }
 0x12b   : > { %s13033_s3 = scalar_lea.sflag [#allocation15], %s10287_s24  ;;  %s8680_s26 = sshll.u32 %s10130_s17, 13 }
 0x12c   : > { %9392 = dma.hbm_to_vmem [thread:$0]  (!%p13020_p6), %s10616_s25, 2048, %s10620_s7, %s13033_s3, %s10148_s13, %s10148_s13, %s10149_s5  }
 0x12d   : > { %s10650_s0 = scalar_lea.hbm %s12898_s10, %s8680_s26  ;;  %s636_s2 = scalar_lea.vmem [#allocation19], %s8263_s29 }
 0x12e   : > { %s643_s27 = sshll.u32 %s636_s2, 4  ;;  %s8269_s16 = sshll.u32 %s10280_s22, 11  ;;  %s10654_s27 = int_to_ptr.vmem [resolvable:$true] %s643_s27 }
 0x12f   : > { %s9936_s28 = scalar_lea.hbm %s10650_s0, 8192  ;;  %s9941_s13 = scalar_lea.hbm %s12898_s10, 24576 }
 0x130   : > { %p9937_p0 = scmp.ne.s32.totalorder %s10650_s0, %s9936_s28  ;;  %p9942_p2 = scmp.lt.u32.totalorder %s10650_s0, %s12898_s10 }
 0x131   : > { %p9943_p9 = scmp.lt.u32.totalorder %s9941_s13, %s9936_s28  ;;  %p9945_p3 = scmp.lt.u32.totalorder %s9936_s28, %s10650_s0 }
 0x132   : > { %p9939_p12 = pnand %p9937_p0, %p10309_p8 }
 0x133   : > { %p9944_p13 = por %p9943_p9, %p9942_p2 }
 0x134   : > { %p9940_p1 = pneg %p9939_p12 }
 0x135   : > { %p9946_p5 = por %p9945_p3, %p9944_p13 }
 0x137   : > { %p9947_p10 = pnand %p9946_p5, %p9940_p1 }
 0x139   : > { %9950 = shalt.err (!%p9947_p10)
}
 0x13a   : > { %s9951_s29 = scalar_lea.vmem %s10654_s27, 8192  ;;  %s10150_s26 = smov [#allocation19]  }
 0x13b   : > { %p9952_p11 = scmp.ne.s32.totalorder %s10654_s27, %s9951_s29  ;;  %s9956_s1 = sshll.u32 %s10150_s26, 4  ;;  %s9957_s1 = int_to_ptr.vmem [resolvable:$false] %s9956_s1 }
 0x13c   : > { %s9958_s15 = scalar_lea.vmem %s9957_s1, 16384  ;;  %p9959_p0 = scmp.lt.s32.totalorder %s10654_s27, %s9957_s1 }
 0x13d   : > { %p9954_p4 = pnand %p9952_p11, %p10309_p8  ;;  %p9960_p12 = scmp.lt.s32.totalorder %s9958_s15, %s9951_s29 }
 0x13f   : > { %p9955_p7 = pneg %p9954_p4  ;;  %p9961_p2 = por %p9960_p12, %p9959_p0 }
 0x141   : > { %p9962_p9 = pnand %p9961_p2, %p9955_p7 }
 0x143   : > { %9965 = shalt.err (!%p9962_p9)
}
 0x144   : > { %s10151_s2 = smov 256   ;;  %s10152_s28 = smov 16  }
 0x145   : > { %s13034_s25 = scalar_lea.sflag [#allocation18], %s10287_s24  ;;  %s8682_s7 = sshll.u32 %s10130_s17, 15 }
 0x146   : > { %9398 = dma.hbm_to_vmem [thread:$0]  (!%p13020_p6), %s10650_s0, 8192, %s10654_s27, %s13034_s25, %s10151_s2, %s10151_s2, %s10152_s28  }
 0x147   : > { %s10684_s3 = scalar_lea.hbm %s12900_s12, %s8682_s7  ;;  %s676_s29 = scalar_lea.vmem [#allocation22], %s8269_s16 }
 0x148   : > { %s683_s26 = sshll.u32 %s676_s29, 4  ;;  %s9966_s1 = scalar_lea.hbm %s10684_s3, 32768  ;;  %s10688_s26 = int_to_ptr.vmem [resolvable:$true] %s683_s26 }
 0x149   : > { %p9967_p1 = scmp.ne.s32.totalorder %s10684_s3, %s9966_s1  ;;  %s9971_s15 = scalar_lea.hbm %s12900_s12, 98304 }
 0x14a   : > { %p9972_p5 = scmp.lt.u32.totalorder %s10684_s3, %s12900_s12  ;;  %p9973_p10 = scmp.lt.u32.totalorder %s9971_s15, %s9966_s1 }
 0x14b   : > { %p9969_p13 = pnand %p9967_p1, %p10309_p8  ;;  %p9975_p4 = scmp.lt.u32.totalorder %s9966_s1, %s10684_s3 }
 0x14c   : > { %p9974_p11 = por %p9973_p10, %p9972_p5 }
 0x14d   : > { %p9970_p3 = pneg %p9969_p13 }
 0x14e   : > { %p9976_p7 = por %p9975_p4, %p9974_p11 }
 0x150   : > { %p9977_p0 = pnand %p9976_p7, %p9970_p3 }
 0x152   : > { %9980 = shalt.err (!%p9977_p0)
}
 0x153   : > { %s9981_s16 = scalar_lea.vmem %s10688_s26, 32768  ;;  %s10153_s25 = smov [#allocation22]  }
 0x154   : > { %p9982_p12 = scmp.ne.s32.totalorder %s10688_s26, %s9981_s16  ;;  %s9986_s7 = sshll.u32 %s10153_s25, 4  ;;  %s9987_s7 = int_to_ptr.vmem [resolvable:$false] %s9986_s7 }
 0x155   : > { %s9988_s13 = scalar_lea.vmem %s9987_s7, 65536  ;;  %p9989_p1 = scmp.lt.s32.totalorder %s10688_s26, %s9987_s7 }
 0x156   : > { %p9984_p2 = pnand %p9982_p12, %p10309_p8  ;;  %p9990_p13 = scmp.lt.s32.totalorder %s9988_s13, %s9981_s16 }
 0x158   : > { %p9985_p9 = pneg %p9984_p2  ;;  %p9991_p5 = por %p9990_p13, %p9989_p1 }
 0x15a   : > { %p9992_p10 = pnand %p9991_p5, %p9985_p9 }
 0x15c   : > { %9995 = shalt.err (!%p9992_p10)
}
 0x15d   : > { %s10154_s5 = smov 512   ;;  %s10155_s29 = smov 32  }
 0x15e   : > { %s13035_s1 = scalar_lea.sflag [#allocation21], %s10287_s24  ;;  %s8272_s0 = sshll.u32 %s10280_s22, 3 }
 0x15f   : > { %9404 = dma.hbm_to_vmem [thread:$0]  (!%p13020_p6), %s10684_s3, 32768, %s10688_s26, %s13035_s1, %s10154_s5, %s10154_s5, %s10155_s29  }
 0x160   : > { %s8683_s27 = sshll.u32 %s10130_s17, 7  ;;  %s13036_s28 = sld [smem:[#allocation89_spill]] }
 0x161   : > { %s697_s25 = scalar_lea.vmem [#allocation23], %s8272_s0  ;;  %s694_s13 = scalar_lea.sflag [#allocation24], %s10280_s22 }
 0x162   : > { %s705_s7 = sshll.u32 %s697_s25, 4  ;;  %s706_s7 = int_to_ptr.vmem [resolvable:$true] %s705_s7 }
 0x166   : > { %s10718_s16 = scalar_lea.hbm %s13036_s28, %s8683_s27  ;;  %s10001_s26 = scalar_lea.hbm %s13036_s28, 384 }
 0x167   : > { %s9996_s4 = scalar_lea.hbm %s10718_s16, 128  ;;  %p10002_p7 = scmp.lt.u32.totalorder %s10718_s16, %s13036_s28 }
 0x168   : > { %p9997_p3 = scmp.ne.s32.totalorder %s10718_s16, %s9996_s4  ;;  %p10003_p0 = scmp.lt.u32.totalorder %s10001_s26, %s9996_s4 }
 0x169   : > { %p10005_p2 = scmp.lt.u32.totalorder %s9996_s4, %s10718_s16 }
 0x16a   : > { %p9999_p11 = pnand %p9997_p3, %p10309_p8  ;;  %p10004_p12 = por %p10003_p0, %p10002_p7 }
 0x16c   : > { %p10000_p4 = pneg %p9999_p11  ;;  %p10006_p9 = por %p10005_p2, %p10004_p12 }
 0x16e   : > { %p10007_p1 = pnand %p10006_p9, %p10000_p4 }
 0x170   : > { %10010 = shalt.err (!%p10007_p1)
}
 0x171   : > { %s10011_s22 = scalar_lea.vmem %s706_s7, 128  ;;  %s10156_s1 = smov [#allocation23]  }
 0x172   : > { %p10012_p13 = scmp.ne.s32.totalorder %s706_s7, %s10011_s22  ;;  %s10016_s0 = sshll.u32 %s10156_s1, 4  ;;  %s10017_s0 = int_to_ptr.vmem [resolvable:$false] %s10016_s0 }
 0x173   : > { %s10018_s27 = scalar_lea.vmem %s10017_s0, 256  ;;  %p10019_p3 = scmp.lt.s32.totalorder %s706_s7, %s10017_s0 }
 0x174   : > { %p10014_p5 = pnand %p10012_p13, %p10309_p8  ;;  %p10020_p11 = scmp.lt.s32.totalorder %s10018_s27, %s10011_s22 }
 0x176   : > { %p10015_p10 = pneg %p10014_p5  ;;  %p10021_p6 = por %p10020_p11, %p10019_p3 }
 0x178   : > { %p10022_p0 = pnand %p10021_p6, %p10015_p10 }
 0x17a   : > { %10025 = shalt.err (!%p10022_p0)
}
 0x17b   : > { %p13037_p7 = scmp.ne.s32.totalorder %s13011_s23, 0  ;;  %p13038_p4 = scmp.ne.s32.totalorder %s13022_s19, 0 }
 0x17d   : > { %9407 = dma.hbm_to_vmem [thread:$0]  (!%p13037_p7), %s10718_s16, 128, %s706_s7, %s694_s13  }
 0x17e   : > { %714 = sbr.rel (%p13038_p4) target bundleno = 2425 (0x979), region = 76 }
 0x185   : > { %p13039_p12 = scmp.eq.s32.totalorder %s10461_s21, 0 }
 0x187   : > { %10077 = dma.done.wait (%p13039_p12), [#allocation6], 16   ;;  %p13040_p8 = pmov %p13039_p12 }
 0x188   : > { %s10745_s4 = sand.u32 1, %s10118_s30   ;;  %p13041_p6 = scmp.ne.s32.totalorder %s13021_s14, 0 }
 0x189   : > { %10079 = vsyncadd (%p13040_p8), [#allocation6], 4294967280  ;;  %s8277_s20 = sshll.u32 %s10745_s4, 2  ;;  %s721_s23 = scalar_lea.sflag [#allocation4], %s10745_s4 }
 0x18a   : > { %s10751_s15 = scalar_lea.vmem [#allocation7], %s8277_s20 }
 0x18b   : > { %10081 = dma.done.wait (%p13041_p6), %s721_s23, 64  }
 0x18c   : > { %10083 = vsyncadd (%p13041_p6), %s721_s23, 4294967232  ;;  %s729_s19 = sand.u32 1, %s10461_s21   ;;  %s732_s16 = scalar_lea.vmem [#allocation8], %s10745_s4 }
 0x18d   : > { %s730_s2 = scalar_lea.sflag [#allocation9], %s729_s19 }
 0x18e   : > { %10085 = dma.done.wait (%p13041_p6), %s730_s2, 528  }
 0x18f   : > { %10087 = vsyncadd (%p13041_p6), %s730_s2, 4294966768  ;;  %s8278_s25 = sshll.u32 %s10745_s4, 5  ;;  %s747_s13 = scalar_lea.sflag [#allocation12], %s729_s19 }
 0x190   : > { %s10764_s7 = scalar_lea.vmem [#allocation10], %s8278_s25 }
 0x191   : > { %10089 = dma.done.wait (%p13041_p6), %s747_s13, 528  }
 0x192   : > { %10091 = vsyncadd (%p13041_p6), %s747_s13, 4294966768  ;;  %s10771_s3 = scalar_lea.vmem [#allocation13], %s8278_s25  ;;  %s764_s26 = scalar_lea.sflag [#allocation15], %s729_s19 }
 0x193   : > { %10093 = dma.done.wait (%p13041_p6), %s764_s26, 2064  }
 0x194   : > { %10095 = vsyncadd (%p13041_p6), %s764_s26, 4294965232  ;;  %s8280_s29 = sshll.u32 %s10745_s4, 7  ;;  %s8281_s22 = sshll.u32 %s10745_s4, 1 }
 0x195   : > { %s10780_s1 = scalar_lea.vmem [#allocation16], %s8280_s29  ;;  %s781_s0 = scalar_lea.sflag [#allocation18], %s729_s19 }
 0x196   : > { %s10782_s27 = scalar_lea.vmem [#allocation17], %s8281_s22 }
 0x197   : > { %10097 = dma.done.wait (%p13041_p6), %s781_s0, 8224  }
 0x198   : > { %10099 = vsyncadd (%p13041_p6), %s781_s0, 4294959072  ;;  %s8282_s23 = sshll.u32 %s10745_s4, 9  ;;  %s799_s25 = scalar_lea.sflag [#allocation21], %s729_s19 }
 0x199   : > { %s10789_s2 = scalar_lea.vmem [#allocation19], %s8282_s23  ;;  %s10793_s13 = scalar_lea.vmem [#allocation20], %s8277_s20 }
 0x19a   : > { %10101 = dma.done.wait (%p13041_p6), %s799_s25, 32832  }
 0x19b   : > { %10103 = vsyncadd (%p13041_p6), %s799_s25, 4294934464  ;;  %s8284_s26 = sshll.u32 %s10745_s4, 11  ;;  %s8285_s29 = sshll.u32 %s10745_s4, 3 }
 0x19c   : > { %s10801_s22 = scalar_lea.vmem [#allocation22], %s8284_s26  ;;  %s817_s0 = scalar_lea.sflag [#allocation24], %s10745_s4 }
 0x19d   : > { %s10804_s23 = scalar_lea.vmem [#allocation23], %s8285_s29 }
 0x19e   : > { %10105 = dma.done.wait (%p13041_p6), %s817_s0, 128  }
 0x19f   : > { %10107 = vsyncadd (%p13041_p6), %s817_s0, 4294967168 }
 0x1a0   : > { %825 = sfence }
 0x1a1   : > { %s13042_s20 = sld [smem:[#allocation36_spill]]  ;;  %v10157_v0 = vmov 1   ;;  %s13043_s29 = sld [smem:[#allocation83_spill]]  ;;  %v10158_v4 = vmov 2   ;;  %v10159_v7 = vmov 0   ;;  %v9524_v10 = vld [vmem:[%s10764_s7] sm:$0xff]   ;;  %v1134_v37 = vlaneseq }
 0x1a2   : > { %9479 = vset.pattern.permute.xlu0 %v10157_v0  ;;  %9477 = vset.pattern.permute.xlu1 %v10157_v0  ;;  %v9525_v12 = vld [vmem:[%s10764_s7 + $0x8] sm:$0xff]   ;;  %v9526_v13 = vld [vmem:[%s10764_s7 + $0x10] sm:$0xff]   ;;  %v9527_v14 = vld [vmem:[%s10764_s7 + $0x18] sm:$0xff]   ;;  %vm1688_vm0 = vcmask 523264   ;;  %s13048_s14 = scalar_lea.vmem [#allocation11], %s10745_s4  ;;  %vm2290_vm1 = vcmask 1041409  }
 0x1a3   : > { %8727 = vmatprep.subr.bf16.mxu0 %v9524_v10  ;;  %v10911_v41 = vshrl.u32 %v1134_v37, 7  ;;  %v973_v46 = vld [vmem:[%s10751_s15] sm:$0x7]  ;;  %s13049_s15 = scalar_lea.vmem [#allocation14], %s10745_s4  ;;  %vm2292_vm2 = vcmask 1043459   ;;  %vm2294_vm3 = vcmask 1045509  }
 0x1a4   : > { %8728 = vmatpush3.bf16.msra.mxu0 %v9524_v10  ;;  %vm2296_vm4 = vcmask 1047559  }
 0x1a5   : > { %8729 = vmatprep.subr.bf16.mxu0 %v9525_v12  ;;  %13044 = vst [vmem:[#allocation39_spill] sm:$0xff] %v10911_v41  ;;  %v10921_v45 = vsub.s32 1, %v10911_v41  ;;  %v10926_v47 = vsub.s32 2, %v10911_v41  ;;  %v10929_v48 = vsub.s32 0, %v10911_v41 }
 0x1a7   : > { %p923_p2 = scmp.lt.s32.totalorder %s13042_s20, 2  ;;  %13045 = vst [vmem:[#allocation40_spill] sm:$0xff] %v10921_v45  ;;  %13046 = vst [vmem:[#allocation41_spill] sm:$0xff] %v10926_v47  ;;  %v10935_v50 = vrot.slane %v973_v46, %v10921_v45  ;;  %v10941_v53 = vrot.slane %v973_v46, %v10926_v47  ;;  %v10944_v54 = vrot.slane %v973_v46, %v10929_v48  ;;  %p7854_p9 = scmp.eq.s32.totalorder %s13042_s20, 0 }
 0x1a8   : > { %8730 = vmatpush3.bf16.msra.mxu0 %v9525_v12  ;;  %13047 = vst [vmem:[#allocation42_spill] sm:$0xff] %v10929_v48 }
 0x1a9   : > { %s924_s19 = scalar_select %p923_p2, %s13042_s20, 2  ;;  %8731 = vmatprep.subr.bf16.mxu0 %v9526_v13 }
 0x1ab   : > { %s8684_s25 = sshll.u32 %s924_s19, 8 }
 0x1ac   : > { %s10817_s24 = scalar_lea.vmem %s13043_s29, %s8684_s25  ;;  %8732 = vmatpush3.bf16.msra.mxu0 %v9526_v13 }
 0x1ad   : > { %v943_v1 = vld [vmem:[%s10817_s24 + $0x10] sm:$0xff]  ;;  %v941_v2 = vld [vmem:[%s10817_s24] sm:$0xff]  ;;  %v942_v3 = vld [vmem:[%s10817_s24 + $0x8] sm:$0xff]  ;;  %8733 = vmatprep.subr.bf16.mxu0 %v9527_v14 }
 0x1ae   : > { %1179 = vperm.xlu0 %9479, %v943_v1   ;;  %1171 = vperm.xlu1 %9477, %v941_v2   ;;  %v945_v5 = vld [vmem:[%s10817_s24 + $0x20] sm:$0xff]  ;;  %v944_v6 = vld [vmem:[%s10817_s24 + $0x18] sm:$0xff]  ;;  %v950_v9 = vld [vmem:[%s10817_s24 + $0x48] sm:$0xff] }
 0x1af   : > { %v948_v8 = vld [vmem:[%s10817_s24 + $0x38] sm:$0xff]  ;;  %v946_v11 = vld [vmem:[%s10817_s24 + $0x28] sm:$0xff]  ;;  %v951_v15 = vld [vmem:[%s10817_s24 + $0x50] sm:$0xff] }
 0x1b0   : > { %v947_v16 = vld [vmem:[%s10817_s24 + $0x30] sm:$0xff]  ;;  %8734 = vmatpush3.bf16.msra.mxu0 %v9527_v14  ;;  %v953_v17 = vld [vmem:[%s10817_s24 + $0x60] sm:$0xff]  ;;  %v10843_v18 = vld [vmem:[%s10817_s24 + $0x88] sm:$0xff] }
 0x1b1   : > { %v10848_v19 = vld [vmem:[%s10817_s24 + $0x90] sm:$0xff]  ;;  %v949_v20 = vld [vmem:[%s10817_s24 + $0x40] sm:$0xff]  ;;  %v954_v21 = vld [vmem:[%s10817_s24 + $0x68] sm:$0xff] }
 0x1b2   : > { %9482 = vset.pattern.permute.xlu0 %v10158_v4  ;;  %1175 = vperm.xlu1 %9477, %v942_v3   ;;  %v955_v22 = vld [vmem:[%s10817_s24 + $0x70] sm:$0xff]  ;;  %v952_v23 = vld [vmem:[%s10817_s24 + $0x58] sm:$0xff]  ;;  %v10862_v24 = vld [vmem:[%s10817_s24 + $0xa8] sm:$0xff] }
 0x1b3   : > { %1371 = vperm.xlu0 %9482, %v942_v3   ;;  %v10867_v25 = vld [vmem:[%s10817_s24 + $0xb0] sm:$0xff]  ;;  %v956_v26 = vld [vmem:[%s10817_s24 + $0x78] sm:$0xff]  ;;  %v10876_v27 = vld [vmem:[%s10817_s24 + $0xa0] sm:$0xff] }
 0x1b4   : > { %v10880_v28 = vld [vmem:[%s10817_s24 + $0xb8] sm:$0xff]  ;;  %v10885_v29 = vld [vmem:[%s10817_s24 + $0xc8] sm:$0xff]  ;;  %v10894_v30 = vld [vmem:[%s10817_s24 + $0xd0] sm:$0xff] }
 0x1b5   : > { %v10899_v31 = vld [vmem:[%s10817_s24 + $0xe0] sm:$0xff]  ;;  %v10907_v38 = vld [vmem:[%s10817_s24 + $0xe8] sm:$0xff]  ;;  %v10916_v42 = vld [vmem:[%s10817_s24 + $0xf0] sm:$0xff] }
 0x1b6   : > { %9478 = vset.pattern.permute.xlu1 %v10159_v7  ;;  %v957_v36 = vld [vmem:[%s10817_s24 + $0x80] sm:$0xff]  ;;  %v960_v52 = vld [vmem:[%s10817_s24 + $0x98] sm:$0xff] }
 0x1b7   : > { %1383 = vperm.xlu0 %9482, %v945_v5   ;;  %991 = vperm.xlu1 %9478, %v944_v6   ;;  %v10950_v59 = vld [vmem:[%s10817_s24 + $0xf8] sm:$0xff] }
 0x1bb   : > { %1395 = vperm.xlu0 %9482, %v948_v8   ;;  %9480 = vset.pattern.permute.xlu1 %v10157_v0 }
 0x1bc   : > { %1183 = vperm.xlu1 %9480, %v944_v6  }
 0x1bf   : > { %1403 = vperm.xlu0 %9482, %v950_v9  }
 0x1c0   : > { %9481 = vset.pattern.permute.xlu1 %v10158_v4 }
 0x1c1   : > { %1367 = vperm.xlu1 %9481, %v941_v2  }
 0x1c3   : > { %9493 = vset.pattern.permute.xlu0 %v10159_v7 }
 0x1c4   : > { %976 = vperm.xlu0 %9493, %v941_v2  }
 0x1c5   : > { %1375 = vperm.xlu1 %9481, %v943_v1  }
 0x1c8   : > { %981 = vperm.xlu0 %9493, %v942_v3  }
 0x1c9   : > { %1379 = vperm.xlu1 %9481, %v944_v6  }
 0x1cc   : > { %986 = vperm.xlu0 %9493, %v943_v1  }
 0x1cd   : > { %9483 = vset.pattern.permute.xlu1 %v10159_v7 }
 0x1ce   : > { %1001 = vperm.xlu1 %9483, %v946_v11  }
 0x1d0   : > { %996 = vperm.xlu0 %9493, %v945_v5  }
 0x1d2   : > { %9484 = vset.pattern.permute.xlu1 %v10157_v0 }
 0x1d3   : > { %1187 = vperm.xlu1 %9484, %v945_v5  }
 0x1d4   : > { %1021 = vperm.xlu0 %9493, %v950_v9  }
 0x1d7   : > { %9485 = vset.pattern.permute.xlu1 %v10159_v7 }
 0x1d8   : > { %1026 = vperm.xlu0 %9493, %v951_v15   ;;  %1006 = vperm.xlu1 %9485, %v947_v16  }
 0x1dc   : > { %1036 = vperm.xlu0 %9493, %v953_v17   ;;  %1011 = vperm.xlu1 %9485, %v948_v8  }
 0x1e0   : > { %1061 = vperm.xlu0 %9493, %v10843_v18   ;;  %9486 = vset.pattern.permute.xlu1 %v10157_v0 }
 0x1e1   : > { %1199 = vperm.xlu1 %9486, %v948_v8  }
 0x1e4   : > { %1066 = vperm.xlu0 %9493, %v10848_v19  }
 0x1e5   : > { %9487 = vset.pattern.permute.xlu1 %v10158_v4 }
 0x1e6   : > { %1387 = vperm.xlu1 %9487, %v946_v11  }
 0x1e8   : > { %9501 = vset.pattern.permute.xlu0 %v10157_v0 }
 0x1e9   : > { %1191 = vperm.xlu0 %9501, %v946_v11  }
 0x1ea   : > { %1391 = vperm.xlu1 %9487, %v947_v16  }
 0x1ed   : > { %1195 = vperm.xlu0 %9501, %v947_v16  }
 0x1ee   : > { %9488 = vset.pattern.permute.xlu1 %v10159_v7 }
 0x1ef   : > { %1016 = vperm.xlu1 %9488, %v949_v20  }
 0x1f1   : > { %1211 = vperm.xlu0 %9501, %v951_v15  }
 0x1f3   : > { %9489 = vset.pattern.permute.xlu1 %v10157_v0 }
 0x1f4   : > { %1203 = vperm.xlu1 %9489, %v949_v20  }
 0x1f5   : > { %1223 = vperm.xlu0 %9501, %v954_v21  }
 0x1f8   : > { %1207 = vperm.xlu1 %9489, %v950_v9   ;;  %v10962_v9 = vld [vmem:[%s732_s16] ss:$0 sm:$0xff] }
 0x1f9   : > { %1227 = vperm.xlu0 %9501, %v955_v22  }
 0x1fc   : > { %9490 = vset.pattern.permute.xlu1 %v10159_v7 }
 0x1fd   : > { %1031 = vperm.xlu1 %9490, %v952_v23   ;;  %1243 = vperm.xlu0 %9501, %v10848_v19  }
 0x201   : > { %9491 = vset.pattern.permute.xlu1 %v10157_v0  ;;  %1255 = vperm.xlu0 %9501, %v10862_v24  }
 0x202   : > { %1215 = vperm.xlu1 %9491, %v952_v23  }
 0x205   : > { %1259 = vperm.xlu0 %9501, %v10867_v25  }
 0x206   : > { %9492 = vset.pattern.permute.xlu1 %v10158_v4 }
 0x207   : > { %1399 = vperm.xlu1 %9492, %v949_v20  }
 0x209   : > { %9508 = vset.pattern.permute.xlu0 %v10158_v4 }
 0x20a   : > { %1415 = vperm.xlu0 %9508, %v953_v17  }
 0x20b   : > { %1407 = vperm.xlu1 %9492, %v951_v15  }
 0x20e   : > { %1427 = vperm.xlu0 %9508, %v956_v26  }
 0x20f   : > { %1411 = vperm.xlu1 %9492, %v952_v23  }
 0x212   : > { %1435 = vperm.xlu0 %9508, %v10843_v18  }
 0x213   : > { %9494 = vset.pattern.permute.xlu1 %v10159_v7 }
 0x214   : > { %1041 = vperm.xlu1 %9494, %v954_v21  }
 0x216   : > { %1447 = vperm.xlu0 %9508, %v10876_v27  }
 0x218   : > { %9495 = vset.pattern.permute.xlu1 %v10157_v0 }
 0x219   : > { %1219 = vperm.xlu1 %9495, %v953_v17  }
 0x21a   : > { %1459 = vperm.xlu0 %9508, %v10880_v28  }
 0x21d   : > { %9496 = vset.pattern.permute.xlu1 %v10159_v7 }
 0x21e   : > { %1046 = vperm.xlu1 %9496, %v955_v22   ;;  %1467 = vperm.xlu0 %9508, %v10885_v29  }
 0x222   : > { %1051 = vperm.xlu1 %9496, %v956_v26   ;;  %9516 = vset.pattern.permute.xlu0 %v10159_v7 }
 0x223   : > { %1076 = vperm.xlu0 %9516, %v10876_v27  }
 0x226   : > { %9497 = vset.pattern.permute.xlu1 %v10157_v0 }
 0x227   : > { %1231 = vperm.xlu1 %9497, %v956_v26   ;;  %1101 = vperm.xlu0 %9516, %v10885_v29  }
 0x22b   : > { %9498 = vset.pattern.permute.xlu1 %v10158_v4  ;;  %1106 = vperm.xlu0 %9516, %v10894_v30  }
 0x22c   : > { %1419 = vperm.xlu1 %9498, %v954_v21  }
 0x22d   : > { %v1172_v32 = vpop.permute.xlu1 %1171  ;;  %v1180_v33 = vpop.permute.xlu0 %1179 }
 0x22e   : > { %v1302_v56 = vmul.f32 %v10935_v50, %v1172_v32  ;;  %v1304_v11 = vmul.f32 %v10935_v50, %v1180_v33 }
 0x22f   : > { %1116 = vperm.xlu0 %9516, %v10899_v31  }
 0x230   : > { %1423 = vperm.xlu1 %9498, %v955_v22  }
 0x231   : > { %v1176_v34 = vpop.permute.xlu1 %1175 }
 0x232   : > { %v1372_v35 = vpop.permute.xlu0 %1371  ;;  %v1303_v63 = vmul.f32 %v10935_v50, %v1176_v34 }
 0x233   : > { %9517 = vset.pattern.permute.xlu0 %v10157_v0  ;;  %v1499_v2 = vmul.f32 %v10941_v53, %v1372_v35 }
 0x234   : > { %9499 = vset.pattern.permute.xlu1 %v10159_v7  ;;  %1275 = vperm.xlu0 %9517, %v10894_v30  }
 0x235   : > { %1056 = vperm.xlu1 %9499, %v957_v36  }
 0x236   : > { %v992_v39 = vpop.permute.xlu1 %991  ;;  %v10909_v40 = vpop.permute.xlu0 %1383 }
 0x237   : > { %v1141_v3 = vmul.f32 %v10944_v54, %v992_v39 }
 0x238   : > { %1287 = vperm.xlu0 %9517, %v10907_v38  }
 0x239   : > { %9500 = vset.pattern.permute.xlu1 %v10157_v0 }
 0x23a   : > { %1235 = vperm.xlu1 %9500, %v957_v36   ;;  %v10918_v43 = vpop.permute.xlu0 %1395 }
 0x23b   : > { %v1184_v44 = vpop.permute.xlu1 %1183 }
 0x23c   : > { %1291 = vperm.xlu0 %9517, %v10916_v42   ;;  %v1305_v60 = vmul.f32 %v10935_v50, %v1184_v44 }
 0x23e   : > { %1239 = vperm.xlu1 %9500, %v10843_v18   ;;  %v10932_v49 = vpop.permute.xlu0 %1403  ;;  %v1337_v12 = vadd.f32 %v1305_v60, %v1141_v3 }
 0x240   : > { %v1368_v51 = vpop.permute.xlu1 %1367  ;;  %9522 = vset.pattern.permute.xlu0 %v10158_v4 }
 0x241   : > { %1479 = vperm.xlu0 %9522, %v10899_v31   ;;  %v1498_v61 = vmul.f32 %v10941_v53, %v1368_v51 }
 0x242   : > { %9502 = vset.pattern.permute.xlu1 %v10159_v7 }
 0x243   : > { %v977_v55 = vpop.permute.xlu0 %976  ;;  %1071 = vperm.xlu1 %9502, %v960_v52  }
 0x244   : > { %v1138_v57 = vmul.f32 %v10944_v54, %v977_v55  ;;  %v1376_v58 = vpop.permute.xlu1 %1375 }
 0x245   : > { %1491 = vperm.xlu0 %9522, %v10950_v59   ;;  %v1500_v21 = vmul.f32 %v10941_v53, %v1376_v58 }
 0x246   : > { %v1334_v62 = vadd.f32 %v1302_v56, %v1138_v57 }
 0x247   : > { %v982_v1 = vpop.permute.xlu0 %981  ;;  %9503 = vset.pattern.permute.xlu1 %v10157_v0 }
 0x248   : > { %v1530_v5 = vadd.f32 %v1498_v61, %v1334_v62  ;;  %v1139_v6 = vmul.f32 %v10944_v54, %v982_v1  ;;  %1247 = vperm.xlu1 %9503, %v960_v52   ;;  %v1380_v8 = vpop.permute.xlu1 %1379  ;;  %v1502_v1 = vmul.f32 %v10941_v53, %v10909_v40 }
 0x249   : > { %v1501_v10 = vmul.f32 %v10941_v53, %v1380_v8 }
 0x24a   : > { %v1335_v13 = vadd.f32 %v1303_v63, %v1139_v6  ;;  %v1569_v18 = vadd.f32 %v10962_v9, %v1530_v5  ;;  %v1505_v6 = vmul.f32 %v10941_v53, %v10918_v43 }
 0x24b   : > { %v987_v14 = vpop.permute.xlu0 %986  ;;  %v1533_v16 = vadd.f32 %v1501_v10, %v1337_v12 }
 0x24c   : > { %v1531_v15 = vadd.f32 %v1499_v2, %v1335_v13  ;;  %v1140_v17 = vmul.f32 %v10944_v54, %v987_v14  ;;  %9504 = vset.pattern.permute.xlu1 %v10158_v4  ;;  %v1601_v34 = vmax.f32 %v1569_v18, 0.0 }
 0x24d   : > { %1431 = vperm.xlu1 %9504, %v957_v36   ;;  %v1002_v20 = vpop.permute.xlu1 %1001  ;;  %v1572_v32 = vadd.f32 %v10962_v9, %v1533_v16 }
 0x24e   : > { %v1336_v22 = vadd.f32 %v1304_v11, %v1140_v17  ;;  %v1570_v23 = vadd.f32 %v10962_v9, %v1531_v15  ;;  %v1143_v10 = vmul.f32 %v10944_v54, %v1002_v20 }
 0x24f   : > { %v997_v26 = vpop.permute.xlu0 %996  ;;  %v1604_v46 = vmax.f32 %v1572_v32, 0.0 }
 0x250   : > { %v1532_v33 = vadd.f32 %v1500_v21, %v1336_v22  ;;  %v1602_v35 = vmax.f32 %v1570_v23, 0.0  ;;  %v1142_v61 = vmul.f32 %v10944_v54, %v997_v26 }
 0x251   : > { %1439 = vperm.xlu1 %9504, %v10848_v19  }
 0x252   : > { %v1571_v37 = vadd.f32 %v10962_v9, %v1532_v33  ;;  %v1188_v39 = vpop.permute.xlu1 %1187  ;;  %v1633_v44 = vpack.c.bf16 %v1602_v35, %v1601_v34 }
 0x253   : > { %v10974_v36 = vpop.permute.xlu0 %1021  ;;  %v1306_v62 = vmul.f32 %v10935_v50, %v1188_v39 }
 0x254   : > { %v1603_v51 = vmax.f32 %v1571_v37, 0.0  ;;  %8735 = vmatprep.mubr.msk.bf16.mxu0 %vm1688_vm0, %v1633_v44 }
 0x255   : > { %1443 = vperm.xlu1 %9504, %v960_v52   ;;  %v1338_v2 = vadd.f32 %v1306_v62, %v1142_v61 }
 0x256   : > { %v1634_v55 = vpack.c.bf16 %v1604_v46, %v1603_v51 }
 0x257   : > { %v1007_v56 = vpop.permute.xlu1 %1006  ;;  %v10977_v57 = vpop.permute.xlu0 %1026  ;;  %v1534_v11 = vadd.f32 %v1502_v1, %v1338_v2 }
 0x258   : > { %8736 = vmatmul.mubr.msk.bf16.vlgmr.msra.gmra.mrb[0].mxu0 %vm1688_vm0, %v1634_v55  ;;  %v1144_v16 = vmul.f32 %v10944_v54, %v1007_v56 }
 0x259   : > { %9505 = vset.pattern.permute.xlu1 %v10159_v7  ;;  %v1573_v43 = vadd.f32 %v10962_v9, %v1534_v11  ;;  %v968_v11 = vld [vmem:[%s10817_s24 + $0xd8] sm:$0xff] }
 0x25a   : > { %1081 = vperm.xlu1 %9505, %v10862_v24  }
 0x25b   : > { %v1012_v19 = vpop.permute.xlu1 %1011  ;;  %v10982_v58 = vpop.permute.xlu0 %1036  ;;  %v1605_v33 = vmax.f32 %v1573_v43, 0.0 }
 0x25c   : > { %v1145_v5 = vmul.f32 %v10944_v54, %v1012_v19  ;;  %v965_v19 = vld [vmem:[%s10817_s24 + $0xc0] sm:$0xff] }
 0x25e   : > { %9506 = vset.pattern.permute.xlu1 %v10157_v0 }
 0x25f   : > { %1251 = vperm.xlu1 %9506, %v10876_v27   ;;  %v10986_v60 = vpop.permute.xlu0 %1061 }
 0x260   : > { %v1200_v52 = vpop.permute.xlu1 %1199 }
 0x261   : > { %v1309_v3 = vmul.f32 %v10935_v50, %v1200_v52 }
 0x263   : > { %9507 = vset.pattern.permute.xlu1 %v10159_v7  ;;  %v10991_v63 = vpop.permute.xlu0 %1066  ;;  %v1341_v12 = vadd.f32 %v1309_v3, %v1145_v5 }
 0x264   : > { %1086 = vperm.xlu1 %9507, %v10867_v25  }
 0x265   : > { %v1388_v27 = vpop.permute.xlu1 %1387  ;;  %v1537_v18 = vadd.f32 %v1505_v6, %v1341_v12 }
 0x266   : > { %v1503_v40 = vmul.f32 %v10941_v53, %v1388_v27  ;;  %v1148_v27 = vmul.f32 %v10944_v54, %v10977_v57 }
 0x267   : > { %v1576_v34 = vadd.f32 %v10962_v9, %v1537_v18 }
 0x268   : > { %v1192_v8 = vpop.permute.xlu0 %1191  ;;  %1091 = vperm.xlu1 %9507, %v10880_v28  }
 0x269   : > { %v1307_v13 = vmul.f32 %v10935_v50, %v1192_v8  ;;  %v1392_v14 = vpop.permute.xlu1 %1391  ;;  %v1608_v46 = vmax.f32 %v1576_v34, 0.0 }
 0x26a   : > { %v1504_v26 = vmul.f32 %v10941_v53, %v1392_v14 }
 0x26b   : > { %v1339_v15 = vadd.f32 %v1307_v13, %v1143_v10 }
 0x26c   : > { %v1196_v17 = vpop.permute.xlu0 %1195  ;;  %9509 = vset.pattern.permute.xlu1 %v10157_v0 }
 0x26d   : > { %v1535_v21 = vadd.f32 %v1503_v40, %v1339_v15  ;;  %v1308_v22 = vmul.f32 %v10935_v50, %v1196_v17  ;;  %1263 = vperm.xlu1 %9509, %v10880_v28  }
 0x26e   : > { %v1017_v20 = vpop.permute.xlu1 %1016 }
 0x26f   : > { %v1574_v23 = vadd.f32 %v10962_v9, %v1535_v21  ;;  %v1340_v32 = vadd.f32 %v1308_v22, %v1144_v16 }
 0x270   : > { %v1212_v62 = vpop.permute.xlu0 %1211 }
 0x271   : > { %v1606_v35 = vmax.f32 %v1574_v23, 0.0  ;;  %v1536_v37 = vadd.f32 %v1504_v26, %v1340_v32  ;;  %9510 = vset.pattern.permute.xlu1 %v10158_v4  ;;  %v1312_v6 = vmul.f32 %v10935_v50, %v1212_v62 }
 0x272   : > { %1451 = vperm.xlu1 %9510, %v10862_v24   ;;  %v1147_v24 = vmul.f32 %v10944_v54, %v10974_v36  ;;  %v1146_v36 = vmul.f32 %v10944_v54, %v1017_v20 }
 0x273   : > { %v1575_v39 = vadd.f32 %v10962_v9, %v1536_v37  ;;  %v1204_v44 = vpop.permute.xlu1 %1203  ;;  %v1635_v28 = vpack.c.bf16 %v1606_v35, %v1605_v33  ;;  %v1344_v14 = vadd.f32 %v1312_v6, %v1148_v27  ;;  %v9529_v6 = vld [vmem:[%s10771_s3 + $0x8] sm:$0xff]  }
 0x274   : > { %v1310_v3 = vmul.f32 %v10935_v50, %v1204_v44  ;;  %v1224_v8 = vpop.permute.xlu0 %1223 }
 0x275   : > { %v1607_v51 = vmax.f32 %v1575_v39, 0.0  ;;  %8739 = vmatprep.mubr.msk.bf16.mxu0 %vm1688_vm0, %v1635_v28 }
 0x276   : > { %1455 = vperm.xlu1 %9510, %v10867_v25   ;;  %v1507_v25 = vmul.f32 %v10941_v53, %v10932_v49  ;;  %v1342_v12 = vadd.f32 %v1310_v3, %v1146_v36 }
 0x277   : > { %v1208_v55 = vpop.permute.xlu1 %1207  ;;  %v1636_v56 = vpack.c.bf16 %v1608_v46, %v1607_v51 }
 0x278   : > { %v1311_v61 = vmul.f32 %v10935_v50, %v1208_v55  ;;  %v1228_v16 = vpop.permute.xlu0 %1227 }
 0x279   : > { %8740 = vmatmul.mubr.msk.bf16.gmra.mrb[4].mxu0 %vm1688_vm0, %v1636_v56 }
 0x27a   : > { %9511 = vset.pattern.permute.xlu1 %v10159_v7  ;;  %v1343_v1 = vadd.f32 %v1311_v61, %v1147_v24  ;;  %v1150_v24 = vmul.f32 %v10944_v54, %v10982_v58  ;;  %v1315_v58 = vmul.f32 %v10935_v50, %v1224_v8  ;;  %v1316_v8 = vmul.f32 %v10935_v50, %v1228_v16 }
 0x27b   : > { %1096 = vperm.xlu1 %9511, %v965_v19  }
 0x27c   : > { %v1032_v52 = vpop.permute.xlu1 %1031  ;;  %v1539_v5 = vadd.f32 %v1507_v25, %v1343_v1  ;;  %v11043_v34 = vpop.permute.xlu0 %1243 }
 0x27d   : > { %v1149_v18 = vmul.f32 %v10944_v54, %v1032_v52 }
 0x27e   : > { %v1578_v13 = vadd.f32 %v10962_v9, %v1539_v5 }
 0x27f   : > { %9512 = vset.pattern.permute.xlu1 %v10157_v0 }
 0x280   : > { %1267 = vperm.xlu1 %9512, %v965_v19   ;;  %v1610_v43 = vmax.f32 %v1578_v13, 0.0  ;;  %v11048_v51 = vpop.permute.xlu0 %1255 }
 0x281   : > { %v1216_v2 = vpop.permute.xlu1 %1215 }
 0x282   : > { %v1313_v57 = vmul.f32 %v10935_v50, %v1216_v2 }
 0x284   : > { %1271 = vperm.xlu1 %9512, %v10885_v29   ;;  %v1345_v23 = vadd.f32 %v1313_v57, %v1149_v18  ;;  %v11052_v56 = vpop.permute.xlu0 %1259 }
 0x286   : > { %v1400_v10 = vpop.permute.xlu1 %1399 }
 0x287   : > { %v1506_v49 = vmul.f32 %v10941_v53, %v1400_v10 }
 0x288   : > { %9513 = vset.pattern.permute.xlu1 %v10159_v7 }
 0x289   : > { %v1538_v29 = vadd.f32 %v1506_v49, %v1342_v12  ;;  %1111 = vperm.xlu1 %9513, %v968_v11   ;;  %v1416_v62 = vpop.permute.xlu0 %1415 }
 0x28a   : > { %v1408_v40 = vpop.permute.xlu1 %1407  ;;  %v1510_v1 = vmul.f32 %v10941_v53, %v1416_v62 }
 0x28b   : > { %v1577_v15 = vadd.f32 %v10962_v9, %v1538_v29  ;;  %v1508_v17 = vmul.f32 %v10941_v53, %v1408_v40  ;;  %v9530_v29 = vld [vmem:[%s10771_s3 + $0x10] sm:$0xff]  }
 0x28d   : > { %v1609_v21 = vmax.f32 %v1577_v15, 0.0  ;;  %v1540_v22 = vadd.f32 %v1508_v17, %v1344_v14  ;;  %9514 = vset.pattern.permute.xlu1 %v10157_v0  ;;  %v1428_v27 = vpop.permute.xlu0 %1427 }
 0x28e   : > { %1279 = vperm.xlu1 %9514, %v968_v11   ;;  %v1412_v20 = vpop.permute.xlu1 %1411 }
 0x28f   : > { %v1637_v26 = vpack.c.bf16 %v1610_v43, %v1609_v21  ;;  %v1509_v32 = vmul.f32 %v10941_v53, %v1412_v20  ;;  %v1579_v33 = vadd.f32 %v10962_v9, %v1540_v22  ;;  %v9531_v21 = vld [vmem:[%s10771_s3 + $0x18] sm:$0xff]  }
 0x291   : > { %v1541_v35 = vadd.f32 %v1509_v32, %v1345_v23  ;;  %8743 = vmatprep.mubr.msk.bf16.mxu0 %vm1688_vm0, %v1637_v26  ;;  %v1611_v44 = vmax.f32 %v1579_v33, 0.0 }
 0x292   : > { %9515 = vset.pattern.permute.xlu1 %v10158_v4 }
 0x293   : > { %v1580_v37 = vadd.f32 %v10962_v9, %v1541_v35  ;;  %1463 = vperm.xlu1 %9515, %v965_v19   ;;  %v1042_v39 = vpop.permute.xlu1 %1041 }
 0x294   : > { %v1151_v36 = vmul.f32 %v10944_v54, %v1042_v39 }
 0x295   : > { %v1612_v28 = vmax.f32 %v1580_v37, 0.0 }
 0x296   : > { %v1347_v49 = vadd.f32 %v1315_v58, %v1151_v36 }
 0x297   : > { %v1638_v46 = vpack.c.bf16 %v1612_v28, %v1611_v44  ;;  %1471 = vperm.xlu1 %9515, %v10894_v30   ;;  %v9528_v30 = vld [vmem:[%s10771_s3] sm:$0xff]  }
 0x298   : > { %v1220_v55 = vpop.permute.xlu1 %1219  ;;  %8767 = vmatprep.subr.bf16.mxu1 %v9528_v30 }
 0x299   : > { %8744 = vmatmul.mubr.msk.bf16.gmra.mrb[8].mxu0 %vm1688_vm0, %v1638_v46  ;;  %v1314_v61 = vmul.f32 %v10935_v50, %v1220_v55  ;;  %8768 = vmatpush3.bf16.msra.mxu1 %v9528_v30  ;;  %v1436_v55 = vpop.permute.xlu0 %1435 }
 0x29a   : > { %8769 = vmatprep.subr.bf16.mxu1 %v9529_v6 }
 0x29b   : > { %1475 = vperm.xlu1 %9515, %v968_v11   ;;  %v1346_v25 = vadd.f32 %v1314_v61, %v1150_v24  ;;  %v1513_v11 = vmul.f32 %v10941_v53, %v1428_v27  ;;  %v1515_v24 = vmul.f32 %v10941_v53, %v1436_v55 }
 0x29d   : > { %v1047_v52 = vpop.permute.xlu1 %1046  ;;  %8770 = vmatpush3.bf16.msra.mxu1 %v9529_v6 }
 0x29e   : > { %v1152_v13 = vmul.f32 %v10944_v54, %v1047_v52  ;;  %8771 = vmatprep.subr.bf16.mxu1 %v9530_v29  ;;  %v1155_v52 = vmul.f32 %v10944_v54, %v10986_v60 }
 0x29f   : > { %9518 = vset.pattern.permute.xlu1 %v10159_v7 }
 0x2a0   : > { %1121 = vperm.xlu1 %9518, %v10907_v38   ;;  %v1348_v43 = vadd.f32 %v1316_v8, %v1152_v13 }
 0x2a1   : > { %v1052_v19 = vpop.permute.xlu1 %1051  ;;  %8772 = vmatpush3.bf16.msra.mxu1 %v9530_v29 }
 0x2a2   : > { %v1153_v5 = vmul.f32 %v10944_v54, %v1052_v19  ;;  %8773 = vmatprep.subr.bf16.mxu1 %v9531_v21 }
 0x2a4   : > { %9519 = vset.pattern.permute.xlu1 %v10157_v0 }
 0x2a5   : > { %1283 = vperm.xlu1 %9519, %v10899_v31   ;;  %v1542_v31 = vadd.f32 %v1510_v1, %v1346_v25  ;;  %8774 = vmatpush3.bf16.msra.mxu1 %v9531_v21  ;;  %v1320_v25 = vmul.f32 %v10935_v50, %v11043_v34  ;;  %v1448_v34 = vpop.permute.xlu0 %1447 }
 0x2a6   : > { %v1232_v2 = vpop.permute.xlu1 %1231 }
 0x2a7   : > { %v1317_v3 = vmul.f32 %v10935_v50, %v1232_v2  ;;  %v1581_v40 = vadd.f32 %v10962_v9, %v1542_v31 }
 0x2a9   : > { %9520 = vset.pattern.permute.xlu1 %v10159_v7  ;;  %v1349_v10 = vadd.f32 %v1317_v3, %v1153_v5  ;;  %v1613_v22 = vmax.f32 %v1581_v40, 0.0 }
 0x2aa   : > { %1126 = vperm.xlu1 %9520, %v10916_v42  }
 0x2ab   : > { %v1420_v12 = vpop.permute.xlu1 %1419  ;;  %v1545_v57 = vadd.f32 %v1513_v11, %v1349_v10 }
 0x2ac   : > { %v1511_v14 = vmul.f32 %v10941_v53, %v1420_v12 }
 0x2ad   : > { %v1584_v20 = vadd.f32 %v10962_v9, %v1545_v57  ;;  %v1460_v57 = vpop.permute.xlu0 %1459 }
 0x2ae   : > { %v1543_v15 = vadd.f32 %v1511_v14, %v1347_v49  ;;  %1131 = vperm.xlu1 %9520, %v10950_v59  }
 0x2af   : > { %v1424_v17 = vpop.permute.xlu1 %1423  ;;  %v1616_v37 = vmax.f32 %v1584_v20, 0.0 }
 0x2b0   : > { %v1582_v18 = vadd.f32 %v10962_v9, %v1543_v15  ;;  %v1512_v16 = vmul.f32 %v10941_v53, %v1424_v17 }
 0x2b1   : > { %v1468_v21 = vpop.permute.xlu0 %1467 }
 0x2b2   : > { %v1614_v23 = vmax.f32 %v1582_v18, 0.0  ;;  %v1544_v26 = vadd.f32 %v1512_v16, %v1348_v43  ;;  %9521 = vset.pattern.permute.xlu1 %v10157_v0 }
 0x2b3   : > { %1295 = vperm.xlu1 %9521, %v10950_v59  }
 0x2b4   : > { %v1639_v32 = vpack.c.bf16 %v1614_v23, %v1613_v22  ;;  %v1583_v33 = vadd.f32 %v10962_v9, %v1544_v26  ;;  %v1057_v35 = vpop.permute.xlu1 %1056 }
 0x2b5   : > { %v1077_v20 = vpop.permute.xlu0 %1076 }
 0x2b6   : > { %v1615_v39 = vmax.f32 %v1583_v33, 0.0  ;;  %8747 = vmatprep.mubr.msk.bf16.mxu0 %vm1688_vm0, %v1639_v32  ;;  %v1158_v26 = vmul.f32 %v10944_v54, %v1077_v20  ;;  %v1518_v33 = vmul.f32 %v10941_v53, %v1448_v34 }
 0x2b7   : > { %9523 = vset.pattern.permute.xlu1 %v10158_v4 }
 0x2b8   : > { %v1640_v44 = vpack.c.bf16 %v1616_v37, %v1615_v39  ;;  %1483 = vperm.xlu1 %9523, %v10907_v38   ;;  %v1154_v38 = vmul.f32 %v10944_v54, %v1057_v35 }
 0x2b9   : > { %v1236_v28 = vpop.permute.xlu1 %1235 }
 0x2ba   : > { %8748 = vmatmul.mubr.msk.bf16.gmra.mrb[12].mxu0 %vm1688_vm0, %v1640_v44  ;;  %v1318_v61 = vmul.f32 %v10935_v50, %v1236_v28 }
 0x2bc   : > { %1487 = vperm.xlu1 %9523, %v10916_v42   ;;  %v1156_v42 = vmul.f32 %v10944_v54, %v10991_v63  ;;  %v1350_v1 = vadd.f32 %v1318_v61, %v1154_v38  ;;  %v1324_v61 = vmul.f32 %v10935_v50, %v11052_v56 }
 0x2bd   : > { %v1240_v0 = vpop.permute.xlu1 %1239 }
 0x2be   : > { %v1319_v46 = vmul.f32 %v10935_v50, %v1240_v0  ;;  %v1352_v58 = vadd.f32 %v1320_v25, %v1156_v42  ;;  %v1323_v0 = vmul.f32 %v10935_v50, %v11048_v51 }
 0x2c0   : > { %v1351_v19 = vadd.f32 %v1319_v46, %v1155_v52 }
 0x2c2   : > { %v1072_v59 = vpop.permute.xlu1 %1071  ;;  %v1547_v62 = vadd.f32 %v1515_v24, %v1351_v19 }
 0x2c3   : > { %v1157_v63 = vmul.f32 %v10944_v54, %v1072_v59  ;;  %v1521_v59 = vmul.f32 %v10941_v53, %v1460_v57  ;;  %v1523_v57 = vmul.f32 %v10941_v53, %v1468_v21 }
 0x2c4   : > { %v1586_v60 = vadd.f32 %v10962_v9, %v1547_v62 }
 0x2c6   : > { %v1618_v31 = vmax.f32 %v1586_v60, 0.0 }
 0x2c7   : > { %v1248_v4 = vpop.permute.xlu1 %1247 }
 0x2c8   : > { %v1321_v36 = vmul.f32 %v10935_v50, %v1248_v4 }
 0x2ca   : > { %v1353_v8 = vadd.f32 %v1321_v36, %v1157_v63  ;;  %v1102_v63 = vpop.permute.xlu0 %1101 }
 0x2cc   : > { %v1432_v30 = vpop.permute.xlu1 %1431 }
 0x2cd   : > { %v1514_v2 = vmul.f32 %v10941_v53, %v1432_v30 }
 0x2cf   : > { %v1546_v3 = vadd.f32 %v1514_v2, %v1350_v1 }
 0x2d0   : > { %v1440_v27 = vpop.permute.xlu1 %1439 }
 0x2d1   : > { %v1585_v5 = vadd.f32 %v10962_v9, %v1546_v3  ;;  %v1516_v6 = vmul.f32 %v10941_v53, %v1440_v27 }
 0x2d3   : > { %v1617_v10 = vmax.f32 %v1585_v5, 0.0  ;;  %v1548_v11 = vadd.f32 %v1516_v6, %v1352_v58 }
 0x2d4   : > { %v1444_v12 = vpop.permute.xlu1 %1443 }
 0x2d5   : > { %v1641_v49 = vpack.c.bf16 %v1618_v31, %v1617_v10  ;;  %v1517_v13 = vmul.f32 %v10941_v53, %v1444_v12  ;;  %v1587_v14 = vadd.f32 %v10962_v9, %v1548_v11  ;;  %v1107_v11 = vpop.permute.xlu0 %1106 }
 0x2d7   : > { %v1549_v29 = vadd.f32 %v1517_v13, %v1353_v8  ;;  %8751 = vmatprep.mubr.msk.bf16.mxu0 %vm1688_vm0, %v1641_v49  ;;  %v1619_v17 = vmax.f32 %v1587_v14, 0.0  ;;  %v1163_v49 = vmul.f32 %v10944_v54, %v1102_v63 }
 0x2d9   : > { %v1588_v40 = vadd.f32 %v10962_v9, %v1549_v29  ;;  %v1082_v15 = vpop.permute.xlu1 %1081  ;;  %v1117_v8 = vpop.permute.xlu0 %1116 }
 0x2da   : > { %v1159_v44 = vmul.f32 %v10944_v54, %v1082_v15 }
 0x2db   : > { %v1620_v43 = vmax.f32 %v1588_v40, 0.0 }
 0x2dc   : > { %v1355_v19 = vadd.f32 %v1323_v0, %v1159_v44 }
 0x2dd   : > { %v1642_v18 = vpack.c.bf16 %v1620_v43, %v1619_v17  ;;  %v1276_v40 = vpop.permute.xlu0 %1275 }
 0x2de   : > { %v1252_v16 = vpop.permute.xlu1 %1251 }
 0x2df   : > { %8752 = vmatmul.mubr.msk.bf16.gmra.mrb[16].mxu0 %vm1688_vm0, %v1642_v18  ;;  %v1322_v32 = vmul.f32 %v10935_v50, %v1252_v16  ;;  %v1164_v18 = vmul.f32 %v10944_v54, %v1107_v11  ;;  %v1328_v16 = vmul.f32 %v10935_v50, %v1276_v40 }
 0x2e1   : > { %v1354_v35 = vadd.f32 %v1322_v32, %v1158_v26 }
 0x2e3   : > { %v1087_v22 = vpop.permute.xlu1 %1086  ;;  %v1550_v46 = vadd.f32 %v1518_v33, %v1354_v35  ;;  %v1360_v33 = vadd.f32 %v1328_v16, %v1164_v18 }
 0x2e4   : > { %v1160_v24 = vmul.f32 %v10944_v54, %v1087_v22 }
 0x2e5   : > { %v1589_v38 = vadd.f32 %v10962_v9, %v1550_v46 }
 0x2e6   : > { %v1356_v25 = vadd.f32 %v1324_v61, %v1160_v24 }
 0x2e7   : > { %v1092_v23 = vpop.permute.xlu1 %1091  ;;  %v1621_v2 = vmax.f32 %v1589_v38, 0.0 }
 0x2e8   : > { %v1161_v28 = vmul.f32 %v10944_v54, %v1092_v23 }
 0x2ec   : > { %v1264_v37 = vpop.permute.xlu1 %1263 }
 0x2ed   : > { %v1325_v39 = vmul.f32 %v10935_v50, %v1264_v37 }
 0x2ef   : > { %v1357_v55 = vadd.f32 %v1325_v39, %v1161_v28 }
 0x2f1   : > { %v1452_v52 = vpop.permute.xlu1 %1451  ;;  %v1553_v62 = vadd.f32 %v1521_v59, %v1357_v55 }
 0x2f2   : > { %v1519_v4 = vmul.f32 %v10941_v53, %v1452_v52 }
 0x2f3   : > { %v1592_v60 = vadd.f32 %v10962_v9, %v1553_v62 }
 0x2f4   : > { %v1551_v30 = vadd.f32 %v1519_v4, %v1355_v19 }
 0x2f5   : > { %v1456_v42 = vpop.permute.xlu1 %1455  ;;  %v1624_v56 = vmax.f32 %v1592_v60, 0.0  ;;  %v11150_v60 = vld [vmem:[%s13048_s14] ss:$0 sm:$0xff] }
 0x2f6   : > { %v1590_v51 = vadd.f32 %v10962_v9, %v1551_v30  ;;  %v1520_v1 = vmul.f32 %v10941_v53, %v1456_v42 }
 0x2f8   : > { %v1622_v3 = vmax.f32 %v1590_v51, 0.0  ;;  %v1552_v27 = vadd.f32 %v1520_v1, %v1356_v25  ;;  %v1288_v25 = vpop.permute.xlu0 %1287 }
 0x2f9   : > { %v1331_v16 = vmul.f32 %v10935_v50, %v1288_v25 }
 0x2fa   : > { %v1643_v58 = vpack.c.bf16 %v1622_v3, %v1621_v2  ;;  %v1591_v36 = vadd.f32 %v10962_v9, %v1552_v27  ;;  %v1097_v5 = vpop.permute.xlu1 %1096 }
 0x2fb   : > { %v1162_v17 = vmul.f32 %v10944_v54, %v1097_v5 }
 0x2fc   : > { %v1623_v6 = vmax.f32 %v1591_v36, 0.0  ;;  %8755 = vmatprep.mubr.msk.bf16.mxu0 %vm1688_vm0, %v1643_v58  ;;  %v1292_v1 = vpop.permute.xlu0 %1291 }
 0x2fe   : > { %v1644_v31 = vpack.c.bf16 %v1624_v56, %v1623_v6 }
 0x2ff   : > { %v1268_v10 = vpop.permute.xlu1 %1267 }
 0x300   : > { %8756 = vmatmul.mubr.msk.bf16.gmra.mrb[20].mxu0 %vm1688_vm0, %v1644_v31  ;;  %v1326_v15 = vmul.f32 %v10935_v50, %v1268_v10  ;;  %v1480_v10 = vpop.permute.xlu0 %1479 }
 0x301   : > { %v1526_v40 = vmul.f32 %v10941_v53, %v1480_v10  ;;  %v9535_v10 = vld [vmem:[%s10780_s1 + $0x10] ss:$8 sps:$4 sm:$0xff]  }
 0x302   : > { %v1358_v20 = vadd.f32 %v1326_v15, %v1162_v17 }
 0x303   : > { %v1272_v34 = vpop.permute.xlu1 %1271 }
 0x304   : > { %v1327_v13 = vmul.f32 %v10935_v50, %v1272_v34  ;;  %v1166_v34 = vmul.f32 %v10944_v54, %v1117_v8 }
 0x306   : > { %v1359_v14 = vadd.f32 %v1327_v13, %v1163_v49 }
 0x308   : > { %v1112_v12 = vpop.permute.xlu1 %1111  ;;  %v1555_v43 = vadd.f32 %v1523_v57, %v1359_v14 }
 0x309   : > { %v1165_v28 = vmul.f32 %v10944_v54, %v1112_v12 }
 0x30a   : > { %v1594_v26 = vadd.f32 %v10962_v9, %v1555_v43  ;;  %v1492_v43 = vpop.permute.xlu0 %1491 }
 0x30c   : > { %v1626_v44 = vmax.f32 %v1594_v26, 0.0  ;;  %v1529_v26 = vmul.f32 %v10941_v53, %v1492_v43 }
 0x30d   : > { %v1280_v29 = vpop.permute.xlu1 %1279 }
 0x30e   : > { %v1329_v21 = vmul.f32 %v10935_v50, %v1280_v29 }
 0x310   : > { %v1361_v55 = vadd.f32 %v1329_v21, %v1165_v28 }
 0x312   : > { %v1464_v22 = vpop.permute.xlu1 %1463 }
 0x313   : > { %v1522_v23 = vmul.f32 %v10941_v53, %v1464_v22 }
 0x315   : > { %v1554_v32 = vadd.f32 %v1522_v23, %v1358_v20 }
 0x316   : > { %v1472_v35 = vpop.permute.xlu1 %1471 }
 0x317   : > { %v1593_v37 = vadd.f32 %v10962_v9, %v1554_v32  ;;  %v1524_v39 = vmul.f32 %v10941_v53, %v1472_v35  ;;  %v1332_v35 = vmul.f32 %v10935_v50, %v1292_v1 }
 0x319   : > { %v1625_v0 = vmax.f32 %v1593_v37, 0.0  ;;  %v1556_v59 = vadd.f32 %v1524_v39, %v1360_v33 }
 0x31a   : > { %v1476_v46 = vpop.permute.xlu1 %1475 }
 0x31b   : > { %v1645_v52 = vpack.c.bf16 %v1626_v44, %v1625_v0  ;;  %v1525_v19 = vmul.f32 %v10941_v53, %v1476_v46  ;;  %v1595_v24 = vadd.f32 %v10962_v9, %v1556_v59 }
 0x31d   : > { %v1557_v4 = vadd.f32 %v1525_v19, %v1361_v55  ;;  %8759 = vmatprep.mubr.msk.bf16.mxu0 %vm1688_vm0, %v1645_v52  ;;  %v1627_v62 = vmax.f32 %v1595_v24, 0.0 }
 0x31f   : > { %v1596_v61 = vadd.f32 %v10962_v9, %v1557_v4  ;;  %v1122_v38 = vpop.permute.xlu1 %1121 }
 0x320   : > { %v1167_v22 = vmul.f32 %v10944_v54, %v1122_v38 }
 0x321   : > { %v1628_v30 = vmax.f32 %v1596_v61, 0.0 }
 0x322   : > { %v1363_v33 = vadd.f32 %v1331_v16, %v1167_v22  ;;  %v9540_v22 = vld [vmem:[%s10780_s1 + $0x24] ss:$8 sps:$4 sm:$0xff]  }
 0x323   : > { %v1646_v42 = vpack.c.bf16 %v1628_v30, %v1627_v62 }
 0x324   : > { %v1284_v51 = vpop.permute.xlu1 %1283 }
 0x325   : > { %8760 = vmatmul.mubr.msk.bf16.gmra.mrb[24].mxu0 %vm1688_vm0, %v1646_v42  ;;  %v1330_v6 = vmul.f32 %v10935_v50, %v1284_v51 }
 0x327   : > { %v1362_v29 = vadd.f32 %v1330_v6, %v1166_v34  ;;  %v9532_v6 = vld [vmem:[%s10780_s1] ss:$8 sps:$4 sm:$0xff]  }
 0x329   : > { %v1127_v2 = vpop.permute.xlu1 %1126  ;;  %v1558_v8 = vadd.f32 %v1526_v40, %v1362_v29 }
 0x32a   : > { %v1168_v21 = vmul.f32 %v10944_v54, %v1127_v2 }
 0x32b   : > { %v8737_v3 = vpop.f32.mrb[0].mxu0  ;;  %v1597_v39 = vadd.f32 %v10962_v9, %v1558_v8  ;;  %v9543_v8 = vld [vmem:[%s10780_s1 + $0x34] ss:$8 sps:$4 sm:$0xff]  }
 0x32c   : > { %v1780_v27 = vadd.f32 %v8737_v3, %v11150_v60  ;;  %v1771_v58 = vpop.f32.mrb[1].mxu0  ;;  %v1364_v59 = vadd.f32 %v1332_v35, %v1168_v21  ;;  %v9547_v35 = vld [vmem:[%s10780_s1 + $0x50] ss:$8 sps:$4 sm:$0xff]   ;;  %v9552_v21 = vld [vmem:[%s10780_s1 + $0x64] ss:$8 sps:$4 sm:$0xff]  }
 0x32d   : > { %v1772_v36 = vadd.f32 %v11150_v60, %v1771_v58  ;;  %v8738_v5 = vpop.f32.mrb[2].mxu0  ;;  %v1132_v56 = vpop.permute.xlu1 %1131  ;;  %v1629_v52 = vmax.f32 %v1597_v39, 0.0 }
 0x32e   : > { %v1783_v31 = vadd.f32 %v8738_v5, %v11150_v60  ;;  %v1774_v63 = vpop.f32.mrb[3].mxu0  ;;  %v1900_v12 = vmax.f32 %v1780_v27, 0.0  ;;  %v1169_v20 = vmul.f32 %v10944_v54, %v1132_v56 }
 0x32f   : > { %v1775_v11 = vadd.f32 %v11150_v60, %v1774_v63  ;;  %v1898_v13 = vmax.f32 %v1772_v36, 0.0  ;;  %v9537_v63 = vld [vmem:[%s10780_s1 + $0x14] ss:$8 sps:$4 sm:$0xff]  }
 0x330   : > { %v1901_v49 = vmax.f32 %v1783_v31, 0.0  ;;  %v9534_v31 = vld [vmem:[%s10780_s1 + $0x4] ss:$8 sps:$4 sm:$0xff]  }
 0x331   : > { %v1899_v14 = vmax.f32 %v1775_v11, 0.0  ;;  %2425 = vmatprep.subr.bf16.mxu0 %v9534_v31  ;;  %8807 = vmatprep.subr.bf16.mxu1 %v9534_v31 }
 0x332   : > { %v1931_v57 = vpack.c.bf16 %v1901_v49, %v1900_v12  ;;  %v1296_v15 = vpop.permute.xlu1 %1295  ;;  %2426 = vmatpush1.bf16.msra.mxu0 %v9532_v6 }
 0x333   : > { %v1333_v17 = vmul.f32 %v10935_v50, %v1296_v15  ;;  %v1930_v18 = vpack.c.bf16 %v1899_v14, %v1898_v13  ;;  %2427 = vmatprep.subr.bf16.mxu0 %v9537_v63 }
 0x335   : > { %8775 = vmatprep.mubr.msk.bf16.mxu1 %vm1688_vm0, %v1930_v18  ;;  %v1365_v23 = vadd.f32 %v1333_v17, %v1169_v20  ;;  %v9538_v20 = vld [vmem:[%s10780_s1 + $0x20] ss:$8 sps:$4 sm:$0xff]  }
 0x336   : > { %8776 = vmatmul.mubr.msk.bf16.vlgmr.msra.gmra.mrb[0].mxu1 %vm1688_vm0, %v1931_v57  ;;  %2428 = vmatpush1.bf16.msra.mxu0 %v9535_v10 }
 0x337   : > { %v1484_v32 = vpop.permute.xlu1 %1483  ;;  %v1561_v44 = vadd.f32 %v1529_v26, %v1365_v23  ;;  %8815 = vmatpush1.bf16.msra.mxu1 %v9532_v6  ;;  %2429 = vmatprep.subr.bf16.mxu0 %v9540_v22  ;;  %v9541_v23 = vld [vmem:[%s10780_s1 + $0x30] ss:$8 sps:$4 sm:$0xff]   ;;  %v9546_v26 = vld [vmem:[%s10780_s1 + $0x44] ss:$8 sps:$4 sm:$0xff]  }
 0x338   : > { %v1527_v37 = vmul.f32 %v10941_v53, %v1484_v32  ;;  %8808 = vmatprep.subr.bf16.mxu1 %v9537_v63  ;;  %v9544_v32 = vld [vmem:[%s10780_s1 + $0x40] ss:$8 sps:$4 sm:$0xff]  }
 0x339   : > { %v1600_v19 = vadd.f32 %v10962_v9, %v1561_v44  ;;  %v9555_v44 = vld [vmem:[%s10780_s1 + $0x74] ss:$8 sps:$4 sm:$0xff]  }
 0x33a   : > { %v1559_v28 = vadd.f32 %v1527_v37, %v1363_v33  ;;  %2430 = vmatpush1.bf16.msra.mxu0 %v9538_v20  ;;  %v9549_v33 = vld [vmem:[%s10780_s1 + $0x54] ss:$8 sps:$4 sm:$0xff]   ;;  %v9550_v37 = vld [vmem:[%s10780_s1 + $0x60] ss:$8 sps:$4 sm:$0xff]  }
 0x33b   : > { %v1488_v0 = vpop.permute.xlu1 %1487  ;;  %v1632_v61 = vmax.f32 %v1600_v19, 0.0  ;;  %8816 = vmatpush1.bf16.msra.mxu1 %v9535_v10  ;;  %2431 = vmatprep.subr.bf16.mxu0 %v9543_v8 }
 0x33c   : > { %v1598_v46 = vadd.f32 %v10962_v9, %v1559_v28  ;;  %v1528_v55 = vmul.f32 %v10941_v53, %v1488_v0  ;;  %8809 = vmatprep.subr.bf16.mxu1 %v9540_v22 }
 0x33e   : > { %v1630_v24 = vmax.f32 %v1598_v46, 0.0  ;;  %v1560_v4 = vadd.f32 %v1528_v55, %v1364_v59  ;;  %2432 = vmatpush1.bf16.msra.mxu0 %v9541_v23  ;;  %v9553_v59 = vld [vmem:[%s10780_s1 + $0x70] ss:$8 sps:$4 sm:$0xff]  }
 0x33f   : > { %8817 = vmatpush1.bf16.msra.mxu1 %v9538_v20  ;;  %2433 = vmatprep.subr.bf16.mxu0 %v9546_v26 }
 0x340   : > { %v1647_v50 = vpack.c.bf16 %v1630_v24, %v1629_v52  ;;  %v1599_v54 = vadd.f32 %v10962_v9, %v1560_v4  ;;  %8810 = vmatprep.subr.bf16.mxu1 %v9543_v8 }
 0x342   : > { %v1631_v38 = vmax.f32 %v1599_v54, 0.0  ;;  %8763 = vmatprep.mubr.msk.bf16.mxu0 %vm1688_vm0, %v1647_v50  ;;  %2434 = vmatpush1.bf16.msra.mxu0 %v9544_v32 }
 0x343   : > { %8818 = vmatpush1.bf16.msra.mxu1 %v9541_v23  ;;  %2435 = vmatprep.subr.bf16.mxu0 %v9549_v33 }
 0x344   : > { %v1648_v62 = vpack.c.bf16 %v1632_v61, %v1631_v38  ;;  %8811 = vmatprep.subr.bf16.mxu1 %v9546_v26 }
 0x346   : > { %8764 = vmatmul.mubr.msk.bf16.gmra.mrb[28].mxu0 %vm1688_vm0, %v1648_v62 }
 0x347   : > { %2457 = vmatprep.mubr.bf16.mxu0 %v10159_v7  ;;  %8819 = vmatpush1.bf16.msra.mxu1 %v9544_v32 }
 0x348   : > { %8812 = vmatprep.subr.bf16.mxu1 %v9549_v33  ;;  %2436 = vmatpush1.bf16.msra.mxu0 %v9547_v35 }
 0x349   : > { %2437 = vmatprep.subr.bf16.mxu0 %v9552_v21 }
 0x34b   : > { %8820 = vmatpush1.bf16.msra.mxu1 %v9547_v35 }
 0x34c   : > { %v8741_v30 = vpop.f32.mrb[4].mxu0  ;;  %8813 = vmatprep.subr.bf16.mxu1 %v9552_v21  ;;  %2438 = vmatpush1.bf16.msra.mxu0 %v9550_v37 }
 0x34d   : > { %v1796_v53 = vadd.f32 %v8741_v30, %v11150_v60  ;;  %v1787_v42 = vpop.f32.mrb[5].mxu0  ;;  %2439 = vmatprep.subr.bf16.mxu0 %v9555_v44 }
 0x34e   : > { %v1788_v25 = vadd.f32 %v11150_v60, %v1787_v42  ;;  %v8742_v51 = vpop.f32.mrb[6].mxu0 }
 0x34f   : > { %v1799_v9 = vadd.f32 %v8742_v51, %v11150_v60  ;;  %v1790_v1 = vpop.f32.mrb[7].mxu0  ;;  %v1904_v3 = vmax.f32 %v1796_v53, 0.0  ;;  %8821 = vmatpush1.bf16.msra.mxu1 %v9550_v37 }
 0x350   : > { %v1791_v2 = vadd.f32 %v11150_v60, %v1790_v1  ;;  %v1902_v58 = vmax.f32 %v1788_v25, 0.0  ;;  %8814 = vmatprep.subr.bf16.mxu1 %v9555_v44  ;;  %2440 = vmatpush1.bf16.msra.mxu0 %v9553_v59 }
 0x351   : > { %v1905_v27 = vmax.f32 %v1799_v9, 0.0 }
 0x352   : > { %v1903_v36 = vmax.f32 %v1791_v2, 0.0 }
 0x353   : > { %v1933_v5 = vpack.c.bf16 %v1905_v27, %v1904_v3  ;;  %8822 = vmatpush1.bf16.msra.mxu1 %v9553_v59 }
 0x354   : > { %v1932_v56 = vpack.c.bf16 %v1903_v36, %v1902_v58 }
 0x356   : > { %8779 = vmatprep.mubr.msk.bf16.mxu1 %vm1688_vm0, %v1932_v56 }
 0x357   : > { %8780 = vmatmul.mubr.msk.bf16.gmra.mrb[4].mxu1 %vm1688_vm0, %v1933_v5 }
 0x36c   : > { %v8745_v11 = vpop.f32.mrb[8].mxu0 }
 0x36d   : > { %v1812_v34 = vadd.f32 %v8745_v11, %v11150_v60  ;;  %v1803_v12 = vpop.f32.mrb[9].mxu0 }
 0x36e   : > { %v1804_v49 = vadd.f32 %v11150_v60, %v1803_v12  ;;  %v8746_v13 = vpop.f32.mrb[10].mxu0 }
 0x36f   : > { %v1815_v14 = vadd.f32 %v8746_v13, %v11150_v60  ;;  %v1806_v29 = vpop.f32.mrb[11].mxu0  ;;  %v1908_v57 = vmax.f32 %v1812_v34, 0.0 }
 0x370   : > { %v1807_v40 = vadd.f32 %v11150_v60, %v1806_v29  ;;  %v1906_v17 = vmax.f32 %v1804_v49, 0.0 }
 0x371   : > { %v1909_v15 = vmax.f32 %v1815_v14, 0.0 }
 0x372   : > { %v1907_v43 = vmax.f32 %v1807_v40, 0.0 }
 0x373   : > { %v1935_v18 = vpack.c.bf16 %v1909_v15, %v1908_v57 }
 0x374   : > { %v1934_v16 = vpack.c.bf16 %v1907_v43, %v1906_v17 }
 0x376   : > { %8783 = vmatprep.mubr.msk.bf16.mxu1 %vm1688_vm0, %v1934_v16 }
 0x377   : > { %8784 = vmatmul.mubr.msk.bf16.gmra.mrb[8].mxu1 %vm1688_vm0, %v1935_v18 }
 0x38d   : > { %v8749_v39 = vpop.f32.mrb[12].mxu0 }
 0x38e   : > { %v1828_v28 = vadd.f32 %v8749_v39, %v11150_v60  ;;  %v1819_v0 = vpop.f32.mrb[13].mxu0  ;;  %v11231_v39 = vld [vmem:[%s13049_s15] ss:$0 sm:$0xff] }
 0x38f   : > { %v1820_v46 = vadd.f32 %v11150_v60, %v1819_v0  ;;  %v8750_v55 = vpop.f32.mrb[14].mxu0 }
 0x390   : > { %v1831_v52 = vadd.f32 %v8750_v55, %v11150_v60  ;;  %v1822_v19 = vpop.f32.mrb[15].mxu0  ;;  %v1912_v4 = vmax.f32 %v1828_v28, 0.0 }
 0x391   : > { %v1823_v24 = vadd.f32 %v11150_v60, %v1822_v19  ;;  %v1910_v54 = vmax.f32 %v1820_v46, 0.0 }
 0x392   : > { %v1913_v50 = vmax.f32 %v1831_v52, 0.0 }
 0x393   : > { %v1911_v61 = vmax.f32 %v1823_v24, 0.0 }
 0x394   : > { %v1937_v38 = vpack.c.bf16 %v1913_v50, %v1912_v4 }
 0x395   : > { %v1936_v62 = vpack.c.bf16 %v1911_v61, %v1910_v54 }
 0x397   : > { %8787 = vmatprep.mubr.msk.bf16.mxu1 %vm1688_vm0, %v1936_v62 }
 0x398   : > { %8788 = vmatmul.mubr.msk.bf16.gmra.mrb[12].mxu1 %vm1688_vm0, %v1937_v38 }
 0x3b2   : > { %v8753_v30 = vpop.f32.mrb[16].mxu0 }
 0x3b3   : > { %v1844_v53 = vadd.f32 %v8753_v30, %v11150_v60  ;;  %v1835_v42 = vpop.f32.mrb[17].mxu0 }
 0x3b4   : > { %v1836_v25 = vadd.f32 %v11150_v60, %v1835_v42  ;;  %v8754_v51 = vpop.f32.mrb[18].mxu0 }
 0x3b5   : > { %v1847_v9 = vadd.f32 %v8754_v51, %v11150_v60  ;;  %v1838_v1 = vpop.f32.mrb[19].mxu0  ;;  %v1916_v3 = vmax.f32 %v1844_v53, 0.0 }
 0x3b6   : > { %v1839_v2 = vadd.f32 %v11150_v60, %v1838_v1  ;;  %v1914_v58 = vmax.f32 %v1836_v25, 0.0 }
 0x3b7   : > { %v1917_v27 = vmax.f32 %v1847_v9, 0.0 }
 0x3b8   : > { %v1915_v36 = vmax.f32 %v1839_v2, 0.0 }
 0x3b9   : > { %v1939_v5 = vpack.c.bf16 %v1917_v27, %v1916_v3 }
 0x3ba   : > { %v1938_v56 = vpack.c.bf16 %v1915_v36, %v1914_v58 }
 0x3bc   : > { %8791 = vmatprep.mubr.msk.bf16.mxu1 %vm1688_vm0, %v1938_v56 }
 0x3bd   : > { %8792 = vmatmul.mubr.msk.bf16.gmra.mrb[16].mxu1 %vm1688_vm0, %v1939_v5 }
 0x3d3   : > { %v8757_v6 = vpop.f32.mrb[20].mxu0 }
 0x3d4   : > { %v1860_v31 = vadd.f32 %v8757_v6, %v11150_v60  ;;  %v1851_v63 = vpop.f32.mrb[21].mxu0 }
 0x3d5   : > { %v1852_v10 = vadd.f32 %v11150_v60, %v1851_v63  ;;  %v8758_v11 = vpop.f32.mrb[22].mxu0 }
 0x3d6   : > { %v1863_v34 = vadd.f32 %v8758_v11, %v11150_v60  ;;  %v1854_v12 = vpop.f32.mrb[23].mxu0  ;;  %v1920_v13 = vmax.f32 %v1860_v31, 0.0 }
 0x3d7   : > { %v1855_v49 = vadd.f32 %v11150_v60, %v1854_v12  ;;  %v1918_v29 = vmax.f32 %v1852_v10, 0.0 }
 0x3d8   : > { %v1921_v14 = vmax.f32 %v1863_v34, 0.0 }
 0x3d9   : > { %v1919_v40 = vmax.f32 %v1855_v49, 0.0 }
 0x3da   : > { %v1941_v57 = vpack.c.bf16 %v1921_v14, %v1920_v13 }
 0x3db   : > { %v1940_v15 = vpack.c.bf16 %v1919_v40, %v1918_v29  ;;  %v9558_v40 = vld [vmem:[%s10789_s2 + $0xc] ss:$16 sps:$4 sm:$0xff]  }
 0x3dc   : > { %3428 = vmatprep.subr.bf16.mxu0 %v9558_v40 }
 0x3dd   : > { %8795 = vmatprep.mubr.msk.bf16.mxu1 %vm1688_vm0, %v1940_v15 }
 0x3de   : > { %8796 = vmatmul.mubr.msk.bf16.gmra.mrb[20].mxu1 %vm1688_vm0, %v1941_v57 }
 0x3f8   : > { %v8761_v17 = vpop.f32.mrb[24].mxu0 }
 0x3f9   : > { %v1876_v43 = vadd.f32 %v8761_v17, %v11150_v60  ;;  %v1867_v18 = vpop.f32.mrb[25].mxu0  ;;  %v9556_v17 = vld [vmem:[%s10789_s2 + $0x8] ss:$16 sps:$4 sm:$0xff]  }
 0x3fa   : > { %v1868_v16 = vadd.f32 %v11150_v60, %v1867_v18  ;;  %v8762_v22 = vpop.f32.mrb[26].mxu0 }
 0x3fb   : > { %v1879_v20 = vadd.f32 %v8762_v22, %v11150_v60  ;;  %v1870_v8 = vpop.f32.mrb[27].mxu0  ;;  %v1924_v26 = vmax.f32 %v1876_v43, 0.0 }
 0x3fc   : > { %v1871_v23 = vadd.f32 %v11150_v60, %v1870_v8  ;;  %v1922_v33 = vmax.f32 %v1868_v16, 0.0 }
 0x3fd   : > { %v1925_v32 = vmax.f32 %v1879_v20, 0.0  ;;  %v9561_v20 = vld [vmem:[%s10789_s2 + $0x2c] ss:$16 sps:$4 sm:$0xff]  }
 0x3fe   : > { %v1923_v35 = vmax.f32 %v1871_v23, 0.0  ;;  %v9559_v23 = vld [vmem:[%s10789_s2 + $0x28] ss:$16 sps:$4 sm:$0xff]  }
 0x3ff   : > { %v1943_v21 = vpack.c.bf16 %v1925_v32, %v1924_v26  ;;  %v9564_v26 = vld [vmem:[%s10789_s2 + $0x4c] ss:$16 sps:$4 sm:$0xff]   ;;  %v9562_v32 = vld [vmem:[%s10789_s2 + $0x48] ss:$16 sps:$4 sm:$0xff]  }
 0x400   : > { %v1942_v37 = vpack.c.bf16 %v1923_v35, %v1922_v33  ;;  %v9565_v33 = vld [vmem:[%s10789_s2 + $0x68] ss:$16 sps:$4 sm:$0xff]   ;;  %v9567_v35 = vld [vmem:[%s10789_s2 + $0x6c] ss:$16 sps:$4 sm:$0xff]  }
 0x402   : > { %8799 = vmatprep.mubr.msk.bf16.mxu1 %vm1688_vm0, %v1942_v37  ;;  %v9568_v37 = vld [vmem:[%s10789_s2 + $0x88] ss:$16 sps:$4 sm:$0xff]  }
 0x403   : > { %8800 = vmatmul.mubr.msk.bf16.gmra.mrb[24].mxu1 %vm1688_vm0, %v1943_v21  ;;  %v9570_v21 = vld [vmem:[%s10789_s2 + $0x8c] ss:$16 sps:$4 sm:$0xff]  }
 0x409   : > { %v8777_v44 = vpop.f32.mrb[0].mxu1 }
 0x40a   : > { %v2076_v28 = vadd.f32 %v8777_v44, %v11231_v39  ;;  %v2067_v0 = vpop.f32.mrb[1].mxu1  ;;  %v9571_v44 = vld [vmem:[%s10789_s2 + $0xa8] ss:$16 sps:$4 sm:$0xff]  }
 0x40b   : > { %v2068_v59 = vadd.f32 %v11231_v39, %v2067_v0  ;;  %v8778_v46 = vpop.f32.mrb[2].mxu1  ;;  %v9576_v0 = vld [vmem:[%s10789_s2 + $0xcc] ss:$16 sps:$4 sm:$0xff]  }
 0x40c   : > { %v2196_v55 = vmax.f32 %v2076_v28, 0.0  ;;  %v2079_v52 = vadd.f32 %v8778_v46, %v11231_v39  ;;  %v2070_v19 = vpop.f32.mrb[3].mxu1  ;;  %v9573_v28 = vld [vmem:[%s10789_s2 + $0xac] ss:$16 sps:$4 sm:$0xff]   ;;  %v9574_v46 = vld [vmem:[%s10789_s2 + $0xc8] ss:$16 sps:$4 sm:$0xff]  }
 0x40d   : > { %v2194_v24 = vmax.f32 %v2068_v59, 0.0  ;;  %v2071_v4 = vadd.f32 %v11231_v39, %v2070_v19  ;;  %v9582_v59 = vld [vmem:[%s10789_s2 + $0x4] ss:$16 sps:$4 sm:$0xff]   ;;  %v9577_v19 = vld [vmem:[%s10789_s2 + $0xe8] ss:$16 sps:$4 sm:$0xff]  }
 0x40e   : > { %v2197_v50 = vmax.f32 %v2079_v52, 0.0  ;;  %3235 = vmatprep.subr.bf16.mxu1 %v9582_v59 }
 0x40f   : > { %v2226_v54 = vmax.f32 %v2194_v24, %v2196_v55  ;;  %v2195_v61 = vmax.f32 %v2071_v4, 0.0 }
 0x410   : > { %v2302_v38 = vpack.c.bf16 %v2197_v50, %v2196_v55  ;;  %v9579_v55 = vld [vmem:[%s10789_s2 + $0xec] ss:$16 sps:$4 sm:$0xff]  }
 0x411   : > { %v2227_v62 = vmax.f32 %v2195_v61, %v2197_v50  ;;  %v2301_v30 = vpack.c.bf16 %v2195_v61, %v2194_v24  ;;  %v9585_v50 = vld [vmem:[%s10789_s2 + $0x10c] ss:$16 sps:$4 sm:$0xff]  }
 0x413   : > { %2458 = vmatmul.mubr.bf16.vlgmr.msra.gmra.mrb[32].mxu0 %v2301_v30 }
 0x414   : > { %2467 = vmatprep.mubr.bf16.mxu0 %v10159_v7  ;;  %3429 = vmatpush1.bf16.msra.mxu0 %v9556_v17 }
 0x415   : > { %3430 = vmatprep.subr.bf16.mxu0 %v9561_v20 }
 0x418   : > { %3431 = vmatpush1.bf16.msra.mxu0 %v9559_v23 }
 0x419   : > { %v8765_v53 = vpop.f32.mrb[28].mxu0  ;;  %3432 = vmatprep.subr.bf16.mxu0 %v9564_v26 }
 0x41a   : > { %v1892_v42 = vadd.f32 %v8765_v53, %v11150_v60  ;;  %v1883_v25 = vpop.f32.mrb[29].mxu0 }
 0x41b   : > { %v1884_v51 = vadd.f32 %v11150_v60, %v1883_v25  ;;  %v8766_v9 = vpop.f32.mrb[30].mxu0  ;;  %2468 = vmatmul.mubr.bf16.gmra.mrb[36].mxu0 %v2302_v38 }
 0x41c   : > { %v1895_v1 = vadd.f32 %v8766_v9, %v11150_v60  ;;  %v1886_v2 = vpop.f32.mrb[31].mxu0  ;;  %2477 = vmatprep.mubr.bf16.mxu0 %v10159_v7  ;;  %v1928_v27 = vmax.f32 %v1892_v42, 0.0  ;;  %3433 = vmatpush1.bf16.msra.mxu0 %v9562_v32  ;;  %v9583_v42 = vld [vmem:[%s10789_s2 + $0x108] ss:$16 sps:$4 sm:$0xff]   ;;  %v9591_v9 = vld [vmem:[%s10789_s2 + $0x12c] ss:$16 sps:$4 sm:$0xff]  }
 0x41d   : > { %v1887_v3 = vadd.f32 %v11150_v60, %v1886_v2  ;;  %v1926_v36 = vmax.f32 %v1884_v51, 0.0  ;;  %3434 = vmatprep.subr.bf16.mxu0 %v9567_v35 }
 0x41e   : > { %v1929_v58 = vmax.f32 %v1895_v1, 0.0 }
 0x41f   : > { %v1927_v5 = vmax.f32 %v1887_v3, 0.0 }
 0x420   : > { %v1945_v56 = vpack.c.bf16 %v1929_v58, %v1928_v27  ;;  %3435 = vmatpush1.bf16.msra.mxu0 %v9565_v33 }
 0x421   : > { %v1944_v6 = vpack.c.bf16 %v1927_v5, %v1926_v36  ;;  %3436 = vmatprep.subr.bf16.mxu0 %v9570_v21  ;;  %v9589_v5 = vld [vmem:[%s10789_s2 + $0x128] ss:$16 sps:$4 sm:$0xff]  }
 0x423   : > { %8803 = vmatprep.mubr.msk.bf16.mxu1 %vm1688_vm0, %v1944_v6  ;;  %v9597_v6 = vld [vmem:[%s10789_s2 + $0x14c] ss:$16 sps:$4 sm:$0xff]  }
 0x424   : > { %8804 = vmatmul.mubr.msk.bf16.gmra.mrb[28].mxu1 %vm1688_vm0, %v1945_v56  ;;  %3437 = vmatpush1.bf16.msra.mxu0 %v9568_v37 }
 0x425   : > { %2537 = vmatprep.mubr.bf16.mxu1 %v10159_v7  ;;  %3438 = vmatprep.subr.bf16.mxu0 %v9573_v28 }
 0x428   : > { %3439 = vmatpush1.bf16.msra.mxu0 %v9571_v44 }
 0x429   : > { %3440 = vmatprep.subr.bf16.mxu0 %v9576_v0  ;;  %v10160_v0 = vmov 0.0  }
 0x42a   : > { %v8781_v31 = vpop.f32.mrb[4].mxu1  ;;  %940 = vst [vmem:[#allocation2 + $0x18] sm:$0x3f] %v10160_v0  ;;  %v9637_v0 = vld [vmem:[%s10789_s2 + $0x160] ss:$16 sps:$4 sm:$0xff]  }
 0x42b   : > { %v2092_v63 = vadd.f32 %v8781_v31, %v11231_v39  ;;  %v2083_v10 = vpop.f32.mrb[5].mxu1  ;;  %v9595_v31 = vld [vmem:[%s10789_s2 + $0x148] ss:$16 sps:$4 sm:$0xff]  }
 0x42c   : > { %v2084_v60 = vadd.f32 %v11231_v39, %v2083_v10  ;;  %v8782_v11 = vpop.f32.mrb[6].mxu1  ;;  %3441 = vmatpush1.bf16.msra.mxu0 %v9574_v46  ;;  %v9601_v10 = vld [vmem:[%s10789_s2 + $0x168] ss:$16 sps:$4 sm:$0xff]  }
 0x42d   : > { %v2095_v34 = vadd.f32 %v8782_v11, %v11231_v39  ;;  %v2086_v12 = vpop.f32.mrb[7].mxu1  ;;  %v2200_v14 = vmax.f32 %v2092_v63, 0.0  ;;  %3442 = vmatprep.subr.bf16.mxu0 %v9579_v55  ;;  %v9603_v63 = vld [vmem:[%s10789_s2 + $0x16c] ss:$16 sps:$4 sm:$0xff]   ;;  %v9607_v11 = vld [vmem:[%s10789_s2 + $0x188] ss:$16 sps:$4 sm:$0xff]  }
 0x42e   : > { %v2198_v49 = vmax.f32 %v2084_v60, 0.0  ;;  %v2087_v13 = vadd.f32 %v11231_v39, %v2086_v12  ;;  %v9609_v60 = vld [vmem:[%s10789_s2 + $0x18c] ss:$16 sps:$4 sm:$0xff]   ;;  %v9613_v12 = vld [vmem:[%s10789_s2 + $0x1a8] ss:$16 sps:$4 sm:$0xff]  }
 0x42f   : > { %v2201_v29 = vmax.f32 %v2095_v34, 0.0  ;;  %v9615_v34 = vld [vmem:[%s10789_s2 + $0x1ac] ss:$16 sps:$4 sm:$0xff]  }
 0x430   : > { %v2228_v57 = vmax.f32 %v2226_v54, %v2198_v49  ;;  %v2199_v15 = vmax.f32 %v2087_v13, 0.0  ;;  %3443 = vmatpush1.bf16.msra.mxu0 %v9577_v19  ;;  %v9619_v13 = vld [vmem:[%s10789_s2 + $0x1c8] ss:$16 sps:$4 sm:$0xff]  }
 0x431   : > { %v2304_v43 = vpack.c.bf16 %v2201_v29, %v2200_v14  ;;  %3444 = vmatprep.subr.bf16.mxu0 %v9585_v50 }
 0x432   : > { %v2229_v18 = vmax.f32 %v2227_v62, %v2199_v15  ;;  %v2303_v16 = vpack.c.bf16 %v2199_v15, %v2198_v49  ;;  %v2230_v22 = vmax.f32 %v2228_v57, %v2200_v14  ;;  %v9621_v49 = vld [vmem:[%s10789_s2 + $0x1cc] ss:$16 sps:$4 sm:$0xff]   ;;  %v9625_v15 = vld [vmem:[%s10789_s2 + $0x1e8] ss:$16 sps:$4 sm:$0xff]  }
 0x434   : > { %2478 = vmatmul.mubr.bf16.gmra.mrb[40].mxu0 %v2303_v16  ;;  %v2231_v8 = vmax.f32 %v2229_v18, %v2201_v29  ;;  %v9627_v29 = vld [vmem:[%s10789_s2 + $0x1ec] ss:$16 sps:$4 sm:$0xff]  }
 0x435   : > { %2487 = vmatprep.mubr.bf16.mxu0 %v10159_v7  ;;  %3445 = vmatpush1.bf16.msra.mxu0 %v9583_v42  ;;  %v9580_v42 = vld [vmem:[%s10789_s2] ss:$16 sps:$4 sm:$0xff]  }
 0x436   : > { %3446 = vmatprep.subr.bf16.mxu0 %v9591_v9  ;;  %v9588_v9 = vld [vmem:[%s10789_s2 + $0x24] ss:$16 sps:$4 sm:$0xff]  }
 0x439   : > { %3447 = vmatpush1.bf16.msra.mxu0 %v9589_v5  ;;  %v9604_v5 = vld [vmem:[%s10789_s2 + $0x80] ss:$16 sps:$4 sm:$0xff]  }
 0x43a   : > { %3448 = vmatprep.subr.bf16.mxu0 %v9597_v6  ;;  %v9610_v6 = vld [vmem:[%s10789_s2 + $0xa0] ss:$16 sps:$4 sm:$0xff]  }
 0x43c   : > { %2488 = vmatmul.mubr.bf16.gmra.mrb[44].mxu0 %v2304_v43 }
 0x43d   : > { %2497 = vmatprep.mubr.bf16.mxu0 %v10159_v7  ;;  %3449 = vmatpush1.bf16.msra.mxu0 %v9595_v31  ;;  %v9618_v31 = vld [vmem:[%s10789_s2 + $0xc4] ss:$16 sps:$4 sm:$0xff]  }
 0x43e   : > { %3450 = vmatprep.subr.bf16.mxu0 %v9603_v63  ;;  %v9616_v63 = vld [vmem:[%s10789_s2 + $0xc0] ss:$16 sps:$4 sm:$0xff]  }
 0x441   : > { %3451 = vmatpush1.bf16.msra.mxu0 %v9601_v10  ;;  %v9624_v10 = vld [vmem:[%s10789_s2 + $0xe4] ss:$16 sps:$4 sm:$0xff]  }
 0x442   : > { %3452 = vmatprep.subr.bf16.mxu0 %v9609_v60 }
 0x445   : > { %3453 = vmatpush1.bf16.msra.mxu0 %v9607_v11 }
 0x446   : > { %3454 = vmatprep.subr.bf16.mxu0 %v9615_v34 }
 0x449   : > { %3455 = vmatpush1.bf16.msra.mxu0 %v9613_v12 }
 0x44a   : > { %v8785_v52 = vpop.f32.mrb[8].mxu1  ;;  %3456 = vmatprep.subr.bf16.mxu0 %v9621_v49 }
 0x44b   : > { %v2108_v24 = vadd.f32 %v8785_v52, %v11231_v39  ;;  %v2099_v4 = vpop.f32.mrb[9].mxu1 }
 0x44c   : > { %v2100_v54 = vadd.f32 %v11231_v39, %v2099_v4  ;;  %v8786_v61 = vpop.f32.mrb[10].mxu1 }
 0x44d   : > { %v2111_v38 = vadd.f32 %v8786_v61, %v11231_v39  ;;  %v2102_v62 = vpop.f32.mrb[11].mxu1  ;;  %v2204_v25 = vmax.f32 %v2108_v24, 0.0  ;;  %3457 = vmatpush1.bf16.msra.mxu0 %v9619_v13  ;;  %v9622_v13 = vld [vmem:[%s10789_s2 + $0xe0] ss:$16 sps:$4 sm:$0xff]  }
 0x44e   : > { %v2202_v30 = vmax.f32 %v2100_v54, 0.0  ;;  %v2103_v53 = vadd.f32 %v11231_v39, %v2102_v62  ;;  %3458 = vmatprep.subr.bf16.mxu0 %v9627_v29 }
 0x44f   : > { %v2205_v51 = vmax.f32 %v2111_v38, 0.0 }
 0x450   : > { %v2232_v1 = vmax.f32 %v2230_v22, %v2202_v30  ;;  %v2203_v2 = vmax.f32 %v2103_v53, 0.0 }
 0x451   : > { %v2306_v3 = vpack.c.bf16 %v2205_v51, %v2204_v25  ;;  %3459 = vmatpush1.bf16.msra.mxu0 %v9625_v15 }
 0x452   : > { %v2233_v27 = vmax.f32 %v2231_v8, %v2203_v2  ;;  %v2305_v58 = vpack.c.bf16 %v2203_v2, %v2202_v30  ;;  %v2234_v36 = vmax.f32 %v2232_v1, %v2204_v25  ;;  %v9586_v1 = vld [vmem:[%s10789_s2 + $0x20] ss:$16 sps:$4 sm:$0xff]   ;;  %v9594_v2 = vld [vmem:[%s10789_s2 + $0x44] ss:$16 sps:$4 sm:$0xff]  }
 0x454   : > { %2498 = vmatmul.mubr.bf16.gmra.mrb[48].mxu0 %v2305_v58  ;;  %v2235_v56 = vmax.f32 %v2233_v27, %v2205_v51  ;;  %v9600_v27 = vld [vmem:[%s10789_s2 + $0x64] ss:$16 sps:$4 sm:$0xff]   ;;  %v9598_v58 = vld [vmem:[%s10789_s2 + $0x60] ss:$16 sps:$4 sm:$0xff]  }
 0x455   : > { %2507 = vmatprep.mubr.bf16.mxu0 %v10159_v7 }
 0x45c   : > { %2508 = vmatmul.mubr.bf16.gmra.mrb[52].mxu0 %v2306_v3  ;;  %v9592_v3 = vld [vmem:[%s10789_s2 + $0x40] ss:$16 sps:$4 sm:$0xff]  }
 0x45d   : > { %2517 = vmatprep.mubr.bf16.mxu0 %v10159_v7 }
 0x46b   : > { %v8789_v14 = vpop.f32.mrb[12].mxu1 }
 0x46c   : > { %v2124_v40 = vadd.f32 %v8789_v14, %v11231_v39  ;;  %v2115_v57 = vpop.f32.mrb[13].mxu1 }
 0x46d   : > { %v2116_v17 = vadd.f32 %v11231_v39, %v2115_v57  ;;  %v8790_v43 = vpop.f32.mrb[14].mxu1 }
 0x46e   : > { %v2127_v18 = vadd.f32 %v8790_v43, %v11231_v39  ;;  %v2118_v16 = vpop.f32.mrb[15].mxu1  ;;  %v2208_v8 = vmax.f32 %v2124_v40, 0.0  ;;  %v9630_v40 = vld [vmem:[%s10789_s2 + $0x104] ss:$16 sps:$4 sm:$0xff]  }
 0x46f   : > { %v2206_v22 = vmax.f32 %v2116_v17, 0.0  ;;  %v2119_v20 = vadd.f32 %v11231_v39, %v2118_v16 }
 0x470   : > { %v2209_v23 = vmax.f32 %v2127_v18, 0.0 }
 0x471   : > { %v2236_v26 = vmax.f32 %v2234_v36, %v2206_v22  ;;  %v2207_v32 = vmax.f32 %v2119_v20, 0.0  ;;  %v9606_v36 = vld [vmem:[%s10789_s2 + $0x84] ss:$16 sps:$4 sm:$0xff]   ;;  %v9628_v20 = vld [vmem:[%s10789_s2 + $0x100] ss:$16 sps:$4 sm:$0xff]  }
 0x472   : > { %v2308_v33 = vpack.c.bf16 %v2209_v23, %v2208_v8 }
 0x473   : > { %v2238_v35 = vmax.f32 %v2236_v26, %v2208_v8  ;;  %v2237_v21 = vmax.f32 %v2235_v56, %v2207_v32  ;;  %v2307_v37 = vpack.c.bf16 %v2207_v32, %v2206_v22  ;;  %v9612_v56 = vld [vmem:[%s10789_s2 + $0xa4] ss:$16 sps:$4 sm:$0xff]  }
 0x474   : > { %v9633_v32 = vld [vmem:[%s10789_s2 + $0x124] ss:$16 sps:$4 sm:$0xff]  }
 0x475   : > { %v2239_v44 = vmax.f32 %v2237_v21, %v2209_v23  ;;  %2518 = vmatmul.mubr.bf16.gmra.mrb[56].mxu0 %v2307_v37  ;;  %v9636_v21 = vld [vmem:[%s10789_s2 + $0x144] ss:$16 sps:$4 sm:$0xff]   ;;  %v9634_v37 = vld [vmem:[%s10789_s2 + $0x140] ss:$16 sps:$4 sm:$0xff]  }
 0x476   : > { %2527 = vmatprep.mubr.bf16.mxu0 %v10159_v7 }
 0x477   : > { %v11296_v28 = vmax.f32 %v2238_v35, %v2239_v44  ;;  %v9631_v35 = vld [vmem:[%s10789_s2 + $0x120] ss:$16 sps:$4 sm:$0xff]   ;;  %v9639_v44 = vld [vmem:[%s10789_s2 + $0x164] ss:$16 sps:$4 sm:$0xff]  }
 0x47d   : > { %2528 = vmatmul.mubr.bf16.gmra.mrb[60].mxu0 %v2308_v33 }
 0x490   : > { %v8793_v59 = vpop.f32.mrb[16].mxu1 }
 0x491   : > { %v2140_v46 = vadd.f32 %v8793_v59, %v11231_v39  ;;  %v2131_v55 = vpop.f32.mrb[17].mxu1  ;;  %v9642_v59 = vld [vmem:[%s10789_s2 + $0x184] ss:$16 sps:$4 sm:$0xff]  }
 0x492   : > { %v2132_v52 = vadd.f32 %v11231_v39, %v2131_v55  ;;  %v8794_v19 = vpop.f32.mrb[18].mxu1  ;;  %v9645_v55 = vld [vmem:[%s10789_s2 + $0x1a4] ss:$16 sps:$4 sm:$0xff]  }
 0x493   : > { %v2212_v24 = vmax.f32 %v2140_v46, 0.0  ;;  %v2143_v4 = vadd.f32 %v8794_v19, %v11231_v39  ;;  %v2134_v50 = vpop.f32.mrb[19].mxu1  ;;  %v9640_v46 = vld [vmem:[%s10789_s2 + $0x180] ss:$16 sps:$4 sm:$0xff]   ;;  %v9648_v19 = vld [vmem:[%s10789_s2 + $0x1c4] ss:$16 sps:$4 sm:$0xff]  }
 0x494   : > { %v2210_v54 = vmax.f32 %v2132_v52, 0.0  ;;  %v2135_v61 = vadd.f32 %v11231_v39, %v2134_v50  ;;  %v9643_v52 = vld [vmem:[%s10789_s2 + $0x1a0] ss:$16 sps:$4 sm:$0xff]  }
 0x495   : > { %v2213_v38 = vmax.f32 %v2143_v4, 0.0  ;;  %v9651_v4 = vld [vmem:[%s10789_s2 + $0x1e4] ss:$16 sps:$4 sm:$0xff]   ;;  %v9649_v50 = vld [vmem:[%s10789_s2 + $0x1e0] ss:$16 sps:$4 sm:$0xff]  }
 0x496   : > { %v2247_v62 = vmax.f32 %v2210_v54, %v2212_v24  ;;  %v2211_v30 = vmax.f32 %v2135_v61, 0.0 }
 0x497   : > { %v2310_v53 = vpack.c.bf16 %v2213_v38, %v2212_v24  ;;  %v9646_v24 = vld [vmem:[%s10789_s2 + $0x1c0] ss:$16 sps:$4 sm:$0xff]  }
 0x498   : > { %v2248_v25 = vmax.f32 %v2211_v30, %v2213_v38  ;;  %v2309_v51 = vpack.c.bf16 %v2211_v30, %v2210_v54 }
 0x49a   : > { %2538 = vmatmul.mubr.bf16.vlgmr.msra.gmra.mrb[32].mxu1 %v2309_v51 }
 0x49b   : > { %2547 = vmatprep.mubr.bf16.mxu1 %v10159_v7  ;;  %3236 = vmatpush1.bf16.msra.mxu1 %v9580_v42 }
 0x49c   : > { %3237 = vmatprep.subr.bf16.mxu1 %v9588_v9 }
 0x49f   : > { %3238 = vmatpush1.bf16.msra.mxu1 %v9586_v1 }
 0x4a0   : > { %3239 = vmatprep.subr.bf16.mxu1 %v9594_v2 }
 0x4a2   : > { %2548 = vmatmul.mubr.bf16.gmra.mrb[36].mxu1 %v2310_v53 }
 0x4a3   : > { %2557 = vmatprep.mubr.bf16.mxu1 %v10159_v7  ;;  %3240 = vmatpush1.bf16.msra.mxu1 %v9592_v3 }
 0x4a4   : > { %3241 = vmatprep.subr.bf16.mxu1 %v9600_v27 }
 0x4a7   : > { %3242 = vmatpush1.bf16.msra.mxu1 %v9598_v58 }
 0x4a8   : > { %3243 = vmatprep.subr.bf16.mxu1 %v9606_v36 }
 0x4ab   : > { %3244 = vmatpush1.bf16.msra.mxu1 %v9604_v5 }
 0x4ac   : > { %3245 = vmatprep.subr.bf16.mxu1 %v9612_v56  ;;  %v2333_v56 = vld [vmem:[%s10782_s27] sm:$0x3] }
 0x4af   : > { %3246 = vmatpush1.bf16.msra.mxu1 %v9610_v6 }
 0x4b0   : > { %3247 = vmatprep.subr.bf16.mxu1 %v9618_v31  ;;  %v11348_v31 = vrot.slane %v2333_v56, %v10929_v48 }
 0x4b1   : > { %v8797_v60 = vpop.f32.mrb[20].mxu1 }
 0x4b2   : > { %v2156_v11 = vadd.f32 %v8797_v60, %v11231_v39  ;;  %v2147_v34 = vpop.f32.mrb[21].mxu1 }
 0x4b3   : > { %v2148_v12 = vadd.f32 %v11231_v39, %v2147_v34  ;;  %v8798_v49 = vpop.f32.mrb[22].mxu1  ;;  %3248 = vmatpush1.bf16.msra.mxu1 %v9616_v63  ;;  %v11351_v63 = vrot.slane %v2333_v56, %v10921_v45 }
 0x4b4   : > { %v2159_v14 = vadd.f32 %v8798_v49, %v11231_v39  ;;  %v2150_v29 = vpop.f32.mrb[23].mxu1  ;;  %3249 = vmatprep.subr.bf16.mxu1 %v9624_v10  ;;  %v2216_v17 = vmax.f32 %v2156_v11, 0.0 }
 0x4b5   : > { %v2214_v57 = vmax.f32 %v2148_v12, 0.0  ;;  %v2151_v15 = vadd.f32 %v11231_v39, %v2150_v29 }
 0x4b6   : > { %v2217_v43 = vmax.f32 %v2159_v14, 0.0 }
 0x4b7   : > { %v2249_v18 = vmax.f32 %v2247_v62, %v2214_v57  ;;  %v2215_v16 = vmax.f32 %v2151_v15, 0.0  ;;  %3250 = vmatpush1.bf16.msra.mxu1 %v9622_v13 }
 0x4b8   : > { %v2312_v22 = vpack.c.bf16 %v2217_v43, %v2216_v17  ;;  %3251 = vmatprep.subr.bf16.mxu1 %v9630_v40 }
 0x4b9   : > { %v2250_v8 = vmax.f32 %v2248_v25, %v2215_v16  ;;  %v2311_v23 = vpack.c.bf16 %v2215_v16, %v2214_v57  ;;  %v2251_v26 = vmax.f32 %v2249_v18, %v2216_v17 }
 0x4bb   : > { %2558 = vmatmul.mubr.bf16.gmra.mrb[40].mxu1 %v2311_v23  ;;  %v2252_v33 = vmax.f32 %v2250_v8, %v2217_v43 }
 0x4bc   : > { %2567 = vmatprep.mubr.bf16.mxu1 %v10159_v7  ;;  %3252 = vmatpush1.bf16.msra.mxu1 %v9628_v20 }
 0x4bd   : > { %3253 = vmatprep.subr.bf16.mxu1 %v9633_v32 }
 0x4c0   : > { %3254 = vmatpush1.bf16.msra.mxu1 %v9631_v35 }
 0x4c1   : > { %3255 = vmatprep.subr.bf16.mxu1 %v9636_v21 }
 0x4c3   : > { %2568 = vmatmul.mubr.bf16.gmra.mrb[44].mxu1 %v2312_v22 }
 0x4c4   : > { %2577 = vmatprep.mubr.bf16.mxu1 %v10159_v7  ;;  %3256 = vmatpush1.bf16.msra.mxu1 %v9634_v37 }
 0x4c5   : > { %3257 = vmatprep.subr.bf16.mxu1 %v9639_v44 }
 0x4c8   : > { %3258 = vmatpush1.bf16.msra.mxu1 %v9637_v0 }
 0x4c9   : > { %3259 = vmatprep.subr.bf16.mxu1 %v9642_v59 }
 0x4cc   : > { %3260 = vmatpush1.bf16.msra.mxu1 %v9640_v46 }
 0x4cd   : > { %3261 = vmatprep.subr.bf16.mxu1 %v9645_v55 }
 0x4d0   : > { %3262 = vmatpush1.bf16.msra.mxu1 %v9643_v52 }
 0x4d1   : > { %3263 = vmatprep.subr.bf16.mxu1 %v9648_v19 }
 0x4d4   : > { %3264 = vmatpush1.bf16.msra.mxu1 %v9646_v24 }
 0x4d5   : > { %3265 = vmatprep.subr.bf16.mxu1 %v9651_v4 }
 0x4d6   : > { %v8801_v54 = vpop.f32.mrb[24].mxu1 }
 0x4d7   : > { %v2172_v61 = vadd.f32 %v8801_v54, %v11231_v39  ;;  %v2163_v38 = vpop.f32.mrb[25].mxu1 }
 0x4d8   : > { %v2164_v62 = vadd.f32 %v11231_v39, %v2163_v38  ;;  %v8802_v30 = vpop.f32.mrb[26].mxu1  ;;  %3266 = vmatpush1.bf16.msra.mxu1 %v9649_v50 }
 0x4d9   : > { %v2175_v53 = vadd.f32 %v8802_v30, %v11231_v39  ;;  %v2166_v42 = vpop.f32.mrb[27].mxu1  ;;  %v2220_v9 = vmax.f32 %v2172_v61, 0.0 }
 0x4da   : > { %v2218_v25 = vmax.f32 %v2164_v62, 0.0  ;;  %v2167_v51 = vadd.f32 %v11231_v39, %v2166_v42  ;;  %v2241_v62 = vrot.slane %v11296_v28, 4 }
 0x4db   : > { %v2221_v1 = vmax.f32 %v2175_v53, 0.0 }
 0x4dc   : > { %v2253_v2 = vmax.f32 %v2251_v26, %v2218_v25  ;;  %v2219_v3 = vmax.f32 %v2167_v51, 0.0 }
 0x4dd   : > { %v2314_v27 = vpack.c.bf16 %v2221_v1, %v2220_v9 }
 0x4de   : > { %v2254_v58 = vmax.f32 %v2252_v33, %v2219_v3  ;;  %v2313_v36 = vpack.c.bf16 %v2219_v3, %v2218_v25  ;;  %v2255_v5 = vmax.f32 %v2253_v2, %v2220_v9  ;;  %v2242_v3 = vmax.f32 %v11296_v28, %v2241_v62 }
 0x4e0   : > { %2578 = vmatmul.mubr.bf16.gmra.mrb[48].mxu1 %v2313_v36  ;;  %v2256_v6 = vmax.f32 %v2254_v58, %v2221_v1 }
 0x4e1   : > { %2587 = vmatprep.mubr.bf16.mxu1 %v10159_v7 }
 0x4e6   : > { %v2459_v10 = vpop.f32.mrb[32].mxu0 }
 0x4e7   : > { %v2460_v60 = vadd.f32 %v2459_v10, %v11348_v31  ;;  %v2461_v11 = vpop.f32.mrb[33].mxu0 }
 0x4e8   : > { %v2462_v34 = vadd.f32 %v2461_v11, %v11351_v63  ;;  %v2463_v12 = vpop.f32.mrb[34].mxu0  ;;  %2588 = vmatmul.mubr.bf16.gmra.mrb[52].mxu1 %v2314_v27 }
 0x4e9   : > { %v2464_v49 = vadd.f32 %v2463_v12, %v11348_v31  ;;  %v2465_v13 = vpop.f32.mrb[35].mxu0  ;;  %2597 = vmatprep.mubr.bf16.mxu1 %v10159_v7  ;;  %v2618_v29 = vmax.f32 %v2460_v60, 0.0  ;;  %v2243_v60 = vrot.slane %v2242_v3, 2 }
 0x4ea   : > { %v2466_v14 = vadd.f32 %v2465_v13, %v11351_v63  ;;  %v2619_v57 = vmax.f32 %v2462_v34, 0.0 }
 0x4eb   : > { %v2620_v40 = vmax.f32 %v2464_v49, 0.0  ;;  %v2244_v12 = vmax.f32 %v2242_v3, %v2243_v60  ;;  %v10161_v49 = vmov 1983009808  }
 0x4ec   : > { %v2621_v15 = vmax.f32 %v2466_v14, 0.0 }
 0x4ed   : > { %v2682_v17 = vmax.f32 %v2618_v29, %v2620_v40  ;;  %v11358_v43 = vpack.c.bf16 %v2620_v40, %v2618_v29 }
 0x4ee   : > { %v2703_v18 = vmax.f32 %v2619_v57, %v2621_v15  ;;  %v11360_v16 = vpack.c.bf16 %v2621_v15, %v2619_v57  ;;  %v2469_v22 = vpop.f32.mrb[36].mxu0  ;;  %v2245_v57 = vrot.slane %v2244_v12, 1 }
 0x4ef   : > { %v2470_v20 = vadd.f32 %v2469_v22, %v11348_v31  ;;  %v2471_v8 = vpop.f32.mrb[37].mxu0 }
 0x4f0   : > { %v2472_v23 = vadd.f32 %v2471_v8, %v11351_v63  ;;  %v2473_v26 = vpop.f32.mrb[38].mxu0  ;;  %3460 = vmatprep.mubr.bf16.mxu0 %v11360_v16 }
 0x4f1   : > { %v2622_v32 = vmax.f32 %v2470_v20, 0.0  ;;  %v2474_v33 = vadd.f32 %v2473_v26, %v11348_v31  ;;  %v2475_v35 = vpop.f32.mrb[39].mxu0  ;;  %3461 = vmatmul.mubr.bf16.vlgmr.msra.gmra.mrb[64].mxu0 %v11358_v43 }
 0x4f2   : > { %v2623_v21 = vmax.f32 %v2472_v23, 0.0  ;;  %v2476_v37 = vadd.f32 %v2475_v35, %v11351_v63 }
 0x4f3   : > { %v2683_v44 = vmax.f32 %v2682_v17, %v2622_v32  ;;  %v2624_v0 = vmax.f32 %v2474_v33, 0.0 }
 0x4f4   : > { %v2704_v59 = vmax.f32 %v2703_v18, %v2623_v21  ;;  %v2625_v46 = vmax.f32 %v2476_v37, 0.0 }
 0x4f5   : > { %v2684_v55 = vmax.f32 %v2683_v44, %v2624_v0  ;;  %v11368_v52 = vpack.c.bf16 %v2624_v0, %v2622_v32 }
 0x4f6   : > { %v2705_v19 = vmax.f32 %v2704_v59, %v2625_v46  ;;  %v11370_v24 = vpack.c.bf16 %v2625_v46, %v2623_v21  ;;  %v2246_v21 = vmax.f32 %v2244_v12, %v2245_v57  ;;  %v4034_v12 = vld [vmem:[%s10801_s22] sm:$0xff] }
 0x4f7   : > { %v8805_v4 = vpop.f32.mrb[28].mxu1 }
 0x4f8   : > { %v2188_v50 = vadd.f32 %v8805_v4, %v11231_v39  ;;  %v2179_v54 = vpop.f32.mrb[29].mxu1  ;;  %3470 = vmatprep.mubr.bf16.mxu0 %v11370_v24 }
 0x4f9   : > { %v2180_v61 = vadd.f32 %v11231_v39, %v2179_v54  ;;  %v8806_v38 = vpop.f32.mrb[30].mxu1  ;;  %3471 = vmatmul.mubr.bf16.gmra.mrb[68].mxu0 %v11368_v52 }
 0x4fa   : > { %v2191_v30 = vadd.f32 %v8806_v38, %v11231_v39  ;;  %v2182_v53 = vpop.f32.mrb[31].mxu1  ;;  %v2224_v51 = vmax.f32 %v2188_v50, 0.0 }
 0x4fb   : > { %v2222_v42 = vmax.f32 %v2180_v61, 0.0  ;;  %v2183_v25 = vadd.f32 %v11231_v39, %v2182_v53  ;;  %v2272_v39 = vunpack.c.l.s4 %v10161_v49  ;;  %v4038_v49 = vld [vmem:[%s10801_s22 + $0x20] sm:$0xff] }
 0x4fc   : > { %v2225_v9 = vmax.f32 %v2191_v30, 0.0 }
 0x4fd   : > { %v2257_v1 = vmax.f32 %v2255_v5, %v2222_v42  ;;  %v2223_v2 = vmax.f32 %v2183_v25, 0.0  ;;  %v2273_v15 = vunpack.c.0.s8 %v2272_v39  ;;  %v4035_v39 = vld [vmem:[%s10801_s22 + $0x8] sm:$0xff] }
 0x4fe   : > { %v2316_v27 = vpack.c.bf16 %v2225_v9, %v2224_v51 }
 0x4ff   : > { %v2259_v58 = vmax.f32 %v2257_v1, %v2224_v51  ;;  %v2258_v36 = vmax.f32 %v2256_v6, %v2223_v2  ;;  %v2315_v56 = vpack.c.bf16 %v2223_v2, %v2222_v42  ;;  %v11387_v37 = vsub.s32 %v2273_v15, %v10911_v41 }
 0x501   : > { %v2260_v10 = vmax.f32 %v2258_v36, %v2225_v9  ;;  %2598 = vmatmul.mubr.bf16.gmra.mrb[56].mxu1 %v2315_v56 }
 0x502   : > { %2607 = vmatprep.mubr.bf16.mxu1 %v10159_v7 }
 0x503   : > { %v2261_v11 = vmax.f32 %v2259_v58, %v2260_v10 }
 0x505   : > { %v2262_v34 = vrot.slane %v2261_v11, 4 }
 0x507   : > { %v2263_v13 = vmax.f32 %v2261_v11, %v2262_v34  ;;  %v2479_v14 = vpop.f32.mrb[40].mxu0 }
 0x508   : > { %v2480_v5 = vadd.f32 %v2479_v14, %v11348_v31  ;;  %v2481_v29 = vpop.f32.mrb[41].mxu0  ;;  %v8412_v14 = vcombine.high %v4034_v12, %v4038_v49 }
 0x509   : > { %v2264_v28 = vrot.slane %v2263_v13, 2  ;;  %v2482_v40 = vadd.f32 %v2481_v29, %v11351_v63  ;;  %v2483_v6 = vpop.f32.mrb[42].mxu0  ;;  %2608 = vmatmul.mubr.bf16.gmra.mrb[60].mxu1 %v2316_v27  ;;  %v2268_v27 = vld [vmem:[#allocation2 + $0x1c] sm:$0x3] }
 0x50a   : > { %v2626_v17 = vmax.f32 %v2480_v5, 0.0  ;;  %v2484_v7 = vadd.f32 %v2483_v6, %v11348_v31  ;;  %v2485_v18 = vpop.f32.mrb[43].mxu0  ;;  %3267 = vmatprep.mubr.bf16.mxu1 %v11360_v16  ;;  %v4039_v5 = vld [vmem:[%s10801_s22 + $0x28] sm:$0xff]  ;;  %5612 = vmatprep.subr.bf16.mxu1 %v8412_v14  ;;  %v4062_v14 = vld [vmem:[%s10801_s22 + $0xe0] sm:$0xff] }
 0x50b   : > { %v2265_v22 = vmax.f32 %v2263_v13, %v2264_v28  ;;  %v2627_v20 = vmax.f32 %v2482_v40, 0.0  ;;  %v2486_v8 = vadd.f32 %v2485_v18, %v11351_v63  ;;  %v8411_v13 = vcombine.low %v4034_v12, %v4038_v49 }
 0x50c   : > { %v2685_v23 = vmax.f32 %v2684_v55, %v2626_v17  ;;  %v2628_v26 = vmax.f32 %v2484_v7, 0.0  ;;  %v8413_v29 = vcombine.low %v4035_v39, %v4039_v5  ;;  %v8414_v28 = vcombine.high %v4035_v39, %v4039_v5  ;;  %v4059_v5 = vld [vmem:[%s10801_s22 + $0xc8] sm:$0xff] }
 0x50d   : > { %v2266_v32 = vrot.slane %v2265_v22, 1  ;;  %v2706_v33 = vmax.f32 %v2705_v19, %v2627_v20  ;;  %v2629_v35 = vmax.f32 %v2486_v8, 0.0  ;;  %v2277_v19 = vrot.slane %v2246_v21, %v11387_v37 }
 0x50e   : > { %v2686_v44 = vmax.f32 %v2685_v23, %v2628_v26  ;;  %v2801_v0 = vpack.c.bf16 %v2628_v26, %v2626_v17  ;;  %5998 = vmatprep.subr.bf16.mxu0 %v8414_v28  ;;  %v4063_v28 = vld [vmem:[%s10801_s22 + $0xe8] sm:$0xff] }
 0x50f   : > { %v2267_v59 = vmax.f32 %v2265_v22, %v2266_v32  ;;  %v2707_v46 = vmax.f32 %v2706_v33, %v2629_v35  ;;  %v2802_v4 = vpack.c.bf16 %v2629_v35, %v2627_v20  ;;  %v2489_v50 = vpop.f32.mrb[44].mxu0  ;;  %5999 = vmatpush1.bf16.msra.mxu0 %v8413_v29 }
 0x510   : > { %v2490_v16 = vadd.f32 %v2489_v50, %v11348_v31  ;;  %v2491_v54 = vpop.f32.mrb[45].mxu0  ;;  %v4046_v50 = vld [vmem:[%s10801_s22 + $0x60] sm:$0xff] }
 0x511   : > { %v2284_v61 = vrot.slane %v2267_v59, %v11387_v37  ;;  %v2492_v55 = vadd.f32 %v2491_v54, %v11351_v63  ;;  %v2493_v38 = vpop.f32.mrb[46].mxu0  ;;  %3268 = vmatmul.mubr.bf16.vlgmr.msra.gmra.mrb[64].mxu1 %v11358_v43  ;;  %3480 = vmatprep.mubr.bf16.mxu0 %v2802_v4 }
 0x512   : > { %v2630_v62 = vmax.f32 %v2490_v16, 0.0  ;;  %v2494_v30 = vadd.f32 %v2493_v38, %v11348_v31  ;;  %v2495_v53 = vpop.f32.mrb[47].mxu0  ;;  %3277 = vmatprep.mubr.bf16.mxu1 %v11370_v24  ;;  %3481 = vmatmul.mubr.bf16.gmra.mrb[72].mxu0 %v2801_v0  ;;  %v4043_v16 = vld [vmem:[%s10801_s22 + $0x48] sm:$0xff] }
 0x513   : > { %v2289_v42 = vrot.slane %v2284_v61, 7  ;;  %v2631_v25 = vmax.f32 %v2492_v55, 0.0  ;;  %v2496_v51 = vadd.f32 %v2495_v53, %v11351_v63  ;;  %5613 = vmatpush1.bf16.msra.mxu1 %v8411_v13  ;;  %v4047_v38 = vld [vmem:[%s10801_s22 + $0x68] sm:$0xff]  ;;  %v4058_v13 = vld [vmem:[%s10801_s22 + $0xc0] sm:$0xff] }
 0x514   : > { %v2687_v9 = vmax.f32 %v2686_v44, %v2630_v62  ;;  %v2632_v1 = vmax.f32 %v2494_v30, 0.0  ;;  %v8436_v29 = vcombine.high %v4058_v13, %v4062_v14 }
 0x515   : > { %v2291_v43 = vsel %vm2290_vm1, %v2289_v42, %v2277_v19  ;;  %v2708_v2 = vmax.f32 %v2707_v46, %v2631_v25  ;;  %v2633_v3 = vmax.f32 %v2496_v51, 0.0 }
 0x516   : > { %v2293_v58 = vsel %vm2292_vm2, %v2289_v42, %v2291_v43  ;;  %v2688_v24 = vmax.f32 %v2687_v9, %v2632_v1  ;;  %v2803_v36 = vpack.c.bf16 %v2632_v1, %v2630_v62  ;;  %v8422_v9 = vcombine.high %v4043_v16, %v4047_v38 }
 0x517   : > { %v2295_v56 = vsel %vm2294_vm3, %v2289_v42, %v2293_v58  ;;  %v2709_v10 = vmax.f32 %v2708_v2, %v2633_v3  ;;  %v2804_v60 = vpack.c.bf16 %v2633_v3, %v2631_v25  ;;  %v4050_v2 = vld [vmem:[%s10801_s22 + $0x80] sm:$0xff] }
 0x518   : > { %v2297_v11 = vsel %vm2296_vm4, %v2289_v42, %v2295_v56  ;;  %v8421_v42 = vcombine.low %v4043_v16, %v4047_v38  ;;  %v4054_v3 = vld [vmem:[%s10801_s22 + $0xa0] sm:$0xff]  ;;  %6000 = vmatprep.subr.bf16.mxu0 %v8422_v9  ;;  %v4055_v56 = vld [vmem:[%s10801_s22 + $0xa8] sm:$0xff] }
 0x519   : > { %v2299_v34 = vmax.f32 %v2268_v27, %v2297_v11  ;;  %3278 = vmatmul.mubr.bf16.gmra.mrb[68].mxu1 %v11368_v52  ;;  %3490 = vmatprep.mubr.bf16.mxu0 %v2804_v60  ;;  %v4051_v27 = vld [vmem:[%s10801_s22 + $0x88] sm:$0xff]  ;;  %v8427_v11 = vcombine.low %v4050_v2, %v4054_v3 }
 0x51a   : > { %3287 = vmatprep.mubr.bf16.mxu1 %v2802_v4  ;;  %3491 = vmatmul.mubr.bf16.gmra.mrb[76].mxu0 %v2803_v36  ;;  %v4042_v4 = vld [vmem:[%s10801_s22 + $0x40] sm:$0xff]  ;;  %v8430_v49 = vcombine.high %v4051_v27, %v4055_v56  ;;  %v8429_v39 = vcombine.low %v4051_v27, %v4055_v56  ;;  %v4087_v16 = vld [vmem:[%s10801_s22 + $0x1a8] sm:$0xff] }
 0x51b   : > { %2300 = vst [vmem:[#allocation2 + $0x1c] sm:$0x3] %v2299_v34  ;;  %v8420_v55 = vcombine.high %v4042_v4, %v4046_v50  ;;  %v8419_v53 = vcombine.low %v4042_v4, %v4046_v50  ;;  %6001 = vmatpush1.bf16.msra.mxu0 %v8421_v42  ;;  %v4083_v4 = vld [vmem:[%s10801_s22 + $0x188] sm:$0xff] }
 0x51c   : > { %6002 = vmatprep.subr.bf16.mxu0 %v8430_v49  ;;  %v8461_v38 = vcombine.low %v4083_v4, %v4087_v16 }
 0x51d   : > { %5614 = vmatprep.subr.bf16.mxu1 %v8420_v55 }
 0x51e   : > { %5615 = vmatpush1.bf16.msra.mxu1 %v8419_v53 }
 0x51f   : > { %6003 = vmatpush1.bf16.msra.mxu0 %v8429_v39 }
 0x521   : > { %3288 = vmatmul.mubr.bf16.gmra.mrb[72].mxu1 %v2801_v0 }
 0x522   : > { %3297 = vmatprep.mubr.bf16.mxu1 %v2804_v60 }
 0x527   : > { %v2499_v40 = vpop.f32.mrb[48].mxu0 }
 0x528   : > { %v2500_v52 = vadd.f32 %v2499_v40, %v11348_v31  ;;  %v2501_v6 = vpop.f32.mrb[49].mxu0  ;;  %v8435_v40 = vcombine.low %v4058_v13, %v4062_v14  ;;  %v4103_v14 = vld [vmem:[%s10801_s22 + $0x228] sm:$0xff] }
 0x529   : > { %v2502_v57 = vadd.f32 %v2501_v6, %v11351_v63  ;;  %v2503_v15 = vpop.f32.mrb[50].mxu0  ;;  %3298 = vmatmul.mubr.bf16.gmra.mrb[76].mxu1 %v2803_v36  ;;  %v8428_v36 = vcombine.high %v4050_v2, %v4054_v3  ;;  %v8437_v6 = vcombine.low %v4059_v5, %v4063_v28 }
 0x52a   : > { %v2634_v17 = vmax.f32 %v2500_v52, 0.0  ;;  %v2504_v7 = vadd.f32 %v2503_v15, %v11348_v31  ;;  %v2505_v18 = vpop.f32.mrb[51].mxu0  ;;  %v8438_v52 = vcombine.high %v4059_v5, %v4063_v28  ;;  %v4070_v15 = vld [vmem:[%s10801_s22 + $0x120] sm:$0xff] }
 0x52b   : > { %v2635_v22 = vmax.f32 %v2502_v57, 0.0  ;;  %v2506_v20 = vadd.f32 %v2505_v18, %v11351_v63  ;;  %5616 = vmatprep.subr.bf16.mxu1 %v8428_v36  ;;  %v4066_v57 = vld [vmem:[%s10801_s22 + $0x100] sm:$0xff]  ;;  %v4071_v18 = vld [vmem:[%s10801_s22 + $0x128] sm:$0xff] }
 0x52c   : > { %v2689_v8 = vmax.f32 %v2688_v24, %v2634_v17  ;;  %v2636_v23 = vmax.f32 %v2504_v7, 0.0  ;;  %5617 = vmatpush1.bf16.msra.mxu1 %v8427_v11  ;;  %6004 = vmatprep.subr.bf16.mxu0 %v8438_v52  ;;  %v8444_v7 = vcombine.high %v4066_v57, %v4070_v15  ;;  %v4102_v11 = vld [vmem:[%s10801_s22 + $0x220] sm:$0xff] }
 0x52d   : > { %v2710_v26 = vmax.f32 %v2709_v10, %v2635_v22  ;;  %v2637_v32 = vmax.f32 %v2506_v20, 0.0  ;;  %5618 = vmatprep.subr.bf16.mxu1 %v8436_v29  ;;  %6005 = vmatpush1.bf16.msra.mxu0 %v8437_v6 }
 0x52e   : > { %v2690_v33 = vmax.f32 %v2689_v8, %v2636_v23  ;;  %v2805_v35 = vpack.c.bf16 %v2636_v23, %v2634_v17  ;;  %v4067_v17 = vld [vmem:[%s10801_s22 + $0x108] sm:$0xff]  ;;  %v4074_v23 = vld [vmem:[%s10801_s22 + $0x140] sm:$0xff] }
 0x52f   : > { %v2711_v21 = vmax.f32 %v2710_v26, %v2637_v32  ;;  %v2806_v44 = vpack.c.bf16 %v2637_v32, %v2635_v22  ;;  %v2509_v0 = vpop.f32.mrb[52].mxu0  ;;  %v8443_v22 = vcombine.low %v4066_v57, %v4070_v15  ;;  %v8446_v20 = vcombine.high %v4067_v17, %v4071_v18  ;;  %v4078_v26 = vld [vmem:[%s10801_s22 + $0x160] sm:$0xff]  ;;  %v4075_v32 = vld [vmem:[%s10801_s22 + $0x148] sm:$0xff] }
 0x530   : > { %v2510_v59 = vadd.f32 %v2509_v0, %v11348_v31  ;;  %v2511_v46 = vpop.f32.mrb[53].mxu0  ;;  %5619 = vmatpush1.bf16.msra.mxu1 %v8435_v40  ;;  %v8445_v8 = vcombine.low %v4067_v17, %v4071_v18  ;;  %v4110_v18 = vld [vmem:[%s10801_s22 + $0x260] sm:$0xff] }
 0x531   : > { %v2512_v54 = vadd.f32 %v2511_v46, %v11351_v63  ;;  %v2513_v61 = vpop.f32.mrb[54].mxu0  ;;  %3307 = vmatprep.mubr.bf16.mxu1 %v2806_v44  ;;  %3500 = vmatprep.mubr.bf16.mxu0 %v2806_v44  ;;  %v4086_v46 = vld [vmem:[%s10801_s22 + $0x1a0] sm:$0xff] }
 0x532   : > { %v2638_v19 = vmax.f32 %v2510_v59, 0.0  ;;  %v2514_v62 = vadd.f32 %v2513_v61, %v11348_v31  ;;  %v2515_v30 = vpop.f32.mrb[55].mxu0  ;;  %3308 = vmatmul.mubr.bf16.gmra.mrb[80].mxu1 %v2805_v35  ;;  %3501 = vmatmul.mubr.bf16.gmra.mrb[80].mxu0 %v2805_v35  ;;  %v4079_v35 = vld [vmem:[%s10801_s22 + $0x168] sm:$0xff]  ;;  %v4082_v59 = vld [vmem:[%s10801_s22 + $0x180] sm:$0xff]  ;;  %v8462_v61 = vcombine.high %v4083_v4, %v4087_v16 }
 0x533   : > { %v2639_v25 = vmax.f32 %v2512_v54, 0.0  ;;  %v2516_v51 = vadd.f32 %v2515_v30, %v11351_v63  ;;  %5620 = vmatprep.subr.bf16.mxu1 %v8444_v7  ;;  %6006 = vmatprep.subr.bf16.mxu0 %v8446_v20  ;;  %v8454_v44 = vcombine.high %v4075_v32, %v4079_v35  ;;  %v8453_v0 = vcombine.low %v4075_v32, %v4079_v35  ;;  %v4091_v30 = vld [vmem:[%s10801_s22 + $0x1c8] sm:$0xff]  ;;  %v4106_v7 = vld [vmem:[%s10801_s22 + $0x240] sm:$0xff] }
 0x534   : > { %v2691_v1 = vmax.f32 %v2690_v33, %v2638_v19  ;;  %v2640_v43 = vmax.f32 %v2514_v62, 0.0  ;;  %5621 = vmatpush1.bf16.msra.mxu1 %v8443_v22  ;;  %v8452_v33 = vcombine.high %v4074_v23, %v4078_v26  ;;  %6007 = vmatpush1.bf16.msra.mxu0 %v8445_v8  ;;  %v8460_v50 = vcombine.high %v4082_v59, %v4086_v46  ;;  %v4094_v62 = vld [vmem:[%s10801_s22 + $0x1e0] sm:$0xff]  ;;  %v4107_v22 = vld [vmem:[%s10801_s22 + $0x248] sm:$0xff] }
 0x535   : > { %v2712_v58 = vmax.f32 %v2711_v21, %v2639_v25  ;;  %v2641_v24 = vmax.f32 %v2516_v51, 0.0  ;;  %v8451_v21 = vcombine.low %v4074_v23, %v4078_v26  ;;  %6008 = vmatprep.subr.bf16.mxu0 %v8454_v44  ;;  %v8459_v54 = vcombine.low %v4082_v59, %v4086_v46  ;;  %v4095_v51 = vld [vmem:[%s10801_s22 + $0x1e8] sm:$0xff]  ;;  %v4118_v16 = vld [vmem:[%s10801_s22 + $0x2a0] sm:$0xff] }
 0x536   : > { %v11422_v10 = vmax.f32 %v2691_v1, %v2640_v43  ;;  %v2807_v60 = vpack.c.bf16 %v2640_v43, %v2638_v19  ;;  %5622 = vmatprep.subr.bf16.mxu1 %v8452_v33  ;;  %v4090_v19 = vld [vmem:[%s10801_s22 + $0x1c0] sm:$0xff]  ;;  %v8470_v2 = vcombine.high %v4091_v30, %v4095_v51  ;;  %v8469_v56 = vcombine.low %v4091_v30, %v4095_v51  ;;  %v4111_v23 = vld [vmem:[%s10801_s22 + $0x268] sm:$0xff] }
 0x537   : > { %v11424_v34 = vmax.f32 %v2712_v58, %v2641_v24  ;;  %v2808_v12 = vpack.c.bf16 %v2641_v24, %v2639_v25  ;;  %v8468_v25 = vcombine.high %v4090_v19, %v4094_v62  ;;  %v8467_v43 = vcombine.low %v4090_v19, %v4094_v62  ;;  %v4119_v19 = vld [vmem:[%s10801_s22 + $0x2a8] sm:$0xff] }
 0x538   : > { %5623 = vmatpush1.bf16.msra.mxu1 %v8451_v21  ;;  %6009 = vmatpush1.bf16.msra.mxu0 %v8453_v0  ;;  %v8483_v33 = vcombine.low %v4106_v7, %v4110_v18  ;;  %v8486_v0 = vcombine.high %v4107_v22, %v4111_v23  ;;  %v8485_v4 = vcombine.low %v4107_v22, %v4111_v23  ;;  %v4139_v22 = vld [vmem:[%s10801_s22 + $0x348] sm:$0xff] }
 0x539   : > { %3317 = vmatprep.mubr.bf16.mxu1 %v2808_v12  ;;  %3510 = vmatprep.mubr.bf16.mxu0 %v2808_v12  ;;  %v4099_v12 = vld [vmem:[%s10801_s22 + $0x208] sm:$0xff] }
 0x53a   : > { %3318 = vmatmul.mubr.bf16.gmra.mrb[84].mxu1 %v2807_v60  ;;  %3511 = vmatmul.mubr.bf16.gmra.mrb[84].mxu0 %v2807_v60  ;;  %v4098_v60 = vld [vmem:[%s10801_s22 + $0x200] sm:$0xff]  ;;  %v8478_v6 = vcombine.high %v4099_v12, %v4103_v14 }
 0x53b   : > { %5624 = vmatprep.subr.bf16.mxu1 %v8460_v50  ;;  %6010 = vmatprep.subr.bf16.mxu0 %v8462_v61  ;;  %v8476_v13 = vcombine.high %v4098_v60, %v4102_v11  ;;  %v8475_v28 = vcombine.low %v4098_v60, %v4102_v11  ;;  %v4114_v50 = vld [vmem:[%s10801_s22 + $0x280] sm:$0xff] }
 0x53c   : > { %5625 = vmatpush1.bf16.msra.mxu1 %v8459_v54  ;;  %6011 = vmatpush1.bf16.msra.mxu0 %v8461_v38  ;;  %v4115_v54 = vld [vmem:[%s10801_s22 + $0x288] sm:$0xff]  ;;  %v8492_v38 = vcombine.high %v4114_v50, %v4118_v16 }
 0x53d   : > { %5626 = vmatprep.subr.bf16.mxu1 %v8468_v25  ;;  %6012 = vmatprep.subr.bf16.mxu0 %v8470_v2  ;;  %v8494_v51 = vcombine.high %v4115_v54, %v4119_v19  ;;  %v4122_v2 = vld [vmem:[%s10801_s22 + $0x2c0] sm:$0xff] }
 0x540   : > { %5627 = vmatpush1.bf16.msra.mxu1 %v8467_v43  ;;  %6013 = vmatpush1.bf16.msra.mxu0 %v8469_v56  ;;  %v8493_v43 = vcombine.low %v4115_v54, %v4119_v19  ;;  %v4155_v19 = vld [vmem:[%s10801_s22 + $0x3c8] sm:$0xff] }
 0x541   : > { %5628 = vmatprep.subr.bf16.mxu1 %v8476_v13  ;;  %6014 = vmatprep.subr.bf16.mxu0 %v8478_v6  ;;  %v4130_v13 = vld [vmem:[%s10801_s22 + $0x300] sm:$0xff] }
 0x544   : > { %5629 = vmatpush1.bf16.msra.mxu1 %v8475_v28 }
 0x548   : > { %v2519_v55 = vpop.f32.mrb[56].mxu0 }
 0x549   : > { %v2520_v53 = vadd.f32 %v2519_v55, %v11348_v31  ;;  %v2521_v42 = vpop.f32.mrb[57].mxu0 }
 0x54a   : > { %v2522_v9 = vadd.f32 %v2521_v42, %v11351_v63  ;;  %v2523_v1 = vpop.f32.mrb[58].mxu0 }
 0x54b   : > { %v2642_v3 = vmax.f32 %v2520_v53, 0.0  ;;  %v2524_v27 = vadd.f32 %v2523_v1, %v11348_v31  ;;  %v2525_v58 = vpop.f32.mrb[59].mxu0  ;;  %v8491_v53 = vcombine.low %v4114_v50, %v4118_v16  ;;  %v4151_v50 = vld [vmem:[%s10801_s22 + $0x3a8] sm:$0xff] }
 0x54c   : > { %v2643_v24 = vmax.f32 %v2522_v9, 0.0  ;;  %v2526_v36 = vadd.f32 %v2525_v58, %v11351_v63 }
 0x54d   : > { %v2693_v49 = vmax.f32 %v11422_v10, %v2642_v3  ;;  %v2644_v39 = vmax.f32 %v2524_v27, 0.0  ;;  %v8477_v10 = vcombine.low %v4099_v12, %v4103_v14  ;;  %v4123_v27 = vld [vmem:[%s10801_s22 + $0x2c8] sm:$0xff]  ;;  %v4134_v14 = vld [vmem:[%s10801_s22 + $0x320] sm:$0xff] }
 0x54e   : > { %v2714_v5 = vmax.f32 %v11424_v34, %v2643_v24  ;;  %v2645_v29 = vmax.f32 %v2526_v36, 0.0  ;;  %v8484_v34 = vcombine.high %v4106_v7, %v4110_v18  ;;  %v4127_v36 = vld [vmem:[%s10801_s22 + $0x2e8] sm:$0xff]  ;;  %v8508_v28 = vcombine.high %v4130_v13, %v4134_v14  ;;  %v4138_v7 = vld [vmem:[%s10801_s22 + $0x340] sm:$0xff] }
 0x54f   : > { %v2694_v40 = vmax.f32 %v2693_v49, %v2644_v39  ;;  %v2809_v52 = vpack.c.bf16 %v2644_v39, %v2642_v3  ;;  %6015 = vmatpush1.bf16.msra.mxu0 %v8477_v10  ;;  %v4126_v3 = vld [vmem:[%s10801_s22 + $0x2e0] sm:$0xff]  ;;  %v8502_v11 = vcombine.high %v4123_v27, %v4127_v36  ;;  %v8501_v39 = vcombine.low %v4123_v27, %v4127_v36 }
 0x550   : > { %v2715_v57 = vmax.f32 %v2714_v5, %v2645_v29  ;;  %v2810_v15 = vpack.c.bf16 %v2645_v29, %v2643_v24  ;;  %v2529_v17 = vpop.f32.mrb[60].mxu0  ;;  %5630 = vmatprep.subr.bf16.mxu1 %v8484_v34  ;;  %6016 = vmatprep.subr.bf16.mxu0 %v8486_v0  ;;  %v8500_v24 = vcombine.high %v4122_v2, %v4126_v3  ;;  %v4131_v5 = vld [vmem:[%s10801_s22 + $0x308] sm:$0xff]  ;;  %v4142_v18 = vld [vmem:[%s10801_s22 + $0x360] sm:$0xff] }
 0x551   : > { %v2530_v20 = vadd.f32 %v2529_v17, %v11348_v31  ;;  %v2531_v8 = vpop.f32.mrb[61].mxu0  ;;  %5631 = vmatpush1.bf16.msra.mxu1 %v8483_v33  ;;  %v8499_v60 = vcombine.low %v4122_v2, %v4126_v3  ;;  %v8507_v6 = vcombine.low %v4130_v13, %v4134_v14  ;;  %v4143_v34 = vld [vmem:[%s10801_s22 + $0x368] sm:$0xff]  ;;  %v4146_v0 = vld [vmem:[%s10801_s22 + $0x380] sm:$0xff] }
 0x552   : > { %v2532_v26 = vadd.f32 %v2531_v8, %v11351_v63  ;;  %v2533_v32 = vpop.f32.mrb[62].mxu0  ;;  %3327 = vmatprep.mubr.bf16.mxu1 %v2810_v15  ;;  %3520 = vmatprep.mubr.bf16.mxu0 %v2810_v15  ;;  %v8516_v8 = vcombine.high %v4138_v7, %v4142_v18 }
 0x553   : > { %v2646_v35 = vmax.f32 %v2530_v20, 0.0  ;;  %v2534_v21 = vadd.f32 %v2533_v32, %v11348_v31  ;;  %v2535_v44 = vpop.f32.mrb[63].mxu0  ;;  %3328 = vmatmul.mubr.bf16.gmra.mrb[88].mxu1 %v2809_v52  ;;  %3521 = vmatmul.mubr.bf16.gmra.mrb[88].mxu0 %v2809_v52  ;;  %v8518_v32 = vcombine.high %v4139_v22, %v4143_v34 }
 0x554   : > { %v2647_v59 = vmax.f32 %v2532_v26, 0.0  ;;  %v2536_v46 = vadd.f32 %v2535_v44, %v11351_v63  ;;  %5632 = vmatprep.subr.bf16.mxu1 %v8492_v38  ;;  %6017 = vmatpush1.bf16.msra.mxu0 %v8485_v4  ;;  %v8515_v26 = vcombine.low %v4138_v7, %v4142_v18  ;;  %v4158_v38 = vld [vmem:[%s10801_s22 + $0x3e0] sm:$0xff] }
 0x555   : > { %v2695_v61 = vmax.f32 %v2694_v40, %v2646_v35  ;;  %v2648_v55 = vmax.f32 %v2534_v21, 0.0  ;;  %6018 = vmatprep.subr.bf16.mxu0 %v8494_v51  ;;  %5633 = vmatpush1.bf16.msra.mxu1 %v8491_v53  ;;  %v4135_v40 = vld [vmem:[%s10801_s22 + $0x328] sm:$0xff]  ;;  %v8517_v21 = vcombine.low %v4139_v22, %v4143_v34 }
 0x556   : > { %v2716_v62 = vmax.f32 %v2715_v57, %v2647_v59  ;;  %v2649_v30 = vmax.f32 %v2536_v46, 0.0  ;;  %5634 = vmatprep.subr.bf16.mxu1 %v8500_v24  ;;  %v8510_v57 = vcombine.high %v4131_v5, %v4135_v40  ;;  %v8509_v10 = vcombine.low %v4131_v5, %v4135_v40  ;;  %v4147_v46 = vld [vmem:[%s10801_s22 + $0x388] sm:$0xff] }
 0x557   : > { %v2696_v42 = vmax.f32 %v2695_v61, %v2648_v55  ;;  %v2811_v25 = vpack.c.bf16 %v2648_v55, %v2646_v35  ;;  %v8525_v54 = vcombine.low %v4147_v46, %v4151_v50  ;;  %v8526_v61 = vcombine.high %v4147_v46, %v4151_v50  ;;  %v4154_v55 = vld [vmem:[%s10801_s22 + $0x3c0] sm:$0xff] }
 0x558   : > { %v2717_v9 = vmax.f32 %v2716_v62, %v2649_v30  ;;  %v2812_v1 = vpack.c.bf16 %v2649_v30, %v2647_v59  ;;  %6019 = vmatpush1.bf16.msra.mxu0 %v8493_v43  ;;  %v4150_v59 = vld [vmem:[%s10801_s22 + $0x3a0] sm:$0xff]  ;;  %v8532_v62 = vcombine.high %v4154_v55, %v4158_v38  ;;  %v4159_v30 = vld [vmem:[%s10801_s22 + $0x3e8] sm:$0xff]  ;;  %v8531_v53 = vcombine.low %v4154_v55, %v4158_v38 }
 0x559   : > { %v2697_v58 = vrot.slane %v2696_v42, 4  ;;  %6020 = vmatprep.subr.bf16.mxu0 %v8502_v11  ;;  %5635 = vmatpush1.bf16.msra.mxu1 %v8499_v60  ;;  %v8524_v4 = vcombine.high %v4146_v0, %v4150_v59  ;;  %v8523_v16 = vcombine.low %v4146_v0, %v4150_v59 }
 0x55a   : > { %v2718_v56 = vrot.slane %v2717_v9, 4  ;;  %3337 = vmatprep.mubr.bf16.mxu1 %v2812_v1  ;;  %3530 = vmatprep.mubr.bf16.mxu0 %v2812_v1 }
 0x55b   : > { %v2698_v12 = vmax.f32 %v2696_v42, %v2697_v58  ;;  %3338 = vmatmul.mubr.bf16.gmra.mrb[92].mxu1 %v2811_v25  ;;  %3531 = vmatmul.mubr.bf16.gmra.mrb[92].mxu0 %v2811_v25  ;;  %v8533_v42 = vcombine.low %v4155_v19, %v4159_v30  ;;  %v8534_v25 = vcombine.high %v4155_v19, %v4159_v30 }
 0x55c   : > { %v2719_v49 = vmax.f32 %v2717_v9, %v2718_v56  ;;  %5636 = vmatprep.subr.bf16.mxu1 %v8508_v28  ;;  %6021 = vmatpush1.bf16.msra.mxu0 %v8501_v39 }
 0x55d   : > { %v2699_v29 = vrot.slane %v2698_v12, 2  ;;  %6022 = vmatprep.subr.bf16.mxu0 %v8510_v57  ;;  %5637 = vmatpush1.bf16.msra.mxu1 %v8507_v6 }
 0x55e   : > { %v2720_v52 = vrot.slane %v2719_v49, 2  ;;  %5638 = vmatprep.subr.bf16.mxu1 %v8516_v8 }
 0x55f   : > { %v2700_v15 = vmax.f32 %v2698_v12, %v2699_v29 }
 0x560   : > { %v2721_v17 = vmax.f32 %v2719_v49, %v2720_v52  ;;  %6023 = vmatpush1.bf16.msra.mxu0 %v8509_v10 }
 0x561   : > { %v2701_v20 = vrot.slane %v2700_v15, 1  ;;  %6024 = vmatprep.subr.bf16.mxu0 %v8518_v32  ;;  %5639 = vmatpush1.bf16.msra.mxu1 %v8515_v26 }
 0x562   : > { %v2722_v23 = vrot.slane %v2721_v17, 1  ;;  %5640 = vmatprep.subr.bf16.mxu1 %v8524_v4 }
 0x563   : > { %v11480_v33 = vmax.f32 %v2700_v15, %v2701_v20 }
 0x564   : > { %v11482_v35 = vmax.f32 %v2721_v17, %v2722_v23  ;;  %6025 = vmatpush1.bf16.msra.mxu0 %v8517_v21 }
 0x565   : > { %6026 = vmatprep.subr.bf16.mxu0 %v8526_v61  ;;  %5641 = vmatpush1.bf16.msra.mxu1 %v8523_v16 }
 0x566   : > { %v2771_v44 = vcombine.low %v11480_v33, %v11482_v35  ;;  %5642 = vmatprep.subr.bf16.mxu1 %v8532_v62 }
 0x568   : > { %6027 = vmatpush1.bf16.msra.mxu0 %v8525_v54 }
 0x569   : > { %6028 = vmatprep.subr.bf16.mxu0 %v8534_v25  ;;  %5643 = vmatpush1.bf16.msra.mxu1 %v8531_v53 }
 0x56c   : > { %6029 = vmatpush1.bf16.msra.mxu0 %v8533_v42 }
 0x56d   : > { %v2539_v51 = vpop.f32.mrb[32].mxu1 }
 0x56e   : > { %v2540_v9 = vadd.f32 %v2539_v51, %v11348_v31  ;;  %v2541_v1 = vpop.f32.mrb[33].mxu1 }
 0x56f   : > { %v2542_v43 = vadd.f32 %v2541_v1, %v11351_v63  ;;  %v2543_v2 = vpop.f32.mrb[34].mxu1 }
 0x570   : > { %v2544_v3 = vadd.f32 %v2543_v2, %v11348_v31  ;;  %v2545_v27 = vpop.f32.mrb[35].mxu1  ;;  %v2650_v24 = vmax.f32 %v2540_v9, 0.0 }
 0x571   : > { %v2546_v58 = vadd.f32 %v2545_v27, %v11351_v63  ;;  %v2651_v56 = vmax.f32 %v2542_v43, 0.0 }
 0x572   : > { %v2652_v36 = vmax.f32 %v2544_v3, 0.0 }
 0x573   : > { %v2653_v60 = vmax.f32 %v2546_v58, 0.0 }
 0x574   : > { %v2724_v11 = vmax.f32 %v2650_v24, %v2652_v36  ;;  %v2813_v12 = vpack.c.bf16 %v2652_v36, %v2650_v24 }
 0x575   : > { %v2745_v49 = vmax.f32 %v2651_v56, %v2653_v60  ;;  %v2814_v39 = vpack.c.bf16 %v2653_v60, %v2651_v56  ;;  %v2549_v13 = vpop.f32.mrb[36].mxu1 }
 0x576   : > { %v2550_v14 = vadd.f32 %v2549_v13, %v11348_v31  ;;  %v2551_v5 = vpop.f32.mrb[37].mxu1 }
 0x577   : > { %v2552_v29 = vadd.f32 %v2551_v5, %v11351_v63  ;;  %v2553_v28 = vpop.f32.mrb[38].mxu1  ;;  %3347 = vmatprep.mubr.bf16.mxu1 %v2814_v39  ;;  %3540 = vmatprep.mubr.bf16.mxu0 %v2814_v39 }
 0x578   : > { %v2654_v40 = vmax.f32 %v2550_v14, 0.0  ;;  %v2554_v52 = vadd.f32 %v2553_v28, %v11348_v31  ;;  %v2555_v6 = vpop.f32.mrb[39].mxu1  ;;  %3348 = vmatmul.mubr.bf16.gmra.mrb[96].mxu1 %v2813_v12  ;;  %3541 = vmatmul.mubr.bf16.gmra.mrb[96].mxu0 %v2813_v12 }
 0x579   : > { %v2655_v57 = vmax.f32 %v2552_v29, 0.0  ;;  %v2556_v15 = vadd.f32 %v2555_v6, %v11351_v63 }
 0x57a   : > { %v2725_v17 = vmax.f32 %v2724_v11, %v2654_v40  ;;  %v2656_v10 = vmax.f32 %v2554_v52, 0.0 }
 0x57b   : > { %v2746_v7 = vmax.f32 %v2745_v49, %v2655_v57  ;;  %v2657_v18 = vmax.f32 %v2556_v15, 0.0 }
 0x57c   : > { %v2726_v22 = vmax.f32 %v2725_v17, %v2656_v10  ;;  %v2815_v20 = vpack.c.bf16 %v2656_v10, %v2654_v40 }
 0x57d   : > { %v2747_v8 = vmax.f32 %v2746_v7, %v2657_v18  ;;  %v2816_v34 = vpack.c.bf16 %v2657_v18, %v2655_v57 }
 0x57f   : > { %3357 = vmatprep.mubr.bf16.mxu1 %v2816_v34  ;;  %3550 = vmatprep.mubr.bf16.mxu0 %v2816_v34 }
 0x580   : > { %3358 = vmatmul.mubr.bf16.gmra.mrb[100].mxu1 %v2815_v20  ;;  %3551 = vmatmul.mubr.bf16.gmra.mrb[100].mxu0 %v2815_v20 }
 0x58e   : > { %v2559_v23 = vpop.f32.mrb[40].mxu1 }
 0x58f   : > { %v2560_v26 = vadd.f32 %v2559_v23, %v11348_v31  ;;  %v2561_v32 = vpop.f32.mrb[41].mxu1 }
 0x590   : > { %v2562_v21 = vadd.f32 %v2561_v32, %v11351_v63  ;;  %v2563_v0 = vpop.f32.mrb[42].mxu1 }
 0x591   : > { %v2658_v59 = vmax.f32 %v2560_v26, 0.0  ;;  %v2564_v46 = vadd.f32 %v2563_v0, %v11348_v31  ;;  %v2565_v4 = vpop.f32.mrb[43].mxu1 }
 0x592   : > { %v2659_v50 = vmax.f32 %v2562_v21, 0.0  ;;  %v2566_v16 = vadd.f32 %v2565_v4, %v11351_v63 }
 0x593   : > { %v2727_v54 = vmax.f32 %v2726_v22, %v2658_v59  ;;  %v2660_v61 = vmax.f32 %v2564_v46, 0.0 }
 0x594   : > { %v2748_v55 = vmax.f32 %v2747_v8, %v2659_v50  ;;  %v2661_v38 = vmax.f32 %v2566_v16, 0.0  ;;  %v12921_v16 = vsub.s32 3, %v10911_v41 }
 0x595   : > { %v2728_v19 = vmax.f32 %v2727_v54, %v2660_v61  ;;  %v2817_v62 = vpack.c.bf16 %v2660_v61, %v2658_v59 }
 0x596   : > { %v2749_v30 = vmax.f32 %v2748_v55, %v2661_v38  ;;  %v2818_v53 = vpack.c.bf16 %v2661_v38, %v2659_v50  ;;  %v2569_v42 = vpop.f32.mrb[44].mxu1  ;;  %v11518_v50 = vld [vmem:[%s10793_s13] sm:$0xf] }
 0x597   : > { %v2570_v25 = vadd.f32 %v2569_v42, %v11348_v31  ;;  %v2571_v51 = vpop.f32.mrb[45].mxu1 }
 0x598   : > { %v2572_v9 = vadd.f32 %v2571_v51, %v11351_v63  ;;  %v2573_v1 = vpop.f32.mrb[46].mxu1  ;;  %3367 = vmatprep.mubr.bf16.mxu1 %v2818_v53  ;;  %3560 = vmatprep.mubr.bf16.mxu0 %v2818_v53 }
 0x599   : > { %v2662_v43 = vmax.f32 %v2570_v25, 0.0  ;;  %v2574_v2 = vadd.f32 %v2573_v1, %v11348_v31  ;;  %v2575_v3 = vpop.f32.mrb[47].mxu1  ;;  %3368 = vmatmul.mubr.bf16.gmra.mrb[104].mxu1 %v2817_v62  ;;  %3561 = vmatmul.mubr.bf16.gmra.mrb[104].mxu0 %v2817_v62  ;;  %v11529_v25 = vrot.slane %v11518_v50, %v12921_v16 }
 0x59a   : > { %v2663_v27 = vmax.f32 %v2572_v9, 0.0  ;;  %v2576_v58 = vadd.f32 %v2575_v3, %v11351_v63 }
 0x59b   : > { %v2729_v24 = vmax.f32 %v2728_v19, %v2662_v43  ;;  %v2664_v36 = vmax.f32 %v2574_v2, 0.0 }
 0x59c   : > { %v2750_v56 = vmax.f32 %v2749_v30, %v2663_v27  ;;  %v2665_v60 = vmax.f32 %v2576_v58, 0.0  ;;  %v11524_v30 = vrot.slane %v11518_v50, %v10926_v47 }
 0x59d   : > { %v2730_v11 = vmax.f32 %v2729_v24, %v2664_v36  ;;  %v2819_v12 = vpack.c.bf16 %v2664_v36, %v2662_v43 }
 0x59e   : > { %v2751_v49 = vmax.f32 %v2750_v56, %v2665_v60  ;;  %v2820_v39 = vpack.c.bf16 %v2665_v60, %v2663_v27 }
 0x5a0   : > { %3377 = vmatprep.mubr.bf16.mxu1 %v2820_v39  ;;  %3570 = vmatprep.mubr.bf16.mxu0 %v2820_v39 }
 0x5a1   : > { %3378 = vmatmul.mubr.bf16.gmra.mrb[108].mxu1 %v2819_v12  ;;  %3571 = vmatmul.mubr.bf16.gmra.mrb[108].mxu0 %v2819_v12 }
 0x5b3   : > { %v2579_v13 = vpop.f32.mrb[48].mxu1 }
 0x5b4   : > { %v2580_v14 = vadd.f32 %v2579_v13, %v11348_v31  ;;  %v2581_v5 = vpop.f32.mrb[49].mxu1 }
 0x5b5   : > { %v2582_v29 = vadd.f32 %v2581_v5, %v11351_v63  ;;  %v2583_v28 = vpop.f32.mrb[50].mxu1 }
 0x5b6   : > { %v2666_v40 = vmax.f32 %v2580_v14, 0.0  ;;  %v2584_v52 = vadd.f32 %v2583_v28, %v11348_v31  ;;  %v2585_v6 = vpop.f32.mrb[51].mxu1 }
 0x5b7   : > { %v2667_v57 = vmax.f32 %v2582_v29, 0.0  ;;  %v2586_v15 = vadd.f32 %v2585_v6, %v11351_v63 }
 0x5b8   : > { %v2731_v17 = vmax.f32 %v2730_v11, %v2666_v40  ;;  %v2668_v10 = vmax.f32 %v2584_v52, 0.0 }
 0x5b9   : > { %v2752_v7 = vmax.f32 %v2751_v49, %v2667_v57  ;;  %v2669_v18 = vmax.f32 %v2586_v15, 0.0 }
 0x5ba   : > { %v2732_v22 = vmax.f32 %v2731_v17, %v2668_v10  ;;  %v2821_v20 = vpack.c.bf16 %v2668_v10, %v2666_v40  ;;  %v11543_v17 = vld [vmem:[%s10801_s22 + $0x400] sm:$0xff] }
 0x5bb   : > { %v2753_v8 = vmax.f32 %v2752_v7, %v2669_v18  ;;  %v2822_v34 = vpack.c.bf16 %v2669_v18, %v2667_v57  ;;  %v2589_v23 = vpop.f32.mrb[52].mxu1  ;;  %v11546_v10 = vld [vmem:[%s10801_s22 + $0x420] sm:$0xff]  ;;  %v11549_v7 = vld [vmem:[%s10801_s22 + $0x408] sm:$0xff] }
 0x5bc   : > { %v2590_v26 = vadd.f32 %v2589_v23, %v11348_v31  ;;  %v2591_v32 = vpop.f32.mrb[53].mxu1 }
 0x5bd   : > { %v2592_v21 = vadd.f32 %v2591_v32, %v11351_v63  ;;  %v2593_v0 = vpop.f32.mrb[54].mxu1  ;;  %3387 = vmatprep.mubr.bf16.mxu1 %v2822_v34  ;;  %3580 = vmatprep.mubr.bf16.mxu0 %v2822_v34 }
 0x5be   : > { %v2670_v59 = vmax.f32 %v2590_v26, 0.0  ;;  %v2594_v46 = vadd.f32 %v2593_v0, %v11348_v31  ;;  %v2595_v4 = vpop.f32.mrb[55].mxu1  ;;  %3388 = vmatmul.mubr.bf16.gmra.mrb[112].mxu1 %v2821_v20  ;;  %3581 = vmatmul.mubr.bf16.gmra.mrb[112].mxu0 %v2821_v20  ;;  %v8540_v20 = vcombine.high %v11543_v17, %v11546_v10 }
 0x5bf   : > { %v2671_v54 = vmax.f32 %v2592_v21, 0.0  ;;  %v2596_v61 = vadd.f32 %v2595_v4, %v11351_v63 }
 0x5c0   : > { %v2733_v55 = vmax.f32 %v2732_v22, %v2670_v59  ;;  %v2672_v38 = vmax.f32 %v2594_v46, 0.0  ;;  %5805 = vmatprep.subr.bf16.mxu1 %v8540_v20  ;;  %v11609_v20 = vld [vmem:[%s10801_s22 + $0x4a0] sm:$0xff] }
 0x5c1   : > { %v2754_v19 = vmax.f32 %v2753_v8, %v2671_v54  ;;  %v2673_v62 = vmax.f32 %v2596_v61, 0.0  ;;  %v11555_v8 = vld [vmem:[%s10801_s22 + $0x428] sm:$0xff] }
 0x5c2   : > { %v2734_v53 = vmax.f32 %v2733_v55, %v2672_v38  ;;  %v2823_v42 = vpack.c.bf16 %v2672_v38, %v2670_v59  ;;  %v8542_v26 = vcombine.high %v11549_v7, %v11555_v8  ;;  %v8541_v35 = vcombine.low %v11549_v7, %v11555_v8 }
 0x5c3   : > { %v2755_v51 = vmax.f32 %v2754_v19, %v2673_v62  ;;  %v2824_v9 = vpack.c.bf16 %v2673_v62, %v2671_v54 }
 0x5c4   : > { %v3462_v1 = vpop.f32.mrb[64].mxu0  ;;  %6191 = vmatprep.subr.bf16.mxu0 %v8542_v26  ;;  %v11616_v26 = vld [vmem:[%s10801_s22 + $0x488] sm:$0xff] }
 0x5c5   : > { %v3463_v43 = vadd.f32 %v3462_v1, %v11524_v30  ;;  %3397 = vmatprep.mubr.bf16.mxu1 %v2824_v9  ;;  %v3464_v2 = vpop.f32.mrb[65].mxu0  ;;  %3590 = vmatprep.mubr.bf16.mxu0 %v2824_v9 }
 0x5c6   : > { %v3465_v3 = vadd.f32 %v3464_v2, %v11529_v25  ;;  %3398 = vmatmul.mubr.bf16.gmra.mrb[116].mxu1 %v2823_v42  ;;  %v3466_v27 = vpop.f32.mrb[66].mxu0  ;;  %3591 = vmatmul.mubr.bf16.gmra.mrb[116].mxu0 %v2823_v42 }
 0x5c7   : > { %v3467_v58 = vadd.f32 %v3466_v27, %v11524_v30  ;;  %v3468_v24 = vpop.f32.mrb[67].mxu0  ;;  %v3623_v56 = vmax.f32 %v3463_v43, 0.0 }
 0x5c8   : > { %v3469_v36 = vadd.f32 %v3468_v24, %v11529_v25  ;;  %v3624_v11 = vmax.f32 %v3465_v3, 0.0 }
 0x5c9   : > { %v3627_v60 = vmax.f32 %v3467_v58, 0.0 }
 0x5ca   : > { %v3628_v12 = vmax.f32 %v3469_v36, 0.0 }
 0x5cb   : > { %v3791_v49 = vmax.f32 %v3623_v56, %v3627_v60  ;;  %v11535_v39 = vpack.c.bf16 %v3627_v60, %v3623_v56 }
 0x5cc   : > { %v3812_v13 = vmax.f32 %v3624_v11, %v3628_v12  ;;  %v11537_v14 = vpack.c.bf16 %v3628_v12, %v3624_v11  ;;  %v3472_v5 = vpop.f32.mrb[68].mxu0 }
 0x5cd   : > { %v3473_v29 = vadd.f32 %v3472_v5, %v11524_v30  ;;  %v3474_v28 = vpop.f32.mrb[69].mxu0 }
 0x5ce   : > { %13050 = vst [vmem:[#allocation43_spill] sm:$0xff] %v11537_v14  ;;  %v3475_v40 = vadd.f32 %v3474_v28, %v11529_v25  ;;  %v3476_v52 = vpop.f32.mrb[70].mxu0  ;;  %v11587_v28 = vrot.slane %v2771_v44, %v11387_v37  ;;  %v11606_v44 = vld [vmem:[%s10801_s22 + $0x480] sm:$0xff] }
 0x5cf   : > { %v3631_v6 = vmax.f32 %v3473_v29, 0.0  ;;  %v3477_v57 = vadd.f32 %v3476_v52, %v11524_v30  ;;  %v3478_v15 = vpop.f32.mrb[71].mxu0  ;;  %v11581_v29 = vld [vmem:[%s10801_s22 + $0x460] sm:$0xff] }
 0x5d0   : > { %v3632_v18 = vmax.f32 %v3475_v40, 0.0  ;;  %v3479_v22 = vadd.f32 %v3478_v15, %v11529_v25  ;;  %v11595_v15 = vld [vmem:[%s10801_s22 + $0x448] sm:$0xff] }
 0x5d1   : > { %v3792_v34 = vmax.f32 %v3791_v49, %v3631_v6  ;;  %v3635_v23 = vmax.f32 %v3477_v57, 0.0  ;;  %v11592_v57 = vrot.slane %v11518_v50, %v10921_v45 }
 0x5d2   : > { %v3813_v32 = vmax.f32 %v3812_v13, %v3632_v18  ;;  %v3636_v21 = vmax.f32 %v3479_v22, 0.0 }
 0x5d3   : > { %v11559_v0 = vmax.f32 %v3792_v34, %v3635_v23  ;;  %v11561_v59 = vpack.c.bf16 %v3635_v23, %v3631_v6 }
 0x5d4   : > { %v11563_v46 = vmax.f32 %v3813_v32, %v3636_v21  ;;  %v11565_v4 = vpack.c.bf16 %v3636_v21, %v3632_v18  ;;  %v2599_v54 = vpop.f32.mrb[56].mxu1  ;;  %v11598_v18 = vld [vmem:[%s10801_s22 + $0x468] sm:$0xff] }
 0x5d5   : > { %v2600_v61 = vadd.f32 %v2599_v54, %v11348_v31  ;;  %v2601_v55 = vpop.f32.mrb[57].mxu1  ;;  %v11619_v32 = vld [vmem:[%s10801_s22 + $0x4a8] sm:$0xff] }
 0x5d6   : > { %v2602_v38 = vadd.f32 %v2601_v55, %v11351_v63  ;;  %v2603_v19 = vpop.f32.mrb[58].mxu1  ;;  %v8550_v55 = vcombine.high %v11595_v15, %v11598_v18 }
 0x5d7   : > { %v2674_v62 = vmax.f32 %v2600_v61, 0.0  ;;  %v2604_v42 = vadd.f32 %v2603_v19, %v11348_v31  ;;  %v2605_v9 = vpop.f32.mrb[59].mxu1  ;;  %v11629_v19 = vld [vmem:[%s10801_s22 + $0x4e0] sm:$0xff] }
 0x5d8   : > { %v2675_v1 = vmax.f32 %v2602_v38, 0.0  ;;  %v2606_v43 = vadd.f32 %v2605_v9, %v11351_v63  ;;  %v11626_v38 = vld [vmem:[%s10801_s22 + $0x4c0] sm:$0xff] }
 0x5d9   : > { %v2735_v2 = vmax.f32 %v2734_v53, %v2674_v62  ;;  %v2676_v3 = vmax.f32 %v2604_v42, 0.0  ;;  %v11575_v53 = vrot.slane %v11518_v50, %v10929_v48 }
 0x5da   : > { %v2756_v27 = vmax.f32 %v2755_v51, %v2675_v1  ;;  %v2677_v58 = vmax.f32 %v2606_v43, 0.0  ;;  %v11578_v51 = vld [vmem:[%s10801_s22 + $0x440] sm:$0xff]  ;;  %v11636_v43 = vld [vmem:[%s10801_s22 + $0x4c8] sm:$0xff] }
 0x5db   : > { %v2736_v24 = vmax.f32 %v2735_v2, %v2676_v3  ;;  %v2825_v36 = vpack.c.bf16 %v2676_v3, %v2674_v62  ;;  %v8547_v23 = vcombine.low %v11578_v51, %v11581_v29  ;;  %v11639_v2 = vld [vmem:[%s10801_s22 + $0x4e8] sm:$0xff] }
 0x5dc   : > { %v2757_v56 = vmax.f32 %v2756_v27, %v2677_v58  ;;  %v2826_v60 = vpack.c.bf16 %v2677_v58, %v2675_v1  ;;  %v2609_v11 = vpop.f32.mrb[60].mxu1 }
 0x5dd   : > { %v2610_v12 = vadd.f32 %v2609_v11, %v11348_v31  ;;  %v2611_v49 = vpop.f32.mrb[61].mxu1 }
 0x5de   : > { %v2612_v13 = vadd.f32 %v2611_v49, %v11351_v63  ;;  %v2613_v5 = vpop.f32.mrb[62].mxu1  ;;  %3407 = vmatprep.mubr.bf16.mxu1 %v2826_v60  ;;  %3600 = vmatprep.mubr.bf16.mxu0 %v2826_v60 }
 0x5df   : > { %v2678_v40 = vmax.f32 %v2610_v12, 0.0  ;;  %v2614_v52 = vadd.f32 %v2613_v5, %v11348_v31  ;;  %v2615_v6 = vpop.f32.mrb[63].mxu1  ;;  %3408 = vmatmul.mubr.bf16.gmra.mrb[120].mxu1 %v2825_v36  ;;  %3601 = vmatmul.mubr.bf16.gmra.mrb[120].mxu0 %v2825_v36  ;;  %v8539_v31 = vcombine.low %v11543_v17, %v11546_v10 }
 0x5e0   : > { %v2679_v22 = vmax.f32 %v2612_v13, 0.0  ;;  %v2616_v33 = vadd.f32 %v2615_v6, %v11351_v63  ;;  %v8548_v63 = vcombine.high %v11578_v51, %v11581_v29 }
 0x5e1   : > { %v2737_v50 = vmax.f32 %v2736_v24, %v2678_v40  ;;  %v2680_v34 = vmax.f32 %v2614_v52, 0.0 }
 0x5e2   : > { %v2758_v21 = vmax.f32 %v2757_v56, %v2679_v22  ;;  %v2681_v54 = vmax.f32 %v2616_v33, 0.0 }
 0x5e3   : > { %v2738_v62 = vmax.f32 %v2737_v50, %v2680_v34  ;;  %v2827_v42 = vpack.c.bf16 %v2680_v34, %v2678_v40 }
 0x5e4   : > { %v2759_v3 = vmax.f32 %v2758_v21, %v2681_v54  ;;  %v2828_v27 = vpack.c.bf16 %v2681_v54, %v2679_v22  ;;  %v3269_v58 = vpop.f32.mrb[64].mxu1 }
 0x5e5   : > { %v2739_v56 = vrot.slane %v2738_v62, 4  ;;  %v3270_v60 = vadd.f32 %v3269_v58, %v11575_v53  ;;  %v3271_v11 = vpop.f32.mrb[65].mxu1  ;;  %v3482_v12 = vpop.f32.mrb[72].mxu0 }
 0x5e6   : > { %v2760_v5 = vrot.slane %v2759_v3, 4  ;;  %v3272_v40 = vadd.f32 %v3271_v11, %v11592_v57  ;;  %v3483_v52 = vadd.f32 %v3482_v12, %v11524_v30  ;;  %v3273_v6 = vpop.f32.mrb[66].mxu1  ;;  %3417 = vmatprep.mubr.bf16.mxu1 %v2828_v27  ;;  %v3484_v22 = vpop.f32.mrb[73].mxu0  ;;  %3610 = vmatprep.mubr.bf16.mxu0 %v2828_v27 }
 0x5e7   : > { %v2740_v50 = vmax.f32 %v2738_v62, %v2739_v56  ;;  %v3621_v34 = vmax.f32 %v3270_v60, 0.0  ;;  %v3274_v21 = vadd.f32 %v3273_v6, %v11575_v53  ;;  %v3485_v54 = vadd.f32 %v3484_v22, %v11529_v25  ;;  %v3275_v58 = vpop.f32.mrb[67].mxu1  ;;  %3418 = vmatmul.mubr.bf16.gmra.mrb[124].mxu1 %v2827_v42  ;;  %v3486_v16 = vpop.f32.mrb[74].mxu0  ;;  %3611 = vmatmul.mubr.bf16.gmra.mrb[124].mxu0 %v2827_v42 }
 0x5e8   : > { %v2761_v11 = vmax.f32 %v2759_v3, %v2760_v5  ;;  %v3622_v49 = vmax.f32 %v3272_v40, 0.0  ;;  %v3639_v12 = vmax.f32 %v3483_v52, 0.0  ;;  %v3276_v13 = vadd.f32 %v3275_v58, %v11592_v57  ;;  %v3488_v24 = vpop.f32.mrb[75].mxu0 }
 0x5e9   : > { %v2741_v27 = vrot.slane %v2740_v50, 2  ;;  %v3625_v9 = vmax.f32 %v3274_v21, 0.0  ;;  %v3640_v36 = vmax.f32 %v3485_v54, 0.0  ;;  %v3487_v62 = vadd.f32 %v3486_v16, %v11524_v30 }
 0x5ea   : > { %v2762_v56 = vrot.slane %v2761_v11, 2  ;;  %v3794_v60 = vmax.f32 %v11559_v0, %v3639_v12  ;;  %v3626_v6 = vmax.f32 %v3276_v13, 0.0  ;;  %v3489_v22 = vadd.f32 %v3488_v24, %v11529_v25 }
 0x5eb   : > { %v2742_v33 = vmax.f32 %v2740_v50, %v2741_v27  ;;  %v3749_v1 = vmax.f32 %v3621_v34, %v3625_v9  ;;  %v11660_v42 = vpack.c.bf16 %v3625_v9, %v3621_v34  ;;  %v3815_v3 = vmax.f32 %v11563_v46, %v3640_v36 }
 0x5ec   : > { %v2763_v5 = vmax.f32 %v2761_v11, %v2762_v56  ;;  %v3770_v40 = vmax.f32 %v3622_v49, %v3626_v6  ;;  %v11663_v52 = vpack.c.bf16 %v3626_v6, %v3622_v49  ;;  %v3643_v21 = vmax.f32 %v3487_v62, 0.0  ;;  %v3279_v54 = vpop.f32.mrb[68].mxu1 }
 0x5ed   : > { %13051 = vst [vmem:[#allocation44_spill] sm:$0xff] %v11660_v42  ;;  %v2743_v58 = vrot.slane %v2742_v33, 1  ;;  %v3644_v16 = vmax.f32 %v3489_v22, 0.0  ;;  %v3280_v61 = vadd.f32 %v3279_v54, %v11575_v53  ;;  %v3281_v0 = vpop.f32.mrb[69].mxu1  ;;  %v3492_v13 = vpop.f32.mrb[76].mxu0 }
 0x5ee   : > { %13052 = vst [vmem:[#allocation45_spill] sm:$0xff] %v11663_v52  ;;  %v2764_v50 = vrot.slane %v2763_v5, 1  ;;  %v3795_v9 = vmax.f32 %v3794_v60, %v3643_v21  ;;  %v11668_v34 = vpack.c.bf16 %v3643_v21, %v3639_v12  ;;  %v3282_v46 = vadd.f32 %v3281_v0, %v11592_v57  ;;  %v3283_v11 = vpop.f32.mrb[70].mxu1  ;;  %v3494_v49 = vpop.f32.mrb[77].mxu0  ;;  %5644 = vmatprep.mubr.bf16.mxu1 %v11663_v52 }
 0x5ef   : > { %6030 = vmatprep.mubr.bf16.mxu0 %v11663_v52  ;;  %v2744_v27 = vmax.f32 %v2742_v33, %v2743_v58  ;;  %v3816_v62 = vmax.f32 %v3815_v3, %v3644_v16  ;;  %v11673_v56 = vpack.c.bf16 %v3644_v16, %v3640_v36  ;;  %v3629_v6 = vmax.f32 %v3280_v61, 0.0  ;;  %v3285_v22 = vpop.f32.mrb[71].mxu1  ;;  %v3496_v54 = vpop.f32.mrb[78].mxu0  ;;  %5645 = vmatmul.mubr.bf16.vlgmr.msra.gmra.mrb[128].mxu1 %v11660_v42 }
 0x5f0   : > { %6031 = vmatmul.mubr.bf16.vlgmr.msra.gmra.mrb[128].mxu0 %v11660_v42  ;;  %v2765_v12 = vmax.f32 %v2763_v5, %v2764_v50  ;;  %v3630_v60 = vmax.f32 %v3282_v46, 0.0  ;;  %v3493_v21 = vadd.f32 %v3492_v13, %v11524_v30  ;;  %v3284_v0 = vadd.f32 %v3283_v11, %v11575_v53  ;;  %v3498_v24 = vpop.f32.mrb[79].mxu0  ;;  %5806 = vmatpush1.bf16.msra.mxu1 %v8539_v31  ;;  %v11705_v46 = vld [vmem:[%s10801_s22 + $0x520] sm:$0xff] }
 0x5f1   : > { %6192 = vmatpush1.bf16.msra.mxu0 %v8541_v35  ;;  %v3750_v61 = vmax.f32 %v3749_v1, %v3629_v6  ;;  %v3495_v36 = vadd.f32 %v3494_v49, %v11529_v25  ;;  %v3286_v33 = vadd.f32 %v3285_v22, %v11592_v57  ;;  %v3497_v3 = vadd.f32 %v3496_v54, %v11524_v30 }
 0x5f2   : > { %5807 = vmatprep.subr.bf16.mxu1 %v8548_v63  ;;  %v2779_v5 = vcombine.low %v2744_v27, %v2765_v12  ;;  %v3771_v17 = vmax.f32 %v3770_v40, %v3630_v60  ;;  %v3647_v10 = vmax.f32 %v3493_v21, 0.0  ;;  %v3633_v31 = vmax.f32 %v3284_v0, 0.0  ;;  %6193 = vmatprep.subr.bf16.mxu0 %v8550_v55  ;;  %v11702_v40 = vld [vmem:[%s10801_s22 + $0x500] sm:$0xff] }
 0x5f3   : > { %v3648_v7 = vmax.f32 %v3495_v36, 0.0  ;;  %v3634_v8 = vmax.f32 %v3286_v33, 0.0  ;;  %v3651_v35 = vmax.f32 %v3497_v3, 0.0  ;;  %v3499_v1 = vadd.f32 %v3498_v24, %v11529_v25  ;;  %v2766_v33 = vld [vmem:[#allocation2 + $0x18] sm:$0xf] }
 0x5f4   : > { %v2786_v58 = vrot.slane %v2779_v5, %v11387_v37  ;;  %v3796_v16 = vmax.f32 %v3795_v9, %v3647_v10  ;;  %v3751_v13 = vmax.f32 %v3750_v61, %v3633_v31  ;;  %v11696_v63 = vpack.c.bf16 %v3633_v31, %v3629_v6  ;;  %v3289_v50 = vpop.f32.mrb[72].mxu1  ;;  %5808 = vmatpush1.bf16.msra.mxu1 %v8547_v23 }
 0x5f5   : > { %v3817_v55 = vmax.f32 %v3816_v62, %v3648_v7  ;;  %v3772_v11 = vmax.f32 %v3771_v17, %v3634_v8  ;;  %v11707_v49 = vpack.c.bf16 %v3634_v8, %v3630_v60  ;;  %v11709_v24 = vpack.c.bf16 %v3651_v35, %v3647_v10  ;;  %v3291_v27 = vpop.f32.mrb[73].mxu1  ;;  %v4199_v8 = vld [vmem:[%s10801_s22 + $0x528] sm:$0xff] }
 0x5f6   : > { %13053 = vst [vmem:[#allocation46_spill] sm:$0xff] %v11696_v63  ;;  %v13055_v9 = vcombine.low %v11595_v15, %v11598_v18  ;;  %v2789_v6 = vrot.slane %v2786_v58, 7  ;;  %v11714_v22 = vmax.f32 %v3796_v16, %v3651_v35  ;;  %v3652_v51 = vmax.f32 %v3499_v1, 0.0  ;;  %v3293_v23 = vpop.f32.mrb[74].mxu1 }
 0x5f7   : > { %13054 = vst [vmem:[#allocation47_spill] sm:$0xff] %v11707_v49  ;;  %v3290_v29 = vadd.f32 %v3289_v50, %v11575_v53  ;;  %v13056_v62 = vcombine.high %v11606_v44, %v11609_v20  ;;  %v13057_v54 = vcombine.high %v11616_v26, %v11619_v32  ;;  %v3292_v12 = vadd.f32 %v3291_v27, %v11592_v57  ;;  %v3295_v18 = vpop.f32.mrb[75].mxu1 }
 0x5f8   : > { %6194 = vmatpush1.bf16.msra.mxu0 %v13055_v9  ;;  %v3294_v15 = vadd.f32 %v3293_v23, %v11575_v53  ;;  %5654 = vmatprep.mubr.bf16.mxu1 %v11707_v49  ;;  %v8571_v60 = vcombine.low %v11702_v40, %v11705_v46  ;;  %v2790_v21 = vsel %vm2290_vm1, %v2789_v6, %v11587_v28 }
 0x5f9   : > { %5809 = vmatprep.subr.bf16.mxu1 %v13056_v62  ;;  %6195 = vmatprep.subr.bf16.mxu0 %v13057_v54  ;;  %v11731_v0 = vmax.f32 %v3817_v55, %v3652_v51  ;;  %v11733_v61 = vpack.c.bf16 %v3652_v51, %v3648_v7  ;;  %v3637_v36 = vmax.f32 %v3290_v29, 0.0  ;;  %v2791_v3 = vsel %vm2292_vm2, %v2789_v6, %v2790_v21  ;;  %v4195_v7 = vld [vmem:[%s10801_s22 + $0x508] sm:$0xff]  ;;  %v11760_v55 = vld [vmem:[%s10801_s22 + $0x540] sm:$0xff] }
 0x5fa   : > { %6040 = vmatprep.mubr.bf16.mxu0 %v11707_v49  ;;  %5655 = vmatmul.mubr.bf16.gmra.mrb[132].mxu1 %v11696_v63  ;;  %v3638_v5 = vmax.f32 %v3292_v12, 0.0  ;;  %v3641_v17 = vmax.f32 %v3294_v15, 0.0  ;;  %v3296_v10 = vadd.f32 %v3295_v18, %v11592_v57  ;;  %v13058_v28 = vcombine.low %v11606_v44, %v11609_v20  ;;  %v4203_v62 = vld [vmem:[%s10801_s22 + $0x548] sm:$0xff] }
 0x5fb   : > { %6041 = vmatmul.mubr.bf16.gmra.mrb[132].mxu0 %v11696_v63  ;;  %v13059_v31 = vcombine.low %v11616_v26, %v11619_v32  ;;  %v2792_v35 = vsel %vm2294_vm3, %v2789_v6, %v2791_v3  ;;  %v3752_v1 = vmax.f32 %v3751_v13, %v3637_v36  ;;  %v13060_v58 = vcombine.high %v11626_v38, %v11629_v19  ;;  %v11763_v13 = vld [vmem:[%s10801_s22 + $0x560] sm:$0xff]  ;;  %v4207_v54 = vld [vmem:[%s10801_s22 + $0x568] sm:$0xff] }
 0x5fc   : > { %5810 = vmatpush1.bf16.msra.mxu1 %v13058_v28  ;;  %v13061_v16 = vcombine.high %v11636_v43, %v11639_v2  ;;  %v8572_v44 = vcombine.high %v11702_v40, %v11705_v46  ;;  %v2793_v20 = vsel %vm2296_vm4, %v2789_v6, %v2792_v35  ;;  %v3773_v26 = vmax.f32 %v3772_v11, %v3638_v5  ;;  %v3299_v51 = vpop.f32.mrb[76].mxu1  ;;  %v11786_v3 = vld [vmem:[%s10801_s22 + $0x5a0] sm:$0xff]  ;;  %v11795_v28 = vld [vmem:[%s10801_s22 + $0x5a8] sm:$0xff] }
 0x5fd   : > { %6196 = vmatpush1.bf16.msra.mxu0 %v13059_v31  ;;  %5811 = vmatprep.subr.bf16.mxu1 %v13060_v58  ;;  %v11757_v32 = vpack.c.bf16 %v3641_v17, %v3637_v36  ;;  %v3642_v50 = vmax.f32 %v3296_v10, 0.0  ;;  %v2795_v27 = vmax.f32 %v2766_v33, %v2793_v20  ;;  %v3753_v9 = vmax.f32 %v3752_v1, %v3641_v17  ;;  %v3301_v46 = vpop.f32.mrb[77].mxu1  ;;  %v11792_v10 = vld [vmem:[%s10801_s22 + $0x588] sm:$0xff]  ;;  %v11800_v1 = vld [vmem:[%s10801_s22 + $0x5c0] sm:$0xff] }
 0x5fe   : > { %6197 = vmatprep.subr.bf16.mxu0 %v13061_v16  ;;  %v8573_v29 = vcombine.low %v4195_v7, %v4199_v8  ;;  %v8574_v23 = vcombine.high %v4195_v7, %v4199_v8  ;;  %v3300_v40 = vadd.f32 %v3299_v51, %v11575_v53  ;;  %v13064_v11 = vcombine.low %v11626_v38, %v11629_v19  ;;  %v3303_v21 = vpop.f32.mrb[78].mxu1  ;;  %v11803_v58 = vld [vmem:[%s10801_s22 + $0x5e0] sm:$0xff]  ;;  %v11806_v16 = vld [vmem:[%s10801_s22 + $0x5c8] sm:$0xff] }
 0x5ff   : > { %13062 = vst [vmem:[#allocation48_spill] sm:$0xff] %v11757_v32  ;;  %v3774_v12 = vmax.f32 %v3773_v26, %v3642_v50  ;;  %v11767_v15 = vpack.c.bf16 %v3642_v50, %v3638_v5  ;;  %v13065_v6 = vcombine.low %v11636_v43, %v11639_v2  ;;  %2796 = vst [vmem:[#allocation2 + $0x18] sm:$0xf] %v2795_v27  ;;  %v3305_v19 = vpop.f32.mrb[79].mxu1  ;;  %v11783_v2 = vld [vmem:[%s10801_s22 + $0x580] sm:$0xff]  ;;  %v11813_v50 = vld [vmem:[%s10801_s22 + $0x5e8] sm:$0xff] }
 0x600   : > { %5812 = vmatpush1.bf16.msra.mxu1 %v13064_v11  ;;  %v3302_v18 = vadd.f32 %v3301_v46, %v11592_v57  ;;  %v8580_v36 = vcombine.high %v11760_v55, %v11763_v13  ;;  %v3645_v33 = vmax.f32 %v3300_v40, 0.0  ;;  %v3304_v38 = vadd.f32 %v3303_v21, %v11575_v53  ;;  %v11834_v40 = vld [vmem:[%s10801_s22 + $0x608] sm:$0xff] }
 0x601   : > { %13063 = vst [vmem:[#allocation49_spill] sm:$0xff] %v11767_v15  ;;  %6198 = vmatpush1.bf16.msra.mxu0 %v13065_v6  ;;  %5813 = vmatprep.subr.bf16.mxu1 %v8572_v44  ;;  %v8582_v43 = vcombine.high %v4203_v62, %v4207_v54  ;;  %v3306_v17 = vadd.f32 %v3305_v19, %v11592_v57  ;;  %v11837_v46 = vld [vmem:[%s10801_s22 + $0x628] sm:$0xff] }
 0x602   : > { %6199 = vmatprep.subr.bf16.mxu0 %v8574_v23  ;;  %5664 = vmatprep.mubr.bf16.mxu1 %v11767_v15  ;;  %v3646_v5 = vmax.f32 %v3302_v18, 0.0  ;;  %v3754_v31 = vmax.f32 %v3753_v9, %v3645_v33  ;;  %v3649_v7 = vmax.f32 %v3304_v38, 0.0  ;;  %v8579_v8 = vcombine.low %v11760_v55, %v11763_v13  ;;  %v11816_v55 = vld [vmem:[%s10801_s22 + $0x600] sm:$0xff] }
 0x603   : > { %6050 = vmatprep.mubr.bf16.mxu0 %v11767_v15  ;;  %5665 = vmatmul.mubr.bf16.gmra.mrb[136].mxu1 %v11757_v32  ;;  %v8581_v35 = vcombine.low %v4203_v62, %v4207_v54  ;;  %v3650_v20 = vmax.f32 %v3306_v17, 0.0  ;;  %v8588_v26 = vcombine.high %v11783_v2, %v11786_v3  ;;  %v11819_v13 = vld [vmem:[%s10801_s22 + $0x620] sm:$0xff]  ;;  %v8589_v51 = vcombine.low %v11792_v10, %v11795_v28 }
 0x604   : > { %6051 = vmatmul.mubr.bf16.gmra.mrb[136].mxu0 %v11757_v32  ;;  %5814 = vmatpush1.bf16.msra.mxu1 %v8571_v60  ;;  %v3775_v44 = vmax.f32 %v3774_v12, %v3646_v5  ;;  %v8587_v60 = vcombine.low %v11783_v2, %v11786_v3  ;;  %v3755_v27 = vmax.f32 %v3754_v31, %v3649_v7 }
 0x605   : > { %6200 = vmatpush1.bf16.msra.mxu0 %v8573_v29  ;;  %5815 = vmatprep.subr.bf16.mxu1 %v8580_v36  ;;  %v11821_v9 = vpack.c.bf16 %v3649_v7, %v3645_v33  ;;  %v8590_v29 = vcombine.high %v11792_v10, %v11795_v28  ;;  %v11827_v62 = vpack.c.bf16 %v3650_v20, %v3646_v5  ;;  %v3309_v11 = vpop.f32.mrb[80].mxu1  ;;  %v3502_v6 = vpop.f32.mrb[80].mxu0 }
 0x606   : > { %6201 = vmatprep.subr.bf16.mxu0 %v8582_v43  ;;  %v3776_v23 = vmax.f32 %v3775_v44, %v3650_v20  ;;  %v8595_v54 = vcombine.low %v11800_v1, %v11803_v58  ;;  %v8596_v12 = vcombine.high %v11800_v1, %v11803_v58  ;;  %v8597_v18 = vcombine.low %v11806_v16, %v11813_v50  ;;  %v3311_v19 = vpop.f32.mrb[81].mxu1  ;;  %v3504_v43 = vpop.f32.mrb[81].mxu0 }
 0x607   : > { %13066 = vst [vmem:[#allocation50_spill] sm:$0xff] %v11821_v9  ;;  %13067 = vst [vmem:[#allocation51_spill] sm:$0xff] %v11827_v62  ;;  %v8598_v21 = vcombine.high %v11806_v16, %v11813_v50  ;;  %v8603_v36 = vcombine.low %v11816_v55, %v11819_v13  ;;  %v3310_v33 = vadd.f32 %v3309_v11, %v11575_v53  ;;  %5674 = vmatprep.mubr.bf16.mxu1 %v11827_v62  ;;  %v3313_v17 = vpop.f32.mrb[82].mxu1  ;;  %v3506_v10 = vpop.f32.mrb[82].mxu0 }
 0x608   : > { %5816 = vmatpush1.bf16.msra.mxu1 %v8579_v8  ;;  %v3503_v38 = vadd.f32 %v3502_v6, %v11524_v30  ;;  %6060 = vmatprep.mubr.bf16.mxu0 %v11827_v62  ;;  %v8604_v2 = vcombine.high %v11816_v55, %v11819_v13  ;;  %v3312_v3 = vadd.f32 %v3311_v19, %v11592_v57  ;;  %v3315_v1 = vpop.f32.mrb[83].mxu1  ;;  %v3508_v58 = vpop.f32.mrb[83].mxu0 }
 0x609   : > { %6202 = vmatpush1.bf16.msra.mxu0 %v8581_v35  ;;  %v3505_v5 = vadd.f32 %v3504_v43, %v11529_v25  ;;  %5817 = vmatprep.subr.bf16.mxu1 %v8588_v26  ;;  %v8606_v28 = vcombine.high %v11834_v40, %v11837_v46  ;;  %v3653_v31 = vmax.f32 %v3310_v33, 0.0  ;;  %v3314_v8 = vadd.f32 %v3313_v17, %v11575_v53 }
 0x60a   : > { %6203 = vmatprep.subr.bf16.mxu0 %v8590_v29  ;;  %v3655_v7 = vmax.f32 %v3503_v38, 0.0  ;;  %v3507_v35 = vadd.f32 %v3506_v10, %v11524_v30  ;;  %v3654_v16 = vmax.f32 %v3312_v3, 0.0  ;;  %v3316_v20 = vadd.f32 %v3315_v1, %v11592_v57 }
 0x60b   : > { %5675 = vmatmul.mubr.bf16.gmra.mrb[140].mxu1 %v11821_v9  ;;  %v3656_v44 = vmax.f32 %v3505_v5, 0.0  ;;  %v3509_v26 = vadd.f32 %v3508_v58, %v11529_v25  ;;  %v3756_v50 = vmax.f32 %v3755_v27, %v3653_v31  ;;  %v3657_v11 = vmax.f32 %v3314_v8, 0.0 }
 0x60c   : > { %6061 = vmatmul.mubr.bf16.gmra.mrb[140].mxu0 %v11821_v9  ;;  %5818 = vmatpush1.bf16.msra.mxu1 %v8587_v60  ;;  %v3798_v29 = vmax.f32 %v11714_v22, %v3655_v7  ;;  %v3659_v6 = vmax.f32 %v3507_v35, 0.0  ;;  %v3777_v33 = vmax.f32 %v3776_v23, %v3654_v16  ;;  %v3658_v19 = vmax.f32 %v3316_v20, 0.0 }
 0x60d   : > { %6204 = vmatpush1.bf16.msra.mxu0 %v8589_v51  ;;  %5819 = vmatprep.subr.bf16.mxu1 %v8596_v12  ;;  %v3819_v38 = vmax.f32 %v11731_v0, %v3656_v44  ;;  %v3660_v43 = vmax.f32 %v3509_v26, 0.0  ;;  %v3757_v3 = vmax.f32 %v3756_v50, %v3657_v11  ;;  %v11863_v5 = vpack.c.bf16 %v3657_v11, %v3653_v31  ;;  %v3319_v8 = vpop.f32.mrb[84].mxu1  ;;  %v3512_v12 = vpop.f32.mrb[84].mxu0 }
 0x60e   : > { %6205 = vmatprep.subr.bf16.mxu0 %v8598_v21  ;;  %v3799_v17 = vmax.f32 %v3798_v29, %v3659_v6  ;;  %v11865_v10 = vpack.c.bf16 %v3659_v6, %v3655_v7  ;;  %v3778_v60 = vmax.f32 %v3777_v33, %v3658_v19  ;;  %v11867_v51 = vpack.c.bf16 %v3658_v19, %v3654_v16  ;;  %v3321_v21 = vpop.f32.mrb[85].mxu1  ;;  %v3514_v35 = vpop.f32.mrb[85].mxu0 }
 0x60f   : > { %13068 = vst [vmem:[#allocation52_spill] sm:$0xff] %v11863_v5  ;;  %v3820_v27 = vmax.f32 %v3819_v38, %v3660_v43  ;;  %v11869_v22 = vpack.c.bf16 %v3660_v43, %v3656_v44  ;;  %v3320_v23 = vadd.f32 %v3319_v8, %v11575_v53  ;;  %v3513_v0 = vadd.f32 %v3512_v12, %v11524_v30  ;;  %v3323_v58 = vpop.f32.mrb[86].mxu1  ;;  %v3516_v16 = vpop.f32.mrb[86].mxu0 }
 0x610   : > { %13069 = vst [vmem:[#allocation53_spill] sm:$0xff] %v11867_v51  ;;  %5820 = vmatpush1.bf16.msra.mxu1 %v8595_v54  ;;  %v8605_v31 = vcombine.low %v11834_v40, %v11837_v46  ;;  %v3322_v7 = vadd.f32 %v3321_v21, %v11592_v57  ;;  %v3515_v1 = vadd.f32 %v3514_v35, %v11529_v25  ;;  %v3518_v26 = vpop.f32.mrb[87].mxu0  ;;  %v4235_v21 = vld [vmem:[%s10801_s22 + $0x648] sm:$0xff] }
 0x611   : > { %6206 = vmatpush1.bf16.msra.mxu0 %v8597_v18  ;;  %5821 = vmatprep.subr.bf16.mxu1 %v8604_v2  ;;  %v3661_v54 = vmax.f32 %v3320_v23, 0.0  ;;  %v3663_v44 = vmax.f32 %v3513_v0, 0.0  ;;  %v3324_v20 = vadd.f32 %v3323_v58, %v11575_v53  ;;  %v3517_v18 = vadd.f32 %v3516_v16, %v11524_v30  ;;  %v3325_v2 = vpop.f32.mrb[87].mxu1  ;;  %v4242_v16 = vld [vmem:[%s10801_s22 + $0x680] sm:$0xff] }
 0x612   : > { %5684 = vmatprep.mubr.bf16.mxu1 %v11867_v51  ;;  %6070 = vmatprep.mubr.bf16.mxu0 %v11867_v51  ;;  %v3662_v40 = vmax.f32 %v3322_v7, 0.0  ;;  %v3664_v46 = vmax.f32 %v3515_v1, 0.0  ;;  %v3326_v50 = vadd.f32 %v3325_v2, %v11592_v57  ;;  %v3519_v29 = vadd.f32 %v3518_v26, %v11529_v25  ;;  %v4239_v7 = vld [vmem:[%s10801_s22 + $0x668] sm:$0xff] }
 0x613   : > { %5685 = vmatmul.mubr.bf16.gmra.mrb[144].mxu1 %v11863_v5  ;;  %6207 = vmatprep.subr.bf16.mxu0 %v8606_v28  ;;  %v3758_v11 = vmax.f32 %v3757_v3, %v3661_v54  ;;  %v3800_v6 = vmax.f32 %v3799_v17, %v3663_v44  ;;  %v3665_v33 = vmax.f32 %v3324_v20, 0.0  ;;  %v3667_v38 = vmax.f32 %v3517_v18, 0.0  ;;  %v4247_v2 = vld [vmem:[%s10801_s22 + $0x6a8] sm:$0xff] }
 0x614   : > { %6071 = vmatmul.mubr.bf16.gmra.mrb[144].mxu0 %v11863_v5  ;;  %5822 = vmatpush1.bf16.msra.mxu1 %v8603_v36  ;;  %v3779_v19 = vmax.f32 %v3778_v60, %v3662_v40  ;;  %v3821_v43 = vmax.f32 %v3820_v27, %v3664_v46  ;;  %v3666_v8 = vmax.f32 %v3326_v50, 0.0  ;;  %v3668_v12 = vmax.f32 %v3519_v29, 0.0  ;;  %v4234_v60 = vld [vmem:[%s10801_s22 + $0x640] sm:$0xff]  ;;  %v4251_v29 = vld [vmem:[%s10801_s22 + $0x6c8] sm:$0xff] }
 0x615   : > { %6208 = vmatpush1.bf16.msra.mxu0 %v8605_v31  ;;  %v11888_v23 = vmax.f32 %v3758_v11, %v3665_v33  ;;  %v11890_v0 = vpack.c.bf16 %v3665_v33, %v3661_v54  ;;  %v11892_v28 = vmax.f32 %v3800_v6, %v3667_v38  ;;  %v11894_v55 = vpack.c.bf16 %v3667_v38, %v3663_v44  ;;  %v4238_v27 = vld [vmem:[%s10801_s22 + $0x660] sm:$0xff]  ;;  %v4243_v44 = vld [vmem:[%s10801_s22 + $0x688] sm:$0xff] }
 0x616   : > { %v11896_v13 = vmax.f32 %v3779_v19, %v3666_v8  ;;  %v11898_v36 = vpack.c.bf16 %v3666_v8, %v3662_v40  ;;  %v11900_v3 = vmax.f32 %v3821_v43, %v3668_v12  ;;  %v11902_v17 = vpack.c.bf16 %v3668_v12, %v3664_v46  ;;  %v4246_v54 = vld [vmem:[%s10801_s22 + $0x6a0] sm:$0xff]  ;;  %v4255_v33 = vld [vmem:[%s10801_s22 + $0x6e8] sm:$0xff] }
 0x617   : > { %13070 = vst [vmem:[#allocation54_spill] sm:$0xff] %v11890_v0  ;;  %v8611_v35 = vcombine.low %v4234_v60, %v4238_v27  ;;  %v8612_v31 = vcombine.high %v4234_v60, %v4238_v27  ;;  %v8613_v1 = vcombine.low %v4235_v21, %v4239_v7  ;;  %v8614_v58 = vcombine.high %v4235_v21, %v4239_v7  ;;  %v4250_v46 = vld [vmem:[%s10801_s22 + $0x6c0] sm:$0xff]  ;;  %v4259_v21 = vld [vmem:[%s10801_s22 + $0x708] sm:$0xff] }
 0x618   : > { %13071 = vst [vmem:[#allocation55_spill] sm:$0xff] %v11898_v36  ;;  %5694 = vmatprep.mubr.bf16.mxu1 %v11898_v36  ;;  %6080 = vmatprep.mubr.bf16.mxu0 %v11898_v36  ;;  %v8619_v20 = vcombine.low %v4242_v16, %v4246_v54  ;;  %v8620_v18 = vcombine.high %v4242_v16, %v4246_v54  ;;  %v4254_v50 = vld [vmem:[%s10801_s22 + $0x6e0] sm:$0xff] }
 0x619   : > { %5823 = vmatprep.subr.bf16.mxu1 %v8612_v31  ;;  %6209 = vmatprep.subr.bf16.mxu0 %v8614_v58  ;;  %v8621_v26 = vcombine.low %v4243_v44, %v4247_v2  ;;  %v8622_v40 = vcombine.high %v4243_v44, %v4247_v2  ;;  %v8627_v11 = vcombine.low %v4250_v46, %v4254_v50  ;;  %v4258_v38 = vld [vmem:[%s10801_s22 + $0x700] sm:$0xff] }
 0x61a   : > { %5824 = vmatpush1.bf16.msra.mxu1 %v8611_v35  ;;  %6210 = vmatpush1.bf16.msra.mxu0 %v8613_v1  ;;  %v8628_v6 = vcombine.high %v4250_v46, %v4254_v50  ;;  %v4262_v19 = vld [vmem:[%s10801_s22 + $0x720] sm:$0xff]  ;;  %v8629_v12 = vcombine.low %v4251_v29, %v4255_v33  ;;  %v8630_v60 = vcombine.high %v4251_v29, %v4255_v33  ;;  %v4263_v35 = vld [vmem:[%s10801_s22 + $0x728] sm:$0xff] }
 0x61b   : > { %5695 = vmatmul.mubr.bf16.gmra.mrb[148].mxu1 %v11890_v0  ;;  %5825 = vmatprep.subr.bf16.mxu1 %v8620_v18  ;;  %v8636_v27 = vcombine.high %v4258_v38, %v4262_v19  ;;  %v8638_v16 = vcombine.high %v4259_v21, %v4263_v35  ;;  %v8635_v2 = vcombine.low %v4258_v38, %v4262_v19 }
 0x61c   : > { %6081 = vmatmul.mubr.bf16.gmra.mrb[148].mxu0 %v11890_v0  ;;  %6211 = vmatprep.subr.bf16.mxu0 %v8622_v40 }
 0x61e   : > { %5826 = vmatpush1.bf16.msra.mxu1 %v8619_v20  ;;  %6212 = vmatpush1.bf16.msra.mxu0 %v8621_v26  ;;  %v8637_v26 = vcombine.low %v4259_v21, %v4263_v35 }
 0x61f   : > { %5827 = vmatprep.subr.bf16.mxu1 %v8628_v6  ;;  %6213 = vmatprep.subr.bf16.mxu0 %v8630_v60 }
 0x622   : > { %5828 = vmatpush1.bf16.msra.mxu1 %v8627_v11  ;;  %6214 = vmatpush1.bf16.msra.mxu0 %v8629_v12 }
 0x623   : > { %5829 = vmatprep.subr.bf16.mxu1 %v8636_v27  ;;  %6215 = vmatprep.subr.bf16.mxu0 %v8638_v16 }
 0x626   : > { %v3329_v43 = vpop.f32.mrb[88].mxu1  ;;  %v3522_v8 = vpop.f32.mrb[88].mxu0  ;;  %5830 = vmatpush1.bf16.msra.mxu1 %v8635_v2  ;;  %6216 = vmatpush1.bf16.msra.mxu0 %v8637_v26 }
 0x627   : > { %v3330_v31 = vadd.f32 %v3329_v43, %v11575_v53  ;;  %v3523_v7 = vadd.f32 %v3522_v8, %v11524_v30  ;;  %v3331_v1 = vpop.f32.mrb[89].mxu1  ;;  %v3524_v58 = vpop.f32.mrb[89].mxu0 }
 0x628   : > { %v3332_v54 = vadd.f32 %v3331_v1, %v11592_v57  ;;  %v3525_v44 = vadd.f32 %v3524_v58, %v11529_v25  ;;  %v3333_v20 = vpop.f32.mrb[90].mxu1  ;;  %v3526_v18 = vpop.f32.mrb[90].mxu0 }
 0x629   : > { %v3669_v40 = vmax.f32 %v3330_v31, 0.0  ;;  %v3671_v46 = vmax.f32 %v3523_v7, 0.0  ;;  %v3334_v50 = vadd.f32 %v3333_v20, %v11575_v53  ;;  %v3527_v29 = vadd.f32 %v3526_v18, %v11524_v30  ;;  %v3335_v33 = vpop.f32.mrb[91].mxu1  ;;  %v3528_v43 = vpop.f32.mrb[91].mxu0 }
 0x62a   : > { %v3670_v6 = vmax.f32 %v3332_v54, 0.0  ;;  %v3672_v8 = vmax.f32 %v3525_v44, 0.0  ;;  %v3336_v1 = vadd.f32 %v3335_v33, %v11592_v57  ;;  %v3529_v58 = vadd.f32 %v3528_v43, %v11529_v25 }
 0x62b   : > { %v3760_v38 = vmax.f32 %v11888_v23, %v3669_v40  ;;  %v3802_v19 = vmax.f32 %v11892_v28, %v3671_v46  ;;  %v3673_v60 = vmax.f32 %v3334_v50, 0.0  ;;  %v3675_v21 = vmax.f32 %v3527_v29, 0.0 }
 0x62c   : > { %v3781_v35 = vmax.f32 %v11896_v13, %v3670_v6  ;;  %v3823_v31 = vmax.f32 %v11900_v3, %v3672_v8  ;;  %v3674_v11 = vmax.f32 %v3336_v1, 0.0  ;;  %v3676_v7 = vmax.f32 %v3529_v58, 0.0 }
 0x62d   : > { %v3761_v54 = vmax.f32 %v3760_v38, %v3673_v60  ;;  %v11936_v44 = vpack.c.bf16 %v3673_v60, %v3669_v40  ;;  %v3803_v20 = vmax.f32 %v3802_v19, %v3675_v21  ;;  %v11938_v18 = vpack.c.bf16 %v3675_v21, %v3671_v46 }
 0x62e   : > { %v3782_v12 = vmax.f32 %v3781_v35, %v3674_v11  ;;  %v11940_v23 = vpack.c.bf16 %v3674_v11, %v3670_v6  ;;  %v3824_v28 = vmax.f32 %v3823_v31, %v3676_v7  ;;  %v11942_v27 = vpack.c.bf16 %v3676_v7, %v3672_v8  ;;  %v3339_v16 = vpop.f32.mrb[92].mxu1  ;;  %v3532_v50 = vpop.f32.mrb[92].mxu0 }
 0x62f   : > { %13072 = vst [vmem:[#allocation56_spill] sm:$0xff] %v11936_v44  ;;  %v3340_v13 = vadd.f32 %v3339_v16, %v11575_v53  ;;  %v3533_v3 = vadd.f32 %v3532_v50, %v11524_v30  ;;  %v3341_v29 = vpop.f32.mrb[93].mxu1  ;;  %v3534_v40 = vpop.f32.mrb[93].mxu0 }
 0x630   : > { %13073 = vst [vmem:[#allocation57_spill] sm:$0xff] %v11940_v23  ;;  %v3342_v33 = vadd.f32 %v3341_v29, %v11592_v57  ;;  %v3535_v46 = vadd.f32 %v3534_v40, %v11529_v25  ;;  %v3343_v2 = vpop.f32.mrb[94].mxu1  ;;  %v3536_v43 = vpop.f32.mrb[94].mxu0  ;;  %5704 = vmatprep.mubr.bf16.mxu1 %v11940_v23  ;;  %6090 = vmatprep.mubr.bf16.mxu0 %v11940_v23 }
 0x631   : > { %v3677_v6 = vmax.f32 %v3340_v13, 0.0  ;;  %v3679_v8 = vmax.f32 %v3533_v3, 0.0  ;;  %v3344_v26 = vadd.f32 %v3343_v2, %v11575_v53  ;;  %v3537_v1 = vadd.f32 %v3536_v43, %v11524_v30  ;;  %v3345_v58 = vpop.f32.mrb[95].mxu1  ;;  %v3538_v38 = vpop.f32.mrb[95].mxu0  ;;  %5705 = vmatmul.mubr.bf16.gmra.mrb[152].mxu1 %v11936_v44  ;;  %6091 = vmatmul.mubr.bf16.gmra.mrb[152].mxu0 %v11936_v44 }
 0x632   : > { %v3678_v19 = vmax.f32 %v3342_v33, 0.0  ;;  %v3680_v60 = vmax.f32 %v3535_v46, 0.0  ;;  %v3346_v21 = vadd.f32 %v3345_v58, %v11592_v57  ;;  %v3539_v35 = vadd.f32 %v3538_v38, %v11529_v25  ;;  %v4266_v58 = vld [vmem:[%s10801_s22 + $0x740] sm:$0xff] }
 0x633   : > { %v3762_v31 = vmax.f32 %v3761_v54, %v3677_v6  ;;  %v3804_v11 = vmax.f32 %v3803_v20, %v3679_v8  ;;  %v3681_v7 = vmax.f32 %v3344_v26, 0.0  ;;  %v3683_v16 = vmax.f32 %v3537_v1, 0.0  ;;  %v4270_v38 = vld [vmem:[%s10801_s22 + $0x760] sm:$0xff] }
 0x634   : > { %v3783_v50 = vmax.f32 %v3782_v12, %v3678_v19  ;;  %v3825_v13 = vmax.f32 %v3824_v28, %v3680_v60  ;;  %v3682_v3 = vmax.f32 %v3346_v21, 0.0  ;;  %v3684_v29 = vmax.f32 %v3539_v35, 0.0 }
 0x635   : > { %v3763_v40 = vmax.f32 %v3762_v31, %v3681_v7  ;;  %v11956_v2 = vpack.c.bf16 %v3681_v7, %v3677_v6  ;;  %v3805_v43 = vmax.f32 %v3804_v11, %v3683_v16  ;;  %v11958_v41 = vpack.c.bf16 %v3683_v16, %v3679_v8  ;;  %v4271_v11 = vld [vmem:[%s10801_s22 + $0x768] sm:$0xff] }
 0x636   : > { %v3784_v33 = vmax.f32 %v3783_v50, %v3682_v3  ;;  %v11960_v46 = vpack.c.bf16 %v3682_v3, %v3678_v19  ;;  %v3826_v54 = vmax.f32 %v3825_v13, %v3684_v29  ;;  %v11962_v20 = vpack.c.bf16 %v3684_v29, %v3680_v60  ;;  %v4267_v19 = vld [vmem:[%s10801_s22 + $0x748] sm:$0xff] }
 0x637   : > { %13074 = vst [vmem:[#allocation58_spill] sm:$0xff] %v11956_v2  ;;  %v3764_v26 = vrot.slane %v3763_v40, 4  ;;  %v3806_v12 = vrot.slane %v3805_v43, 4  ;;  %v8643_v35 = vcombine.low %v4266_v58, %v4270_v38  ;;  %v8644_v31 = vcombine.high %v4266_v58, %v4270_v38 }
 0x638   : > { %13075 = vst [vmem:[#allocation59_spill] sm:$0xff] %v11960_v46  ;;  %v3785_v28 = vrot.slane %v3784_v33, 4  ;;  %v3827_v1 = vrot.slane %v3826_v54, 4  ;;  %5714 = vmatprep.mubr.bf16.mxu1 %v11960_v46  ;;  %6100 = vmatprep.mubr.bf16.mxu0 %v11960_v46  ;;  %v8645_v50 = vcombine.low %v4267_v19, %v4271_v11  ;;  %v8646_v13 = vcombine.high %v4267_v19, %v4271_v11 }
 0x639   : > { %v3765_v6 = vmax.f32 %v3763_v40, %v3764_v26  ;;  %v3807_v8 = vmax.f32 %v3805_v43, %v3806_v12  ;;  %5715 = vmatmul.mubr.bf16.gmra.mrb[156].mxu1 %v11956_v2  ;;  %6101 = vmatmul.mubr.bf16.gmra.mrb[156].mxu0 %v11956_v2 }
 0x63a   : > { %v3786_v60 = vmax.f32 %v3784_v33, %v3785_v28  ;;  %v3828_v21 = vmax.f32 %v3826_v54, %v3827_v1  ;;  %5831 = vmatprep.subr.bf16.mxu1 %v8644_v31  ;;  %6217 = vmatprep.subr.bf16.mxu0 %v8646_v13 }
 0x63b   : > { %v3766_v7 = vrot.slane %v3765_v6, 2  ;;  %v3808_v16 = vrot.slane %v3807_v8, 2  ;;  %5832 = vmatpush1.bf16.msra.mxu1 %v8643_v35  ;;  %6218 = vmatpush1.bf16.msra.mxu0 %v8645_v50  ;;  %v4278_v35 = vld [vmem:[%s10801_s22 + $0x7a0] sm:$0xff]  ;;  %v4279_v50 = vld [vmem:[%s10801_s22 + $0x7a8] sm:$0xff] }
 0x63c   : > { %v3787_v3 = vrot.slane %v3786_v60, 2  ;;  %v3829_v29 = vrot.slane %v3828_v21, 2 }
 0x63d   : > { %v3767_v40 = vmax.f32 %v3765_v6, %v3766_v7  ;;  %v3809_v43 = vmax.f32 %v3807_v8, %v3808_v16  ;;  %v4274_v8 = vld [vmem:[%s10801_s22 + $0x780] sm:$0xff]  ;;  %v4275_v7 = vld [vmem:[%s10801_s22 + $0x788] sm:$0xff] }
 0x63e   : > { %v3788_v26 = vmax.f32 %v3786_v60, %v3787_v3  ;;  %v3830_v33 = vmax.f32 %v3828_v21, %v3829_v29  ;;  %v8652_v16 = vcombine.high %v4274_v8, %v4278_v35  ;;  %v8651_v13 = vcombine.low %v4274_v8, %v4278_v35 }
 0x63f   : > { %v3768_v54 = vrot.slane %v3767_v40, 1  ;;  %v3810_v12 = vrot.slane %v3809_v43, 1  ;;  %v8653_v3 = vcombine.low %v4275_v7, %v4279_v50  ;;  %v8654_v29 = vcombine.high %v4275_v7, %v4279_v50 }
 0x640   : > { %v3789_v28 = vrot.slane %v3788_v26, 1  ;;  %v3831_v1 = vrot.slane %v3830_v33, 1  ;;  %5833 = vmatprep.subr.bf16.mxu1 %v8652_v16 }
 0x641   : > { %v3769_v58 = vmax.f32 %v3767_v40, %v3768_v54  ;;  %v3811_v38 = vmax.f32 %v3809_v43, %v3810_v12  ;;  %6219 = vmatprep.subr.bf16.mxu0 %v8654_v29  ;;  %5834 = vmatpush1.bf16.msra.mxu1 %v8651_v13  ;;  %v4282_v43 = vld [vmem:[%s10801_s22 + $0x7c0] sm:$0xff]  ;;  %v4287_v12 = vld [vmem:[%s10801_s22 + $0x7e8] sm:$0xff] }
 0x642   : > { %v3790_v19 = vmax.f32 %v3788_v26, %v3789_v28  ;;  %v3832_v11 = vmax.f32 %v3830_v33, %v3831_v1  ;;  %v4286_v26 = vld [vmem:[%s10801_s22 + $0x7e0] sm:$0xff]  ;;  %v4283_v33 = vld [vmem:[%s10801_s22 + $0x7c8] sm:$0xff]  ;;  %6220 = vmatpush1.bf16.msra.mxu0 %v8653_v3 }
 0x643   : > { %v8660_v54 = vcombine.high %v4282_v43, %v4286_v26 }
 0x644   : > { %v3926_v31 = vcombine.low %v3769_v58, %v3790_v19  ;;  %v3927_v6 = vcombine.low %v3811_v38, %v3832_v11  ;;  %v8659_v58 = vcombine.low %v4282_v43, %v4286_v26  ;;  %v8661_v38 = vcombine.low %v4283_v33, %v4287_v12 }
 0x645   : > { %v8662_v19 = vcombine.high %v4283_v33, %v4287_v12  ;;  %5835 = vmatprep.subr.bf16.mxu1 %v8660_v54 }
 0x646   : > { %v11976_v60 = vrot.slane %v3926_v31, %v11387_v37  ;;  %v11979_v21 = vrot.slane %v3927_v6, %v11387_v37  ;;  %5836 = vmatpush1.bf16.msra.mxu1 %v8659_v58 }
 0x647   : > { %6221 = vmatprep.subr.bf16.mxu0 %v8662_v19 }
 0x648   : > { %6222 = vmatpush1.bf16.msra.mxu0 %v8661_v38 }
 0x64b   : > { %v3349_v28 = vpop.f32.mrb[96].mxu1  ;;  %v3542_v1 = vpop.f32.mrb[96].mxu0 }
 0x64c   : > { %v3350_v11 = vadd.f32 %v3349_v28, %v11575_v53  ;;  %v3543_v31 = vadd.f32 %v3542_v1, %v11524_v30  ;;  %v3351_v6 = vpop.f32.mrb[97].mxu1  ;;  %v3544_v8 = vpop.f32.mrb[97].mxu0 }
 0x64d   : > { %v3352_v35 = vadd.f32 %v3351_v6, %v11592_v57  ;;  %v3545_v7 = vadd.f32 %v3544_v8, %v11529_v25  ;;  %v3353_v16 = vpop.f32.mrb[98].mxu1  ;;  %v3546_v50 = vpop.f32.mrb[98].mxu0 }
 0x64e   : > { %v3354_v13 = vadd.f32 %v3353_v16, %v11575_v53  ;;  %v3547_v3 = vadd.f32 %v3546_v50, %v11524_v30  ;;  %v3355_v29 = vpop.f32.mrb[99].mxu1  ;;  %v3548_v43 = vpop.f32.mrb[99].mxu0  ;;  %v3685_v54 = vmax.f32 %v3350_v11, 0.0  ;;  %v3687_v12 = vmax.f32 %v3543_v31, 0.0 }
 0x64f   : > { %v3356_v26 = vadd.f32 %v3355_v29, %v11592_v57  ;;  %v3549_v33 = vadd.f32 %v3548_v43, %v11529_v25  ;;  %v3686_v6 = vmax.f32 %v3352_v35, 0.0  ;;  %v3688_v8 = vmax.f32 %v3545_v7, 0.0 }
 0x650   : > { %v3689_v28 = vmax.f32 %v3354_v13, 0.0  ;;  %v3691_v1 = vmax.f32 %v3547_v3, 0.0 }
 0x651   : > { %v3690_v40 = vmax.f32 %v3356_v26, 0.0  ;;  %v3692_v19 = vmax.f32 %v3549_v33, 0.0 }
 0x652   : > { %v3833_v58 = vmax.f32 %v3685_v54, %v3689_v28  ;;  %v11996_v45 = vpack.c.bf16 %v3689_v28, %v3685_v54  ;;  %v3875_v16 = vmax.f32 %v3687_v12, %v3691_v1  ;;  %v11998_v50 = vpack.c.bf16 %v3691_v1, %v3687_v12 }
 0x653   : > { %v3854_v47 = vmax.f32 %v3686_v6, %v3690_v40  ;;  %v12000_v38 = vpack.c.bf16 %v3690_v40, %v3686_v6  ;;  %v3896_v29 = vmax.f32 %v3688_v8, %v3692_v19  ;;  %v12002_v48 = vpack.c.bf16 %v3692_v19, %v3688_v8  ;;  %v3359_v11 = vpop.f32.mrb[100].mxu1  ;;  %v3552_v31 = vpop.f32.mrb[100].mxu0 }
 0x654   : > { %13076 = vst [vmem:[#allocation60_spill] sm:$0xff] %v11996_v45  ;;  %v3360_v13 = vadd.f32 %v3359_v11, %v11575_v53  ;;  %v3553_v35 = vadd.f32 %v3552_v31, %v11524_v30  ;;  %v3361_v7 = vpop.f32.mrb[101].mxu1  ;;  %v3554_v3 = vpop.f32.mrb[101].mxu0 }
 0x655   : > { %13077 = vst [vmem:[#allocation61_spill] sm:$0xff] %v12000_v38  ;;  %v3362_v43 = vadd.f32 %v3361_v7, %v11592_v57  ;;  %v3555_v26 = vadd.f32 %v3554_v3, %v11529_v25  ;;  %v3363_v33 = vpop.f32.mrb[102].mxu1  ;;  %v3556_v54 = vpop.f32.mrb[102].mxu0  ;;  %5724 = vmatprep.mubr.bf16.mxu1 %v12000_v38  ;;  %6110 = vmatprep.mubr.bf16.mxu0 %v12000_v38 }
 0x656   : > { %v3693_v40 = vmax.f32 %v3360_v13, 0.0  ;;  %v3695_v12 = vmax.f32 %v3553_v35, 0.0  ;;  %v3364_v28 = vadd.f32 %v3363_v33, %v11575_v53  ;;  %v3557_v1 = vadd.f32 %v3556_v54, %v11524_v30  ;;  %v3365_v6 = vpop.f32.mrb[103].mxu1  ;;  %v3558_v8 = vpop.f32.mrb[103].mxu0  ;;  %5725 = vmatmul.mubr.bf16.gmra.mrb[160].mxu1 %v11996_v45  ;;  %6111 = vmatmul.mubr.bf16.gmra.mrb[160].mxu0 %v11996_v45 }
 0x657   : > { %v3694_v19 = vmax.f32 %v3362_v43, 0.0  ;;  %v3696_v11 = vmax.f32 %v3555_v26, 0.0  ;;  %v3366_v31 = vadd.f32 %v3365_v6, %v11592_v57  ;;  %v3559_v7 = vadd.f32 %v3558_v8, %v11529_v25 }
 0x658   : > { %v3834_v3 = vmax.f32 %v3833_v58, %v3693_v40  ;;  %v3876_v38 = vmax.f32 %v3875_v16, %v3695_v12  ;;  %v3697_v13 = vmax.f32 %v3364_v28, 0.0  ;;  %v3699_v35 = vmax.f32 %v3557_v1, 0.0 }
 0x659   : > { %v3855_v2 = vmax.f32 %v3854_v47, %v3694_v19  ;;  %v3897_v33 = vmax.f32 %v3896_v29, %v3696_v11  ;;  %v3698_v54 = vmax.f32 %v3366_v31, 0.0  ;;  %v3700_v46 = vmax.f32 %v3559_v7, 0.0  ;;  %v12029_v47 = vld [vmem:[%s10801_s22 + $0x10] sm:$0xff] }
 0x65a   : > { %v3835_v44 = vmax.f32 %v3834_v3, %v3697_v13  ;;  %v12016_v23 = vpack.c.bf16 %v3697_v13, %v3693_v40  ;;  %v3877_v43 = vmax.f32 %v3876_v38, %v3699_v35  ;;  %v12018_v26 = vpack.c.bf16 %v3699_v35, %v3695_v12  ;;  %v12032_v29 = vld [vmem:[%s10801_s22 + $0x30] sm:$0xff]  ;;  %v12035_v38 = vld [vmem:[%s10801_s22 + $0x18] sm:$0xff] }
 0x65b   : > { %v3856_v6 = vmax.f32 %v3855_v2, %v3698_v54  ;;  %v12020_v8 = vpack.c.bf16 %v3698_v54, %v3694_v19  ;;  %v3898_v58 = vmax.f32 %v3897_v33, %v3700_v46  ;;  %v12022_v16 = vpack.c.bf16 %v3700_v46, %v3696_v11  ;;  %v12042_v40 = vld [vmem:[%s10801_s22 + $0x38] sm:$0xff] }
 0x65c   : > { %13078 = vst [vmem:[#allocation62_spill] sm:$0xff] %v12016_v23  ;;  %v8416_v46 = vcombine.high %v12029_v47, %v12032_v29  ;;  %v8418_v28 = vcombine.high %v12035_v38, %v12042_v40 }
 0x65d   : > { %13079 = vst [vmem:[#allocation63_spill] sm:$0xff] %v12020_v8  ;;  %5734 = vmatprep.mubr.bf16.mxu1 %v12020_v8  ;;  %6120 = vmatprep.mubr.bf16.mxu0 %v12020_v8 }
 0x65e   : > { %5735 = vmatmul.mubr.bf16.gmra.mrb[164].mxu1 %v12016_v23  ;;  %6121 = vmatmul.mubr.bf16.gmra.mrb[164].mxu0 %v12016_v23 }
 0x65f   : > { %6384 = vmatprep.subr.bf16.mxu1 %v8416_v46  ;;  %6770 = vmatprep.subr.bf16.mxu0 %v8418_v28 }
 0x66c   : > { %v3369_v1 = vpop.f32.mrb[104].mxu1  ;;  %v3562_v19 = vpop.f32.mrb[104].mxu0 }
 0x66d   : > { %v3370_v11 = vadd.f32 %v3369_v1, %v11575_v53  ;;  %v3563_v31 = vadd.f32 %v3562_v19, %v11524_v30  ;;  %v3371_v7 = vpop.f32.mrb[105].mxu1  ;;  %v3564_v3 = vpop.f32.mrb[105].mxu0 }
 0x66e   : > { %v3372_v13 = vadd.f32 %v3371_v7, %v11592_v57  ;;  %v3565_v35 = vadd.f32 %v3564_v3, %v11529_v25  ;;  %v3373_v33 = vpop.f32.mrb[106].mxu1  ;;  %v3566_v54 = vpop.f32.mrb[106].mxu0 }
 0x66f   : > { %v3701_v12 = vmax.f32 %v3370_v11, 0.0  ;;  %v3703_v2 = vmax.f32 %v3563_v31, 0.0  ;;  %v3374_v23 = vadd.f32 %v3373_v33, %v11575_v53  ;;  %v3567_v46 = vadd.f32 %v3566_v54, %v11524_v30  ;;  %v3375_v28 = vpop.f32.mrb[107].mxu1  ;;  %v3568_v8 = vpop.f32.mrb[107].mxu0 }
 0x670   : > { %v3702_v45 = vmax.f32 %v3372_v13, 0.0  ;;  %v3704_v1 = vmax.f32 %v3565_v35, 0.0  ;;  %v3376_v19 = vadd.f32 %v3375_v28, %v11592_v57  ;;  %v3569_v0 = vadd.f32 %v3568_v8, %v11529_v25 }
 0x671   : > { %v3836_v36 = vmax.f32 %v3835_v44, %v3701_v12  ;;  %v3878_v7 = vmax.f32 %v3877_v43, %v3703_v2  ;;  %v3705_v5 = vmax.f32 %v3374_v23, 0.0  ;;  %v3707_v3 = vmax.f32 %v3567_v46, 0.0 }
 0x672   : > { %v3857_v51 = vmax.f32 %v3856_v6, %v3702_v45  ;;  %v3899_v9 = vmax.f32 %v3898_v58, %v3704_v1  ;;  %v3706_v11 = vmax.f32 %v3376_v19, 0.0  ;;  %v3708_v31 = vmax.f32 %v3569_v0, 0.0 }
 0x673   : > { %v3837_v62 = vmax.f32 %v3836_v36, %v3705_v5  ;;  %v12056_v33 = vpack.c.bf16 %v3705_v5, %v3701_v12  ;;  %v3879_v54 = vmax.f32 %v3878_v7, %v3707_v3  ;;  %v12058_v32 = vpack.c.bf16 %v3707_v3, %v3703_v2 }
 0x674   : > { %v3858_v13 = vmax.f32 %v3857_v51, %v3706_v11  ;;  %v12060_v35 = vpack.c.bf16 %v3706_v11, %v3702_v45  ;;  %v3900_v28 = vmax.f32 %v3899_v9, %v3708_v31  ;;  %v12062_v15 = vpack.c.bf16 %v3708_v31, %v3704_v1  ;;  %v3379_v44 = vpop.f32.mrb[108].mxu1  ;;  %v3572_v43 = vpop.f32.mrb[108].mxu0 }
 0x675   : > { %13080 = vst [vmem:[#allocation64_spill] sm:$0xff] %v12056_v33  ;;  %v3380_v23 = vadd.f32 %v3379_v44, %v11575_v53  ;;  %v3573_v6 = vadd.f32 %v3572_v43, %v11524_v30  ;;  %v3381_v8 = vpop.f32.mrb[109].mxu1  ;;  %v3574_v0 = vpop.f32.mrb[109].mxu0 }
 0x676   : > { %13081 = vst [vmem:[#allocation65_spill] sm:$0xff] %v12060_v35  ;;  %v3382_v5 = vadd.f32 %v3381_v8, %v11592_v57  ;;  %v3575_v36 = vadd.f32 %v3574_v0, %v11529_v25  ;;  %v3383_v58 = vpop.f32.mrb[110].mxu1  ;;  %v3576_v2 = vpop.f32.mrb[110].mxu0  ;;  %5744 = vmatprep.mubr.bf16.mxu1 %v12060_v35  ;;  %6130 = vmatprep.mubr.bf16.mxu0 %v12060_v35 }
 0x677   : > { %v3709_v45 = vmax.f32 %v3380_v23, 0.0  ;;  %v3711_v9 = vmax.f32 %v3573_v6, 0.0  ;;  %v3384_v51 = vadd.f32 %v3383_v58, %v11575_v53  ;;  %v3577_v12 = vadd.f32 %v3576_v2, %v11524_v30  ;;  %v3385_v46 = vpop.f32.mrb[111].mxu1  ;;  %v3578_v1 = vpop.f32.mrb[111].mxu0  ;;  %5745 = vmatmul.mubr.bf16.gmra.mrb[168].mxu1 %v12056_v33  ;;  %6131 = vmatmul.mubr.bf16.gmra.mrb[168].mxu0 %v12056_v33 }
 0x678   : > { %v3710_v19 = vmax.f32 %v3382_v5, 0.0  ;;  %v3712_v7 = vmax.f32 %v3575_v36, 0.0  ;;  %v3386_v3 = vadd.f32 %v3385_v46, %v11592_v57  ;;  %v3579_v11 = vadd.f32 %v3578_v1, %v11529_v25 }
 0x679   : > { %v3838_v31 = vmax.f32 %v3837_v62, %v3709_v45  ;;  %v3880_v44 = vmax.f32 %v3879_v54, %v3711_v9  ;;  %v3713_v43 = vmax.f32 %v3384_v51, 0.0  ;;  %v3715_v23 = vmax.f32 %v3577_v12, 0.0 }
 0x67a   : > { %v3859_v6 = vmax.f32 %v3858_v13, %v3710_v19  ;;  %v3901_v8 = vmax.f32 %v3900_v28, %v3712_v7  ;;  %v3714_v0 = vmax.f32 %v3386_v3, 0.0  ;;  %v3716_v58 = vmax.f32 %v3579_v11, 0.0 }
 0x67b   : > { %v3839_v2 = vmax.f32 %v3838_v31, %v3713_v43  ;;  %v12076_v35 = vpack.c.bf16 %v3713_v43, %v3709_v45  ;;  %v3881_v63 = vmax.f32 %v3880_v44, %v3715_v23  ;;  %v12078_v49 = vpack.c.bf16 %v3715_v23, %v3711_v9 }
 0x67c   : > { %v3860_v5 = vmax.f32 %v3859_v6, %v3714_v0  ;;  %v12080_v36 = vpack.c.bf16 %v3714_v0, %v3710_v19  ;;  %v3902_v46 = vmax.f32 %v3901_v8, %v3716_v58  ;;  %v12082_v33 = vpack.c.bf16 %v3716_v58, %v3712_v7 }
 0x67d   : > { %13082 = vst [vmem:[#allocation66_spill] sm:$0xff] %v12076_v35 }
 0x67e   : > { %13083 = vst [vmem:[#allocation67_spill] sm:$0xff] %v12080_v36  ;;  %5754 = vmatprep.mubr.bf16.mxu1 %v12080_v36  ;;  %6140 = vmatprep.mubr.bf16.mxu0 %v12080_v36 }
 0x67f   : > { %5755 = vmatmul.mubr.bf16.gmra.mrb[172].mxu1 %v12076_v35  ;;  %6141 = vmatmul.mubr.bf16.gmra.mrb[172].mxu0 %v12076_v35 }
 0x691   : > { %v3389_v62 = vpop.f32.mrb[112].mxu1  ;;  %v3582_v54 = vpop.f32.mrb[112].mxu0 }
 0x692   : > { %v3390_v13 = vadd.f32 %v3389_v62, %v11575_v53  ;;  %v3583_v28 = vadd.f32 %v3582_v54, %v11524_v30  ;;  %v3391_v45 = vpop.f32.mrb[113].mxu1  ;;  %v3584_v9 = vpop.f32.mrb[113].mxu0 }
 0x693   : > { %v3392_v51 = vadd.f32 %v3391_v45, %v11592_v57  ;;  %v3585_v12 = vadd.f32 %v3584_v9, %v11529_v25  ;;  %v3393_v1 = vpop.f32.mrb[114].mxu1  ;;  %v3586_v19 = vpop.f32.mrb[114].mxu0 }
 0x694   : > { %v3717_v7 = vmax.f32 %v3390_v13, 0.0  ;;  %v3719_v3 = vmax.f32 %v3583_v28, 0.0  ;;  %v3394_v11 = vadd.f32 %v3393_v1, %v11575_v53  ;;  %v3587_v31 = vadd.f32 %v3586_v19, %v11524_v30  ;;  %v3395_v44 = vpop.f32.mrb[115].mxu1  ;;  %v3588_v43 = vpop.f32.mrb[115].mxu0 }
 0x695   : > { %v3718_v23 = vmax.f32 %v3392_v51, 0.0  ;;  %v3720_v6 = vmax.f32 %v3585_v12, 0.0  ;;  %v3396_v8 = vadd.f32 %v3395_v44, %v11592_v57  ;;  %v3589_v0 = vadd.f32 %v3588_v43, %v11529_v25 }
 0x696   : > { %v3840_v58 = vmax.f32 %v3839_v2, %v3717_v7  ;;  %v3882_v62 = vmax.f32 %v3881_v63, %v3719_v3  ;;  %v3721_v54 = vmax.f32 %v3394_v11, 0.0  ;;  %v3723_v45 = vmax.f32 %v3587_v31, 0.0 }
 0x697   : > { %v3861_v9 = vmax.f32 %v3860_v5, %v3718_v23  ;;  %v3903_v35 = vmax.f32 %v3902_v46, %v3720_v6  ;;  %v3722_v13 = vmax.f32 %v3396_v8, 0.0  ;;  %v3724_v28 = vmax.f32 %v3589_v0, 0.0 }
 0x698   : > { %v3841_v36 = vmax.f32 %v3840_v58, %v3721_v54  ;;  %v12096_v1 = vpack.c.bf16 %v3721_v54, %v3717_v7  ;;  %v3883_v19 = vmax.f32 %v3882_v62, %v3723_v45  ;;  %v12098_v42 = vpack.c.bf16 %v3723_v45, %v3719_v3 }
 0x699   : > { %v3862_v51 = vmax.f32 %v3861_v9, %v3722_v13  ;;  %v12100_v12 = vpack.c.bf16 %v3722_v13, %v3718_v23  ;;  %v3904_v44 = vmax.f32 %v3903_v35, %v3724_v28  ;;  %v12102_v52 = vpack.c.bf16 %v3724_v28, %v3720_v6  ;;  %v3399_v2 = vpop.f32.mrb[116].mxu1  ;;  %v3592_v63 = vpop.f32.mrb[116].mxu0 }
 0x69a   : > { %13084 = vst [vmem:[#allocation68_spill] sm:$0xff] %v12096_v1  ;;  %13085 = vst [vmem:[#allocation69_spill] sm:$0xff] %v12098_v42  ;;  %v3400_v11 = vadd.f32 %v3399_v2, %v11575_v53  ;;  %v3593_v5 = vadd.f32 %v3592_v63, %v11524_v30  ;;  %v3401_v46 = vpop.f32.mrb[117].mxu1  ;;  %v3594_v31 = vpop.f32.mrb[117].mxu0 }
 0x69b   : > { %13086 = vst [vmem:[#allocation70_spill] sm:$0xff] %v12100_v12  ;;  %13087 = vst [vmem:[#allocation71_spill] sm:$0xff] %v12102_v52  ;;  %v3402_v7 = vadd.f32 %v3401_v46, %v11592_v57  ;;  %v3595_v43 = vadd.f32 %v3594_v31, %v11529_v25  ;;  %v3403_v3 = vpop.f32.mrb[118].mxu1  ;;  %v3596_v8 = vpop.f32.mrb[118].mxu0  ;;  %5764 = vmatprep.mubr.bf16.mxu1 %v12100_v12  ;;  %6150 = vmatprep.mubr.bf16.mxu0 %v12100_v12 }
 0x69c   : > { %v3725_v35 = vmax.f32 %v3400_v11, 0.0  ;;  %v3727_v23 = vmax.f32 %v3593_v5, 0.0  ;;  %v3404_v6 = vadd.f32 %v3403_v3, %v11575_v53  ;;  %v3597_v0 = vadd.f32 %v3596_v8, %v11524_v30  ;;  %v3405_v58 = vpop.f32.mrb[119].mxu1  ;;  %v3598_v62 = vpop.f32.mrb[119].mxu0  ;;  %5765 = vmatmul.mubr.bf16.gmra.mrb[176].mxu1 %v12096_v1  ;;  %6151 = vmatmul.mubr.bf16.gmra.mrb[176].mxu0 %v12096_v1 }
 0x69d   : > { %v3726_v54 = vmax.f32 %v3402_v7, 0.0  ;;  %v3728_v45 = vmax.f32 %v3595_v43, 0.0  ;;  %v3406_v9 = vadd.f32 %v3405_v58, %v11592_v57  ;;  %v3599_v13 = vadd.f32 %v3598_v62, %v11529_v25 }
 0x69e   : > { %v3842_v28 = vmax.f32 %v3841_v36, %v3725_v35  ;;  %v3884_v2 = vmax.f32 %v3883_v19, %v3727_v23  ;;  %v3729_v63 = vmax.f32 %v3404_v6, 0.0  ;;  %v3731_v11 = vmax.f32 %v3597_v0, 0.0 }
 0x69f   : > { %v3863_v5 = vmax.f32 %v3862_v51, %v3726_v54  ;;  %v3905_v46 = vmax.f32 %v3904_v44, %v3728_v45  ;;  %v3730_v31 = vmax.f32 %v3406_v9, 0.0  ;;  %v3732_v3 = vmax.f32 %v3599_v13, 0.0 }
 0x6a0   : > { %v3843_v8 = vmax.f32 %v3842_v28, %v3729_v63  ;;  %v12116_v12 = vpack.c.bf16 %v3729_v63, %v3725_v35  ;;  %v3885_v42 = vmax.f32 %v3884_v2, %v3731_v11  ;;  %v12118_v52 = vpack.c.bf16 %v3731_v11, %v3727_v23 }
 0x6a1   : > { %v3864_v7 = vmax.f32 %v3863_v5, %v3730_v31  ;;  %v12120_v43 = vpack.c.bf16 %v3730_v31, %v3726_v54  ;;  %v3906_v58 = vmax.f32 %v3905_v46, %v3732_v3  ;;  %v12122_v1 = vpack.c.bf16 %v3732_v3, %v3728_v45 }
 0x6a2   : > { %13088 = vst [vmem:[#allocation72_spill] sm:$0xff] %v12116_v12  ;;  %13089 = vst [vmem:[#allocation73_spill] sm:$0xff] %v12118_v52 }
 0x6a3   : > { %13090 = vst [vmem:[#allocation74_spill] sm:$0xff] %v12120_v43  ;;  %13091 = vst [vmem:[#allocation75_spill] sm:$0xff] %v12122_v1  ;;  %5774 = vmatprep.mubr.bf16.mxu1 %v12120_v43  ;;  %6160 = vmatprep.mubr.bf16.mxu0 %v12120_v43 }
 0x6a4   : > { %5775 = vmatmul.mubr.bf16.gmra.mrb[180].mxu1 %v12116_v12  ;;  %6161 = vmatmul.mubr.bf16.gmra.mrb[180].mxu0 %v12116_v12 }
 0x6b2   : > { %v3409_v36 = vpop.f32.mrb[120].mxu1  ;;  %v3602_v19 = vpop.f32.mrb[120].mxu0 }
 0x6b3   : > { %v3410_v51 = vadd.f32 %v3409_v36, %v11575_v53  ;;  %v3603_v44 = vadd.f32 %v3602_v19, %v11524_v30  ;;  %v3411_v35 = vpop.f32.mrb[121].mxu1  ;;  %v3604_v23 = vpop.f32.mrb[121].mxu0 }
 0x6b4   : > { %v3412_v6 = vadd.f32 %v3411_v35, %v11592_v57  ;;  %v3605_v0 = vadd.f32 %v3604_v23, %v11529_v25  ;;  %v3413_v62 = vpop.f32.mrb[122].mxu1  ;;  %v3606_v54 = vpop.f32.mrb[122].mxu0 }
 0x6b5   : > { %v3733_v45 = vmax.f32 %v3410_v51, 0.0  ;;  %v3735_v9 = vmax.f32 %v3603_v44, 0.0  ;;  %v3414_v13 = vadd.f32 %v3413_v62, %v11575_v53  ;;  %v3607_v28 = vadd.f32 %v3606_v54, %v11524_v30  ;;  %v3415_v2 = vpop.f32.mrb[123].mxu1  ;;  %v3608_v63 = vpop.f32.mrb[123].mxu0 }
 0x6b6   : > { %v3734_v11 = vmax.f32 %v3412_v6, 0.0  ;;  %v3736_v5 = vmax.f32 %v3605_v0, 0.0  ;;  %v3416_v46 = vadd.f32 %v3415_v2, %v11592_v57  ;;  %v3609_v31 = vadd.f32 %v3608_v63, %v11529_v25 }
 0x6b7   : > { %v3844_v3 = vmax.f32 %v3843_v8, %v3733_v45  ;;  %v3886_v36 = vmax.f32 %v3885_v42, %v3735_v9  ;;  %v3737_v19 = vmax.f32 %v3414_v13, 0.0  ;;  %v3739_v35 = vmax.f32 %v3607_v28, 0.0 }
 0x6b8   : > { %v3865_v23 = vmax.f32 %v3864_v7, %v3734_v11  ;;  %v3907_v12 = vmax.f32 %v3906_v58, %v3736_v5  ;;  %v3738_v51 = vmax.f32 %v3416_v46, 0.0  ;;  %v3740_v44 = vmax.f32 %v3609_v31, 0.0 }
 0x6b9   : > { %v3845_v43 = vmax.f32 %v3844_v3, %v3737_v19  ;;  %v12136_v62 = vpack.c.bf16 %v3737_v19, %v3733_v45  ;;  %v3887_v54 = vmax.f32 %v3886_v36, %v3739_v35  ;;  %v12138_v52 = vpack.c.bf16 %v3739_v35, %v3735_v9 }
 0x6ba   : > { %v3866_v6 = vmax.f32 %v3865_v23, %v3738_v51  ;;  %v12140_v0 = vpack.c.bf16 %v3738_v51, %v3734_v11  ;;  %v3908_v2 = vmax.f32 %v3907_v12, %v3740_v44  ;;  %v12142_v1 = vpack.c.bf16 %v3740_v44, %v3736_v5  ;;  %v3419_v8 = vpop.f32.mrb[124].mxu1  ;;  %v3612_v42 = vpop.f32.mrb[124].mxu0 }
 0x6bb   : > { %13092 = vst [vmem:[#allocation76_spill] sm:$0xff] %v12136_v62  ;;  %v3420_v13 = vadd.f32 %v3419_v8, %v11575_v53  ;;  %v3613_v7 = vadd.f32 %v3612_v42, %v11524_v30  ;;  %v3421_v58 = vpop.f32.mrb[125].mxu1  ;;  %v3614_v28 = vpop.f32.mrb[125].mxu0 }
 0x6bc   : > { %13093 = vst [vmem:[#allocation77_spill] sm:$0xff] %v12140_v0  ;;  %v3422_v45 = vadd.f32 %v3421_v58, %v11592_v57  ;;  %v3615_v63 = vadd.f32 %v3614_v28, %v11529_v25  ;;  %v3423_v9 = vpop.f32.mrb[126].mxu1  ;;  %v3616_v46 = vpop.f32.mrb[126].mxu0  ;;  %5784 = vmatprep.mubr.bf16.mxu1 %v12140_v0  ;;  %6170 = vmatprep.mubr.bf16.mxu0 %v12140_v0 }
 0x6bd   : > { %v3741_v12 = vmax.f32 %v3420_v13, 0.0  ;;  %v3743_v11 = vmax.f32 %v3613_v7, 0.0  ;;  %v3424_v5 = vadd.f32 %v3423_v9, %v11575_v53  ;;  %v3617_v31 = vadd.f32 %v3616_v46, %v11524_v30  ;;  %v3425_v3 = vpop.f32.mrb[127].mxu1  ;;  %v3618_v36 = vpop.f32.mrb[127].mxu0  ;;  %5785 = vmatmul.mubr.bf16.gmra.mrb[184].mxu1 %v12136_v62  ;;  %6171 = vmatmul.mubr.bf16.gmra.mrb[184].mxu0 %v12136_v62  ;;  %v4053_v62 = vld [vmem:[%s10801_s22 + $0x98] sm:$0xff] }
 0x6be   : > { %v3742_v19 = vmax.f32 %v3422_v45, 0.0  ;;  %v3744_v35 = vmax.f32 %v3615_v63, 0.0  ;;  %v3426_v23 = vadd.f32 %v3425_v3, %v11592_v57  ;;  %v3619_v51 = vadd.f32 %v3618_v36, %v11529_v25  ;;  %v12171_v3 = vld [vmem:[%s10801_s22 + $0x410] sm:$0xff] }
 0x6bf   : > { %v3846_v44 = vmax.f32 %v3845_v43, %v3741_v12  ;;  %v3888_v8 = vmax.f32 %v3887_v54, %v3743_v11  ;;  %v3745_v42 = vmax.f32 %v3424_v5, 0.0  ;;  %v3747_v13 = vmax.f32 %v3617_v31, 0.0  ;;  %v12174_v36 = vld [vmem:[%s10801_s22 + $0x430] sm:$0xff] }
 0x6c0   : > { %v3867_v7 = vmax.f32 %v3866_v6, %v3742_v19  ;;  %v3909_v53 = vmax.f32 %v3908_v2, %v3744_v35  ;;  %v3746_v58 = vmax.f32 %v3426_v23, 0.0  ;;  %v3748_v30 = vmax.f32 %v3619_v51, 0.0 }
 0x6c1   : > { %v3847_v28 = vmax.f32 %v3846_v44, %v3745_v42  ;;  %v12156_v9 = vpack.c.bf16 %v3745_v42, %v3741_v12  ;;  %v3889_v46 = vmax.f32 %v3888_v8, %v3747_v13  ;;  %v12158_v0 = vpack.c.bf16 %v3747_v13, %v3743_v11  ;;  %v12182_v44 = vld [vmem:[%s10801_s22 + $0x438] sm:$0xff]  ;;  %v4044_v13 = vld [vmem:[%s10801_s22 + $0x50] sm:$0xff] }
 0x6c2   : > { %v3868_v45 = vmax.f32 %v3867_v7, %v3746_v58  ;;  %v12160_v63 = vpack.c.bf16 %v3746_v58, %v3742_v19  ;;  %v3910_v57 = vmax.f32 %v3909_v53, %v3748_v30  ;;  %v12162_v25 = vpack.c.bf16 %v3748_v30, %v3744_v35  ;;  %v12177_v19 = vld [vmem:[%s10801_s22 + $0x418] sm:$0xff]  ;;  %v4048_v30 = vld [vmem:[%s10801_s22 + $0x70] sm:$0xff] }
 0x6c3   : > { %13094 = vst [vmem:[#allocation78_spill] sm:$0xff] %v12156_v9  ;;  %13095 = vst [vmem:[#allocation79_spill] sm:$0xff] %v12158_v0  ;;  %v3848_v43 = vrot.slane %v3847_v28, 4  ;;  %v3890_v54 = vrot.slane %v3889_v46, 4  ;;  %v4057_v0 = vld [vmem:[%s10801_s22 + $0xb8] sm:$0xff] }
 0x6c4   : > { %13096 = vst [vmem:[#allocation80_spill] sm:$0xff] %v12160_v63  ;;  %13097 = vst [vmem:[#allocation81_spill] sm:$0xff] %v12162_v25  ;;  %v3869_v6 = vrot.slane %v3868_v45, 4  ;;  %v3911_v2 = vrot.slane %v3910_v57, 4  ;;  %5794 = vmatprep.mubr.bf16.mxu1 %v12160_v63  ;;  %6180 = vmatprep.mubr.bf16.mxu0 %v12160_v63  ;;  %v4056_v63 = vld [vmem:[%s10801_s22 + $0xb0] sm:$0xff] }
 0x6c5   : > { %v3849_v12 = vmax.f32 %v3847_v28, %v3848_v43  ;;  %v3891_v11 = vmax.f32 %v3889_v46, %v3890_v54  ;;  %5795 = vmatmul.mubr.bf16.gmra.mrb[188].mxu1 %v12156_v9  ;;  %6181 = vmatmul.mubr.bf16.gmra.mrb[188].mxu0 %v12156_v9  ;;  %v4045_v28 = vld [vmem:[%s10801_s22 + $0x58] sm:$0xff] }
 0x6c6   : > { %v3870_v5 = vmax.f32 %v3868_v45, %v3869_v6  ;;  %v3912_v31 = vmax.f32 %v3910_v57, %v3911_v2  ;;  %5837 = vmatprep.mubr.bf16.mxu1 %v11537_v14  ;;  %6223 = vmatprep.mubr.bf16.mxu0 %v11537_v14  ;;  %v4049_v46 = vld [vmem:[%s10801_s22 + $0x78] sm:$0xff]  ;;  %v4052_v6 = vld [vmem:[%s10801_s22 + $0x90] sm:$0xff]  ;;  %v8424_v14 = vcombine.high %v4044_v13, %v4048_v30 }
 0x6c7   : > { %v3850_v35 = vrot.slane %v3849_v12, 2  ;;  %v3892_v23 = vrot.slane %v3891_v11, 2  ;;  %v8426_v9 = vcombine.high %v4045_v28, %v4049_v46 }
 0x6c8   : > { %v3871_v8 = vrot.slane %v3870_v5, 2  ;;  %v3913_v42 = vrot.slane %v3912_v31, 2 }
 0x6c9   : > { %v3851_v53 = vmax.f32 %v3849_v12, %v3850_v35  ;;  %v3893_v58 = vmax.f32 %v3891_v11, %v3892_v23  ;;  %v8423_v12 = vcombine.low %v4044_v13, %v4048_v30  ;;  %v13099_v35 = vcombine.low %v12035_v38, %v12042_v40 }
 0x6ca   : > { %v3872_v45 = vmax.f32 %v3870_v5, %v3871_v8  ;;  %v3914_v57 = vmax.f32 %v3912_v31, %v3913_v42  ;;  %v13098_v31 = vcombine.low %v12029_v47, %v12032_v29  ;;  %v8425_v23 = vcombine.low %v4045_v28, %v4049_v46  ;;  %v4061_v47 = vld [vmem:[%s10801_s22 + $0xd8] sm:$0xff]  ;;  %v4068_v28 = vld [vmem:[%s10801_s22 + $0x110] sm:$0xff] }
 0x6cb   : > { %v3852_v43 = vrot.slane %v3851_v53, 1  ;;  %v3894_v54 = vrot.slane %v3893_v58, 1  ;;  %v8432_v8 = vcombine.high %v4052_v6, %v4056_v63  ;;  %v8434_v42 = vcombine.high %v4053_v62, %v4057_v0  ;;  %v4065_v29 = vld [vmem:[%s10801_s22 + $0xf8] sm:$0xff]  ;;  %v4072_v46 = vld [vmem:[%s10801_s22 + $0x130] sm:$0xff] }
 0x6cc   : > { %v3873_v2 = vrot.slane %v3872_v45, 1  ;;  %v3915_v51 = vrot.slane %v3914_v57, 1  ;;  %v8431_v30 = vcombine.low %v4052_v6, %v4056_v63  ;;  %v13100_v63 = vcombine.low %v11976_v60, %v11979_v21 }
 0x6cd   : > { %v3853_v7 = vmax.f32 %v3851_v53, %v3852_v43  ;;  %v3895_v25 = vmax.f32 %v3893_v58, %v3894_v54  ;;  %5838 = vmatmul.mubr.bf16.vlgmr.msra.gmra.mrb[128].mxu1 %v11535_v39  ;;  %6224 = vmatmul.mubr.bf16.vlgmr.msra.gmra.mrb[128].mxu0 %v11535_v39  ;;  %v4064_v58 = vld [vmem:[%s10801_s22 + $0xf0] sm:$0xff]  ;;  %v8448_v6 = vcombine.high %v4068_v28, %v4072_v46 }
 0x6ce   : > { %v3874_v11 = vmax.f32 %v3872_v45, %v3873_v2  ;;  %v3916_v5 = vmax.f32 %v3914_v57, %v3915_v51  ;;  %6385 = vmatpush1.bf16.msra.mxu1 %v13098_v31  ;;  %6771 = vmatpush1.bf16.msra.mxu0 %v13099_v35  ;;  %v4060_v51 = vld [vmem:[%s10801_s22 + $0xd0] sm:$0xff]  ;;  %v4069_v45 = vld [vmem:[%s10801_s22 + $0x118] sm:$0xff]  ;;  %v8447_v21 = vcombine.low %v4068_v28, %v4072_v46 }
 0x6cf   : > { %5847 = vmatprep.mubr.bf16.mxu1 %v11565_v4  ;;  %6233 = vmatprep.mubr.bf16.mxu0 %v11565_v4  ;;  %v4073_v57 = vld [vmem:[%s10801_s22 + $0x138] sm:$0xff] }
 0x6d0   : > { %v3943_v13 = vcombine.low %v3853_v7, %v3874_v11  ;;  %v3944_v53 = vcombine.low %v3895_v25, %v3916_v5  ;;  %6386 = vmatprep.subr.bf16.mxu1 %v8424_v14  ;;  %6772 = vmatprep.subr.bf16.mxu0 %v8426_v9  ;;  %v8433_v7 = vcombine.low %v4053_v62, %v4057_v0  ;;  %v4080_v5 = vld [vmem:[%s10801_s22 + $0x170] sm:$0xff]  ;;  %v4077_v31 = vld [vmem:[%s10801_s22 + $0x158] sm:$0xff] }
 0x6d1   : > { %v8440_v9 = vcombine.high %v4060_v51, %v4064_v58  ;;  %v8442_v25 = vcombine.high %v4061_v47, %v4065_v29  ;;  %v8439_v62 = vcombine.low %v4060_v51, %v4064_v58  ;;  %v8441_v0 = vcombine.low %v4061_v47, %v4065_v29  ;;  %v4081_v35 = vld [vmem:[%s10801_s22 + $0x178] sm:$0xff]  ;;  %v4084_v51 = vld [vmem:[%s10801_s22 + $0x190] sm:$0xff] }
 0x6d2   : > { %v3951_v38 = vrot.slane %v3943_v13, %v11387_v37  ;;  %v3958_v40 = vrot.slane %v3944_v53, %v11387_v37  ;;  %6387 = vmatpush1.bf16.msra.mxu1 %v8423_v12  ;;  %6773 = vmatpush1.bf16.msra.mxu0 %v8425_v23  ;;  %v8450_v2 = vcombine.high %v4069_v45, %v4073_v57  ;;  %v4076_v12 = vld [vmem:[%s10801_s22 + $0x150] sm:$0xff]  ;;  %v4085_v47 = vld [vmem:[%s10801_s22 + $0x198] sm:$0xff] }
 0x6d3   : > { %6388 = vmatprep.subr.bf16.mxu1 %v8432_v8  ;;  %6774 = vmatprep.subr.bf16.mxu0 %v8434_v42  ;;  %v8449_v8 = vcombine.low %v4069_v45, %v4073_v57  ;;  %v8456_v13 = vcombine.high %v4076_v12, %v4080_v5  ;;  %v8458_v53 = vcombine.high %v4077_v31, %v4081_v35  ;;  %v4088_v58 = vld [vmem:[%s10801_s22 + $0x1b0] sm:$0xff]  ;;  %v4089_v29 = vld [vmem:[%s10801_s22 + $0x1b8] sm:$0xff] }
 0x6d4   : > { %v3959_v14 = vcombine.low %v3951_v38, %v3958_v40  ;;  %v8455_v38 = vcombine.low %v4076_v12, %v4080_v5  ;;  %v8457_v40 = vcombine.low %v4077_v31, %v4081_v35  ;;  %v4097_v28 = vld [vmem:[%s10801_s22 + $0x1f8] sm:$0xff]  ;;  %v8463_v46 = vcombine.low %v4084_v51, %v4088_v58  ;;  %v4108_v5 = vld [vmem:[%s10801_s22 + $0x250] sm:$0xff] }
 0x6d5   : > { %5848 = vmatmul.mubr.bf16.gmra.mrb[132].mxu1 %v11561_v59  ;;  %6234 = vmatmul.mubr.bf16.gmra.mrb[132].mxu0 %v11561_v59  ;;  %v8465_v45 = vcombine.low %v4085_v47, %v4089_v29  ;;  %v4112_v31 = vld [vmem:[%s10801_s22 + $0x270] sm:$0xff]  ;;  %v4109_v35 = vld [vmem:[%s10801_s22 + $0x258] sm:$0xff] }
 0x6d6   : > { %v3962_v43 = vrot.slane %v3959_v14, 7  ;;  %5857 = vmatprep.mubr.bf16.mxu1 %v11673_v56  ;;  %6243 = vmatprep.mubr.bf16.mxu0 %v11673_v56  ;;  %v4092_v14 = vld [vmem:[%s10801_s22 + $0x1d0] sm:$0xff] }
 0x6d7   : > { %6389 = vmatpush1.bf16.msra.mxu1 %v8431_v30  ;;  %6775 = vmatpush1.bf16.msra.mxu0 %v8433_v7  ;;  %v8464_v30 = vcombine.high %v4084_v51, %v4088_v58  ;;  %v8466_v7 = vcombine.high %v4085_v47, %v4089_v29  ;;  %v4117_v51 = vld [vmem:[%s10801_s22 + $0x298] sm:$0xff]  ;;  %v8487_v47 = vcombine.low %v4108_v5, %v4112_v31 }
 0x6d8   : > { %v3963_v54 = vsel %vm2290_vm1, %v3962_v43, %v13100_v63  ;;  %6390 = vmatprep.subr.bf16.mxu1 %v8440_v9  ;;  %6776 = vmatprep.subr.bf16.mxu0 %v8442_v25  ;;  %v4096_v9 = vld [vmem:[%s10801_s22 + $0x1f0] sm:$0xff]  ;;  %v4093_v25 = vld [vmem:[%s10801_s22 + $0x1d8] sm:$0xff] }
 0x6d9   : > { %v3964_v11 = vsel %vm2292_vm2, %v3962_v43, %v3963_v54  ;;  %v8472_v57 = vcombine.high %v4092_v14, %v4096_v9  ;;  %v4101_v63 = vld [vmem:[%s10801_s22 + $0x218] sm:$0xff] }
 0x6da   : > { %v3965_v23 = vsel %vm2294_vm3, %v3962_v43, %v3964_v11  ;;  %v4105_v54 = vld [vmem:[%s10801_s22 + $0x238] sm:$0xff] }
 0x6db   : > { %v3966_v60 = vsel %vm2296_vm4, %v3962_v43, %v3965_v23  ;;  %6391 = vmatpush1.bf16.msra.mxu1 %v8439_v62  ;;  %6777 = vmatpush1.bf16.msra.mxu0 %v8441_v0  ;;  %v8474_v43 = vcombine.high %v4093_v25, %v4097_v28  ;;  %v4100_v62 = vld [vmem:[%s10801_s22 + $0x210] sm:$0xff]  ;;  %v8482_v11 = vcombine.high %v4101_v63, %v4105_v54  ;;  %v4113_v23 = vld [vmem:[%s10801_s22 + $0x278] sm:$0xff] }
 0x6dc   : > { %v3968_v42 = vmax.f32 %v3966_v60, 0.0  ;;  %6392 = vmatprep.subr.bf16.mxu1 %v8448_v6  ;;  %6778 = vmatprep.subr.bf16.mxu0 %v8450_v2  ;;  %v4104_v0 = vld [vmem:[%s10801_s22 + $0x230] sm:$0xff]  ;;  %v8471_v6 = vcombine.low %v4092_v14, %v4096_v9  ;;  %v8473_v2 = vcombine.low %v4093_v25, %v4097_v28  ;;  %v4121_v58 = vld [vmem:[%s10801_s22 + $0x2b8] sm:$0xff]  ;;  %v8489_v29 = vcombine.low %v4109_v35, %v4113_v23 }
 0x6dd   : > { %5858 = vmatmul.mubr.bf16.gmra.mrb[136].mxu1 %v11668_v34  ;;  %6244 = vmatmul.mubr.bf16.gmra.mrb[136].mxu0 %v11668_v34  ;;  %v8480_v12 = vcombine.high %v4100_v62, %v4104_v0  ;;  %v8479_v60 = vcombine.low %v4100_v62, %v4104_v0  ;;  %v4125_v14 = vld [vmem:[%s10801_s22 + $0x2d8] sm:$0xff]  ;;  %v8497_v28 = vcombine.low %v4117_v51, %v4121_v58 }
 0x6de   : > { %3969 = vst [vmem:[#allocation2 + $0x10] sm:$0xff] %v3968_v42  ;;  %5867 = vmatprep.mubr.bf16.mxu1 %v11733_v61  ;;  %6253 = vmatprep.mubr.bf16.mxu0 %v11733_v61  ;;  %v8490_v42 = vcombine.high %v4109_v35, %v4113_v23  ;;  %v4129_v9 = vld [vmem:[%s10801_s22 + $0x2f8] sm:$0xff] }
 0x6df   : > { %6393 = vmatpush1.bf16.msra.mxu1 %v8447_v21  ;;  %6779 = vmatpush1.bf16.msra.mxu0 %v8449_v8  ;;  %v8481_v21 = vcombine.low %v4101_v63, %v4105_v54  ;;  %v8488_v8 = vcombine.high %v4108_v5, %v4112_v31  ;;  %v4133_v62 = vld [vmem:[%s10801_s22 + $0x318] sm:$0xff]  ;;  %v8505_v54 = vcombine.low %v4125_v14, %v4129_v9 }
 0x6e0   : > { %6394 = vmatprep.subr.bf16.mxu1 %v8456_v13  ;;  %6780 = vmatprep.subr.bf16.mxu0 %v8458_v53  ;;  %v4116_v13 = vld [vmem:[%s10801_s22 + $0x290] sm:$0xff]  ;;  %v4137_v0 = vld [vmem:[%s10801_s22 + $0x338] sm:$0xff] }
 0x6e1   : > { %v4120_v53 = vld [vmem:[%s10801_s22 + $0x2b0] sm:$0xff]  ;;  %v4141_v5 = vld [vmem:[%s10801_s22 + $0x358] sm:$0xff]  ;;  %v8513_v23 = vcombine.low %v4133_v62, %v4137_v0 }
 0x6e2   : > { %v8495_v25 = vcombine.low %v4116_v13, %v4120_v53  ;;  %v4145_v31 = vld [vmem:[%s10801_s22 + $0x378] sm:$0xff] }
 0x6e3   : > { %6395 = vmatpush1.bf16.msra.mxu1 %v8455_v38  ;;  %6781 = vmatpush1.bf16.msra.mxu0 %v8457_v40  ;;  %v8496_v38 = vcombine.high %v4116_v13, %v4120_v53  ;;  %v8498_v40 = vcombine.high %v4117_v51, %v4121_v58  ;;  %v4149_v13 = vld [vmem:[%s10801_s22 + $0x398] sm:$0xff]  ;;  %v8521_v58 = vcombine.low %v4141_v5, %v4145_v31 }
 0x6e4   : > { %6396 = vmatprep.subr.bf16.mxu1 %v8464_v30  ;;  %6782 = vmatprep.subr.bf16.mxu0 %v8466_v7  ;;  %v4124_v30 = vld [vmem:[%s10801_s22 + $0x2d0] sm:$0xff]  ;;  %v4153_v53 = vld [vmem:[%s10801_s22 + $0x3b8] sm:$0xff] }
 0x6e5   : > { %5868 = vmatmul.mubr.bf16.gmra.mrb[140].mxu1 %v11709_v24  ;;  %6254 = vmatmul.mubr.bf16.gmra.mrb[140].mxu0 %v11709_v24  ;;  %v4128_v7 = vld [vmem:[%s10801_s22 + $0x2f0] sm:$0xff] }
 0x6e6   : > { %5877 = vmatprep.mubr.bf16.mxu1 %v11869_v22  ;;  %6263 = vmatprep.mubr.bf16.mxu0 %v11869_v22  ;;  %v8503_v63 = vcombine.low %v4124_v30, %v4128_v7 }
 0x6e7   : > { %6397 = vmatpush1.bf16.msra.mxu1 %v8463_v46  ;;  %6783 = vmatpush1.bf16.msra.mxu0 %v8465_v45  ;;  %v8504_v46 = vcombine.high %v4124_v30, %v4128_v7  ;;  %v8506_v45 = vcombine.high %v4125_v14, %v4129_v9  ;;  %v4157_v30 = vld [vmem:[%s10801_s22 + $0x3d8] sm:$0xff]  ;;  %v8529_v9 = vcombine.low %v4149_v13, %v4153_v53 }
 0x6e8   : > { %6398 = vmatprep.subr.bf16.mxu1 %v8472_v57  ;;  %6784 = vmatprep.subr.bf16.mxu0 %v8474_v43  ;;  %v4132_v57 = vld [vmem:[%s10801_s22 + $0x310] sm:$0xff]  ;;  %v4161_v7 = vld [vmem:[%s10801_s22 + $0x3f8] sm:$0xff] }
 0x6e9   : > { %v4136_v43 = vld [vmem:[%s10801_s22 + $0x330] sm:$0xff] }
 0x6ea   : > { %v8511_v35 = vcombine.low %v4132_v57, %v4136_v43 }
 0x6eb   : > { %6399 = vmatpush1.bf16.msra.mxu1 %v8471_v6  ;;  %6785 = vmatpush1.bf16.msra.mxu0 %v8473_v2  ;;  %v8512_v6 = vcombine.high %v4132_v57, %v4136_v43  ;;  %v8514_v2 = vcombine.high %v4133_v62, %v4137_v0  ;;  %v8544_v57 = vcombine.high %v12171_v3, %v12174_v36  ;;  %v13101_v62 = vld [vmem:[#allocation71_spill] sm:$0xff]  ;;  %v13102_v0 = vld [vmem:[#allocation69_spill] sm:$0xff] }
 0x6ec   : > { %6400 = vmatprep.subr.bf16.mxu1 %v8480_v12  ;;  %6786 = vmatprep.subr.bf16.mxu0 %v8482_v11  ;;  %v4140_v12 = vld [vmem:[%s10801_s22 + $0x350] sm:$0xff]  ;;  %v8546_v43 = vcombine.high %v12177_v19, %v12182_v44 }
 0x6ed   : > { %5878 = vmatmul.mubr.bf16.gmra.mrb[144].mxu1 %v11865_v10  ;;  %6264 = vmatmul.mubr.bf16.gmra.mrb[144].mxu0 %v11865_v10  ;;  %v4144_v11 = vld [vmem:[%s10801_s22 + $0x370] sm:$0xff] }
 0x6ee   : > { %5887 = vmatprep.mubr.bf16.mxu1 %v11902_v17  ;;  %6273 = vmatprep.mubr.bf16.mxu0 %v11902_v17  ;;  %v8519_v51 = vcombine.low %v4140_v12, %v4144_v11 }
 0x6ef   : > { %6401 = vmatpush1.bf16.msra.mxu1 %v8479_v60  ;;  %6787 = vmatpush1.bf16.msra.mxu0 %v8481_v21  ;;  %v8520_v60 = vcombine.high %v4140_v12, %v4144_v11  ;;  %v8522_v21 = vcombine.high %v4141_v5, %v4145_v31  ;;  %v13107_v12 = vld [vmem:[#allocation45_spill] sm:$0xff]  ;;  %v4172_v11 = vld [vmem:[%s10801_s22 + $0x450] sm:$0xff] }
 0x6f0   : > { %6402 = vmatprep.subr.bf16.mxu1 %v8488_v8  ;;  %6788 = vmatprep.subr.bf16.mxu0 %v8490_v42  ;;  %v4148_v8 = vld [vmem:[%s10801_s22 + $0x390] sm:$0xff]  ;;  %v4173_v31 = vld [vmem:[%s10801_s22 + $0x458] sm:$0xff] }
 0x6f1   : > { %v4152_v42 = vld [vmem:[%s10801_s22 + $0x3b0] sm:$0xff] }
 0x6f2   : > { %v8527_v14 = vcombine.low %v4148_v8, %v4152_v42  ;;  %v4176_v5 = vld [vmem:[%s10801_s22 + $0x470] sm:$0xff] }
 0x6f3   : > { %6403 = vmatpush1.bf16.msra.mxu1 %v8487_v47  ;;  %6789 = vmatpush1.bf16.msra.mxu0 %v8489_v29  ;;  %v8528_v47 = vcombine.high %v4148_v8, %v4152_v42  ;;  %v8530_v29 = vcombine.high %v4149_v13, %v4153_v53  ;;  %v4184_v8 = vld [vmem:[%s10801_s22 + $0x4b0] sm:$0xff]  ;;  %v4181_v42 = vld [vmem:[%s10801_s22 + $0x498] sm:$0xff] }
 0x6f4   : > { %6404 = vmatprep.subr.bf16.mxu1 %v8496_v38  ;;  %6790 = vmatprep.subr.bf16.mxu0 %v8498_v40  ;;  %v4156_v38 = vld [vmem:[%s10801_s22 + $0x3d0] sm:$0xff]  ;;  %v4185_v13 = vld [vmem:[%s10801_s22 + $0x4b8] sm:$0xff] }
 0x6f5   : > { %5888 = vmatmul.mubr.bf16.gmra.mrb[148].mxu1 %v11894_v55  ;;  %6274 = vmatmul.mubr.bf16.gmra.mrb[148].mxu0 %v11894_v55  ;;  %v4160_v40 = vld [vmem:[%s10801_s22 + $0x3f0] sm:$0xff] }
 0x6f6   : > { %5897 = vmatprep.mubr.bf16.mxu1 %v11942_v27  ;;  %6283 = vmatprep.mubr.bf16.mxu0 %v11942_v27  ;;  %v13108_v53 = vld [vmem:[#allocation44_spill] sm:$0xff] }
 0x6f7   : > { %6405 = vmatpush1.bf16.msra.mxu1 %v8495_v25  ;;  %6791 = vmatpush1.bf16.msra.mxu0 %v8497_v28  ;;  %v8536_v25 = vcombine.high %v4156_v38, %v4160_v40  ;;  %v8538_v28 = vcombine.high %v4157_v30, %v4161_v7 }
 0x6f8   : > { %6406 = vmatprep.subr.bf16.mxu1 %v8504_v46  ;;  %6792 = vmatprep.subr.bf16.mxu0 %v8506_v45  ;;  %v8535_v46 = vcombine.low %v4156_v38, %v4160_v40  ;;  %v8537_v45 = vcombine.low %v4157_v30, %v4161_v7  ;;  %v13111_v38 = vld [vmem:[#allocation47_spill] sm:$0xff]  ;;  %v8562_v30 = vcombine.high %v4181_v42, %v4185_v13 }
 0x6f9   : > { %v4188_v7 = vld [vmem:[%s10801_s22 + $0x4d0] sm:$0xff] }
 0x6fb   : > { %6407 = vmatpush1.bf16.msra.mxu1 %v8503_v63  ;;  %6793 = vmatpush1.bf16.msra.mxu0 %v8505_v54  ;;  %v13103_v63 = vld [vmem:[#allocation75_spill] sm:$0xff]  ;;  %v13104_v54 = vld [vmem:[#allocation73_spill] sm:$0xff] }
 0x6fc   : > { %6408 = vmatprep.subr.bf16.mxu1 %v8512_v6  ;;  %6794 = vmatprep.subr.bf16.mxu0 %v8514_v2  ;;  %v13105_v6 = vld [vmem:[#allocation81_spill] sm:$0xff]  ;;  %v13106_v2 = vld [vmem:[#allocation79_spill] sm:$0xff] }
 0x6fd   : > { %5898 = vmatmul.mubr.bf16.gmra.mrb[152].mxu1 %v11938_v18  ;;  %6284 = vmatmul.mubr.bf16.gmra.mrb[152].mxu0 %v11938_v18 }
 0x6fe   : > { %5907 = vmatprep.mubr.bf16.mxu1 %v11962_v20  ;;  %6293 = vmatprep.mubr.bf16.mxu0 %v11962_v20 }
 0x6ff   : > { %6409 = vmatpush1.bf16.msra.mxu1 %v8511_v35  ;;  %6795 = vmatpush1.bf16.msra.mxu0 %v8513_v23  ;;  %v4177_v35 = vld [vmem:[%s10801_s22 + $0x478] sm:$0xff]  ;;  %v4180_v23 = vld [vmem:[%s10801_s22 + $0x490] sm:$0xff] }
 0x700   : > { %6410 = vmatprep.subr.bf16.mxu1 %v8520_v60  ;;  %6796 = vmatprep.subr.bf16.mxu0 %v8522_v21  ;;  %v8552_v60 = vcombine.high %v4172_v11, %v4176_v5  ;;  %v8554_v21 = vcombine.high %v4173_v31, %v4177_v35  ;;  %v8560_v40 = vcombine.high %v4180_v23, %v4184_v8 }
 0x703   : > { %6411 = vmatpush1.bf16.msra.mxu1 %v8519_v51  ;;  %6797 = vmatpush1.bf16.msra.mxu0 %v8521_v58  ;;  %v13109_v51 = vcombine.low %v12171_v3, %v12174_v36  ;;  %v13110_v58 = vcombine.low %v12177_v19, %v12182_v44  ;;  %v4192_v3 = vld [vmem:[%s10801_s22 + $0x4f0] sm:$0xff]  ;;  %v4189_v36 = vld [vmem:[%s10801_s22 + $0x4d8] sm:$0xff]  ;;  %v8559_v19 = vcombine.low %v4180_v23, %v4184_v8 }
 0x704   : > { %6412 = vmatprep.subr.bf16.mxu1 %v8528_v47  ;;  %6798 = vmatprep.subr.bf16.mxu0 %v8530_v29  ;;  %v8551_v47 = vcombine.low %v4172_v11, %v4176_v5  ;;  %v8553_v29 = vcombine.low %v4173_v31, %v4177_v35  ;;  %v8561_v44 = vcombine.low %v4181_v42, %v4185_v13  ;;  %v4204_v23 = vld [vmem:[%s10801_s22 + $0x550] sm:$0xff]  ;;  %v4209_v8 = vld [vmem:[%s10801_s22 + $0x578] sm:$0xff] }
 0x705   : > { %5908 = vmatmul.mubr.bf16.gmra.mrb[156].mxu1 %v11958_v41  ;;  %6294 = vmatmul.mubr.bf16.gmra.mrb[156].mxu0 %v11958_v41  ;;  %v8567_v11 = vcombine.low %v4188_v7, %v4192_v3 }
 0x706   : > { %5917 = vmatprep.mubr.bf16.mxu1 %v12002_v48  ;;  %6303 = vmatprep.mubr.bf16.mxu0 %v12002_v48 }
 0x707   : > { %6413 = vmatpush1.bf16.msra.mxu1 %v8527_v14  ;;  %6799 = vmatpush1.bf16.msra.mxu0 %v8529_v9  ;;  %v4193_v14 = vld [vmem:[%s10801_s22 + $0x4f8] sm:$0xff]  ;;  %v8568_v9 = vcombine.high %v4188_v7, %v4192_v3 }
 0x708   : > { %6414 = vmatprep.subr.bf16.mxu1 %v8536_v25  ;;  %6800 = vmatprep.subr.bf16.mxu0 %v8538_v28  ;;  %v8570_v25 = vcombine.high %v4189_v36, %v4193_v14  ;;  %v4196_v28 = vld [vmem:[%s10801_s22 + $0x510] sm:$0xff]  ;;  %v8569_v5 = vcombine.low %v4189_v36, %v4193_v14 }
 0x70b   : > { %6415 = vmatpush1.bf16.msra.mxu1 %v8535_v46  ;;  %6801 = vmatpush1.bf16.msra.mxu0 %v8537_v45  ;;  %v13112_v46 = vld [vmem:[#allocation46_spill] sm:$0xff]  ;;  %v4200_v45 = vld [vmem:[%s10801_s22 + $0x530] sm:$0xff] }
 0x70c   : > { %6577 = vmatprep.subr.bf16.mxu1 %v8544_v57  ;;  %6963 = vmatprep.subr.bf16.mxu0 %v8546_v43  ;;  %v4197_v57 = vld [vmem:[%s10801_s22 + $0x518] sm:$0xff]  ;;  %v8576_v31 = vcombine.high %v4196_v28, %v4200_v45  ;;  %v8575_v42 = vcombine.low %v4196_v28, %v4200_v45 }
 0x70d   : > { %5918 = vmatmul.mubr.bf16.gmra.mrb[160].mxu1 %v11998_v50  ;;  %6304 = vmatmul.mubr.bf16.gmra.mrb[160].mxu0 %v11998_v50  ;;  %v4201_v43 = vld [vmem:[%s10801_s22 + $0x538] sm:$0xff] }
 0x70e   : > { %5927 = vmatprep.mubr.bf16.mxu1 %v12022_v16  ;;  %6313 = vmatprep.mubr.bf16.mxu0 %v12022_v16  ;;  %v8578_v35 = vcombine.high %v4197_v57, %v4201_v43  ;;  %v8577_v13 = vcombine.low %v4197_v57, %v4201_v43  ;;  %v4228_v43 = vld [vmem:[%s10801_s22 + $0x610] sm:$0xff] }
 0x715   : > { %5928 = vmatmul.mubr.bf16.gmra.mrb[164].mxu1 %v12018_v26  ;;  %6314 = vmatmul.mubr.bf16.gmra.mrb[164].mxu0 %v12018_v26 }
 0x716   : > { %5937 = vmatprep.mubr.bf16.mxu1 %v12062_v15  ;;  %6323 = vmatprep.mubr.bf16.mxu0 %v12062_v15 }
 0x71d   : > { %5938 = vmatmul.mubr.bf16.gmra.mrb[168].mxu1 %v12058_v32  ;;  %6324 = vmatmul.mubr.bf16.gmra.mrb[168].mxu0 %v12058_v32 }
 0x71e   : > { %5947 = vmatprep.mubr.bf16.mxu1 %v12082_v33  ;;  %6333 = vmatprep.mubr.bf16.mxu0 %v12082_v33 }
 0x725   : > { %5948 = vmatmul.mubr.bf16.gmra.mrb[172].mxu1 %v12078_v49  ;;  %6334 = vmatmul.mubr.bf16.gmra.mrb[172].mxu0 %v12078_v49 }
 0x726   : > { %5957 = vmatprep.mubr.bf16.mxu1 %v13101_v62  ;;  %6343 = vmatprep.mubr.bf16.mxu0 %v13101_v62 }
 0x72d   : > { %5958 = vmatmul.mubr.bf16.gmra.mrb[176].mxu1 %v13102_v0  ;;  %6344 = vmatmul.mubr.bf16.gmra.mrb[176].mxu0 %v13102_v0 }
 0x72e   : > { %5967 = vmatprep.mubr.bf16.mxu1 %v13103_v63  ;;  %6353 = vmatprep.mubr.bf16.mxu0 %v13103_v63 }
 0x735   : > { %5968 = vmatmul.mubr.bf16.gmra.mrb[180].mxu1 %v13104_v54  ;;  %6354 = vmatmul.mubr.bf16.gmra.mrb[180].mxu0 %v13104_v54 }
 0x736   : > { %5977 = vmatprep.mubr.bf16.mxu1 %v12142_v1  ;;  %6363 = vmatprep.mubr.bf16.mxu0 %v12142_v1 }
 0x73d   : > { %5978 = vmatmul.mubr.bf16.gmra.mrb[184].mxu1 %v12138_v52  ;;  %6364 = vmatmul.mubr.bf16.gmra.mrb[184].mxu0 %v12138_v52 }
 0x73e   : > { %5987 = vmatprep.mubr.bf16.mxu1 %v13105_v6  ;;  %6373 = vmatprep.mubr.bf16.mxu0 %v13105_v6 }
 0x745   : > { %5988 = vmatmul.mubr.bf16.gmra.mrb[188].mxu1 %v13106_v2  ;;  %6374 = vmatmul.mubr.bf16.gmra.mrb[188].mxu0 %v13106_v2 }
 0x746   : > { %6416 = vmatprep.mubr.bf16.mxu1 %v13107_v12  ;;  %6802 = vmatprep.mubr.bf16.mxu0 %v13107_v12  ;;  %v13113_v12 = vld [vmem:[#allocation49_spill] sm:$0xff] }
 0x74d   : > { %6417 = vmatmul.mubr.bf16.vlgmr.msra.gmra.mrb[192].mxu1 %v13108_v53  ;;  %6803 = vmatmul.mubr.bf16.vlgmr.msra.gmra.mrb[192].mxu0 %v13108_v53 }
 0x74e   : > { %6578 = vmatpush1.bf16.msra.mxu1 %v13109_v51  ;;  %6964 = vmatpush1.bf16.msra.mxu0 %v13110_v58  ;;  %v4212_v58 = vld [vmem:[%s10801_s22 + $0x590] sm:$0xff] }
 0x74f   : > { %6426 = vmatprep.mubr.bf16.mxu1 %v13111_v38  ;;  %6812 = vmatprep.mubr.bf16.mxu0 %v13111_v38  ;;  %v4213_v38 = vld [vmem:[%s10801_s22 + $0x598] sm:$0xff] }
 0x750   : > { %6579 = vmatprep.subr.bf16.mxu1 %v8552_v60  ;;  %6965 = vmatprep.subr.bf16.mxu0 %v8554_v21  ;;  %v4208_v60 = vld [vmem:[%s10801_s22 + $0x570] sm:$0xff]  ;;  %v4205_v21 = vld [vmem:[%s10801_s22 + $0x558] sm:$0xff] }
 0x751   : > { %v8584_v53 = vcombine.high %v4204_v23, %v4208_v60  ;;  %v8586_v51 = vcombine.high %v4205_v21, %v4209_v8  ;;  %v8583_v7 = vcombine.low %v4204_v23, %v4208_v60  ;;  %v8585_v3 = vcombine.low %v4205_v21, %v4209_v8 }
 0x752   : > { %6580 = vmatpush1.bf16.msra.mxu1 %v8551_v47  ;;  %6966 = vmatpush1.bf16.msra.mxu0 %v8553_v29  ;;  %v13114_v47 = vld [vmem:[#allocation48_spill] sm:$0xff] }
 0x753   : > { %6581 = vmatprep.subr.bf16.mxu1 %v8560_v40  ;;  %6967 = vmatprep.subr.bf16.mxu0 %v8562_v30  ;;  %v4216_v29 = vld [vmem:[%s10801_s22 + $0x5b0] sm:$0xff]  ;;  %v4217_v40 = vld [vmem:[%s10801_s22 + $0x5b8] sm:$0xff] }
 0x754   : > { %v13115_v30 = vld [vmem:[#allocation51_spill] sm:$0xff]  ;;  %v8592_v36 = vcombine.high %v4212_v58, %v4216_v29  ;;  %v8594_v14 = vcombine.high %v4213_v38, %v4217_v40  ;;  %v8591_v28 = vcombine.low %v4212_v58, %v4216_v29 }
 0x755   : > { %6427 = vmatmul.mubr.bf16.gmra.mrb[196].mxu1 %v13112_v46  ;;  %6813 = vmatmul.mubr.bf16.gmra.mrb[196].mxu0 %v13112_v46  ;;  %v8593_v46 = vcombine.low %v4213_v38, %v4217_v40  ;;  %v4244_v40 = vld [vmem:[%s10801_s22 + $0x690] sm:$0xff] }
 0x756   : > { %6436 = vmatprep.mubr.bf16.mxu1 %v13113_v12  ;;  %6822 = vmatprep.mubr.bf16.mxu0 %v13113_v12  ;;  %v13116_v12 = vld [vmem:[#allocation50_spill] sm:$0xff] }
 0x757   : > { %6582 = vmatpush1.bf16.msra.mxu1 %v8559_v19  ;;  %6968 = vmatpush1.bf16.msra.mxu0 %v8561_v44  ;;  %v4220_v19 = vld [vmem:[%s10801_s22 + $0x5d0] sm:$0xff] }
 0x758   : > { %6583 = vmatprep.subr.bf16.mxu1 %v8568_v9  ;;  %6969 = vmatprep.subr.bf16.mxu0 %v8570_v25  ;;  %v4224_v44 = vld [vmem:[%s10801_s22 + $0x5f0] sm:$0xff]  ;;  %v4221_v9 = vld [vmem:[%s10801_s22 + $0x5d8] sm:$0xff] }
 0x759   : > { %v4225_v25 = vld [vmem:[%s10801_s22 + $0x5f8] sm:$0xff]  ;;  %v8600_v45 = vcombine.high %v4220_v19, %v4224_v44  ;;  %v8599_v23 = vcombine.low %v4220_v19, %v4224_v44 }
 0x75a   : > { %v8602_v57 = vcombine.high %v4221_v9, %v4225_v25  ;;  %v8601_v60 = vcombine.low %v4221_v9, %v4225_v25 }
 0x75b   : > { %6584 = vmatpush1.bf16.msra.mxu1 %v8567_v11  ;;  %6970 = vmatpush1.bf16.msra.mxu0 %v8569_v5  ;;  %v4232_v11 = vld [vmem:[%s10801_s22 + $0x630] sm:$0xff]  ;;  %v4229_v5 = vld [vmem:[%s10801_s22 + $0x618] sm:$0xff] }
 0x75c   : > { %6585 = vmatprep.subr.bf16.mxu1 %v8576_v31  ;;  %6971 = vmatprep.subr.bf16.mxu0 %v8578_v35  ;;  %v4233_v31 = vld [vmem:[%s10801_s22 + $0x638] sm:$0xff]  ;;  %v8608_v21 = vcombine.high %v4228_v43, %v4232_v11  ;;  %v8607_v58 = vcombine.low %v4228_v43, %v4232_v11 }
 0x75d   : > { %6437 = vmatmul.mubr.bf16.gmra.mrb[200].mxu1 %v13114_v47  ;;  %6823 = vmatmul.mubr.bf16.gmra.mrb[200].mxu0 %v13114_v47  ;;  %v13117_v35 = vld [vmem:[#allocation53_spill] sm:$0xff]  ;;  %v8610_v8 = vcombine.high %v4229_v5, %v4233_v31  ;;  %v8609_v47 = vcombine.low %v4229_v5, %v4233_v31  ;;  %v4260_v31 = vld [vmem:[%s10801_s22 + $0x710] sm:$0xff] }
 0x75e   : > { %6446 = vmatprep.mubr.bf16.mxu1 %v13115_v30  ;;  %6832 = vmatprep.mubr.bf16.mxu0 %v13115_v30  ;;  %v13118_v30 = vld [vmem:[#allocation52_spill] sm:$0xff] }
 0x75f   : > { %6586 = vmatpush1.bf16.msra.mxu1 %v8575_v42  ;;  %6972 = vmatpush1.bf16.msra.mxu0 %v8577_v13  ;;  %v4236_v42 = vld [vmem:[%s10801_s22 + $0x650] sm:$0xff] }
 0x760   : > { %6587 = vmatprep.subr.bf16.mxu1 %v8584_v53  ;;  %6973 = vmatprep.subr.bf16.mxu0 %v8586_v51  ;;  %v4240_v13 = vld [vmem:[%s10801_s22 + $0x670] sm:$0xff]  ;;  %v4237_v53 = vld [vmem:[%s10801_s22 + $0x658] sm:$0xff] }
 0x761   : > { %v4241_v51 = vld [vmem:[%s10801_s22 + $0x678] sm:$0xff]  ;;  %v8616_v29 = vcombine.high %v4236_v42, %v4240_v13  ;;  %v8615_v19 = vcombine.low %v4236_v42, %v4240_v13 }
 0x762   : > { %v8618_v38 = vcombine.high %v4237_v53, %v4241_v51  ;;  %v8617_v44 = vcombine.low %v4237_v53, %v4241_v51 }
 0x763   : > { %6588 = vmatpush1.bf16.msra.mxu1 %v8583_v7  ;;  %6974 = vmatpush1.bf16.msra.mxu0 %v8585_v3  ;;  %v4248_v7 = vld [vmem:[%s10801_s22 + $0x6b0] sm:$0xff]  ;;  %v4245_v3 = vld [vmem:[%s10801_s22 + $0x698] sm:$0xff] }
 0x764   : > { %6589 = vmatprep.subr.bf16.mxu1 %v8592_v36  ;;  %6975 = vmatprep.subr.bf16.mxu0 %v8594_v14  ;;  %v4249_v36 = vld [vmem:[%s10801_s22 + $0x6b8] sm:$0xff]  ;;  %v13119_v14 = vld [vmem:[#allocation55_spill] sm:$0xff]  ;;  %v8624_v9 = vcombine.high %v4244_v40, %v4248_v7  ;;  %v8623_v43 = vcombine.low %v4244_v40, %v4248_v7 }
 0x765   : > { %6447 = vmatmul.mubr.bf16.gmra.mrb[204].mxu1 %v13116_v12  ;;  %6833 = vmatmul.mubr.bf16.gmra.mrb[204].mxu0 %v13116_v12  ;;  %v8626_v25 = vcombine.high %v4245_v3, %v4249_v36  ;;  %v8625_v12 = vcombine.low %v4245_v3, %v4249_v36  ;;  %v4276_v36 = vld [vmem:[%s10801_s22 + $0x790] sm:$0xff] }
 0x766   : > { %6456 = vmatprep.mubr.bf16.mxu1 %v13117_v35  ;;  %6842 = vmatprep.mubr.bf16.mxu0 %v13117_v35  ;;  %v13120_v35 = vld [vmem:[#allocation54_spill] sm:$0xff] }
 0x767   : > { %6590 = vmatpush1.bf16.msra.mxu1 %v8591_v28  ;;  %6976 = vmatpush1.bf16.msra.mxu0 %v8593_v46  ;;  %v4252_v28 = vld [vmem:[%s10801_s22 + $0x6d0] sm:$0xff] }
 0x768   : > { %6591 = vmatprep.subr.bf16.mxu1 %v8600_v45  ;;  %6977 = vmatprep.subr.bf16.mxu0 %v8602_v57  ;;  %v4256_v46 = vld [vmem:[%s10801_s22 + $0x6f0] sm:$0xff]  ;;  %v4253_v45 = vld [vmem:[%s10801_s22 + $0x6d8] sm:$0xff] }
 0x769   : > { %v4257_v57 = vld [vmem:[%s10801_s22 + $0x6f8] sm:$0xff]  ;;  %v8632_v11 = vcombine.high %v4252_v28, %v4256_v46  ;;  %v8631_v42 = vcombine.low %v4252_v28, %v4256_v46 }
 0x76a   : > { %v8634_v5 = vcombine.high %v4253_v45, %v4257_v57  ;;  %v8633_v13 = vcombine.low %v4253_v45, %v4257_v57 }
 0x76b   : > { %6592 = vmatpush1.bf16.msra.mxu1 %v8599_v23  ;;  %6978 = vmatpush1.bf16.msra.mxu0 %v8601_v60  ;;  %v4264_v23 = vld [vmem:[%s10801_s22 + $0x730] sm:$0xff]  ;;  %v4261_v60 = vld [vmem:[%s10801_s22 + $0x718] sm:$0xff] }
 0x76c   : > { %6593 = vmatprep.subr.bf16.mxu1 %v8608_v21  ;;  %6979 = vmatprep.subr.bf16.mxu0 %v8610_v8  ;;  %v4265_v21 = vld [vmem:[%s10801_s22 + $0x738] sm:$0xff]  ;;  %v8640_v53 = vcombine.high %v4260_v31, %v4264_v23  ;;  %v8639_v40 = vcombine.low %v4260_v31, %v4264_v23 }
 0x76d   : > { %6457 = vmatmul.mubr.bf16.gmra.mrb[208].mxu1 %v13118_v30  ;;  %6843 = vmatmul.mubr.bf16.gmra.mrb[208].mxu0 %v13118_v30  ;;  %v13121_v8 = vld [vmem:[#allocation57_spill] sm:$0xff]  ;;  %v8642_v51 = vcombine.high %v4261_v60, %v4265_v21  ;;  %v8641_v30 = vcombine.low %v4261_v60, %v4265_v21  ;;  %v13124_v21 = vld [vmem:[#allocation58_spill] sm:$0xff] }
 0x76e   : > { %6466 = vmatprep.mubr.bf16.mxu1 %v13119_v14  ;;  %6852 = vmatprep.mubr.bf16.mxu0 %v13119_v14  ;;  %v13122_v14 = vld [vmem:[#allocation56_spill] sm:$0xff] }
 0x76f   : > { %6594 = vmatpush1.bf16.msra.mxu1 %v8607_v58  ;;  %6980 = vmatpush1.bf16.msra.mxu0 %v8609_v47  ;;  %v4268_v58 = vld [vmem:[%s10801_s22 + $0x750] sm:$0xff] }
 0x770   : > { %6595 = vmatprep.subr.bf16.mxu1 %v8616_v29  ;;  %6981 = vmatprep.subr.bf16.mxu0 %v8618_v38  ;;  %v4272_v47 = vld [vmem:[%s10801_s22 + $0x770] sm:$0xff]  ;;  %v4269_v29 = vld [vmem:[%s10801_s22 + $0x758] sm:$0xff] }
 0x771   : > { %v4273_v38 = vld [vmem:[%s10801_s22 + $0x778] sm:$0xff]  ;;  %v8648_v7 = vcombine.high %v4268_v58, %v4272_v47  ;;  %v8647_v28 = vcombine.low %v4268_v58, %v4272_v47  ;;  %v13128_v58 = vld [vmem:[#allocation62_spill] sm:$0xff] }
 0x772   : > { %v8650_v3 = vcombine.high %v4269_v29, %v4273_v38  ;;  %v8649_v46 = vcombine.low %v4269_v29, %v4273_v38  ;;  %v13129_v47 = vld [vmem:[#allocation65_spill] sm:$0xff]  ;;  %v13130_v38 = vld [vmem:[#allocation64_spill] sm:$0xff] }
 0x773   : > { %6596 = vmatpush1.bf16.msra.mxu1 %v8615_v19  ;;  %6982 = vmatpush1.bf16.msra.mxu0 %v8617_v44  ;;  %v4280_v19 = vld [vmem:[%s10801_s22 + $0x7b0] sm:$0xff]  ;;  %v4277_v44 = vld [vmem:[%s10801_s22 + $0x798] sm:$0xff]  ;;  %v4290_v29 = vld [vmem:[%s10804_s23] sm:$0xff] }
 0x774   : > { %6597 = vmatprep.subr.bf16.mxu1 %v8624_v9  ;;  %6983 = vmatprep.subr.bf16.mxu0 %v8626_v25  ;;  %v4281_v9 = vld [vmem:[%s10801_s22 + $0x7b8] sm:$0xff]  ;;  %v13123_v25 = vld [vmem:[#allocation59_spill] sm:$0xff]  ;;  %v8656_v45 = vcombine.high %v4276_v36, %v4280_v19  ;;  %v8655_v31 = vcombine.low %v4276_v36, %v4280_v19 }
 0x775   : > { %6467 = vmatmul.mubr.bf16.gmra.mrb[212].mxu1 %v13120_v35  ;;  %6853 = vmatmul.mubr.bf16.gmra.mrb[212].mxu0 %v13120_v35  ;;  %v8658_v57 = vcombine.high %v4277_v44, %v4281_v9  ;;  %v8657_v35 = vcombine.low %v4277_v44, %v4281_v9  ;;  %v13133_v36 = vld [vmem:[#allocation67_spill] sm:$0xff] }
 0x776   : > { %6476 = vmatprep.mubr.bf16.mxu1 %v13121_v8  ;;  %6862 = vmatprep.mubr.bf16.mxu0 %v13121_v8  ;;  %v13125_v8 = vld [vmem:[#allocation61_spill] sm:$0xff]  ;;  %v13135_v44 = vld [vmem:[#allocation39_spill] sm:$0xff] }
 0x777   : > { %6598 = vmatpush1.bf16.msra.mxu1 %v8623_v43  ;;  %6984 = vmatpush1.bf16.msra.mxu0 %v8625_v12  ;;  %v4284_v43 = vld [vmem:[%s10801_s22 + $0x7d0] sm:$0xff]  ;;  %v13136_v9 = vsub.s32 3, %v13135_v44 }
 0x778   : > { %6599 = vmatprep.subr.bf16.mxu1 %v8632_v11  ;;  %6985 = vmatprep.subr.bf16.mxu0 %v8634_v5  ;;  %v4288_v12 = vld [vmem:[%s10801_s22 + $0x7f0] sm:$0xff]  ;;  %v4285_v11 = vld [vmem:[%s10801_s22 + $0x7d8] sm:$0xff] }
 0x779   : > { %v4289_v5 = vld [vmem:[%s10801_s22 + $0x7f8] sm:$0xff]  ;;  %v8664_v23 = vcombine.high %v4284_v43, %v4288_v12 }
 0x77a   : > { %v8666_v60 = vcombine.high %v4285_v11, %v4289_v5 }
 0x77b   : > { %6600 = vmatpush1.bf16.msra.mxu1 %v8631_v42  ;;  %6986 = vmatpush1.bf16.msra.mxu0 %v8633_v13  ;;  %v8663_v42 = vcombine.low %v4284_v43, %v4288_v12  ;;  %v8665_v13 = vcombine.low %v4285_v11, %v4289_v5 }
 0x77c   : > { %6601 = vmatprep.subr.bf16.mxu1 %v8640_v53  ;;  %6987 = vmatprep.subr.bf16.mxu0 %v8642_v51  ;;  %v13126_v53 = vld [vmem:[#allocation60_spill] sm:$0xff]  ;;  %v13127_v51 = vld [vmem:[#allocation63_spill] sm:$0xff] }
 0x77d   : > { %6477 = vmatmul.mubr.bf16.gmra.mrb[216].mxu1 %v13122_v14  ;;  %6863 = vmatmul.mubr.bf16.gmra.mrb[216].mxu0 %v13122_v14  ;;  %v13134_v14 = vld [vmem:[#allocation40_spill] sm:$0xff] }
 0x77e   : > { %6486 = vmatprep.mubr.bf16.mxu1 %v13123_v25  ;;  %6872 = vmatprep.mubr.bf16.mxu0 %v13123_v25  ;;  %v12447_v19 = vrot.slane %v4290_v29, %v13134_v14  ;;  %v12451_v25 = vrot.slane %v4290_v29, %v13136_v9  ;;  %v13138_v14 = vld [vmem:[#allocation70_spill] sm:$0xff] }
 0x77f   : > { %6602 = vmatpush1.bf16.msra.mxu1 %v8639_v40  ;;  %6988 = vmatpush1.bf16.msra.mxu0 %v8641_v30  ;;  %v13131_v40 = vld [vmem:[#allocation42_spill] sm:$0xff] }
 0x780   : > { %6603 = vmatprep.subr.bf16.mxu1 %v8648_v7  ;;  %6989 = vmatprep.subr.bf16.mxu0 %v8650_v3  ;;  %v12439_v30 = vrot.slane %v4290_v29, %v13131_v40  ;;  %v13132_v7 = vld [vmem:[#allocation41_spill] sm:$0xff] }
 0x781   : > { %v12442_v3 = vrot.slane %v4290_v29, %v13132_v7  ;;  %v13137_v29 = vld [vmem:[#allocation66_spill] sm:$0xff] }
 0x783   : > { %6604 = vmatpush1.bf16.msra.mxu1 %v8647_v28  ;;  %6990 = vmatpush1.bf16.msra.mxu0 %v8649_v46 }
 0x784   : > { %6605 = vmatprep.subr.bf16.mxu1 %v8656_v45  ;;  %6991 = vmatprep.subr.bf16.mxu0 %v8658_v57 }
 0x785   : > { %6487 = vmatmul.mubr.bf16.gmra.mrb[220].mxu1 %v13124_v21  ;;  %6873 = vmatmul.mubr.bf16.gmra.mrb[220].mxu0 %v13124_v21 }
 0x786   : > { %6496 = vmatprep.mubr.bf16.mxu1 %v13125_v8  ;;  %6882 = vmatprep.mubr.bf16.mxu0 %v13125_v8 }
 0x787   : > { %6606 = vmatpush1.bf16.msra.mxu1 %v8655_v31  ;;  %6992 = vmatpush1.bf16.msra.mxu0 %v8657_v35 }
 0x788   : > { %6607 = vmatprep.subr.bf16.mxu1 %v8664_v23  ;;  %6993 = vmatprep.subr.bf16.mxu0 %v8666_v60 }
 0x78b   : > { %6608 = vmatpush1.bf16.msra.mxu1 %v8663_v42  ;;  %6994 = vmatpush1.bf16.msra.mxu0 %v8665_v13 }
 0x78d   : > { %6497 = vmatmul.mubr.bf16.gmra.mrb[224].mxu1 %v13126_v53  ;;  %6883 = vmatmul.mubr.bf16.gmra.mrb[224].mxu0 %v13126_v53 }
 0x78e   : > { %6506 = vmatprep.mubr.bf16.mxu1 %v13127_v51  ;;  %6892 = vmatprep.mubr.bf16.mxu0 %v13127_v51 }
 0x795   : > { %6507 = vmatmul.mubr.bf16.gmra.mrb[228].mxu1 %v13128_v58  ;;  %6893 = vmatmul.mubr.bf16.gmra.mrb[228].mxu0 %v13128_v58 }
 0x796   : > { %6516 = vmatprep.mubr.bf16.mxu1 %v13129_v47  ;;  %6902 = vmatprep.mubr.bf16.mxu0 %v13129_v47 }
 0x79d   : > { %6517 = vmatmul.mubr.bf16.gmra.mrb[232].mxu1 %v13130_v38  ;;  %6903 = vmatmul.mubr.bf16.gmra.mrb[232].mxu0 %v13130_v38 }
 0x79e   : > { %6526 = vmatprep.mubr.bf16.mxu1 %v13133_v36  ;;  %6912 = vmatprep.mubr.bf16.mxu0 %v13133_v36 }
 0x7a0   : > { %v5839_v28 = vpop.f32.mrb[128].mxu1  ;;  %v6225_v46 = vpop.f32.mrb[128].mxu0 }
 0x7a1   : > { %v8823_v45 = vadd.f32 %v5839_v28, %v12439_v30  ;;  %v8887_v57 = vadd.f32 %v6225_v46, %v12442_v3  ;;  %v5841_v43 = vpop.f32.mrb[129].mxu1  ;;  %v6227_v12 = vpop.f32.mrb[129].mxu0 }
 0x7a2   : > { %v8824_v11 = vadd.f32 %v5841_v43, %v12447_v19  ;;  %v8888_v5 = vadd.f32 %v6227_v12, %v12451_v25  ;;  %v5843_v31 = vpop.f32.mrb[130].mxu1  ;;  %v6229_v35 = vpop.f32.mrb[130].mxu0 }
 0x7a3   : > { %v8825_v23 = vadd.f32 %v5843_v31, %v12439_v30  ;;  %v8889_v60 = vadd.f32 %v6229_v35, %v12442_v3  ;;  %v5845_v21 = vpop.f32.mrb[131].mxu1  ;;  %v6231_v8 = vpop.f32.mrb[131].mxu0  ;;  %v7156_v53 = vmax.f32 %v8823_v45, 0.0  ;;  %v7158_v51 = vmax.f32 %v8887_v57, 0.0 }
 0x7a4   : > { %v8826_v42 = vadd.f32 %v5845_v21, %v12447_v19  ;;  %v8890_v13 = vadd.f32 %v6231_v8, %v12451_v25  ;;  %v7157_v38 = vmax.f32 %v8824_v11, 0.0  ;;  %v7159_v40 = vmax.f32 %v8888_v5, 0.0 }
 0x7a5   : > { %v7164_v58 = vmax.f32 %v8825_v23, 0.0  ;;  %v7166_v47 = vmax.f32 %v8889_v60, 0.0  ;;  %6527 = vmatmul.mubr.bf16.gmra.mrb[236].mxu1 %v13137_v29  ;;  %6913 = vmatmul.mubr.bf16.gmra.mrb[236].mxu0 %v13137_v29 }
 0x7a6   : > { %v7165_v7 = vmax.f32 %v8826_v42, 0.0  ;;  %v7167_v36 = vmax.f32 %v8890_v13, 0.0  ;;  %6536 = vmatprep.mubr.bf16.mxu1 %v13138_v14  ;;  %6922 = vmatprep.mubr.bf16.mxu0 %v13138_v14 }
 0x7a7   : > { %v7412_v9 = vmax.f32 %v7156_v53, %v7164_v58  ;;  %v7454_v28 = vmax.f32 %v7158_v51, %v7166_v47 }
 0x7a8   : > { %v7433_v46 = vmax.f32 %v7157_v38, %v7165_v7  ;;  %v7475_v43 = vmax.f32 %v7159_v40, %v7167_v36  ;;  %v5849_v45 = vpop.f32.mrb[132].mxu1  ;;  %v6235_v57 = vpop.f32.mrb[132].mxu0 }
 0x7a9   : > { %v8827_v12 = vadd.f32 %v5849_v45, %v12439_v30  ;;  %v8891_v31 = vadd.f32 %v6235_v57, %v12442_v3  ;;  %v5851_v35 = vpop.f32.mrb[133].mxu1  ;;  %v6237_v23 = vpop.f32.mrb[133].mxu0  ;;  %v13139_v57 = vld [vmem:[#allocation68_spill] sm:$0xff] }
 0x7aa   : > { %v8828_v11 = vadd.f32 %v5851_v35, %v12447_v19  ;;  %v8892_v5 = vadd.f32 %v6237_v23, %v12451_v25  ;;  %v5853_v60 = vpop.f32.mrb[134].mxu1  ;;  %v6239_v21 = vpop.f32.mrb[134].mxu0 }
 0x7ab   : > { %v7172_v8 = vmax.f32 %v8827_v12, 0.0  ;;  %v7174_v42 = vmax.f32 %v8891_v31, 0.0  ;;  %v8829_v13 = vadd.f32 %v5853_v60, %v12439_v30  ;;  %v8893_v53 = vadd.f32 %v6239_v21, %v12442_v3  ;;  %v5855_v51 = vpop.f32.mrb[135].mxu1  ;;  %v6241_v58 = vpop.f32.mrb[135].mxu0  ;;  %v13140_v60 = vld [vmem:[#allocation74_spill] sm:$0xff] }
 0x7ac   : > { %v7173_v47 = vmax.f32 %v8828_v11, 0.0  ;;  %v7175_v29 = vmax.f32 %v8892_v5, 0.0  ;;  %v8830_v38 = vadd.f32 %v5855_v51, %v12447_v19  ;;  %v8894_v40 = vadd.f32 %v6241_v58, %v12451_v25 }
 0x7ad   : > { %v7413_v7 = vmax.f32 %v7412_v9, %v7172_v8  ;;  %v7455_v36 = vmax.f32 %v7454_v28, %v7174_v42  ;;  %v7180_v14 = vmax.f32 %v8829_v13, 0.0  ;;  %v7182_v45 = vmax.f32 %v8893_v53, 0.0  ;;  %6537 = vmatmul.mubr.bf16.gmra.mrb[240].mxu1 %v13139_v57  ;;  %6923 = vmatmul.mubr.bf16.gmra.mrb[240].mxu0 %v13139_v57 }
 0x7ae   : > { %v7434_v12 = vmax.f32 %v7433_v46, %v7173_v47  ;;  %v7476_v31 = vmax.f32 %v7475_v43, %v7175_v29  ;;  %v7181_v35 = vmax.f32 %v8830_v38, 0.0  ;;  %v7183_v23 = vmax.f32 %v8894_v40, 0.0  ;;  %6546 = vmatprep.mubr.bf16.mxu1 %v13140_v60  ;;  %6932 = vmatprep.mubr.bf16.mxu0 %v13140_v60 }
 0x7af   : > { %v7414_v11 = vmax.f32 %v7413_v7, %v7180_v14  ;;  %v7456_v5 = vmax.f32 %v7455_v36, %v7182_v45 }
 0x7b0   : > { %v7435_v21 = vmax.f32 %v7434_v12, %v7181_v35  ;;  %v7477_v51 = vmax.f32 %v7476_v31, %v7183_v23  ;;  %v5859_v9 = vpop.f32.mrb[136].mxu1  ;;  %v6245_v28 = vpop.f32.mrb[136].mxu0 }
 0x7b1   : > { %v8831_v8 = vadd.f32 %v5859_v9, %v12439_v30  ;;  %v8895_v42 = vadd.f32 %v6245_v28, %v12442_v3  ;;  %v5861_v13 = vpop.f32.mrb[137].mxu1  ;;  %v6247_v53 = vpop.f32.mrb[137].mxu0  ;;  %v13141_v28 = vld [vmem:[#allocation72_spill] sm:$0xff] }
 0x7b2   : > { %v8832_v46 = vadd.f32 %v5861_v13, %v12447_v19  ;;  %v8896_v43 = vadd.f32 %v6247_v53, %v12451_v25  ;;  %v5863_v58 = vpop.f32.mrb[138].mxu1  ;;  %v6249_v47 = vpop.f32.mrb[138].mxu0 }
 0x7b3   : > { %v7188_v29 = vmax.f32 %v8831_v8, 0.0  ;;  %v7190_v38 = vmax.f32 %v8895_v42, 0.0  ;;  %v8833_v40 = vadd.f32 %v5863_v58, %v12439_v30  ;;  %v8897_v7 = vadd.f32 %v6249_v47, %v12442_v3  ;;  %v5865_v36 = vpop.f32.mrb[139].mxu1  ;;  %v6251_v14 = vpop.f32.mrb[139].mxu0  ;;  %v13142_v58 = vld [vmem:[#allocation77_spill] sm:$0xff] }
 0x7b4   : > { %v7189_v45 = vmax.f32 %v8832_v46, 0.0  ;;  %v7191_v57 = vmax.f32 %v8896_v43, 0.0  ;;  %v8834_v12 = vadd.f32 %v5865_v36, %v12447_v19  ;;  %v8898_v31 = vadd.f32 %v6251_v14, %v12451_v25 }
 0x7b5   : > { %v7415_v35 = vmax.f32 %v7414_v11, %v7188_v29  ;;  %v7457_v23 = vmax.f32 %v7456_v5, %v7190_v38  ;;  %v7196_v60 = vmax.f32 %v8833_v40, 0.0  ;;  %v7198_v9 = vmax.f32 %v8897_v7, 0.0  ;;  %6547 = vmatmul.mubr.bf16.gmra.mrb[244].mxu1 %v13141_v28  ;;  %6933 = vmatmul.mubr.bf16.gmra.mrb[244].mxu0 %v13141_v28 }
 0x7b6   : > { %v7436_v8 = vmax.f32 %v7435_v21, %v7189_v45  ;;  %v7478_v42 = vmax.f32 %v7477_v51, %v7191_v57  ;;  %v7197_v13 = vmax.f32 %v8834_v12, 0.0  ;;  %v7199_v53 = vmax.f32 %v8898_v31, 0.0  ;;  %6556 = vmatprep.mubr.bf16.mxu1 %v13142_v58  ;;  %6942 = vmatprep.mubr.bf16.mxu0 %v13142_v58 }
 0x7b7   : > { %v7416_v46 = vmax.f32 %v7415_v35, %v7196_v60  ;;  %v7458_v43 = vmax.f32 %v7457_v23, %v7198_v9 }
 0x7b8   : > { %v7437_v47 = vmax.f32 %v7436_v8, %v7197_v13  ;;  %v7479_v36 = vmax.f32 %v7478_v42, %v7199_v53  ;;  %v5869_v11 = vpop.f32.mrb[140].mxu1  ;;  %v6255_v5 = vpop.f32.mrb[140].mxu0 }
 0x7b9   : > { %v8835_v29 = vadd.f32 %v5869_v11, %v12439_v30  ;;  %v8899_v38 = vadd.f32 %v6255_v5, %v12442_v3  ;;  %v5871_v40 = vpop.f32.mrb[141].mxu1  ;;  %v6257_v7 = vpop.f32.mrb[141].mxu0  ;;  %v13143_v5 = vld [vmem:[#allocation76_spill] sm:$0xff] }
 0x7ba   : > { %v8836_v21 = vadd.f32 %v5871_v40, %v12447_v19  ;;  %v8900_v51 = vadd.f32 %v6257_v7, %v12451_v25  ;;  %v5873_v14 = vpop.f32.mrb[142].mxu1  ;;  %v6259_v45 = vpop.f32.mrb[142].mxu0 }
 0x7bb   : > { %v7204_v57 = vmax.f32 %v8835_v29, 0.0  ;;  %v7206_v12 = vmax.f32 %v8899_v38, 0.0  ;;  %v8837_v31 = vadd.f32 %v5873_v14, %v12439_v30  ;;  %v8901_v35 = vadd.f32 %v6259_v45, %v12442_v3  ;;  %v5875_v23 = vpop.f32.mrb[143].mxu1  ;;  %v6261_v60 = vpop.f32.mrb[143].mxu0  ;;  %v13144_v14 = vld [vmem:[#allocation80_spill] sm:$0xff] }
 0x7bc   : > { %v7205_v9 = vmax.f32 %v8836_v21, 0.0  ;;  %v7207_v28 = vmax.f32 %v8900_v51, 0.0  ;;  %v8838_v8 = vadd.f32 %v5875_v23, %v12447_v19  ;;  %v8902_v42 = vadd.f32 %v6261_v60, %v12451_v25 }
 0x7bd   : > { %v7417_v13 = vmax.f32 %v7416_v46, %v7204_v57  ;;  %v7459_v53 = vmax.f32 %v7458_v43, %v7206_v12  ;;  %v7212_v58 = vmax.f32 %v8837_v31, 0.0  ;;  %v7214_v11 = vmax.f32 %v8901_v35, 0.0  ;;  %6557 = vmatmul.mubr.bf16.gmra.mrb[248].mxu1 %v13143_v5  ;;  %6943 = vmatmul.mubr.bf16.gmra.mrb[248].mxu0 %v13143_v5 }
 0x7be   : > { %v7438_v29 = vmax.f32 %v7437_v47, %v7205_v9  ;;  %v7480_v38 = vmax.f32 %v7479_v36, %v7207_v28  ;;  %v7213_v40 = vmax.f32 %v8838_v8, 0.0  ;;  %v7215_v7 = vmax.f32 %v8902_v42, 0.0  ;;  %6566 = vmatprep.mubr.bf16.mxu1 %v13144_v14  ;;  %6952 = vmatprep.mubr.bf16.mxu0 %v13144_v14 }
 0x7bf   : > { %v7418_v21 = vmax.f32 %v7417_v13, %v7212_v58  ;;  %v7460_v51 = vmax.f32 %v7459_v53, %v7214_v11 }
 0x7c0   : > { %v7439_v45 = vmax.f32 %v7438_v29, %v7213_v40  ;;  %v7481_v23 = vmax.f32 %v7480_v38, %v7215_v7  ;;  %v5879_v46 = vpop.f32.mrb[144].mxu1  ;;  %v6265_v43 = vpop.f32.mrb[144].mxu0 }
 0x7c1   : > { %v8839_v57 = vadd.f32 %v5879_v46, %v12439_v30  ;;  %v8903_v12 = vadd.f32 %v6265_v43, %v12442_v3  ;;  %v5881_v31 = vpop.f32.mrb[145].mxu1  ;;  %v6267_v35 = vpop.f32.mrb[145].mxu0  ;;  %v13145_v43 = vld [vmem:[#allocation78_spill] sm:$0xff] }
 0x7c2   : > { %v8840_v47 = vadd.f32 %v5881_v31, %v12447_v19  ;;  %v8904_v36 = vadd.f32 %v6267_v35, %v12451_v25  ;;  %v5883_v60 = vpop.f32.mrb[146].mxu1  ;;  %v6269_v9 = vpop.f32.mrb[146].mxu0 }
 0x7c3   : > { %v7220_v28 = vmax.f32 %v8839_v57, 0.0  ;;  %v7222_v8 = vmax.f32 %v8903_v12, 0.0  ;;  %v8841_v42 = vadd.f32 %v5883_v60, %v12439_v30  ;;  %v8905_v13 = vadd.f32 %v6269_v9, %v12442_v3  ;;  %v5885_v53 = vpop.f32.mrb[147].mxu1  ;;  %v6271_v58 = vpop.f32.mrb[147].mxu0  ;;  %v13146_v60 = vld [vmem:[#allocation43_spill] sm:$0xff] }
 0x7c4   : > { %v7221_v11 = vmax.f32 %v8840_v47, 0.0  ;;  %v7223_v5 = vmax.f32 %v8904_v36, 0.0  ;;  %v8842_v29 = vadd.f32 %v5885_v53, %v12447_v19  ;;  %v8906_v38 = vadd.f32 %v6271_v58, %v12451_v25 }
 0x7c5   : > { %v7419_v40 = vmax.f32 %v7418_v21, %v7220_v28  ;;  %v7461_v7 = vmax.f32 %v7460_v51, %v7222_v8  ;;  %v7228_v14 = vmax.f32 %v8841_v42, 0.0  ;;  %v7230_v46 = vmax.f32 %v8905_v13, 0.0  ;;  %6567 = vmatmul.mubr.bf16.gmra.mrb[252].mxu1 %v13145_v43  ;;  %6953 = vmatmul.mubr.bf16.gmra.mrb[252].mxu0 %v13145_v43 }
 0x7c6   : > { %v7440_v57 = vmax.f32 %v7439_v45, %v7221_v11  ;;  %v7482_v12 = vmax.f32 %v7481_v23, %v7223_v5  ;;  %v7229_v31 = vmax.f32 %v8842_v29, 0.0  ;;  %v7231_v35 = vmax.f32 %v8906_v38, 0.0  ;;  %6609 = vmatprep.mubr.bf16.mxu1 %v13146_v60  ;;  %6995 = vmatprep.mubr.bf16.mxu0 %v13146_v60 }
 0x7c7   : > { %v7420_v47 = vmax.f32 %v7419_v40, %v7228_v14  ;;  %v7462_v36 = vmax.f32 %v7461_v7, %v7230_v46 }
 0x7c8   : > { %v7441_v9 = vmax.f32 %v7440_v57, %v7229_v31  ;;  %v7483_v53 = vmax.f32 %v7482_v12, %v7231_v35  ;;  %v5889_v21 = vpop.f32.mrb[148].mxu1  ;;  %v6275_v51 = vpop.f32.mrb[148].mxu0 }
 0x7c9   : > { %v8843_v28 = vadd.f32 %v5889_v21, %v12439_v30  ;;  %v8907_v8 = vadd.f32 %v6275_v51, %v12442_v3  ;;  %v5891_v42 = vpop.f32.mrb[149].mxu1  ;;  %v6277_v13 = vpop.f32.mrb[149].mxu0 }
 0x7ca   : > { %v8844_v45 = vadd.f32 %v5891_v42, %v12447_v19  ;;  %v8908_v23 = vadd.f32 %v6277_v13, %v12451_v25  ;;  %v5893_v58 = vpop.f32.mrb[150].mxu1  ;;  %v6279_v11 = vpop.f32.mrb[150].mxu0 }
 0x7cb   : > { %v7236_v5 = vmax.f32 %v8843_v28, 0.0  ;;  %v7238_v29 = vmax.f32 %v8907_v8, 0.0  ;;  %v8845_v38 = vadd.f32 %v5893_v58, %v12439_v30  ;;  %v8909_v40 = vadd.f32 %v6279_v11, %v12442_v3  ;;  %v5895_v7 = vpop.f32.mrb[151].mxu1  ;;  %v6281_v14 = vpop.f32.mrb[151].mxu0 }
 0x7cc   : > { %v7237_v46 = vmax.f32 %v8844_v45, 0.0  ;;  %v7239_v43 = vmax.f32 %v8908_v23, 0.0  ;;  %v8846_v57 = vadd.f32 %v5895_v7, %v12447_v19  ;;  %v8910_v12 = vadd.f32 %v6281_v14, %v12451_v25 }
 0x7cd   : > { %v7421_v31 = vmax.f32 %v7420_v47, %v7236_v5  ;;  %v7463_v35 = vmax.f32 %v7462_v36, %v7238_v29  ;;  %v7244_v60 = vmax.f32 %v8845_v38, 0.0  ;;  %v7246_v21 = vmax.f32 %v8909_v40, 0.0  ;;  %6610 = vmatmul.mubr.bf16.vlgmr.msra.gmra.mrb[192].mxu1 %v11535_v39  ;;  %6996 = vmatmul.mubr.bf16.vlgmr.msra.gmra.mrb[192].mxu0 %v11535_v39 }
 0x7ce   : > { %v7442_v51 = vmax.f32 %v7441_v9, %v7237_v46  ;;  %v7484_v28 = vmax.f32 %v7483_v53, %v7239_v43  ;;  %v7245_v8 = vmax.f32 %v8846_v57, 0.0  ;;  %v7247_v42 = vmax.f32 %v8910_v12, 0.0  ;;  %6619 = vmatprep.mubr.bf16.mxu1 %v11565_v4  ;;  %7005 = vmatprep.mubr.bf16.mxu0 %v11565_v4 }
 0x7cf   : > { %v7422_v13 = vmax.f32 %v7421_v31, %v7244_v60  ;;  %v7464_v45 = vmax.f32 %v7463_v35, %v7246_v21 }
 0x7d0   : > { %v7443_v23 = vmax.f32 %v7442_v51, %v7245_v8  ;;  %v7485_v58 = vmax.f32 %v7484_v28, %v7247_v42  ;;  %v5899_v47 = vpop.f32.mrb[152].mxu1  ;;  %v6285_v36 = vpop.f32.mrb[152].mxu0 }
 0x7d1   : > { %v8847_v11 = vadd.f32 %v5899_v47, %v12439_v30  ;;  %v8911_v5 = vadd.f32 %v6285_v36, %v12442_v3  ;;  %v5901_v29 = vpop.f32.mrb[153].mxu1  ;;  %v6287_v39 = vpop.f32.mrb[153].mxu0 }
 0x7d2   : > { %v8848_v9 = vadd.f32 %v5901_v29, %v12447_v19  ;;  %v8912_v53 = vadd.f32 %v6287_v39, %v12451_v25  ;;  %v5903_v38 = vpop.f32.mrb[154].mxu1  ;;  %v6289_v40 = vpop.f32.mrb[154].mxu0 }
 0x7d3   : > { %v7252_v7 = vmax.f32 %v8847_v11, 0.0  ;;  %v7254_v4 = vmax.f32 %v8911_v5, 0.0  ;;  %v8849_v14 = vadd.f32 %v5903_v38, %v12439_v30  ;;  %v8913_v46 = vadd.f32 %v6289_v40, %v12442_v3  ;;  %v5905_v43 = vpop.f32.mrb[155].mxu1  ;;  %v6291_v57 = vpop.f32.mrb[155].mxu0 }
 0x7d4   : > { %v7253_v12 = vmax.f32 %v8848_v9, 0.0  ;;  %v7255_v31 = vmax.f32 %v8912_v53, 0.0  ;;  %v8850_v35 = vadd.f32 %v5905_v43, %v12447_v19  ;;  %v8914_v60 = vadd.f32 %v6291_v57, %v12451_v25 }
 0x7d5   : > { %v7423_v21 = vmax.f32 %v7422_v13, %v7252_v7  ;;  %v7465_v51 = vmax.f32 %v7464_v45, %v7254_v4  ;;  %v7260_v28 = vmax.f32 %v8849_v14, 0.0  ;;  %v7262_v8 = vmax.f32 %v8913_v46, 0.0  ;;  %6620 = vmatmul.mubr.bf16.gmra.mrb[196].mxu1 %v11561_v59  ;;  %7006 = vmatmul.mubr.bf16.gmra.mrb[196].mxu0 %v11561_v59 }
 0x7d6   : > { %v7444_v42 = vmax.f32 %v7443_v23, %v7253_v12  ;;  %v7486_v47 = vmax.f32 %v7485_v58, %v7255_v31  ;;  %v7261_v36 = vmax.f32 %v8850_v35, 0.0  ;;  %v7263_v11 = vmax.f32 %v8914_v60, 0.0  ;;  %6629 = vmatprep.mubr.bf16.mxu1 %v11673_v56  ;;  %7015 = vmatprep.mubr.bf16.mxu0 %v11673_v56 }
 0x7d7   : > { %v7424_v5 = vmax.f32 %v7423_v21, %v7260_v28  ;;  %v7466_v29 = vmax.f32 %v7465_v51, %v7262_v8 }
 0x7d8   : > { %v7445_v39 = vmax.f32 %v7444_v42, %v7261_v36  ;;  %v7487_v9 = vmax.f32 %v7486_v47, %v7263_v11  ;;  %v5909_v13 = vpop.f32.mrb[156].mxu1  ;;  %v6295_v45 = vpop.f32.mrb[156].mxu0 }
 0x7d9   : > { %v8851_v53 = vadd.f32 %v5909_v13, %v12439_v30  ;;  %v8915_v38 = vadd.f32 %v6295_v45, %v12442_v3  ;;  %v5911_v40 = vpop.f32.mrb[157].mxu1  ;;  %v6297_v59 = vpop.f32.mrb[157].mxu0 }
 0x7da   : > { %v8852_v23 = vadd.f32 %v5911_v40, %v12447_v19  ;;  %v8916_v58 = vadd.f32 %v6297_v59, %v12451_v25  ;;  %v5913_v7 = vpop.f32.mrb[158].mxu1  ;;  %v6299_v4 = vpop.f32.mrb[158].mxu0 }
 0x7db   : > { %v7268_v14 = vmax.f32 %v8851_v53, 0.0  ;;  %v7270_v56 = vmax.f32 %v8915_v38, 0.0  ;;  %v8853_v46 = vadd.f32 %v5913_v7, %v12439_v30  ;;  %v8917_v43 = vadd.f32 %v6299_v4, %v12442_v3  ;;  %v5915_v57 = vpop.f32.mrb[159].mxu1  ;;  %v6301_v12 = vpop.f32.mrb[159].mxu0 }
 0x7dc   : > { %v7269_v31 = vmax.f32 %v8852_v23, 0.0  ;;  %v7271_v35 = vmax.f32 %v8916_v58, 0.0  ;;  %v8854_v60 = vadd.f32 %v5915_v57, %v12447_v19  ;;  %v8918_v21 = vadd.f32 %v6301_v12, %v12451_v25 }
 0x7dd   : > { %v7425_v51 = vmax.f32 %v7424_v5, %v7268_v14  ;;  %v7467_v28 = vmax.f32 %v7466_v29, %v7270_v56  ;;  %v7276_v8 = vmax.f32 %v8853_v46, 0.0  ;;  %v7278_v42 = vmax.f32 %v8917_v43, 0.0  ;;  %6630 = vmatmul.mubr.bf16.gmra.mrb[200].mxu1 %v11668_v34  ;;  %7016 = vmatmul.mubr.bf16.gmra.mrb[200].mxu0 %v11668_v34 }
 0x7de   : > { %v7446_v47 = vmax.f32 %v7445_v39, %v7269_v31  ;;  %v7488_v36 = vmax.f32 %v7487_v9, %v7271_v35  ;;  %v7277_v11 = vmax.f32 %v8854_v60, 0.0  ;;  %v7279_v13 = vmax.f32 %v8918_v21, 0.0  ;;  %6639 = vmatprep.mubr.bf16.mxu1 %v11733_v61  ;;  %7025 = vmatprep.mubr.bf16.mxu0 %v11733_v61 }
 0x7df   : > { %v7426_v45 = vmax.f32 %v7425_v51, %v7276_v8  ;;  %v7468_v53 = vmax.f32 %v7467_v28, %v7278_v42 }
 0x7e0   : > { %v7447_v38 = vmax.f32 %v7446_v47, %v7277_v11  ;;  %v7489_v40 = vmax.f32 %v7488_v36, %v7279_v13  ;;  %v5919_v5 = vpop.f32.mrb[160].mxu1  ;;  %v6305_v29 = vpop.f32.mrb[160].mxu0 }
 0x7e1   : > { %v7427_v59 = vrot.slane %v7426_v45, 4  ;;  %v7469_v23 = vrot.slane %v7468_v53, 4  ;;  %v8855_v58 = vadd.f32 %v5919_v5, %v12439_v30  ;;  %v8919_v34 = vadd.f32 %v6305_v29, %v12442_v3  ;;  %v5921_v39 = vpop.f32.mrb[161].mxu1  ;;  %v6307_v9 = vpop.f32.mrb[161].mxu0 }
 0x7e2   : > { %v7448_v7 = vrot.slane %v7447_v38, 4  ;;  %v7490_v4 = vrot.slane %v7489_v40, 4  ;;  %v8856_v14 = vadd.f32 %v5921_v39, %v12447_v19  ;;  %v8920_v61 = vadd.f32 %v6307_v9, %v12451_v25  ;;  %v5923_v56 = vpop.f32.mrb[162].mxu1  ;;  %v6309_v46 = vpop.f32.mrb[162].mxu0 }
 0x7e3   : > { %v7428_v43 = vmax.f32 %v7426_v45, %v7427_v59  ;;  %v7470_v57 = vmax.f32 %v7468_v53, %v7469_v23  ;;  %v7284_v12 = vmax.f32 %v8855_v58, 0.0  ;;  %v7286_v31 = vmax.f32 %v8919_v34, 0.0  ;;  %v5925_v35 = vpop.f32.mrb[163].mxu1  ;;  %v6311_v60 = vpop.f32.mrb[163].mxu0 }
 0x7e4   : > { %v7449_v21 = vmax.f32 %v7447_v38, %v7448_v7  ;;  %v7491_v51 = vmax.f32 %v7489_v40, %v7490_v4  ;;  %v7285_v28 = vmax.f32 %v8856_v14, 0.0  ;;  %v7287_v8 = vmax.f32 %v8920_v61, 0.0 }
 0x7e5   : > { %v7429_v42 = vrot.slane %v7428_v43, 2  ;;  %v7471_v47 = vrot.slane %v7470_v57, 2  ;;  %v8857_v36 = vadd.f32 %v5923_v56, %v12439_v30  ;;  %v8921_v11 = vadd.f32 %v6309_v46, %v12442_v3  ;;  %6640 = vmatmul.mubr.bf16.gmra.mrb[204].mxu1 %v11709_v24  ;;  %7026 = vmatmul.mubr.bf16.gmra.mrb[204].mxu0 %v11709_v24 }
 0x7e6   : > { %v7450_v13 = vrot.slane %v7449_v21, 2  ;;  %v7492_v45 = vrot.slane %v7491_v51, 2  ;;  %v8858_v53 = vadd.f32 %v5925_v35, %v12447_v19  ;;  %v8922_v5 = vadd.f32 %v6311_v60, %v12451_v25  ;;  %6649 = vmatprep.mubr.bf16.mxu1 %v11869_v22  ;;  %7035 = vmatprep.mubr.bf16.mxu0 %v11869_v22 }
 0x7e7   : > { %v7430_v38 = vmax.f32 %v7428_v43, %v7429_v42  ;;  %v7472_v40 = vmax.f32 %v7470_v57, %v7471_v47  ;;  %v7292_v29 = vmax.f32 %v8857_v36, 0.0  ;;  %v7294_v59 = vmax.f32 %v8921_v11, 0.0 }
 0x7e8   : > { %v7451_v23 = vmax.f32 %v7449_v21, %v7450_v13  ;;  %v7493_v58 = vmax.f32 %v7491_v51, %v7492_v45  ;;  %v7293_v34 = vmax.f32 %v8858_v53, 0.0  ;;  %v7295_v39 = vmax.f32 %v8922_v5, 0.0  ;;  %v5929_v9 = vpop.f32.mrb[164].mxu1  ;;  %v6315_v24 = vpop.f32.mrb[164].mxu0 }
 0x7e9   : > { %v7431_v7 = vrot.slane %v7430_v38, 1  ;;  %v7473_v4 = vrot.slane %v7472_v40, 1  ;;  %v7580_v14 = vmax.f32 %v7284_v12, %v7292_v29  ;;  %v7622_v61 = vmax.f32 %v7286_v31, %v7294_v59  ;;  %v5931_v56 = vpop.f32.mrb[165].mxu1  ;;  %v6317_v46 = vpop.f32.mrb[165].mxu0 }
 0x7ea   : > { %v7452_v35 = vrot.slane %v7451_v23, 1  ;;  %v7494_v60 = vrot.slane %v7493_v58, 1  ;;  %v7601_v44 = vmax.f32 %v7285_v28, %v7293_v34  ;;  %v7643_v22 = vmax.f32 %v7287_v8, %v7295_v39  ;;  %v5933_v43 = vpop.f32.mrb[166].mxu1  ;;  %v6319_v57 = vpop.f32.mrb[166].mxu0 }
 0x7eb   : > { %v7432_v42 = vmax.f32 %v7430_v38, %v7431_v7  ;;  %v7474_v47 = vmax.f32 %v7472_v40, %v7473_v4  ;;  %v8859_v21 = vadd.f32 %v5929_v9, %v12439_v30  ;;  %v8923_v51 = vadd.f32 %v6315_v24, %v12442_v3  ;;  %v5935_v36 = vpop.f32.mrb[167].mxu1  ;;  %v6321_v11 = vpop.f32.mrb[167].mxu0 }
 0x7ec   : > { %v7453_v13 = vmax.f32 %v7451_v23, %v7452_v35  ;;  %v7495_v45 = vmax.f32 %v7493_v58, %v7494_v60  ;;  %v8860_v12 = vadd.f32 %v5931_v56, %v12447_v19  ;;  %v8924_v31 = vadd.f32 %v6317_v46, %v12451_v25 }
 0x7ed   : > { %v7300_v53 = vmax.f32 %v8859_v21, 0.0  ;;  %v7302_v5 = vmax.f32 %v8923_v51, 0.0  ;;  %v8861_v28 = vadd.f32 %v5933_v43, %v12439_v30  ;;  %v8925_v8 = vadd.f32 %v6319_v57, %v12442_v3  ;;  %6650 = vmatmul.mubr.bf16.gmra.mrb[208].mxu1 %v11865_v10  ;;  %7036 = vmatmul.mubr.bf16.gmra.mrb[208].mxu0 %v11865_v10 }
 0x7ee   : > { %v7766_v38 = vcombine.low %v7432_v42, %v7453_v13  ;;  %v7767_v40 = vcombine.low %v7474_v47, %v7495_v45  ;;  %v7301_v29 = vmax.f32 %v8860_v12, 0.0  ;;  %v7303_v59 = vmax.f32 %v8924_v31, 0.0  ;;  %6659 = vmatprep.mubr.bf16.mxu1 %v11902_v17  ;;  %7045 = vmatprep.mubr.bf16.mxu0 %v11902_v17 }
 0x7ef   : > { %v7581_v23 = vmax.f32 %v7580_v14, %v7300_v53  ;;  %v7623_v58 = vmax.f32 %v7622_v61, %v7302_v5  ;;  %v7308_v34 = vmax.f32 %v8861_v28, 0.0  ;;  %v7310_v39 = vmax.f32 %v8925_v8, 0.0 }
 0x7f0   : > { %v12572_v9 = vrot.slane %v7766_v38, %v11387_v37  ;;  %v12575_v24 = vrot.slane %v7767_v40, %v11387_v37  ;;  %v7602_v7 = vmax.f32 %v7601_v44, %v7301_v29  ;;  %v7644_v10 = vmax.f32 %v7643_v22, %v7303_v59  ;;  %v5939_v4 = vpop.f32.mrb[168].mxu1  ;;  %v6325_v56 = vpop.f32.mrb[168].mxu0 }
 0x7f1   : > { %v7582_v46 = vmax.f32 %v7581_v23, %v7308_v34  ;;  %v7624_v35 = vmax.f32 %v7623_v58, %v7310_v39  ;;  %v8862_v60 = vadd.f32 %v5935_v36, %v12447_v19  ;;  %v8926_v17 = vadd.f32 %v6321_v11, %v12451_v25  ;;  %v5941_v14 = vpop.f32.mrb[169].mxu1  ;;  %v6327_v61 = vpop.f32.mrb[169].mxu0 }
 0x7f2   : > { %v7782_v43 = vcombine.low %v12572_v9, %v12575_v24  ;;  %v8863_v57 = vadd.f32 %v5939_v4, %v12439_v30  ;;  %v8927_v42 = vadd.f32 %v6325_v56, %v12442_v3  ;;  %v8864_v44 = vadd.f32 %v5941_v14, %v12447_v19  ;;  %v5943_v22 = vpop.f32.mrb[170].mxu1  ;;  %v6329_v47 = vpop.f32.mrb[170].mxu0 }
 0x7f3   : > { %v7309_v21 = vmax.f32 %v8862_v60, 0.0  ;;  %v7311_v51 = vmax.f32 %v8926_v17, 0.0  ;;  %v8928_v13 = vadd.f32 %v6327_v61, %v12451_v25  ;;  %v8865_v36 = vadd.f32 %v5943_v22, %v12439_v30  ;;  %v5945_v11 = vpop.f32.mrb[171].mxu1  ;;  %v6331_v45 = vpop.f32.mrb[171].mxu0 }
 0x7f4   : > { %v7316_v12 = vmax.f32 %v8863_v57, 0.0  ;;  %v7318_v31 = vmax.f32 %v8927_v42, 0.0  ;;  %v7317_v53 = vmax.f32 %v8864_v44, 0.0  ;;  %v8929_v5 = vadd.f32 %v6329_v47, %v12442_v3 }
 0x7f5   : > { %v7603_v28 = vmax.f32 %v7602_v7, %v7309_v21  ;;  %v7645_v8 = vmax.f32 %v7644_v10, %v7311_v51  ;;  %v7319_v38 = vmax.f32 %v8928_v13, 0.0  ;;  %v7324_v40 = vmax.f32 %v8865_v36, 0.0  ;;  %6660 = vmatmul.mubr.bf16.gmra.mrb[212].mxu1 %v11894_v55  ;;  %7046 = vmatmul.mubr.bf16.gmra.mrb[212].mxu0 %v11894_v55 }
 0x7f6   : > { %v7583_v29 = vmax.f32 %v7582_v46, %v7316_v12  ;;  %v7625_v59 = vmax.f32 %v7624_v35, %v7318_v31  ;;  %v7326_v23 = vmax.f32 %v8929_v5, 0.0  ;;  %v8866_v58 = vadd.f32 %v5945_v11, %v12447_v19  ;;  %6669 = vmatprep.mubr.bf16.mxu1 %v11942_v27  ;;  %7055 = vmatprep.mubr.bf16.mxu0 %v11942_v27 }
 0x7f7   : > { %v7604_v34 = vmax.f32 %v7603_v28, %v7317_v53  ;;  %v7646_v39 = vmax.f32 %v7645_v8, %v7319_v38  ;;  %v8930_v7 = vadd.f32 %v6331_v45, %v12451_v25 }
 0x7f8   : > { %v7584_v10 = vmax.f32 %v7583_v29, %v7324_v40  ;;  %v7626_v4 = vmax.f32 %v7625_v59, %v7326_v23  ;;  %v7325_v56 = vmax.f32 %v8866_v58, 0.0  ;;  %v5949_v60 = vpop.f32.mrb[172].mxu1  ;;  %v6335_v17 = vpop.f32.mrb[172].mxu0 }
 0x7f9   : > { %v7327_v14 = vmax.f32 %v8930_v7, 0.0  ;;  %v8867_v55 = vadd.f32 %v5949_v60, %v12439_v30  ;;  %v8931_v46 = vadd.f32 %v6335_v17, %v12442_v3  ;;  %v5951_v35 = vpop.f32.mrb[173].mxu1  ;;  %v6337_v61 = vpop.f32.mrb[173].mxu0 }
 0x7fa   : > { %v7605_v57 = vmax.f32 %v7604_v34, %v7325_v56  ;;  %v8868_v42 = vadd.f32 %v5951_v35, %v12447_v19  ;;  %v8932_v27 = vadd.f32 %v6337_v61, %v12451_v25  ;;  %v5953_v44 = vpop.f32.mrb[174].mxu1  ;;  %v6339_v22 = vpop.f32.mrb[174].mxu0 }
 0x7fb   : > { %v7647_v47 = vmax.f32 %v7646_v39, %v7327_v14  ;;  %v7332_v21 = vmax.f32 %v8867_v55, 0.0  ;;  %v7334_v51 = vmax.f32 %v8931_v46, 0.0  ;;  %v8869_v13 = vadd.f32 %v5953_v44, %v12439_v30  ;;  %v5955_v36 = vpop.f32.mrb[175].mxu1  ;;  %v6341_v11 = vpop.f32.mrb[175].mxu0 }
 0x7fc   : > { %v7333_v45 = vmax.f32 %v8868_v42, 0.0  ;;  %v7335_v12 = vmax.f32 %v8932_v27, 0.0  ;;  %v8933_v31 = vadd.f32 %v6339_v22, %v12442_v3  ;;  %v8870_v53 = vadd.f32 %v5955_v36, %v12447_v19 }
 0x7fd   : > { %v7585_v5 = vmax.f32 %v7584_v10, %v7332_v21  ;;  %v7627_v28 = vmax.f32 %v7626_v4, %v7334_v51  ;;  %v7340_v8 = vmax.f32 %v8869_v13, 0.0  ;;  %v8934_v38 = vadd.f32 %v6341_v11, %v12451_v25  ;;  %6670 = vmatmul.mubr.bf16.gmra.mrb[216].mxu1 %v11938_v18  ;;  %7056 = vmatmul.mubr.bf16.gmra.mrb[216].mxu0 %v11938_v18 }
 0x7fe   : > { %v7606_v40 = vmax.f32 %v7605_v57, %v7333_v45  ;;  %v7648_v29 = vmax.f32 %v7647_v47, %v7335_v12  ;;  %v7342_v59 = vmax.f32 %v8933_v31, 0.0  ;;  %v7341_v23 = vmax.f32 %v8870_v53, 0.0  ;;  %6679 = vmatprep.mubr.bf16.mxu1 %v11962_v20  ;;  %7065 = vmatprep.mubr.bf16.mxu0 %v11962_v20 }
 0x7ff   : > { %v7586_v58 = vmax.f32 %v7585_v5, %v7340_v8  ;;  %v7343_v34 = vmax.f32 %v8934_v38, 0.0 }
 0x800   : > { %v7628_v39 = vmax.f32 %v7627_v28, %v7342_v59  ;;  %v7607_v7 = vmax.f32 %v7606_v40, %v7341_v23  ;;  %v5959_v10 = vpop.f32.mrb[176].mxu1  ;;  %v6345_v4 = vpop.f32.mrb[176].mxu0 }
 0x801   : > { %v7649_v56 = vmax.f32 %v7648_v29, %v7343_v34  ;;  %v8871_v60 = vadd.f32 %v5959_v10, %v12439_v30  ;;  %v8935_v17 = vadd.f32 %v6345_v4, %v12442_v3  ;;  %v5961_v18 = vpop.f32.mrb[177].mxu1  ;;  %v6347_v14 = vpop.f32.mrb[177].mxu0 }
 0x802   : > { %v8872_v55 = vadd.f32 %v5961_v18, %v12447_v19  ;;  %v8936_v46 = vadd.f32 %v6347_v14, %v12451_v25  ;;  %v5963_v35 = vpop.f32.mrb[178].mxu1  ;;  %v6349_v61 = vpop.f32.mrb[178].mxu0 }
 0x803   : > { %v7348_v20 = vmax.f32 %v8871_v60, 0.0  ;;  %v7350_v57 = vmax.f32 %v8935_v17, 0.0  ;;  %v8873_v42 = vadd.f32 %v5963_v35, %v12439_v30  ;;  %v8937_v27 = vadd.f32 %v6349_v61, %v12442_v3  ;;  %v5965_v44 = vpop.f32.mrb[179].mxu1  ;;  %v6351_v22 = vpop.f32.mrb[179].mxu0 }
 0x804   : > { %v7349_v47 = vmax.f32 %v8872_v55, 0.0  ;;  %v7351_v21 = vmax.f32 %v8936_v46, 0.0  ;;  %v8874_v51 = vadd.f32 %v5965_v44, %v12447_v19  ;;  %v8938_v13 = vadd.f32 %v6351_v22, %v12451_v25 }
 0x805   : > { %v7587_v36 = vmax.f32 %v7586_v58, %v7348_v20  ;;  %v7629_v11 = vmax.f32 %v7628_v39, %v7350_v57  ;;  %v7356_v45 = vmax.f32 %v8873_v42, 0.0  ;;  %v7358_v12 = vmax.f32 %v8937_v27, 0.0  ;;  %6680 = vmatmul.mubr.bf16.gmra.mrb[220].mxu1 %v11958_v41  ;;  %7066 = vmatmul.mubr.bf16.gmra.mrb[220].mxu0 %v11958_v41 }
 0x806   : > { %v7608_v31 = vmax.f32 %v7607_v7, %v7349_v47  ;;  %v7650_v53 = vmax.f32 %v7649_v56, %v7351_v21  ;;  %v7357_v5 = vmax.f32 %v8874_v51, 0.0  ;;  %v7359_v28 = vmax.f32 %v8938_v13, 0.0  ;;  %6689 = vmatprep.mubr.bf16.mxu1 %v12002_v48  ;;  %7075 = vmatprep.mubr.bf16.mxu0 %v12002_v48 }
 0x807   : > { %v7588_v8 = vmax.f32 %v7587_v36, %v7356_v45  ;;  %v7630_v38 = vmax.f32 %v7629_v11, %v7358_v12 }
 0x808   : > { %v7609_v40 = vmax.f32 %v7608_v31, %v7357_v5  ;;  %v7651_v29 = vmax.f32 %v7650_v53, %v7359_v28  ;;  %v5969_v59 = vpop.f32.mrb[180].mxu1  ;;  %v6355_v23 = vpop.f32.mrb[180].mxu0 }
 0x809   : > { %v8875_v58 = vadd.f32 %v5969_v59, %v12439_v30  ;;  %v8939_v34 = vadd.f32 %v6355_v23, %v12442_v3  ;;  %v5971_v39 = vpop.f32.mrb[181].mxu1  ;;  %v6357_v41 = vpop.f32.mrb[181].mxu0 }
 0x80a   : > { %v8876_v7 = vadd.f32 %v5971_v39, %v12447_v19  ;;  %v8940_v10 = vadd.f32 %v6357_v41, %v12451_v25  ;;  %v5973_v4 = vpop.f32.mrb[182].mxu1  ;;  %v6359_v56 = vpop.f32.mrb[182].mxu0 }
 0x80b   : > { %v7364_v60 = vmax.f32 %v8875_v58, 0.0  ;;  %v7366_v48 = vmax.f32 %v8939_v34, 0.0  ;;  %v8877_v17 = vadd.f32 %v5973_v4, %v12439_v30  ;;  %v8941_v18 = vadd.f32 %v6359_v56, %v12442_v3  ;;  %v5975_v14 = vpop.f32.mrb[183].mxu1  ;;  %v6361_v55 = vpop.f32.mrb[183].mxu0 }
 0x80c   : > { %v7365_v46 = vmax.f32 %v8876_v7, 0.0  ;;  %v7367_v35 = vmax.f32 %v8940_v10, 0.0  ;;  %v8878_v61 = vadd.f32 %v5975_v14, %v12447_v19  ;;  %v8942_v20 = vadd.f32 %v6361_v55, %v12451_v25 }
 0x80d   : > { %v7589_v57 = vmax.f32 %v7588_v8, %v7364_v60  ;;  %v7631_v42 = vmax.f32 %v7630_v38, %v7366_v48  ;;  %v7372_v27 = vmax.f32 %v8877_v17, 0.0  ;;  %v7374_v44 = vmax.f32 %v8941_v18, 0.0  ;;  %6690 = vmatmul.mubr.bf16.gmra.mrb[224].mxu1 %v11998_v50  ;;  %7076 = vmatmul.mubr.bf16.gmra.mrb[224].mxu0 %v11998_v50 }
 0x80e   : > { %v7610_v22 = vmax.f32 %v7609_v40, %v7365_v46  ;;  %v7652_v47 = vmax.f32 %v7651_v29, %v7367_v35  ;;  %v7373_v21 = vmax.f32 %v8878_v61, 0.0  ;;  %v7375_v51 = vmax.f32 %v8942_v20, 0.0  ;;  %6699 = vmatprep.mubr.bf16.mxu1 %v12022_v16  ;;  %7085 = vmatprep.mubr.bf16.mxu0 %v12022_v16 }
 0x80f   : > { %v7590_v13 = vmax.f32 %v7589_v57, %v7372_v27  ;;  %v7632_v36 = vmax.f32 %v7631_v42, %v7374_v44 }
 0x810   : > { %v7611_v11 = vmax.f32 %v7610_v22, %v7373_v21  ;;  %v7653_v45 = vmax.f32 %v7652_v47, %v7375_v51  ;;  %v5979_v12 = vpop.f32.mrb[184].mxu1  ;;  %v6365_v31 = vpop.f32.mrb[184].mxu0 }
 0x811   : > { %v8879_v53 = vadd.f32 %v5979_v12, %v12439_v30  ;;  %v8943_v5 = vadd.f32 %v6365_v31, %v12442_v3  ;;  %v5981_v28 = vpop.f32.mrb[185].mxu1  ;;  %v6367_v50 = vpop.f32.mrb[185].mxu0 }
 0x812   : > { %v8880_v8 = vadd.f32 %v5981_v28, %v12447_v19  ;;  %v8944_v38 = vadd.f32 %v6367_v50, %v12451_v25  ;;  %v5983_v40 = vpop.f32.mrb[186].mxu1  ;;  %v6369_v29 = vpop.f32.mrb[186].mxu0 }
 0x813   : > { %v7380_v59 = vmax.f32 %v8879_v53, 0.0  ;;  %v7382_v16 = vmax.f32 %v8943_v5, 0.0  ;;  %v8881_v23 = vadd.f32 %v5983_v40, %v12439_v30  ;;  %v8945_v58 = vadd.f32 %v6369_v29, %v12442_v3  ;;  %v5985_v34 = vpop.f32.mrb[187].mxu1  ;;  %v6371_v39 = vpop.f32.mrb[187].mxu0 }
 0x814   : > { %v7381_v41 = vmax.f32 %v8880_v8, 0.0  ;;  %v7383_v7 = vmax.f32 %v8944_v38, 0.0  ;;  %v8882_v10 = vadd.f32 %v5985_v34, %v12447_v19  ;;  %v8946_v4 = vadd.f32 %v6371_v39, %v12451_v25 }
 0x815   : > { %v7591_v56 = vmax.f32 %v7590_v13, %v7380_v59  ;;  %v7633_v60 = vmax.f32 %v7632_v36, %v7382_v16  ;;  %v7388_v48 = vmax.f32 %v8881_v23, 0.0  ;;  %v7390_v17 = vmax.f32 %v8945_v58, 0.0  ;;  %6700 = vmatmul.mubr.bf16.gmra.mrb[228].mxu1 %v12018_v26  ;;  %7086 = vmatmul.mubr.bf16.gmra.mrb[228].mxu0 %v12018_v26 }
 0x816   : > { %v7612_v18 = vmax.f32 %v7611_v11, %v7381_v41  ;;  %v7654_v14 = vmax.f32 %v7653_v45, %v7383_v7  ;;  %v7389_v55 = vmax.f32 %v8882_v10, 0.0  ;;  %v7391_v46 = vmax.f32 %v8946_v4, 0.0  ;;  %6709 = vmatprep.mubr.bf16.mxu1 %v12062_v15  ;;  %7095 = vmatprep.mubr.bf16.mxu0 %v12062_v15 }
 0x817   : > { %v7592_v35 = vmax.f32 %v7591_v56, %v7388_v48  ;;  %v7634_v61 = vmax.f32 %v7633_v60, %v7390_v17 }
 0x818   : > { %v7613_v20 = vmax.f32 %v7612_v18, %v7389_v55  ;;  %v7655_v57 = vmax.f32 %v7654_v14, %v7391_v46  ;;  %v5989_v42 = vpop.f32.mrb[188].mxu1  ;;  %v6375_v27 = vpop.f32.mrb[188].mxu0 }
 0x819   : > { %v8883_v44 = vadd.f32 %v5989_v42, %v12439_v30  ;;  %v8947_v22 = vadd.f32 %v6375_v27, %v12442_v3  ;;  %v5991_v47 = vpop.f32.mrb[189].mxu1  ;;  %v6377_v26 = vpop.f32.mrb[189].mxu0 }
 0x81a   : > { %v8884_v21 = vadd.f32 %v5991_v47, %v12447_v19  ;;  %v8948_v51 = vadd.f32 %v6377_v26, %v12451_v25  ;;  %v5993_v13 = vpop.f32.mrb[190].mxu1  ;;  %v6379_v36 = vpop.f32.mrb[190].mxu0 }
 0x81b   : > { %v7396_v11 = vmax.f32 %v8883_v44, 0.0  ;;  %v7398_v15 = vmax.f32 %v8947_v22, 0.0  ;;  %v8885_v45 = vadd.f32 %v5993_v13, %v12439_v30  ;;  %v8949_v12 = vadd.f32 %v6379_v36, %v12442_v3  ;;  %v5995_v31 = vpop.f32.mrb[191].mxu1  ;;  %v6381_v53 = vpop.f32.mrb[191].mxu0 }
 0x81c   : > { %v7397_v5 = vmax.f32 %v8884_v21, 0.0  ;;  %v7399_v28 = vmax.f32 %v8948_v51, 0.0  ;;  %v8886_v50 = vadd.f32 %v5995_v31, %v12447_v19  ;;  %v8950_v8 = vadd.f32 %v6381_v53, %v12451_v25 }
 0x81d   : > { %v7593_v38 = vmax.f32 %v7592_v35, %v7396_v11  ;;  %v7635_v40 = vmax.f32 %v7634_v61, %v7398_v15  ;;  %v7404_v29 = vmax.f32 %v8885_v45, 0.0  ;;  %v7406_v59 = vmax.f32 %v8949_v12, 0.0  ;;  %6710 = vmatmul.mubr.bf16.gmra.mrb[232].mxu1 %v12058_v32  ;;  %7096 = vmatmul.mubr.bf16.gmra.mrb[232].mxu0 %v12058_v32  ;;  %v9652_v45 = vld [vmem:[%s10804_s23] sm:$0xff] }
 0x81e   : > { %v7614_v16 = vmax.f32 %v7613_v20, %v7397_v5  ;;  %v7656_v30 = vmax.f32 %v7655_v57, %v7399_v28  ;;  %v7405_v23 = vmax.f32 %v8886_v50, 0.0  ;;  %v7407_v3 = vmax.f32 %v8950_v8, 0.0  ;;  %6719 = vmatprep.mubr.bf16.mxu1 %v12082_v33  ;;  %7105 = vmatprep.mubr.bf16.mxu0 %v12082_v33 }
 0x81f   : > { %v7594_v58 = vmax.f32 %v7593_v38, %v7404_v29  ;;  %v7636_v19 = vmax.f32 %v7635_v40, %v7406_v59 }
 0x820   : > { %v7615_v34 = vmax.f32 %v7614_v16, %v7405_v23  ;;  %v7657_v25 = vmax.f32 %v7656_v30, %v7407_v3 }
 0x821   : > { %v7595_v39 = vrot.slane %v7594_v58, 4  ;;  %v7637_v41 = vrot.slane %v7636_v19, 4 }
 0x822   : > { %v7616_v7 = vrot.slane %v7615_v34, 4  ;;  %v7658_v10 = vrot.slane %v7657_v25, 4 }
 0x823   : > { %v7596_v4 = vmax.f32 %v7594_v58, %v7595_v39  ;;  %v7638_v56 = vmax.f32 %v7636_v19, %v7637_v41 }
 0x824   : > { %v7617_v60 = vmax.f32 %v7615_v34, %v7616_v7  ;;  %v7659_v32 = vmax.f32 %v7657_v25, %v7658_v10 }
 0x825   : > { %v7597_v48 = vrot.slane %v7596_v4, 2  ;;  %v7639_v17 = vrot.slane %v7638_v56, 2  ;;  %6720 = vmatmul.mubr.bf16.gmra.mrb[236].mxu1 %v12078_v49  ;;  %7106 = vmatmul.mubr.bf16.gmra.mrb[236].mxu0 %v12078_v49 }
 0x826   : > { %v7618_v18 = vrot.slane %v7617_v60, 2  ;;  %v7660_v33 = vrot.slane %v7659_v32, 2  ;;  %6729 = vmatprep.mubr.bf16.mxu1 %v13101_v62  ;;  %7115 = vmatprep.mubr.bf16.mxu0 %v13101_v62 }
 0x827   : > { %v7598_v14 = vmax.f32 %v7596_v4, %v7597_v48  ;;  %v7640_v55 = vmax.f32 %v7638_v56, %v7639_v17 }
 0x828   : > { %v7619_v46 = vmax.f32 %v7617_v60, %v7618_v18  ;;  %v7661_v35 = vmax.f32 %v7659_v32, %v7660_v33 }
 0x829   : > { %v7599_v61 = vrot.slane %v7598_v14, 1  ;;  %v7641_v20 = vrot.slane %v7640_v55, 1 }
 0x82a   : > { %v7620_v57 = vrot.slane %v7619_v46, 1  ;;  %v7662_v42 = vrot.slane %v7661_v35, 1 }
 0x82b   : > { %v7600_v27 = vmax.f32 %v7598_v14, %v7599_v61  ;;  %v7642_v44 = vmax.f32 %v7640_v55, %v7641_v20 }
 0x82c   : > { %v7621_v22 = vmax.f32 %v7619_v46, %v7620_v57  ;;  %v7663_v47 = vmax.f32 %v7661_v35, %v7662_v42 }
 0x82d   : > { %6730 = vmatmul.mubr.bf16.gmra.mrb[240].mxu1 %v13102_v0  ;;  %7116 = vmatmul.mubr.bf16.gmra.mrb[240].mxu0 %v13102_v0 }
 0x82e   : > { %v7800_v49 = vcombine.low %v7600_v27, %v7621_v22  ;;  %v7801_v26 = vcombine.low %v7642_v44, %v7663_v47  ;;  %6739 = vmatprep.mubr.bf16.mxu1 %v13103_v63  ;;  %7125 = vmatprep.mubr.bf16.mxu0 %v13103_v63 }
 0x830   : > { %v7808_v62 = vrot.slane %v7800_v49, %v11387_v37  ;;  %v7815_v21 = vrot.slane %v7801_v26, %v11387_v37 }
 0x832   : > { %v7816_v51 = vcombine.low %v7808_v62, %v7815_v21 }
 0x834   : > { %v7836_v13 = vrot.slane %v7816_v51, 7 }
 0x835   : > { %6740 = vmatmul.mubr.bf16.gmra.mrb[244].mxu1 %v13104_v54  ;;  %7126 = vmatmul.mubr.bf16.gmra.mrb[244].mxu0 %v13104_v54 }
 0x836   : > { %v7837_v0 = vsel %vm2290_vm1, %v7836_v13, %v7782_v43  ;;  %6749 = vmatprep.mubr.bf16.mxu1 %v12142_v1  ;;  %7135 = vmatprep.mubr.bf16.mxu0 %v12142_v1  ;;  %v13147_v1 = vld [vmem:[#allocation39_spill] sm:$0xff] }
 0x837   : > { %v7838_v63 = vsel %vm2292_vm2, %v7836_v13, %v7837_v0  ;;  %v4310_v54 = vsub.s32 4, %v13147_v1  ;;  %v4318_v9 = vsub.s32 6, %v13147_v1  ;;  %v4314_v24 = vsub.s32 5, %v13147_v1 }
 0x838   : > { %v7839_v36 = vsel %vm2294_vm3, %v7836_v13, %v7838_v63  ;;  %v4322_v43 = vsub.s32 7, %v13147_v1 }
 0x839   : > { %v7840_v11 = vsel %vm2296_vm4, %v7836_v13, %v7839_v36  ;;  %v12685_v12 = vrot.slane %v9652_v45, %v4310_v54  ;;  %v12689_v31 = vrot.slane %v9652_v45, %v4314_v24 }
 0x83a   : > { %v7850_v15 = vmax.f32 %v7840_v11, 0.0 }
 0x83c   : > { %7852 = vst [vmem:[#allocation2] sm:$0xff] %v7850_v15 }
 0x83d   : > { %6750 = vmatmul.mubr.bf16.gmra.mrb[248].mxu1 %v12138_v52  ;;  %7136 = vmatmul.mubr.bf16.gmra.mrb[248].mxu0 %v12138_v52  ;;  %v12687_v52 = vrot.slane %v9652_v45, %v4318_v9 }
 0x83e   : > { %6759 = vmatprep.mubr.bf16.mxu1 %v13105_v6  ;;  %7145 = vmatprep.mubr.bf16.mxu0 %v13105_v6  ;;  %v12691_v6 = vrot.slane %v9652_v45, %v4322_v43 }
 0x845   : > { %6760 = vmatmul.mubr.bf16.gmra.mrb[252].mxu1 %v13106_v2  ;;  %7146 = vmatmul.mubr.bf16.gmra.mrb[252].mxu0 %v13106_v2 }
 0x8a0   : > { %v6611_v53 = vpop.f32.mrb[192].mxu1  ;;  %v6997_v5 = vpop.f32.mrb[192].mxu0 }
 0x8a1   : > { %v8951_v2 = vadd.f32 %v6611_v53, %v12685_v12  ;;  %v9015_v28 = vadd.f32 %v6997_v5, %v12687_v52  ;;  %v6613_v50 = vpop.f32.mrb[193].mxu1  ;;  %v6999_v8 = vpop.f32.mrb[193].mxu0 }
 0x8a2   : > { %v8952_v38 = vadd.f32 %v6613_v50, %v12689_v31  ;;  %v9016_v40 = vadd.f32 %v6999_v8, %v12691_v6  ;;  %v6615_v29 = vpop.f32.mrb[194].mxu1  ;;  %v7001_v59 = vpop.f32.mrb[194].mxu0 }
 0x8a3   : > { %v8953_v16 = vadd.f32 %v6615_v29, %v12685_v12  ;;  %v9017_v30 = vadd.f32 %v7001_v59, %v12687_v52  ;;  %v6617_v23 = vpop.f32.mrb[195].mxu1  ;;  %v7003_v3 = vpop.f32.mrb[195].mxu0  ;;  %v7160_v34 = vmax.f32 %v8951_v2, 0.0  ;;  %v7162_v25 = vmax.f32 %v9015_v28, 0.0 }
 0x8a4   : > { %v8954_v58 = vadd.f32 %v6617_v23, %v12689_v31  ;;  %v9018_v19 = vadd.f32 %v7003_v3, %v12691_v6  ;;  %v7161_v7 = vmax.f32 %v8952_v38, 0.0  ;;  %v7163_v10 = vmax.f32 %v9016_v40, 0.0 }
 0x8a5   : > { %v7168_v39 = vmax.f32 %v8953_v16, 0.0  ;;  %v7170_v41 = vmax.f32 %v9017_v30, 0.0 }
 0x8a6   : > { %v7169_v4 = vmax.f32 %v8954_v58, 0.0  ;;  %v7171_v56 = vmax.f32 %v9018_v19, 0.0 }
 0x8a7   : > { %v7496_v60 = vmax.f32 %v7160_v34, %v7168_v39  ;;  %v7538_v32 = vmax.f32 %v7162_v25, %v7170_v41 }
 0x8a8   : > { %v7517_v48 = vmax.f32 %v7161_v7, %v7169_v4  ;;  %v7559_v17 = vmax.f32 %v7163_v10, %v7171_v56  ;;  %v6621_v18 = vpop.f32.mrb[196].mxu1  ;;  %v7007_v33 = vpop.f32.mrb[196].mxu0 }
 0x8a9   : > { %v8955_v14 = vadd.f32 %v6621_v18, %v12685_v12  ;;  %v9019_v55 = vadd.f32 %v7007_v33, %v12687_v52  ;;  %v6623_v46 = vpop.f32.mrb[197].mxu1  ;;  %v7009_v35 = vpop.f32.mrb[197].mxu0 }
 0x8aa   : > { %v8956_v61 = vadd.f32 %v6623_v46, %v12689_v31  ;;  %v9020_v20 = vadd.f32 %v7009_v35, %v12691_v6  ;;  %v6625_v57 = vpop.f32.mrb[198].mxu1  ;;  %v7011_v42 = vpop.f32.mrb[198].mxu0 }
 0x8ab   : > { %v7176_v27 = vmax.f32 %v8955_v14, 0.0  ;;  %v7178_v44 = vmax.f32 %v9019_v55, 0.0  ;;  %v8957_v22 = vadd.f32 %v6625_v57, %v12685_v12  ;;  %v9021_v47 = vadd.f32 %v7011_v42, %v12687_v52  ;;  %v6627_v49 = vpop.f32.mrb[199].mxu1  ;;  %v7013_v26 = vpop.f32.mrb[199].mxu0 }
 0x8ac   : > { %v7177_v62 = vmax.f32 %v8956_v61, 0.0  ;;  %v7179_v21 = vmax.f32 %v9020_v20, 0.0  ;;  %v8958_v51 = vadd.f32 %v6627_v49, %v12689_v31  ;;  %v9022_v13 = vadd.f32 %v7013_v26, %v12691_v6 }
 0x8ad   : > { %v7497_v0 = vmax.f32 %v7496_v60, %v7176_v27  ;;  %v7539_v63 = vmax.f32 %v7538_v32, %v7178_v44  ;;  %v7184_v36 = vmax.f32 %v8957_v22, 0.0  ;;  %v7186_v11 = vmax.f32 %v9021_v47, 0.0 }
 0x8ae   : > { %v7518_v15 = vmax.f32 %v7517_v48, %v7177_v62  ;;  %v7560_v1 = vmax.f32 %v7559_v17, %v7179_v21  ;;  %v7185_v54 = vmax.f32 %v8958_v51, 0.0  ;;  %v7187_v9 = vmax.f32 %v9022_v13, 0.0 }
 0x8af   : > { %v7498_v24 = vmax.f32 %v7497_v0, %v7184_v36  ;;  %v7540_v43 = vmax.f32 %v7539_v63, %v7186_v11 }
 0x8b0   : > { %v7519_v45 = vmax.f32 %v7518_v15, %v7185_v54  ;;  %v7561_v53 = vmax.f32 %v7560_v1, %v7187_v9  ;;  %v6631_v5 = vpop.f32.mrb[200].mxu1  ;;  %v7017_v2 = vpop.f32.mrb[200].mxu0 }
 0x8b1   : > { %v8959_v28 = vadd.f32 %v6631_v5, %v12685_v12  ;;  %v9023_v50 = vadd.f32 %v7017_v2, %v12687_v52  ;;  %v6633_v8 = vpop.f32.mrb[201].mxu1  ;;  %v7019_v38 = vpop.f32.mrb[201].mxu0 }
 0x8b2   : > { %v8960_v40 = vadd.f32 %v6633_v8, %v12689_v31  ;;  %v9024_v29 = vadd.f32 %v7019_v38, %v12691_v6  ;;  %v6635_v59 = vpop.f32.mrb[202].mxu1  ;;  %v7021_v16 = vpop.f32.mrb[202].mxu0 }
 0x8b3   : > { %v7192_v30 = vmax.f32 %v8959_v28, 0.0  ;;  %v7194_v23 = vmax.f32 %v9023_v50, 0.0  ;;  %v8961_v3 = vadd.f32 %v6635_v59, %v12685_v12  ;;  %v9025_v58 = vadd.f32 %v7021_v16, %v12687_v52  ;;  %v6637_v19 = vpop.f32.mrb[203].mxu1  ;;  %v7023_v34 = vpop.f32.mrb[203].mxu0 }
 0x8b4   : > { %v7193_v25 = vmax.f32 %v8960_v40, 0.0  ;;  %v7195_v39 = vmax.f32 %v9024_v29, 0.0  ;;  %v8962_v41 = vadd.f32 %v6637_v19, %v12689_v31  ;;  %v9026_v7 = vadd.f32 %v7023_v34, %v12691_v6 }
 0x8b5   : > { %v7499_v10 = vmax.f32 %v7498_v24, %v7192_v30  ;;  %v7541_v4 = vmax.f32 %v7540_v43, %v7194_v23  ;;  %v7200_v56 = vmax.f32 %v8961_v3, 0.0  ;;  %v7202_v60 = vmax.f32 %v9025_v58, 0.0 }
 0x8b6   : > { %v7520_v32 = vmax.f32 %v7519_v45, %v7193_v25  ;;  %v7562_v48 = vmax.f32 %v7561_v53, %v7195_v39  ;;  %v7201_v17 = vmax.f32 %v8962_v41, 0.0  ;;  %v7203_v18 = vmax.f32 %v9026_v7, 0.0 }
 0x8b7   : > { %v7500_v33 = vmax.f32 %v7499_v10, %v7200_v56  ;;  %v7542_v14 = vmax.f32 %v7541_v4, %v7202_v60 }
 0x8b8   : > { %v7521_v55 = vmax.f32 %v7520_v32, %v7201_v17  ;;  %v7563_v46 = vmax.f32 %v7562_v48, %v7203_v18  ;;  %v6641_v35 = vpop.f32.mrb[204].mxu1  ;;  %v7027_v61 = vpop.f32.mrb[204].mxu0 }
 0x8b9   : > { %v8963_v20 = vadd.f32 %v6641_v35, %v12685_v12  ;;  %v9027_v57 = vadd.f32 %v7027_v61, %v12687_v52  ;;  %v6643_v42 = vpop.f32.mrb[205].mxu1  ;;  %v7029_v27 = vpop.f32.mrb[205].mxu0 }
 0x8ba   : > { %v8964_v44 = vadd.f32 %v6643_v42, %v12689_v31  ;;  %v9028_v22 = vadd.f32 %v7029_v27, %v12691_v6  ;;  %v6645_v47 = vpop.f32.mrb[206].mxu1  ;;  %v7031_v49 = vpop.f32.mrb[206].mxu0 }
 0x8bb   : > { %v7208_v26 = vmax.f32 %v8963_v20, 0.0  ;;  %v7210_v62 = vmax.f32 %v9027_v57, 0.0  ;;  %v8965_v21 = vadd.f32 %v6645_v47, %v12685_v12  ;;  %v9029_v51 = vadd.f32 %v7031_v49, %v12687_v52  ;;  %v6647_v13 = vpop.f32.mrb[207].mxu1  ;;  %v7033_v0 = vpop.f32.mrb[207].mxu0 }
 0x8bc   : > { %v7209_v63 = vmax.f32 %v8964_v44, 0.0  ;;  %v7211_v36 = vmax.f32 %v9028_v22, 0.0  ;;  %v8966_v11 = vadd.f32 %v6647_v13, %v12689_v31  ;;  %v9030_v15 = vadd.f32 %v7033_v0, %v12691_v6 }
 0x8bd   : > { %v7501_v1 = vmax.f32 %v7500_v33, %v7208_v26  ;;  %v7543_v54 = vmax.f32 %v7542_v14, %v7210_v62  ;;  %v7216_v9 = vmax.f32 %v8965_v21, 0.0  ;;  %v7218_v24 = vmax.f32 %v9029_v51, 0.0 }
 0x8be   : > { %v7522_v43 = vmax.f32 %v7521_v55, %v7209_v63  ;;  %v7564_v45 = vmax.f32 %v7563_v46, %v7211_v36  ;;  %v7217_v53 = vmax.f32 %v8966_v11, 0.0  ;;  %v7219_v5 = vmax.f32 %v9030_v15, 0.0 }
 0x8bf   : > { %v7502_v2 = vmax.f32 %v7501_v1, %v7216_v9  ;;  %v7544_v28 = vmax.f32 %v7543_v54, %v7218_v24 }
 0x8c0   : > { %v7523_v50 = vmax.f32 %v7522_v43, %v7217_v53  ;;  %v7565_v8 = vmax.f32 %v7564_v45, %v7219_v5  ;;  %v6651_v38 = vpop.f32.mrb[208].mxu1  ;;  %v7037_v40 = vpop.f32.mrb[208].mxu0 }
 0x8c1   : > { %v8967_v29 = vadd.f32 %v6651_v38, %v12685_v12  ;;  %v9031_v59 = vadd.f32 %v7037_v40, %v12687_v52  ;;  %v6653_v16 = vpop.f32.mrb[209].mxu1  ;;  %v7039_v30 = vpop.f32.mrb[209].mxu0 }
 0x8c2   : > { %v8968_v23 = vadd.f32 %v6653_v16, %v12689_v31  ;;  %v9032_v3 = vadd.f32 %v7039_v30, %v12691_v6  ;;  %v6655_v58 = vpop.f32.mrb[210].mxu1  ;;  %v7041_v19 = vpop.f32.mrb[210].mxu0 }
 0x8c3   : > { %v7224_v34 = vmax.f32 %v8967_v29, 0.0  ;;  %v7226_v25 = vmax.f32 %v9031_v59, 0.0  ;;  %v8969_v39 = vadd.f32 %v6655_v58, %v12685_v12  ;;  %v9033_v41 = vadd.f32 %v7041_v19, %v12687_v52  ;;  %v6657_v7 = vpop.f32.mrb[211].mxu1  ;;  %v7043_v10 = vpop.f32.mrb[211].mxu0 }
 0x8c4   : > { %v7225_v4 = vmax.f32 %v8968_v23, 0.0  ;;  %v7227_v56 = vmax.f32 %v9032_v3, 0.0  ;;  %v8970_v60 = vadd.f32 %v6657_v7, %v12689_v31  ;;  %v9034_v32 = vadd.f32 %v7043_v10, %v12691_v6 }
 0x8c5   : > { %v7503_v48 = vmax.f32 %v7502_v2, %v7224_v34  ;;  %v7545_v17 = vmax.f32 %v7544_v28, %v7226_v25  ;;  %v7232_v18 = vmax.f32 %v8969_v39, 0.0  ;;  %v7234_v33 = vmax.f32 %v9033_v41, 0.0 }
 0x8c6   : > { %v7524_v14 = vmax.f32 %v7523_v50, %v7225_v4  ;;  %v7566_v55 = vmax.f32 %v7565_v8, %v7227_v56  ;;  %v7233_v46 = vmax.f32 %v8970_v60, 0.0  ;;  %v7235_v35 = vmax.f32 %v9034_v32, 0.0 }
 0x8c7   : > { %v7504_v61 = vmax.f32 %v7503_v48, %v7232_v18  ;;  %v7546_v20 = vmax.f32 %v7545_v17, %v7234_v33 }
 0x8c8   : > { %v7525_v57 = vmax.f32 %v7524_v14, %v7233_v46  ;;  %v7567_v42 = vmax.f32 %v7566_v55, %v7235_v35  ;;  %v6661_v27 = vpop.f32.mrb[212].mxu1  ;;  %v7047_v44 = vpop.f32.mrb[212].mxu0 }
 0x8c9   : > { %v8971_v22 = vadd.f32 %v6661_v27, %v12685_v12  ;;  %v9035_v47 = vadd.f32 %v7047_v44, %v12687_v52  ;;  %v6663_v49 = vpop.f32.mrb[213].mxu1  ;;  %v7049_v26 = vpop.f32.mrb[213].mxu0 }
 0x8ca   : > { %v8972_v62 = vadd.f32 %v6663_v49, %v12689_v31  ;;  %v9036_v21 = vadd.f32 %v7049_v26, %v12691_v6  ;;  %v6665_v51 = vpop.f32.mrb[214].mxu1  ;;  %v7051_v13 = vpop.f32.mrb[214].mxu0 }
 0x8cb   : > { %v7240_v0 = vmax.f32 %v8971_v22, 0.0  ;;  %v7242_v63 = vmax.f32 %v9035_v47, 0.0  ;;  %v8973_v36 = vadd.f32 %v6665_v51, %v12685_v12  ;;  %v9037_v11 = vadd.f32 %v7051_v13, %v12687_v52  ;;  %v6667_v15 = vpop.f32.mrb[215].mxu1  ;;  %v7053_v1 = vpop.f32.mrb[215].mxu0 }
 0x8cc   : > { %v7241_v54 = vmax.f32 %v8972_v62, 0.0  ;;  %v7243_v9 = vmax.f32 %v9036_v21, 0.0  ;;  %v8974_v24 = vadd.f32 %v6667_v15, %v12689_v31  ;;  %v9038_v43 = vadd.f32 %v7053_v1, %v12691_v6 }
 0x8cd   : > { %v7505_v45 = vmax.f32 %v7504_v61, %v7240_v0  ;;  %v7547_v53 = vmax.f32 %v7546_v20, %v7242_v63  ;;  %v7248_v5 = vmax.f32 %v8973_v36, 0.0  ;;  %v7250_v2 = vmax.f32 %v9037_v11, 0.0 }
 0x8ce   : > { %v7526_v28 = vmax.f32 %v7525_v57, %v7241_v54  ;;  %v7568_v50 = vmax.f32 %v7567_v42, %v7243_v9  ;;  %v7249_v8 = vmax.f32 %v8974_v24, 0.0  ;;  %v7251_v38 = vmax.f32 %v9038_v43, 0.0 }
 0x8cf   : > { %v7506_v40 = vmax.f32 %v7505_v45, %v7248_v5  ;;  %v7548_v29 = vmax.f32 %v7547_v53, %v7250_v2 }
 0x8d0   : > { %v7527_v59 = vmax.f32 %v7526_v28, %v7249_v8  ;;  %v7569_v16 = vmax.f32 %v7568_v50, %v7251_v38  ;;  %v6671_v30 = vpop.f32.mrb[216].mxu1  ;;  %v7057_v23 = vpop.f32.mrb[216].mxu0 }
 0x8d1   : > { %v8975_v3 = vadd.f32 %v6671_v30, %v12685_v12  ;;  %v9039_v58 = vadd.f32 %v7057_v23, %v12687_v52  ;;  %v6673_v19 = vpop.f32.mrb[217].mxu1  ;;  %v7059_v34 = vpop.f32.mrb[217].mxu0 }
 0x8d2   : > { %v8976_v25 = vadd.f32 %v6673_v19, %v12689_v31  ;;  %v9040_v39 = vadd.f32 %v7059_v34, %v12691_v6  ;;  %v6675_v41 = vpop.f32.mrb[218].mxu1  ;;  %v7061_v7 = vpop.f32.mrb[218].mxu0 }
 0x8d3   : > { %v7256_v10 = vmax.f32 %v8975_v3, 0.0  ;;  %v7258_v4 = vmax.f32 %v9039_v58, 0.0  ;;  %v8977_v56 = vadd.f32 %v6675_v41, %v12685_v12  ;;  %v9041_v60 = vadd.f32 %v7061_v7, %v12687_v52  ;;  %v6677_v32 = vpop.f32.mrb[219].mxu1  ;;  %v7063_v48 = vpop.f32.mrb[219].mxu0 }
 0x8d4   : > { %v7257_v17 = vmax.f32 %v8976_v25, 0.0  ;;  %v7259_v18 = vmax.f32 %v9040_v39, 0.0  ;;  %v8978_v33 = vadd.f32 %v6677_v32, %v12689_v31  ;;  %v9042_v14 = vadd.f32 %v7063_v48, %v12691_v6 }
 0x8d5   : > { %v7507_v55 = vmax.f32 %v7506_v40, %v7256_v10  ;;  %v7549_v46 = vmax.f32 %v7548_v29, %v7258_v4  ;;  %v7264_v35 = vmax.f32 %v8977_v56, 0.0  ;;  %v7266_v61 = vmax.f32 %v9041_v60, 0.0 }
 0x8d6   : > { %v7528_v20 = vmax.f32 %v7527_v59, %v7257_v17  ;;  %v7570_v57 = vmax.f32 %v7569_v16, %v7259_v18  ;;  %v7265_v42 = vmax.f32 %v8978_v33, 0.0  ;;  %v7267_v27 = vmax.f32 %v9042_v14, 0.0 }
 0x8d7   : > { %v7508_v44 = vmax.f32 %v7507_v55, %v7264_v35  ;;  %v7550_v22 = vmax.f32 %v7549_v46, %v7266_v61 }
 0x8d8   : > { %v7529_v47 = vmax.f32 %v7528_v20, %v7265_v42  ;;  %v7571_v49 = vmax.f32 %v7570_v57, %v7267_v27  ;;  %v6681_v26 = vpop.f32.mrb[220].mxu1  ;;  %v7067_v62 = vpop.f32.mrb[220].mxu0 }
 0x8d9   : > { %v8979_v21 = vadd.f32 %v6681_v26, %v12685_v12  ;;  %v9043_v51 = vadd.f32 %v7067_v62, %v12687_v52  ;;  %v6683_v13 = vpop.f32.mrb[221].mxu1  ;;  %v7069_v0 = vpop.f32.mrb[221].mxu0 }
 0x8da   : > { %v8980_v63 = vadd.f32 %v6683_v13, %v12689_v31  ;;  %v9044_v36 = vadd.f32 %v7069_v0, %v12691_v6  ;;  %v6685_v11 = vpop.f32.mrb[222].mxu1  ;;  %v7071_v15 = vpop.f32.mrb[222].mxu0 }
 0x8db   : > { %v7272_v1 = vmax.f32 %v8979_v21, 0.0  ;;  %v7274_v54 = vmax.f32 %v9043_v51, 0.0  ;;  %v8981_v9 = vadd.f32 %v6685_v11, %v12685_v12  ;;  %v9045_v24 = vadd.f32 %v7071_v15, %v12687_v52  ;;  %v6687_v43 = vpop.f32.mrb[223].mxu1  ;;  %v7073_v45 = vpop.f32.mrb[223].mxu0 }
 0x8dc   : > { %v7273_v53 = vmax.f32 %v8980_v63, 0.0  ;;  %v7275_v5 = vmax.f32 %v9044_v36, 0.0  ;;  %v8982_v2 = vadd.f32 %v6687_v43, %v12689_v31  ;;  %v9046_v28 = vadd.f32 %v7073_v45, %v12691_v6 }
 0x8dd   : > { %v7509_v50 = vmax.f32 %v7508_v44, %v7272_v1  ;;  %v7551_v8 = vmax.f32 %v7550_v22, %v7274_v54  ;;  %v7280_v38 = vmax.f32 %v8981_v9, 0.0  ;;  %v7282_v40 = vmax.f32 %v9045_v24, 0.0 }
 0x8de   : > { %v7530_v29 = vmax.f32 %v7529_v47, %v7273_v53  ;;  %v7572_v59 = vmax.f32 %v7571_v49, %v7275_v5  ;;  %v7281_v16 = vmax.f32 %v8982_v2, 0.0  ;;  %v7283_v30 = vmax.f32 %v9046_v28, 0.0 }
 0x8df   : > { %v7510_v23 = vmax.f32 %v7509_v50, %v7280_v38  ;;  %v7552_v3 = vmax.f32 %v7551_v8, %v7282_v40 }
 0x8e0   : > { %v7531_v58 = vmax.f32 %v7530_v29, %v7281_v16  ;;  %v7573_v19 = vmax.f32 %v7572_v59, %v7283_v30  ;;  %v6691_v34 = vpop.f32.mrb[224].mxu1  ;;  %v7077_v25 = vpop.f32.mrb[224].mxu0 }
 0x8e1   : > { %v7511_v39 = vrot.slane %v7510_v23, 4  ;;  %v7553_v41 = vrot.slane %v7552_v3, 4  ;;  %v8983_v7 = vadd.f32 %v6691_v34, %v12685_v12  ;;  %v9047_v10 = vadd.f32 %v7077_v25, %v12687_v52  ;;  %v6693_v4 = vpop.f32.mrb[225].mxu1  ;;  %v7079_v56 = vpop.f32.mrb[225].mxu0 }
 0x8e2   : > { %v7532_v60 = vrot.slane %v7531_v58, 4  ;;  %v7574_v32 = vrot.slane %v7573_v19, 4  ;;  %v8984_v48 = vadd.f32 %v6693_v4, %v12689_v31  ;;  %v9048_v17 = vadd.f32 %v7079_v56, %v12691_v6  ;;  %v6695_v18 = vpop.f32.mrb[226].mxu1  ;;  %v7081_v33 = vpop.f32.mrb[226].mxu0 }
 0x8e3   : > { %v7512_v14 = vmax.f32 %v7510_v23, %v7511_v39  ;;  %v7554_v55 = vmax.f32 %v7552_v3, %v7553_v41  ;;  %v7288_v46 = vmax.f32 %v8983_v7, 0.0  ;;  %v7290_v35 = vmax.f32 %v9047_v10, 0.0  ;;  %v6697_v61 = vpop.f32.mrb[227].mxu1  ;;  %v7083_v20 = vpop.f32.mrb[227].mxu0 }
 0x8e4   : > { %v7533_v57 = vmax.f32 %v7531_v58, %v7532_v60  ;;  %v7575_v42 = vmax.f32 %v7573_v19, %v7574_v32  ;;  %v7289_v27 = vmax.f32 %v8984_v48, 0.0  ;;  %v7291_v44 = vmax.f32 %v9048_v17, 0.0 }
 0x8e5   : > { %v7513_v22 = vrot.slane %v7512_v14, 2  ;;  %v7555_v47 = vrot.slane %v7554_v55, 2  ;;  %v8985_v49 = vadd.f32 %v6695_v18, %v12685_v12  ;;  %v9049_v26 = vadd.f32 %v7081_v33, %v12687_v52 }
 0x8e6   : > { %v7534_v62 = vrot.slane %v7533_v57, 2  ;;  %v7576_v21 = vrot.slane %v7575_v42, 2  ;;  %v8986_v51 = vadd.f32 %v6697_v61, %v12689_v31  ;;  %v9050_v13 = vadd.f32 %v7083_v20, %v12691_v6 }
 0x8e7   : > { %v7514_v0 = vmax.f32 %v7512_v14, %v7513_v22  ;;  %v7556_v63 = vmax.f32 %v7554_v55, %v7555_v47  ;;  %v7296_v36 = vmax.f32 %v8985_v49, 0.0  ;;  %v7298_v11 = vmax.f32 %v9049_v26, 0.0 }
 0x8e8   : > { %v7535_v15 = vmax.f32 %v7533_v57, %v7534_v62  ;;  %v7577_v1 = vmax.f32 %v7575_v42, %v7576_v21  ;;  %v7297_v54 = vmax.f32 %v8986_v51, 0.0  ;;  %v7299_v9 = vmax.f32 %v9050_v13, 0.0  ;;  %v6701_v24 = vpop.f32.mrb[228].mxu1  ;;  %v7087_v43 = vpop.f32.mrb[228].mxu0 }
 0x8e9   : > { %v7515_v45 = vrot.slane %v7514_v0, 1  ;;  %v7557_v53 = vrot.slane %v7556_v63, 1  ;;  %v7664_v5 = vmax.f32 %v7288_v46, %v7296_v36  ;;  %v7706_v2 = vmax.f32 %v7290_v35, %v7298_v11  ;;  %v6703_v28 = vpop.f32.mrb[229].mxu1  ;;  %v7089_v50 = vpop.f32.mrb[229].mxu0 }
 0x8ea   : > { %v7536_v8 = vrot.slane %v7535_v15, 1  ;;  %v7578_v38 = vrot.slane %v7577_v1, 1  ;;  %v7685_v40 = vmax.f32 %v7289_v27, %v7297_v54  ;;  %v7727_v29 = vmax.f32 %v7291_v44, %v7299_v9  ;;  %v6705_v59 = vpop.f32.mrb[230].mxu1  ;;  %v7091_v16 = vpop.f32.mrb[230].mxu0 }
 0x8eb   : > { %v7516_v30 = vmax.f32 %v7514_v0, %v7515_v45  ;;  %v7558_v23 = vmax.f32 %v7556_v63, %v7557_v53  ;;  %v8987_v3 = vadd.f32 %v6701_v24, %v12685_v12  ;;  %v9051_v58 = vadd.f32 %v7087_v43, %v12687_v52  ;;  %v6707_v19 = vpop.f32.mrb[231].mxu1  ;;  %v7093_v34 = vpop.f32.mrb[231].mxu0 }
 0x8ec   : > { %v7537_v25 = vmax.f32 %v7535_v15, %v7536_v8  ;;  %v7579_v39 = vmax.f32 %v7577_v1, %v7578_v38  ;;  %v8988_v41 = vadd.f32 %v6703_v28, %v12689_v31  ;;  %v9052_v7 = vadd.f32 %v7089_v50, %v12691_v6 }
 0x8ed   : > { %v7304_v10 = vmax.f32 %v8987_v3, 0.0  ;;  %v7306_v4 = vmax.f32 %v9051_v58, 0.0  ;;  %v8989_v56 = vadd.f32 %v6705_v59, %v12685_v12  ;;  %v9053_v60 = vadd.f32 %v7091_v16, %v12687_v52 }
 0x8ee   : > { %v7783_v32 = vcombine.low %v7516_v30, %v7537_v25  ;;  %v7784_v48 = vcombine.low %v7558_v23, %v7579_v39  ;;  %v7305_v17 = vmax.f32 %v8988_v41, 0.0  ;;  %v7307_v18 = vmax.f32 %v9052_v7, 0.0 }
 0x8ef   : > { %v7665_v33 = vmax.f32 %v7664_v5, %v7304_v10  ;;  %v7707_v14 = vmax.f32 %v7706_v2, %v7306_v4  ;;  %v7312_v55 = vmax.f32 %v8989_v56, 0.0  ;;  %v7314_v46 = vmax.f32 %v9053_v60, 0.0 }
 0x8f0   : > { %v12773_v35 = vrot.slane %v7783_v32, %v11387_v37  ;;  %v12776_v61 = vrot.slane %v7784_v48, %v11387_v37  ;;  %v7686_v20 = vmax.f32 %v7685_v40, %v7305_v17  ;;  %v7728_v57 = vmax.f32 %v7727_v29, %v7307_v18  ;;  %v6711_v42 = vpop.f32.mrb[232].mxu1  ;;  %v7097_v27 = vpop.f32.mrb[232].mxu0 }
 0x8f1   : > { %v7666_v44 = vmax.f32 %v7665_v33, %v7312_v55  ;;  %v7708_v22 = vmax.f32 %v7707_v14, %v7314_v46  ;;  %v8990_v47 = vadd.f32 %v6707_v19, %v12689_v31  ;;  %v9054_v49 = vadd.f32 %v7093_v34, %v12691_v6  ;;  %v6713_v26 = vpop.f32.mrb[233].mxu1  ;;  %v7099_v62 = vpop.f32.mrb[233].mxu0 }
 0x8f2   : > { %v7799_v21 = vcombine.low %v12773_v35, %v12776_v61  ;;  %v8991_v51 = vadd.f32 %v6711_v42, %v12685_v12  ;;  %v9055_v13 = vadd.f32 %v7097_v27, %v12687_v52  ;;  %v8992_v0 = vadd.f32 %v6713_v26, %v12689_v31  ;;  %v6715_v63 = vpop.f32.mrb[234].mxu1  ;;  %v7101_v36 = vpop.f32.mrb[234].mxu0 }
 0x8f3   : > { %v7313_v11 = vmax.f32 %v8990_v47, 0.0  ;;  %v7315_v15 = vmax.f32 %v9054_v49, 0.0  ;;  %v9056_v1 = vadd.f32 %v7099_v62, %v12691_v6  ;;  %v8993_v54 = vadd.f32 %v6715_v63, %v12685_v12  ;;  %v6717_v9 = vpop.f32.mrb[235].mxu1  ;;  %v7103_v24 = vpop.f32.mrb[235].mxu0 }
 0x8f4   : > { %v7320_v43 = vmax.f32 %v8991_v51, 0.0  ;;  %v7322_v45 = vmax.f32 %v9055_v13, 0.0  ;;  %v7321_v53 = vmax.f32 %v8992_v0, 0.0  ;;  %v9057_v5 = vadd.f32 %v7101_v36, %v12687_v52 }
 0x8f5   : > { %v7687_v2 = vmax.f32 %v7686_v20, %v7313_v11  ;;  %v7729_v28 = vmax.f32 %v7728_v57, %v7315_v15  ;;  %v7323_v50 = vmax.f32 %v9056_v1, 0.0  ;;  %v7328_v8 = vmax.f32 %v8993_v54, 0.0 }
 0x8f6   : > { %v7667_v38 = vmax.f32 %v7666_v44, %v7320_v43  ;;  %v7709_v40 = vmax.f32 %v7708_v22, %v7322_v45  ;;  %v7330_v29 = vmax.f32 %v9057_v5, 0.0  ;;  %v8994_v59 = vadd.f32 %v6717_v9, %v12689_v31 }
 0x8f7   : > { %v7688_v16 = vmax.f32 %v7687_v2, %v7321_v53  ;;  %v7730_v30 = vmax.f32 %v7729_v28, %v7323_v50  ;;  %v9058_v23 = vadd.f32 %v7103_v24, %v12691_v6 }
 0x8f8   : > { %v7668_v3 = vmax.f32 %v7667_v38, %v7328_v8  ;;  %v7710_v58 = vmax.f32 %v7709_v40, %v7330_v29  ;;  %v7329_v19 = vmax.f32 %v8994_v59, 0.0  ;;  %v6721_v34 = vpop.f32.mrb[236].mxu1  ;;  %v7107_v25 = vpop.f32.mrb[236].mxu0 }
 0x8f9   : > { %v7331_v39 = vmax.f32 %v9058_v23, 0.0  ;;  %v8995_v41 = vadd.f32 %v6721_v34, %v12685_v12  ;;  %v9059_v7 = vadd.f32 %v7107_v25, %v12687_v52  ;;  %v6723_v10 = vpop.f32.mrb[237].mxu1  ;;  %v7109_v4 = vpop.f32.mrb[237].mxu0 }
 0x8fa   : > { %v7689_v56 = vmax.f32 %v7688_v16, %v7329_v19  ;;  %v8996_v60 = vadd.f32 %v6723_v10, %v12689_v31  ;;  %v9060_v32 = vadd.f32 %v7109_v4, %v12691_v6  ;;  %v6725_v48 = vpop.f32.mrb[238].mxu1  ;;  %v7111_v17 = vpop.f32.mrb[238].mxu0 }
 0x8fb   : > { %v7731_v18 = vmax.f32 %v7730_v30, %v7331_v39  ;;  %v7336_v33 = vmax.f32 %v8995_v41, 0.0  ;;  %v7338_v14 = vmax.f32 %v9059_v7, 0.0  ;;  %v8997_v55 = vadd.f32 %v6725_v48, %v12685_v12  ;;  %v6727_v46 = vpop.f32.mrb[239].mxu1  ;;  %v7113_v20 = vpop.f32.mrb[239].mxu0 }
 0x8fc   : > { %v7337_v57 = vmax.f32 %v8996_v60, 0.0  ;;  %v7339_v42 = vmax.f32 %v9060_v32, 0.0  ;;  %v9061_v27 = vadd.f32 %v7111_v17, %v12687_v52  ;;  %v8998_v44 = vadd.f32 %v6727_v46, %v12689_v31 }
 0x8fd   : > { %v7669_v22 = vmax.f32 %v7668_v3, %v7336_v33  ;;  %v7711_v47 = vmax.f32 %v7710_v58, %v7338_v14  ;;  %v7344_v49 = vmax.f32 %v8997_v55, 0.0  ;;  %v9062_v26 = vadd.f32 %v7113_v20, %v12691_v6 }
 0x8fe   : > { %v7690_v62 = vmax.f32 %v7689_v56, %v7337_v57  ;;  %v7732_v51 = vmax.f32 %v7731_v18, %v7339_v42  ;;  %v7346_v13 = vmax.f32 %v9061_v27, 0.0  ;;  %v7345_v0 = vmax.f32 %v8998_v44, 0.0 }
 0x8ff   : > { %v7670_v63 = vmax.f32 %v7669_v22, %v7344_v49  ;;  %v7347_v36 = vmax.f32 %v9062_v26, 0.0 }
 0x900   : > { %v7712_v11 = vmax.f32 %v7711_v47, %v7346_v13  ;;  %v7691_v15 = vmax.f32 %v7690_v62, %v7345_v0  ;;  %v6731_v1 = vpop.f32.mrb[240].mxu1  ;;  %v7117_v54 = vpop.f32.mrb[240].mxu0 }
 0x901   : > { %v7733_v9 = vmax.f32 %v7732_v51, %v7347_v36  ;;  %v8999_v24 = vadd.f32 %v6731_v1, %v12685_v12  ;;  %v9063_v43 = vadd.f32 %v7117_v54, %v12687_v52  ;;  %v6733_v45 = vpop.f32.mrb[241].mxu1  ;;  %v7119_v53 = vpop.f32.mrb[241].mxu0 }
 0x902   : > { %v9000_v5 = vadd.f32 %v6733_v45, %v12689_v31  ;;  %v9064_v2 = vadd.f32 %v7119_v53, %v12691_v6  ;;  %v6735_v28 = vpop.f32.mrb[242].mxu1  ;;  %v7121_v50 = vpop.f32.mrb[242].mxu0 }
 0x903   : > { %v7352_v8 = vmax.f32 %v8999_v24, 0.0  ;;  %v7354_v38 = vmax.f32 %v9063_v43, 0.0  ;;  %v9001_v40 = vadd.f32 %v6735_v28, %v12685_v12  ;;  %v9065_v29 = vadd.f32 %v7121_v50, %v12687_v52  ;;  %v6737_v59 = vpop.f32.mrb[243].mxu1  ;;  %v7123_v16 = vpop.f32.mrb[243].mxu0 }
 0x904   : > { %v7353_v30 = vmax.f32 %v9000_v5, 0.0  ;;  %v7355_v23 = vmax.f32 %v9064_v2, 0.0  ;;  %v9002_v3 = vadd.f32 %v6737_v59, %v12689_v31  ;;  %v9066_v58 = vadd.f32 %v7123_v16, %v12691_v6 }
 0x905   : > { %v7671_v19 = vmax.f32 %v7670_v63, %v7352_v8  ;;  %v7713_v34 = vmax.f32 %v7712_v11, %v7354_v38  ;;  %v7360_v25 = vmax.f32 %v9001_v40, 0.0  ;;  %v7362_v39 = vmax.f32 %v9065_v29, 0.0 }
 0x906   : > { %v7692_v41 = vmax.f32 %v7691_v15, %v7353_v30  ;;  %v7734_v7 = vmax.f32 %v7733_v9, %v7355_v23  ;;  %v7361_v10 = vmax.f32 %v9002_v3, 0.0  ;;  %v7363_v4 = vmax.f32 %v9066_v58, 0.0 }
 0x907   : > { %v7672_v56 = vmax.f32 %v7671_v19, %v7360_v25  ;;  %v7714_v60 = vmax.f32 %v7713_v34, %v7362_v39 }
 0x908   : > { %v7693_v32 = vmax.f32 %v7692_v41, %v7361_v10  ;;  %v7735_v48 = vmax.f32 %v7734_v7, %v7363_v4  ;;  %v6741_v17 = vpop.f32.mrb[244].mxu1  ;;  %v7127_v18 = vpop.f32.mrb[244].mxu0 }
 0x909   : > { %v9003_v33 = vadd.f32 %v6741_v17, %v12685_v12  ;;  %v9067_v14 = vadd.f32 %v7127_v18, %v12687_v52  ;;  %v6743_v55 = vpop.f32.mrb[245].mxu1  ;;  %v7129_v46 = vpop.f32.mrb[245].mxu0 }
 0x90a   : > { %v9004_v20 = vadd.f32 %v6743_v55, %v12689_v31  ;;  %v9068_v57 = vadd.f32 %v7129_v46, %v12691_v6  ;;  %v6745_v42 = vpop.f32.mrb[246].mxu1  ;;  %v7131_v27 = vpop.f32.mrb[246].mxu0 }
 0x90b   : > { %v7368_v44 = vmax.f32 %v9003_v33, 0.0  ;;  %v7370_v22 = vmax.f32 %v9067_v14, 0.0  ;;  %v9005_v47 = vadd.f32 %v6745_v42, %v12685_v12  ;;  %v9069_v49 = vadd.f32 %v7131_v27, %v12687_v52  ;;  %v6747_v26 = vpop.f32.mrb[247].mxu1  ;;  %v7133_v62 = vpop.f32.mrb[247].mxu0 }
 0x90c   : > { %v7369_v51 = vmax.f32 %v9004_v20, 0.0  ;;  %v7371_v13 = vmax.f32 %v9068_v57, 0.0  ;;  %v9006_v0 = vadd.f32 %v6747_v26, %v12689_v31  ;;  %v9070_v63 = vadd.f32 %v7133_v62, %v12691_v6 }
 0x90d   : > { %v7673_v36 = vmax.f32 %v7672_v56, %v7368_v44  ;;  %v7715_v11 = vmax.f32 %v7714_v60, %v7370_v22  ;;  %v7376_v15 = vmax.f32 %v9005_v47, 0.0  ;;  %v7378_v1 = vmax.f32 %v9069_v49, 0.0 }
 0x90e   : > { %v7694_v54 = vmax.f32 %v7693_v32, %v7369_v51  ;;  %v7736_v9 = vmax.f32 %v7735_v48, %v7371_v13  ;;  %v7377_v24 = vmax.f32 %v9006_v0, 0.0  ;;  %v7379_v43 = vmax.f32 %v9070_v63, 0.0 }
 0x90f   : > { %v7674_v45 = vmax.f32 %v7673_v36, %v7376_v15  ;;  %v7716_v53 = vmax.f32 %v7715_v11, %v7378_v1 }
 0x910   : > { %v7695_v5 = vmax.f32 %v7694_v54, %v7377_v24  ;;  %v7737_v2 = vmax.f32 %v7736_v9, %v7379_v43  ;;  %v6751_v28 = vpop.f32.mrb[248].mxu1  ;;  %v7137_v50 = vpop.f32.mrb[248].mxu0 }
 0x911   : > { %v9007_v8 = vadd.f32 %v6751_v28, %v12685_v12  ;;  %v9071_v38 = vadd.f32 %v7137_v50, %v12687_v52  ;;  %v6753_v40 = vpop.f32.mrb[249].mxu1  ;;  %v7139_v29 = vpop.f32.mrb[249].mxu0 }
 0x912   : > { %v9008_v59 = vadd.f32 %v6753_v40, %v12689_v31  ;;  %v9072_v16 = vadd.f32 %v7139_v29, %v12691_v6  ;;  %v6755_v30 = vpop.f32.mrb[250].mxu1  ;;  %v7141_v23 = vpop.f32.mrb[250].mxu0 }
 0x913   : > { %v7384_v3 = vmax.f32 %v9007_v8, 0.0  ;;  %v7386_v58 = vmax.f32 %v9071_v38, 0.0  ;;  %v9009_v19 = vadd.f32 %v6755_v30, %v12685_v12  ;;  %v9073_v34 = vadd.f32 %v7141_v23, %v12687_v52  ;;  %v6757_v25 = vpop.f32.mrb[251].mxu1  ;;  %v7143_v39 = vpop.f32.mrb[251].mxu0 }
 0x914   : > { %v7385_v41 = vmax.f32 %v9008_v59, 0.0  ;;  %v7387_v7 = vmax.f32 %v9072_v16, 0.0  ;;  %v9010_v10 = vadd.f32 %v6757_v25, %v12689_v31  ;;  %v9074_v4 = vadd.f32 %v7143_v39, %v12691_v6 }
 0x915   : > { %v7675_v56 = vmax.f32 %v7674_v45, %v7384_v3  ;;  %v7717_v60 = vmax.f32 %v7716_v53, %v7386_v58  ;;  %v7392_v32 = vmax.f32 %v9009_v19, 0.0  ;;  %v7394_v48 = vmax.f32 %v9073_v34, 0.0 }
 0x916   : > { %v7696_v17 = vmax.f32 %v7695_v5, %v7385_v41  ;;  %v7738_v18 = vmax.f32 %v7737_v2, %v7387_v7  ;;  %v7393_v33 = vmax.f32 %v9010_v10, 0.0  ;;  %v7395_v14 = vmax.f32 %v9074_v4, 0.0 }
 0x917   : > { %v7676_v55 = vmax.f32 %v7675_v56, %v7392_v32  ;;  %v7718_v46 = vmax.f32 %v7717_v60, %v7394_v48 }
 0x918   : > { %v7697_v20 = vmax.f32 %v7696_v17, %v7393_v33  ;;  %v7739_v57 = vmax.f32 %v7738_v18, %v7395_v14  ;;  %v6761_v42 = vpop.f32.mrb[252].mxu1  ;;  %v7147_v27 = vpop.f32.mrb[252].mxu0 }
 0x919   : > { %v9011_v44 = vadd.f32 %v6761_v42, %v12685_v12  ;;  %v9075_v22 = vadd.f32 %v7147_v27, %v12687_v52  ;;  %v6763_v47 = vpop.f32.mrb[253].mxu1  ;;  %v7149_v49 = vpop.f32.mrb[253].mxu0 }
 0x91a   : > { %v9012_v26 = vadd.f32 %v6763_v47, %v12689_v31  ;;  %v9076_v62 = vadd.f32 %v7149_v49, %v12691_v6  ;;  %v6765_v51 = vpop.f32.mrb[254].mxu1  ;;  %v7151_v13 = vpop.f32.mrb[254].mxu0 }
 0x91b   : > { %v7400_v0 = vmax.f32 %v9011_v44, 0.0  ;;  %v7402_v63 = vmax.f32 %v9075_v22, 0.0  ;;  %v9013_v36 = vadd.f32 %v6765_v51, %v12685_v12  ;;  %v9077_v11 = vadd.f32 %v7151_v13, %v12687_v52  ;;  %v6767_v15 = vpop.f32.mrb[255].mxu1  ;;  %v7153_v1 = vpop.f32.mrb[255].mxu0 }
 0x91c   : > { %v7401_v54 = vmax.f32 %v9012_v26, 0.0  ;;  %v7403_v9 = vmax.f32 %v9076_v62, 0.0  ;;  %v9014_v24 = vadd.f32 %v6767_v15, %v12689_v31  ;;  %v9078_v43 = vadd.f32 %v7153_v1, %v12691_v6 }
 0x91d   : > { %v7677_v45 = vmax.f32 %v7676_v55, %v7400_v0  ;;  %v7719_v53 = vmax.f32 %v7718_v46, %v7402_v63  ;;  %v7408_v5 = vmax.f32 %v9013_v36, 0.0  ;;  %v7410_v2 = vmax.f32 %v9077_v11, 0.0 }
 0x91e   : > { %v7698_v28 = vmax.f32 %v7697_v20, %v7401_v54  ;;  %v7740_v50 = vmax.f32 %v7739_v57, %v7403_v9  ;;  %v7409_v8 = vmax.f32 %v9014_v24, 0.0  ;;  %v7411_v38 = vmax.f32 %v9078_v43, 0.0 }
 0x91f   : > { %v7678_v40 = vmax.f32 %v7677_v45, %v7408_v5  ;;  %v7720_v12 = vmax.f32 %v7719_v53, %v7410_v2  ;;  %v10162_v62 = vmov (%p7854_p9), 0.0  }
 0x920   : > { %v7699_v29 = vmax.f32 %v7698_v28, %v7409_v8  ;;  %v7741_v52 = vmax.f32 %v7740_v50, %v7411_v38  ;;  %7859 = vst [vmem:[#allocation25] sm:$0xff] (%p7854_p9), %v10162_v62  ;;  %7860 = vst [vmem:[#allocation25 + $0x8] sm:$0xff] (%p7854_p9), %v10162_v62 }
 0x921   : > { %v7679_v59 = vrot.slane %v7678_v40, 4  ;;  %v7721_v16 = vrot.slane %v7720_v12, 4  ;;  %7861 = vst [vmem:[#allocation25 + $0x10] sm:$0xff] (%p7854_p9), %v10162_v62  ;;  %7862 = vst [vmem:[#allocation25 + $0x18] sm:$0x3f] (%p7854_p9), %v10162_v62 }
 0x922   : > { %v7700_v30 = vrot.slane %v7699_v29, 4  ;;  %v7742_v23 = vrot.slane %v7741_v52, 4 }
 0x923   : > { %v7680_v3 = vmax.f32 %v7678_v40, %v7679_v59  ;;  %v7722_v31 = vmax.f32 %v7720_v12, %v7721_v16 }
 0x924   : > { %v7701_v58 = vmax.f32 %v7699_v29, %v7700_v30  ;;  %v7743_v6 = vmax.f32 %v7741_v52, %v7742_v23 }
 0x925   : > { %v7681_v19 = vrot.slane %v7680_v3, 2  ;;  %v7723_v34 = vrot.slane %v7722_v31, 2 }
 0x926   : > { %v7702_v25 = vrot.slane %v7701_v58, 2  ;;  %v7744_v39 = vrot.slane %v7743_v6, 2 }
 0x927   : > { %v7682_v41 = vmax.f32 %v7680_v3, %v7681_v19  ;;  %v7724_v7 = vmax.f32 %v7722_v31, %v7723_v34 }
 0x928   : > { %v7703_v10 = vmax.f32 %v7701_v58, %v7702_v25  ;;  %v7745_v4 = vmax.f32 %v7743_v6, %v7744_v39 }
 0x929   : > { %v7683_v56 = vrot.slane %v7682_v41, 1  ;;  %v7725_v60 = vrot.slane %v7724_v7, 1 }
 0x92a   : > { %v7704_v32 = vrot.slane %v7703_v10, 1  ;;  %v7746_v48 = vrot.slane %v7745_v4, 1 }
 0x92b   : > { %v7684_v17 = vmax.f32 %v7682_v41, %v7683_v56  ;;  %v7726_v18 = vmax.f32 %v7724_v7, %v7725_v60 }
 0x92c   : > { %v7705_v33 = vmax.f32 %v7703_v10, %v7704_v32  ;;  %v7747_v14 = vmax.f32 %v7745_v4, %v7746_v48 }
 0x92e   : > { %v7817_v55 = vcombine.low %v7684_v17, %v7705_v33  ;;  %v7818_v46 = vcombine.low %v7726_v18, %v7747_v14 }
 0x930   : > { %v7825_v20 = vrot.slane %v7817_v55, %v11387_v37  ;;  %v7832_v57 = vrot.slane %v7818_v46, %v11387_v37 }
 0x932   : > { %v7833_v42 = vcombine.low %v7825_v20, %v7832_v57 }
 0x934   : > { %v7843_v27 = vrot.slane %v7833_v42, 7 }
 0x936   : > { %v7844_v44 = vsel %vm2290_vm1, %v7843_v27, %v7799_v21  ;;  %7858 = sbr.rel (!%p7854_p9) target bundleno = 2365 (0x93d), region = 136 }
 0x937   : > { %v7845_v22 = vsel %vm2292_vm2, %v7843_v27, %v7844_v44 }
 0x938   : > { %v7846_v47 = vsel %vm2294_vm3, %v7843_v27, %v7845_v22 }
 0x939   : > { %v7847_v49 = vsel %vm2296_vm4, %v7843_v27, %v7846_v47 }
 0x93a   : > { %v7851_v26 = vmax.f32 %v7847_v49, 0.0 }
 0x93c   : > { %7853 = vst [vmem:[#allocation2 + $0x8] sm:$0xff] %v7851_v26 }
 0x93d PF: > { %s7866_s4 = sld [smem:[#allocation3]]  ;;  %s13148_s16 = sld [smem:[#allocation36_spill]]  ;;  %v7877_v37 = vld [vmem:[#allocation2] sm:$0xff]  ;;  %v7879_v61 = vld [vmem:[#allocation2 + $0x10] sm:$0xff]  ;;  %v7880_v21 = vld [vmem:[#allocation2 + $0x18] sm:$0x3f] }
 0x93e   : > { %s8668_s7 = sld [smem:[#allocation3 + $0x1]]  ;;  %s8669_s24 = sld [smem:[#allocation3 + $0x2]]  ;;  %v7873_v51 = vld [vmem:[#allocation25] sm:$0xff]  ;;  %v7874_v0 = vld [vmem:[#allocation25 + $0x8] sm:$0xff]  ;;  %v7875_v63 = vld [vmem:[#allocation25 + $0x10] sm:$0xff] }
 0x93f   : > { %v7876_v36 = vld [vmem:[#allocation25 + $0x18] sm:$0x3f] }
 0x943   : > { %p7867_p1 = scmp.eq.s32.totalorder %s13148_s16, 1  ;;  %p7870_p13 = scmp.eq.s32.totalorder %s13148_s16, 2  ;;  %v7878_v35 = vld [vmem:[#allocation2 + $0x8] sm:$0xff] }
 0x944   : > { %s8671_s3 = sld [smem:[#allocation3 + $0x3]] (%p7870_p13) }
 0x945   : > { %s13160_s7 = smov (!%p7867_p1, %s8668_s7), %s7866_s4 }
 0x946   : > { %s13162_s24 = smov (!%p7870_p13, %s8669_s24), %s13160_s7 }
 0x947   : > { %v7881_v13 = vstv %s13162_s24  ;;  %7898 = sbr.rel (!%p7870_p13) target bundleno = 2394 (0x95a), region = 144 }
 0x948   : > { %v7882_v11 = vmul.f32 %v7881_v13, %v7877_v37  ;;  %v7883_v15 = vmul.f32 %v7881_v13, %v7878_v35  ;;  %v7884_v1 = vmul.f32 %v7881_v13, %v7879_v61  ;;  %v7885_v54 = vmul.f32 %v7881_v13, %v7880_v21 }
 0x94a   : > { %v7886_v9 = vadd.f32 %v7882_v11, %v7873_v51  ;;  %v7887_v24 = vadd.f32 %v7883_v15, %v7874_v0  ;;  %v7888_v43 = vadd.f32 %v7884_v1, %v7875_v63  ;;  %v7889_v45 = vadd.f32 %v7885_v54, %v7876_v36 }
 0x94b   : > { %v7904_v50 = vstv (%p7870_p13), %s8671_s3 }
 0x94c   : > { %7890 = vst [vmem:[#allocation25] sm:$0xff] %v7886_v9  ;;  %7891 = vst [vmem:[#allocation25 + $0x8] sm:$0xff] %v7887_v24 }
 0x94d   : > { %7892 = vst [vmem:[#allocation25 + $0x10] sm:$0xff] %v7888_v43  ;;  %7893 = vst [vmem:[#allocation25 + $0x18] sm:$0x3f] %v7889_v45 }
 0x953   : > { %v7899_v53 = vld [vmem:[#allocation25] sm:$0xff]  ;;  %v7900_v5 = vld [vmem:[#allocation25 + $0x8] sm:$0xff] }
 0x954   : > { %v7901_v2 = vld [vmem:[#allocation25 + $0x10] sm:$0xff]  ;;  %v7902_v28 = vld [vmem:[#allocation25 + $0x18] sm:$0x3f]  ;;  %v7905_v8 = vadd.f32 %v7904_v50, %v7899_v53  ;;  %v7906_v38 = vadd.f32 %v7904_v50, %v7900_v5 }
 0x955   : > { %v7907_v40 = vadd.f32 %v7904_v50, %v7901_v2  ;;  %v7908_v12 = vadd.f32 %v7904_v50, %v7902_v28 }
 0x956   : > { %v7909_v29 = vmax.f32 %v7905_v8, 0.0  ;;  %v7910_v52 = vmax.f32 %v7906_v38, 0.0 }
 0x957   : > { %v7911_v59 = vmax.f32 %v7907_v40, 0.0  ;;  %v7912_v16 = vmax.f32 %v7908_v12, 0.0 }
 0x958   : > { %7913 = vst [vmem:[#allocation25] sm:$0xff] %v7909_v29  ;;  %7914 = vst [vmem:[#allocation25 + $0x8] sm:$0xff] %v7910_v52 }
 0x959   : > { %7915 = vst [vmem:[#allocation25 + $0x10] sm:$0xff] %v7911_v59  ;;  %7916 = vst [vmem:[#allocation25 + $0x18] sm:$0x3f] %v7912_v16 }
 0x95a PF: > { %p9411_p5 = scmp.eq.s32.totalorder %s10461_s21, 2  ;;  %s10163_s5 = smov [#allocation25]  }
 0x95b   : > { %s7924_s1 = sshll.u32 %s10163_s5, 4  ;;  %s7925_s1 = int_to_ptr.vmem [resolvable:$true] %s7924_s1 }
 0x95c   : > { %s10026_s27 = scalar_lea.vmem %s7925_s1, 480  ;;  %p10033_p0 = scmp.lt.s32.totalorder %s7925_s1, %s7925_s1 }
 0x95d   : > { %p10027_p10 = scmp.ne.s32.totalorder %s7925_s1, %s10026_s27  ;;  %p10034_p7 = scmp.lt.s32.totalorder %s10026_s27, %s10026_s27 }
 0x95f   : > { %p10028_p3 = pnand %p10027_p10, %p9411_p5  ;;  %p10035_p4 = por %p10034_p7, %p10033_p0 }
 0x961   : > { %p10029_p11 = pneg %p10028_p3 }
 0x963   : > { %p10036_p12 = pnand %p10035_p4, %p10029_p11 }
 0x965   : > { %10039 = shalt.err (!%p10036_p12)
}
 0x966   : > { %s13149_s22 = sld [smem:[#allocation90_spill]] }
 0x96c   : > { %s10040_s0 = scalar_lea.hbm %s13149_s22, 480 }
 0x96d   : > { %p10041_p8 = scmp.ne.s32.totalorder %s13149_s22, %s10040_s0  ;;  %p10046_p9 = scmp.lt.u32.totalorder %s10040_s0, %s13149_s22 }
 0x96f   : > { %p10042_p6 = pnand %p10041_p8, %p9411_p5 }
 0x971   : > { %p10043_p2 = pneg %p10042_p6 }
 0x973   : > { %p10048_p1 = pnand %p10046_p9, %p10043_p2 }
 0x975   : > { %10051 = shalt.err (!%p10048_p1)
}
 0x976   : > { %9364 = dma.vmem_to_hbm [thread:$0]  (%p9411_p5), %s7925_s1, 480, %s13149_s22, [#allocation5]  }
 0x977   : > { %10109 = dma.done.wait (%p9411_p5), [#allocation5], 480  }
 0x978   : > { %10111 = vsyncadd (%p9411_p5), [#allocation5], 4294966816 }
 0x979 PF: > { %s47_s18 = sadd.s32 1, %s10134_s18   ;;  %s13150_s14 = sld [smem:[#allocation35_spill]] }
 0x97a   : > { %p44_p13 = scmp.ge.s32.totalorder %s47_s18, 5   ;;  %s13151_s15 = sld [smem:[#allocation38_spill]] }
 0x97b   : > { %s13152_s4 = sld [smem:[#allocation37_spill]]  ;;  %s13153_s29 = smov %s10118_s30 }
 0x97c   : > { %s13155_s16 = smov %s10130_s17  ;;  %46 = sbr.rel (!%p44_p13) target bundleno = 28 (0x1c), region = 270 }
 0x97f   : > { %s13154_s30 = smov %s13150_s14 }
 0x981   : > { %s13156_s17 = smov %s13152_s4 }
 0x983   :  { %7937 = vsyncpa [#allocation4], 1 }
 0x984   :  { %7939 = vsyncpa [#allocation4 + $0x1], 1 }
 0x985   :  { %7940 = vsyncpa [#allocation9], 1 }
 0x986   :  { %7942 = vsyncpa [#allocation9 + $0x1], 1 }
 0x987   :  { %7943 = vsyncpa [#allocation12], 1 }
 0x988   :  { %7945 = vsyncpa [#allocation12 + $0x1], 1 }
 0x989   :  { %7946 = vsyncpa [#allocation15], 1 }
 0x98a   :  { %7948 = vsyncpa [#allocation15 + $0x1], 1 }
 0x98b   :  { %7949 = vsyncpa [#allocation18], 1 }
 0x98c   :  { %7951 = vsyncpa [#allocation18 + $0x1], 1 }
 0x98d   :  { %7952 = vsyncpa [#allocation21], 1 }
 0x98e   :  { %7954 = vsyncpa [#allocation21 + $0x1], 1 }
 0x98f   :  { %7955 = vsyncpa [#allocation24], 1 }
 0x990   :  { %7957 = vsyncpa [#allocation24 + $0x1], 1 }
 0x991   :  { %7958 = vsyncpa [#allocation5], 1 }
 0x992   :  { %7960 = vsyncpa [#allocation5 + $0x1], 1 }
 0x993   :  { %7961 = vsyncpa [#allocation6], 1 }
 0x994   :  { %7963 = vsyncpa [#allocation6 + $0x1], 1 }

</bundles_post_ra>
